<compile_context>
chip_gen: v7x
topology: tpu7x:2x2x1
jax: 0.10.0
libtpu: 0.0.40
codegen_flags: <defaults>
</compile_context>

<pallas_src>
import math
import jax
import jax.numpy as jnp
from jax.experimental import pallas as pl
from jax.experimental.pallas import tpu as pltpu

# ---- module hyperparameters (from TorchMelSpectrogram.__init__) ----
N_FFT = 1024
HOP = 256
WIN = 1024
N_MELS = 80
F_MIN = 0.0
F_MAX = 8000.0
SR = 22050

N_FREQ = N_FFT // 2 + 1       # 513 onesided bins
N_FREQ_PAD = 640              # pad freq axis to a multiple of 128 (lane-dense MXU tiles)
N_MEL_PAD = 128               # pad mel axis to 128 for a lane-dense output
TILE_R = 256                  # rows (batch*frames) per grid step; v7x-safe VMEM footprint


# -------------------- parameter construction (plain JAX glue) --------------------
def _hz_to_mel_htk(f):
    return 2595.0 * jnp.log10(1.0 + f / 700.0)


def _mel_to_hz_htk(m):
    return 700.0 * (10.0 ** (m / 2595.0) - 1.0)


def make_mel_filterbank():
    """torchaudio.functional.melscale_fbanks(mel_scale='htk', norm='slaney') -> (N_FREQ, N_MELS) f32."""
    all_freqs = jnp.linspace(0.0, SR / 2.0, N_FREQ)
    m_pts = jnp.linspace(_hz_to_mel_htk(F_MIN), _hz_to_mel_htk(F_MAX), N_MELS + 2)
    f_pts = _mel_to_hz_htk(m_pts)
    f_diff = f_pts[1:] - f_pts[:-1]
    slopes = f_pts[None, :] - all_freqs[:, None]               # (N_FREQ, N_MELS + 2)
    down = -slopes[:, :-2] / f_diff[:-1]
    up = slopes[:, 2:] / f_diff[1:]
    fb = jnp.maximum(0.0, jnp.minimum(down, up))
    enorm = 2.0 / (f_pts[2:N_MELS + 2] - f_pts[:N_MELS])       # slaney area norm
    return (fb * enorm[None, :]).astype(jnp.float32)


def make_window():
    n = jnp.arange(N_FFT, dtype=jnp.float32)
    return 0.5 - 0.5 * jnp.cos(2.0 * math.pi * n / N_FFT)      # periodic Hann


def make_dft_mats():
    """Real-DFT basis: real = frames @ cos, imag = frames @ (-sin). (N_FFT, N_FREQ) f32 each."""
    k = jnp.arange(N_FFT, dtype=jnp.float32)[:, None]
    f = jnp.arange(N_FREQ, dtype=jnp.float32)[None, :]
    ang = 2.0 * math.pi * k * f / N_FFT
    return jnp.cos(ang), -jnp.sin(ang)


def make_kernel_constants(mel_norms):
    """bf16 MXU operands (window folded into DFT basis, cos|sin concatenated) + f32 1/mel_norms."""
    window = make_window()[:, None]
    cos_m, sin_m = make_dft_mats()
    cos_m = jnp.pad(window * cos_m, ((0, 0), (0, N_FREQ_PAD - N_FREQ)))
    sin_m = jnp.pad(window * sin_m, ((0, 0), (0, N_FREQ_PAD - N_FREQ)))
    dft = jnp.concatenate([cos_m, sin_m], axis=1).astype(jnp.bfloat16)     # (1024, 1280)
    fb = jnp.pad(make_mel_filterbank(),
                 ((0, N_FREQ_PAD - N_FREQ), (0, N_MEL_PAD - N_MELS))).astype(jnp.bfloat16)
    inv_norm = jnp.pad(1.0 / mel_norms.astype(jnp.float32),
                       (0, N_MEL_PAD - N_MELS), constant_values=1.0).reshape(1, N_MEL_PAD)
    return dft, fb, inv_norm


def frame_signal(inp):
    """(B, T) or (B, 1, T) audio -> bf16 frames (B*n_frames, N_FFT); center=True, reflect pad."""
    if inp.ndim == 3:
        inp = inp[:, 0, :]
    assert inp.ndim == 2
    B, T = inp.shape
    n_frames = 1 + T // HOP
    pad = N_FFT // 2
    x = jnp.pad(inp.astype(jnp.float32), ((0, 0), (pad, pad)), mode="reflect")
    idx = jnp.arange(n_frames)[:, None] * HOP + jnp.arange(N_FFT)[None, :]
    # NOTE: this materializes overlapping frames (4x HBM expansion, hop=256 vs win=1024).
    # Accepted: the kernel is MXU-bound (~650 FLOP/byte), so the extra HBM traffic hides
    # under compute; bf16 frames halve that traffic anyway.
    frames = x[:, idx].reshape(B * n_frames, N_FFT).astype(jnp.bfloat16)
    return frames, B, n_frames


# -------------------- Pallas kernel (the hot path) --------------------
def mel_kernel(frames_ref, dft_ref, fb_ref, inv_norm_ref, out_ref):
    # frames:  (TILE_R, 1024) bf16   (Hann window already folded into dft)
    # dft:     (1024, 1280)   bf16   [window*cos | -window*sin], zero-padded freq cols
    # fb:      (640, 128)     bf16   mel filterbank, zero-padded
    # inv_norm:(1, 128)       f32    1 / mel_norms (padding filled with 1.0)
    # out:     (TILE_R, 128)  f32
    spec = jnp.dot(frames_ref[...], dft_ref[...],
                   preferred_element_type=jnp.float32)             # MXU -> (TILE_R, 1280) f32
    re = spec[:, :N_FREQ_PAD]                                      # lane-aligned slices (free)
    im = spec[:, N_FREQ_PAD:]
    power = re * re + im * im                                      # |X|^2 in f32 (VPU)
    mel = jnp.dot(power.astype(jnp.bfloat16), fb_ref[...],
                  preferred_element_type=jnp.float32)              # MXU -> (TILE_R, 128) f32
    out_ref[...] = jnp.log(jnp.maximum(mel, 1e-5)) * inv_norm_ref[...]  # clamp+log+norm (f32)


# -------------------- wrapper --------------------
def torch_mel_spectrogram(inp, mel_norms):
    frames, B, n_frames = frame_signal(inp)
    n_rows = B * n_frames
    n_rows_pad = pl.cdiv(n_rows, TILE_R) * TILE_R
    frames = jnp.pad(frames, ((0, n_rows_pad - n_rows), (0, 0)))

    dft, fb, inv_norm = make_kernel_constants(mel_norms)

    out = pl.pallas_call(
        mel_kernel,
        out_shape=jax.ShapeDtypeStruct((n_rows_pad, N_MEL_PAD), jnp.float32),
        grid=(n_rows_pad // TILE_R,),
        in_specs=[
            pl.BlockSpec((TILE_R, N_FFT), lambda i: (i, 0)),           # streamed row tile
            pl.BlockSpec((N_FFT, 2 * N_FREQ_PAD), lambda i: (0, 0)),   # VMEM-resident constant
            pl.BlockSpec((N_FREQ_PAD, N_MEL_PAD), lambda i: (0, 0)),   # VMEM-resident constant
            pl.BlockSpec((1, N_MEL_PAD), lambda i: (0, 0)),            # VMEM-resident constant
        ],
        out_specs=pl.BlockSpec((TILE_R, N_MEL_PAD), lambda i: (i, 0)),
        compiler_params=pltpu.CompilerParams(
            dimension_semantics=("parallel",),       # shards row tiles across v7x's 2 TCs
            vmem_limit_bytes=48 * 1024 * 1024,       # explicit; well within v7x's 64 MiB
        ),
    )(frames, dft, fb, inv_norm)

    mel = out[:n_rows, :N_MELS].reshape(B, n_frames, N_MELS)
    return jnp.transpose(mel, (0, 2, 1))  # (B, n_mels, n_frames)


# -------------------- pure-JAX references --------------------
def reference_f32(inp, mel_norms):
    """Full-f32 reference with the original (unfolded, unpadded) math."""
    if inp.ndim == 3:
        inp = inp[:, 0, :]
    B, T = inp.shape
    n_frames = 1 + T // HOP
    pad = N_FFT // 2
    x = jnp.pad(inp.astype(jnp.float32), ((0, 0), (pad, pad)), mode="reflect")
    idx = jnp.arange(n_frames)[:, None] * HOP + jnp.arange(N_FFT)[None, :]
    frames = x[:, idx].reshape(B * n_frames, N_FFT)
    fw = frames * make_window()[None, :]
    cos_m, sin_m = make_dft_mats()
    real = fw @ cos_m
    imag = fw @ sin_m
    power = real * real + imag * imag
    mel = power @ make_mel_filterbank()
    logmel = jnp.log(jnp.maximum(mel, 1e-5)) / mel_norms[None, :]
    return jnp.transpose(logmel.reshape(B, n_frames, N_MELS), (0, 2, 1))


def reference_bf16(inp, mel_norms):
    """Pure-JAX reference using the exact same bf16 MXU operands as the kernel."""
    frames, B, n_frames = frame_signal(inp)
    dft, fb, inv_norm = make_kernel_constants(mel_norms)
    spec = jnp.dot(frames, dft, preferred_element_type=jnp.float32)
    re, im = spec[:, :N_FREQ_PAD], spec[:, N_FREQ_PAD:]
    power = re * re + im * im
    mel = jnp.dot(power.astype(jnp.bfloat16), fb, preferred_element_type=jnp.float32)
    logmel = jnp.log(jnp.maximum(mel, 1e-5)) * inv_norm
    out = logmel[:, :N_MELS].reshape(B, n_frames, N_MELS)
    return jnp.transpose(out, (0, 2, 1))


if __name__ == "__main__":
    key = jax.random.PRNGKey(0)
    B, T = 2, 4096                       # small: 2 clips of 4096 samples -> 17 frames each
    inp = jax.random.normal(key, (B, 1, T), dtype=jnp.float32)  # (B, 1, T) exercises squeeze path

    # Deterministic synthetic mel_norms (module loads these from mel_norms.pth).
    mel_norms = 1.0 + 0.05 * jnp.arange(N_MELS, dtype=jnp.float32)

    out = jax.block_until_ready(torch_mel_spectrogram(inp, mel_norms))
    assert out.shape == (B, N_MELS, 1 + T // HOP), out.shape

    # Tight check: identical math (bf16 MXU operands, f32 accumulation) -> validates the
    # Pallas tiling/plumbing independent of the bf16 quantization choice.
    ref_b = jax.block_until_ready(reference_bf16(inp, mel_norms))
    assert jnp.allclose(out, ref_b, rtol=1e-2, atol=1e-2), float(jnp.max(jnp.abs(out - ref_b)))

    # Loose check against full-f32 math: bounds the numerical effect of bf16 MXU operands
    # on the log-mel output (low-energy bins of the DFT are the sensitive path).
    ref_f = jax.block_until_ready(reference_f32(inp, mel_norms))
    assert jnp.allclose(out, ref_f, rtol=5e-2, atol=2e-1), float(jnp.max(jnp.abs(out - ref_f)))

    print("KERNEL_OK")
</pallas_src>

<mosaic_0001>
module attributes {stable_mosaic.version = 11 : i64} {
  func.func @mel_kernel(%arg0: i32, %arg1: memref<256x1024xbf16, #tpu.memory_space<vmem>>, %arg2: memref<1024x1280xbf16, #tpu.memory_space<vmem>>, %arg3: memref<640x128xbf16, #tpu.memory_space<vmem>>, %arg4: memref<1x128xf32, #tpu.memory_space<vmem>>, %arg5: memref<256x128xf32, #tpu.memory_space<vmem>>) attributes {dimension_semantics = [#tpu.dimension_semantics<parallel>], iteration_bounds = array<i64: 1>, scalar_prefetch = 0 : i64, scratch_operands = 0 : i64, tpu.core_type = #tpu.core_type<tc>, window_params = [{transform_indices = @transform_0, window_bounds = array<i64: 256, 1024>}, {pipeline_mode = #tpu.pipeline_mode<synchronous>, transform_indices = @transform_1, window_bounds = array<i64: 1024, 1280>}, {pipeline_mode = #tpu.pipeline_mode<synchronous>, transform_indices = @transform_2, window_bounds = array<i64: 640, 128>}, {pipeline_mode = #tpu.pipeline_mode<synchronous>, transform_indices = @transform_3, window_bounds = array<i64: 1, 128>}, {transform_indices = @transform_4, window_bounds = array<i64: 256, 128>}]} {
    %c0 = arith.constant 0 : index
    %c0_0 = arith.constant 0 : index
    %0 = vector.load %arg1[%c0, %c0_0] : memref<256x1024xbf16, #tpu.memory_space<vmem>>, vector<256x1024xbf16>
    %c0_1 = arith.constant 0 : index
    %c0_2 = arith.constant 0 : index
    %1 = vector.load %arg2[%c0_1, %c0_2] : memref<1024x1280xbf16, #tpu.memory_space<vmem>>, vector<1024x1280xbf16>
    %cst = arith.constant dense<0.000000e+00> : vector<256x1280xf32>
    %2 = tpu.matmul %0, %1, %cst {dimension_numbers = #tpu.dot_dimension_numbers<[1], [0], [0], [1], [0, 0, 1, 1], [], []>} : vector<256x1024xbf16>, vector<1024x1280xbf16>, vector<256x1280xf32> -> vector<256x1280xf32>
    %3 = vector.extract_strided_slice %2 {offsets = [0, 0], sizes = [256, 640], strides = [1, 1]} : vector<256x1280xf32> to vector<256x640xf32>
    %4 = vector.extract_strided_slice %2 {offsets = [0, 640], sizes = [256, 640], strides = [1, 1]} : vector<256x1280xf32> to vector<256x640xf32>
    %5 = arith.mulf %3, %3 : vector<256x640xf32>
    %6 = arith.mulf %4, %4 : vector<256x640xf32>
    %7 = arith.addf %5, %6 : vector<256x640xf32>
    %8 = arith.truncf %7 : vector<256x640xf32> to vector<256x640xbf16>
    %c0_3 = arith.constant 0 : index
    %c0_4 = arith.constant 0 : index
    %9 = vector.load %arg3[%c0_3, %c0_4] : memref<640x128xbf16, #tpu.memory_space<vmem>>, vector<640x128xbf16>
    %cst_5 = arith.constant dense<0.000000e+00> : vector<256x128xf32>
    %10 = tpu.matmul %8, %9, %cst_5 {dimension_numbers = #tpu.dot_dimension_numbers<[1], [0], [0], [1], [0, 0, 1, 1], [], []>} : vector<256x640xbf16>, vector<640x128xbf16>, vector<256x128xf32> -> vector<256x128xf32>
    %cst_6 = arith.constant 9.99999974E-6 : f32
    %11 = vector.broadcast %cst_6 : f32 to vector<256x128xf32>
    %12 = arith.maximumf %10, %11 : vector<256x128xf32>
    %13 = math.log %12 : vector<256x128xf32>
    %c0_7 = arith.constant 0 : index
    %c0_8 = arith.constant 0 : index
    %14 = vector.load %arg4[%c0_7, %c0_8] : memref<1x128xf32, #tpu.memory_space<vmem>>, vector<1x128xf32>
    %15 = vector.broadcast %14 : vector<1x128xf32> to vector<256x128xf32>
    %16 = arith.mulf %13, %15 : vector<256x128xf32>
    %c0_9 = arith.constant 0 : index
    %c0_10 = arith.constant 0 : index
    %17 = vector.load %arg5[%c0_9, %c0_10] : memref<256x128xf32, #tpu.memory_space<vmem>>, vector<256x128xf32>
    tpu.vector_store %arg5[%c0_9, %c0_10], %16 {strides = array<i32>} : memref<256x128xf32, #tpu.memory_space<vmem>>, vector<256x128xf32>,
    return
  }
  func.func @transform_0(%arg0: i32) -> (i32, i32) {
    %c0_i32 = arith.constant 0 : i32
    %c0_i32_0 = arith.constant 0 : i32
    return %arg0, %c0_i32 : i32, i32
  }
  func.func @transform_1(%arg0: i32) -> (i32, i32) {
    %c0_i32 = arith.constant 0 : i32
    %c0_i32_0 = arith.constant 0 : i32
    %c0_i32_1 = arith.constant 0 : i32
    return %c0_i32, %c0_i32_0 : i32, i32
  }
  func.func @transform_2(%arg0: i32) -> (i32, i32) {
    %c0_i32 = arith.constant 0 : i32
    %c0_i32_0 = arith.constant 0 : i32
    %c0_i32_1 = arith.constant 0 : i32
    return %c0_i32, %c0_i32_0 : i32, i32
  }
  func.func @transform_3(%arg0: i32) -> (i32, i32) {
    %c0_i32 = arith.constant 0 : i32
    %c0_i32_0 = arith.constant 0 : i32
    %c0_i32_1 = arith.constant 0 : i32
    return %c0_i32, %c0_i32_0 : i32, i32
  }
  func.func @transform_4(%arg0: i32) -> (i32, i32) {
    %c0_i32 = arith.constant 0 : i32
    %c0_i32_0 = arith.constant 0 : i32
    return %arg0, %c0_i32 : i32, i32
  }
}

</mosaic_0001>

<bundles_post_ra>
// kernel: tpu_custom_call.1
= control target key start
LH: loop header
LB: loop body
LE: loop exit
PB: predicated region body
PF: predicated region fallthrough
CT: control target
= control target key end

     0   :  { %9 = vsyncpa [#allocation3], 0  ;;  %s15805_s0 = inlined_call_operand.hbm [shape: bf16[256,1024], index: 0, kind: input, shape index: {}]   ;;  %s15806_s1 = inlined_call_operand.hbm [shape: bf16[1024,1280], index: 1, kind: input, shape index: {}]   ;;  %s15807_s2 = inlined_call_operand.hbm [shape: bf16[640,128], index: 2, kind: input, shape index: {}]   ;;  %s15808_s3 = inlined_call_operand.hbm [shape: f32[1,128], index: 3, kind: input, shape index: {}]   ;;  %s15809_s4 = inlined_call_operand.hbm [shape: f32[256,128], index: 4, kind: output, shape index: {}]  }
   0x1   :  { %10 = vsyncpa [#allocation6], 0 }
   0x2   :  { %11 = vsyncpa [#allocation9], 0 }
   0x3   :  { %12 = vsyncpa [#allocation4], 0  ;;  %s13413_s15 = smov [#allocation5]   ;;  %s13295_s19 = scalar_lea.hbm %s15806_s1, 81920 }
   0x4   :  { %s30_s16 = sshll.u32 %s13413_s15, 4  ;;  %p13296_p0 = scmp.ne.s32.totalorder %s15806_s1, %s13295_s19  ;;  %s31_s16 = int_to_ptr.vmem [resolvable:$true] %s30_s16 }
   0x5   :  { %p13299_p1 = scmp.lt.u32.totalorder %s13295_s19, %s15806_s1 }
   0x7   :  { %p13301_p2 = pnand %p13299_p1, %p13296_p0 }
   0x9   :  { %13304 = shalt.err (!%p13301_p2)
}
   0xa   :  { %s13305_s24 = scalar_lea.vmem %s31_s16, 81920  ;;  %p13310_p4 = scmp.lt.s32.totalorder %s31_s16, %s31_s16 }
   0xb   :  { %p13306_p3 = scmp.ne.s32.totalorder %s31_s16, %s13305_s24  ;;  %p13311_p5 = scmp.lt.s32.totalorder %s13305_s24, %s13305_s24 }
   0xd   :  { %p13312_p6 = por %p13311_p5, %p13310_p4 }
   0xf   :  { %p13313_p7 = pnand %p13312_p6, %p13306_p3 }
  0x11   :  { %13316 = shalt.err (!%p13313_p7)
}
  0x12   :  { %s13414_s25 = smov 640   ;;  %s13415_s26 = smov 40  }
  0x13   :  { %36 = dma.hbm_to_vmem [thread:$0]  %s15806_s1, 81920, %s31_s16, [#allocation6], %s13414_s25, %s13414_s25, %s13415_s26  }
  0x14   :  { %s13416_s29 = smov [#allocation2]   ;;  %s13317_s7 = scalar_lea.hbm %s15805_s0, 16384 }
  0x15   :  { %s18_s30 = sshll.u32 %s13416_s29, 4  ;;  %p13318_p8 = scmp.ne.s32.totalorder %s15805_s0, %s13317_s7  ;;  %s19_s30 = int_to_ptr.vmem [resolvable:$true] %s18_s30 }
  0x16   :  { %p13321_p9 = scmp.lt.u32.totalorder %s13317_s7, %s15805_s0 }
  0x18   :  { %p13323_p10 = pnand %p13321_p9, %p13318_p8 }
  0x1a   :  { %13326 = shalt.err (!%p13323_p10)
}
  0x1b   :  { %s13327_s12 = scalar_lea.vmem %s19_s30, 16384  ;;  %p13332_p12 = scmp.lt.s32.totalorder %s19_s30, %s19_s30 }
  0x1c   :  { %p13328_p11 = scmp.ne.s32.totalorder %s19_s30, %s13327_s12  ;;  %p13333_p13 = scmp.lt.s32.totalorder %s13327_s12, %s13327_s12 }
  0x1e   :  { %p13334_p0 = por %p13333_p13, %p13332_p12 }
  0x20   :  { %p13335_p1 = pnand %p13334_p0, %p13328_p11 }
  0x22   :  { %13338 = shalt.err (!%p13335_p1)
}
  0x23   :  { %s13417_s1 = smov 512   ;;  %s13418_s13 = smov 32  }
  0x24   :  { %24 = dma.hbm_to_vmem [thread:$0]  %s15805_s0, 16384, %s19_s30, [#allocation3], %s13417_s1, %s13417_s1, %s13418_s13  }
  0x25   :  { %s13419_s16 = smov [#allocation7]   ;;  %s13339_s20 = scalar_lea.hbm %s15807_s2, 5120 }
  0x26   :  { %s42_s17 = sshll.u32 %s13419_s16, 4  ;;  %p13340_p2 = scmp.ne.s32.totalorder %s15807_s2, %s13339_s20  ;;  %s43_s17 = int_to_ptr.vmem [resolvable:$true] %s42_s17 }
  0x27   :  { %p13343_p3 = scmp.lt.u32.totalorder %s13339_s20, %s15807_s2 }
  0x29   :  { %p13345_p4 = pnand %p13343_p3, %p13340_p2 }
  0x2b   :  { %13348 = shalt.err (!%p13345_p4)
}
  0x2c   :  { %s13349_s25 = scalar_lea.vmem %s43_s17, 5120  ;;  %p13354_p6 = scmp.lt.s32.totalorder %s43_s17, %s43_s17 }
  0x2d   :  { %p13350_p5 = scmp.ne.s32.totalorder %s43_s17, %s13349_s25  ;;  %p13355_p7 = scmp.lt.s32.totalorder %s13349_s25, %s13349_s25 }
  0x2f   :  { %p13356_p8 = por %p13355_p7, %p13354_p6 }
  0x31   :  { %p13357_p9 = pnand %p13356_p8, %p13350_p5 }
  0x33   :  { %13360 = shalt.err (!%p13357_p9)
}
  0x34   :  { %s13420_s0 = smov 64   ;;  %s13421_s26 = smov 4  }
  0x35   :  { %48 = dma.hbm_to_vmem [thread:$0]  %s15807_s2, 5120, %s43_s17, [#allocation6], %s13420_s0, %s13420_s0, %s13421_s26  }
  0x36   :  { %s13422_s29 = smov [#allocation8]   ;;  %s13361_s7 = scalar_lea.hbm %s15808_s3, 16 }
  0x37   :  { %s55_s30 = sshll.u32 %s13422_s29, 4  ;;  %p13362_p10 = scmp.ne.s32.totalorder %s15808_s3, %s13361_s7  ;;  %s56_s30 = int_to_ptr.vmem [resolvable:$true] %s55_s30 }
  0x38   :  { %p13365_p11 = scmp.lt.u32.totalorder %s13361_s7, %s15808_s3 }
  0x3a   :  { %p13367_p12 = pnand %p13365_p11, %p13362_p10 }
  0x3c   :  { %13370 = shalt.err (!%p13367_p12)
}
  0x3d   :  { %s13371_s12 = scalar_lea.vmem %s56_s30, 16  ;;  %s13375_s2 = scalar_lea.vmem %s56_s30, 32 }
  0x3e   :  { %p13372_p13 = scmp.ne.s32.totalorder %s56_s30, %s13371_s12  ;;  %p13376_p0 = scmp.lt.s32.totalorder %s56_s30, %s56_s30 }
  0x3f   :  { %p13377_p1 = scmp.lt.s32.totalorder %s13375_s2, %s13371_s12 }
  0x41   :  { %p13378_p2 = por %p13377_p1, %p13376_p0 }
  0x43   :  { %p13379_p3 = pnand %p13378_p2, %p13372_p13 }
  0x45   :  { %13382 = shalt.err (!%p13379_p3)
}
  0x46   :  { %58 = dma.hbm_to_vmem [thread:$0]  %s15808_s3, 16, %s56_s30, [#allocation9]  }
  0x47   :  { %13405 = dma.done.wait [#allocation3], 16384  }
  0x48   :  { %13406 = vsyncadd [#allocation3], 4294950912 }
  0x49   :  { %13407 = dma.done.wait [#allocation6], 87040  }
  0x4a   :  { %13408 = vsyncadd [#allocation6], 4294880256 }
  0x4b   :  { %13409 = dma.done.wait [#allocation9], 16  }
  0x4c   :  { %13410 = vsyncadd [#allocation9], 4294967280  ;;  %v12199_v0 = vld [vmem:[#allocation5 + $0x4] ss:$40 sps:$4 sm:$0xff]   ;;  %v12203_v2 = vld [vmem:[#allocation5] ss:$40 sps:$4 sm:$0xff]  }
  0x4d   :  { %v12201_v1 = vld [vmem:[#allocation5 + $0xc] ss:$40 sps:$4 sm:$0xff]   ;;  %4680 = vmatprep.subr.bf16.mxu0 %v12199_v0  ;;  %v12204_v3 = vld [vmem:[#allocation5 + $0x8] ss:$40 sps:$4 sm:$0xff]   ;;  %v12207_v5 = vld [vmem:[#allocation5 + $0x5c] ss:$40 sps:$4 sm:$0xff]  }
  0x4e   :  { %5452 = vmatprep.subr.bf16.mxu1 %v12201_v1  ;;  %v12205_v4 = vld [vmem:[#allocation5 + $0x54] ss:$40 sps:$4 sm:$0xff]   ;;  %4681 = vmatpush1.bf16.msra.mxu0 %v12203_v2  ;;  %v12209_v6 = vld [vmem:[#allocation5 + $0x50] ss:$40 sps:$4 sm:$0xff]   ;;  %v12211_v8 = vld [vmem:[#allocation5 + $0xa4] ss:$40 sps:$4 sm:$0xff]  }
  0x4f   :  { %5453 = vmatpush1.bf16.msra.mxu1 %v12204_v3  ;;  %4682 = vmatprep.subr.bf16.mxu0 %v12205_v4  ;;  %v12210_v7 = vld [vmem:[#allocation5 + $0x58] ss:$40 sps:$4 sm:$0xff]   ;;  %v12213_v9 = vld [vmem:[#allocation5 + $0xac] ss:$40 sps:$4 sm:$0xff]   ;;  %v12216_v11 = vld [vmem:[#allocation5 + $0xa8] ss:$40 sps:$4 sm:$0xff]  }
  0x50   :  { %5454 = vmatprep.subr.bf16.mxu1 %v12207_v5  ;;  %v12215_v10 = vld [vmem:[#allocation5 + $0xa0] ss:$40 sps:$4 sm:$0xff]   ;;  %v12217_v12 = vld [vmem:[#allocation5 + $0xf4] ss:$40 sps:$4 sm:$0xff]   ;;  %v12221_v14 = vld [vmem:[#allocation5 + $0xf0] ss:$40 sps:$4 sm:$0xff]  }
  0x51   :  { %v12219_v13 = vld [vmem:[#allocation5 + $0xfc] ss:$40 sps:$4 sm:$0xff]   ;;  %v12222_v15 = vld [vmem:[#allocation5 + $0xf8] ss:$40 sps:$4 sm:$0xff]   ;;  %v12225_v17 = vld [vmem:[#allocation5 + $0x14c] ss:$40 sps:$4 sm:$0xff]  }
  0x52   :  { %4683 = vmatpush1.bf16.msra.mxu0 %v12209_v6  ;;  %v12223_v16 = vld [vmem:[#allocation5 + $0x144] ss:$40 sps:$4 sm:$0xff]   ;;  %v12227_v18 = vld [vmem:[#allocation5 + $0x140] ss:$40 sps:$4 sm:$0xff]   ;;  %v12229_v20 = vld [vmem:[#allocation5 + $0x194] ss:$40 sps:$4 sm:$0xff]  }
  0x53   :  { %5455 = vmatpush1.bf16.msra.mxu1 %v12210_v7  ;;  %4684 = vmatprep.subr.bf16.mxu0 %v12211_v8  ;;  %v12228_v19 = vld [vmem:[#allocation5 + $0x148] ss:$40 sps:$4 sm:$0xff]   ;;  %v12231_v21 = vld [vmem:[#allocation5 + $0x19c] ss:$40 sps:$4 sm:$0xff]   ;;  %v12234_v23 = vld [vmem:[#allocation5 + $0x198] ss:$40 sps:$4 sm:$0xff]  }
  0x54   :  { %5456 = vmatprep.subr.bf16.mxu1 %v12213_v9  ;;  %v12233_v22 = vld [vmem:[#allocation5 + $0x190] ss:$40 sps:$4 sm:$0xff]   ;;  %v12235_v24 = vld [vmem:[#allocation5 + $0x1e4] ss:$40 sps:$4 sm:$0xff]   ;;  %v12239_v26 = vld [vmem:[#allocation5 + $0x1e0] ss:$40 sps:$4 sm:$0xff]  }
  0x55   :  { %v12237_v25 = vld [vmem:[#allocation5 + $0x1ec] ss:$40 sps:$4 sm:$0xff]   ;;  %v12240_v27 = vld [vmem:[#allocation5 + $0x1e8] ss:$40 sps:$4 sm:$0xff]   ;;  %v12243_v29 = vld [vmem:[#allocation5 + $0x23c] ss:$40 sps:$4 sm:$0xff]  }
  0x56   :  { %4685 = vmatpush1.bf16.msra.mxu0 %v12215_v10  ;;  %v12241_v28 = vld [vmem:[#allocation5 + $0x234] ss:$40 sps:$4 sm:$0xff]   ;;  %v12245_v30 = vld [vmem:[#allocation5 + $0x230] ss:$40 sps:$4 sm:$0xff]   ;;  %v12247_v32 = vld [vmem:[#allocation5 + $0x284] ss:$40 sps:$4 sm:$0xff]  }
  0x57   :  { %5457 = vmatpush1.bf16.msra.mxu1 %v12216_v11  ;;  %4686 = vmatprep.subr.bf16.mxu0 %v12217_v12  ;;  %v12246_v31 = vld [vmem:[#allocation5 + $0x238] ss:$40 sps:$4 sm:$0xff]   ;;  %v12249_v33 = vld [vmem:[#allocation5 + $0x28c] ss:$40 sps:$4 sm:$0xff]   ;;  %v12252_v35 = vld [vmem:[#allocation5 + $0x288] ss:$40 sps:$4 sm:$0xff]  }
  0x58   :  { %5458 = vmatprep.subr.bf16.mxu1 %v12219_v13  ;;  %v12251_v34 = vld [vmem:[#allocation5 + $0x280] ss:$40 sps:$4 sm:$0xff]   ;;  %v12253_v36 = vld [vmem:[#allocation5 + $0x2d4] ss:$40 sps:$4 sm:$0xff]   ;;  %v12257_v38 = vld [vmem:[#allocation5 + $0x2d0] ss:$40 sps:$4 sm:$0xff]  }
  0x59   :  { %v12255_v37 = vld [vmem:[#allocation5 + $0x2dc] ss:$40 sps:$4 sm:$0xff]   ;;  %v12258_v39 = vld [vmem:[#allocation5 + $0x2d8] ss:$40 sps:$4 sm:$0xff]   ;;  %v12261_v41 = vld [vmem:[#allocation5 + $0x32c] ss:$40 sps:$4 sm:$0xff]  }
  0x5a   :  { %4687 = vmatpush1.bf16.msra.mxu0 %v12221_v14  ;;  %v12259_v40 = vld [vmem:[#allocation5 + $0x324] ss:$40 sps:$4 sm:$0xff]   ;;  %v12263_v42 = vld [vmem:[#allocation5 + $0x320] ss:$40 sps:$4 sm:$0xff]   ;;  %v12265_v44 = vld [vmem:[#allocation5 + $0x374] ss:$40 sps:$4 sm:$0xff]  }
  0x5b   :  { %5459 = vmatpush1.bf16.msra.mxu1 %v12222_v15  ;;  %4688 = vmatprep.subr.bf16.mxu0 %v12223_v16  ;;  %v12264_v43 = vld [vmem:[#allocation5 + $0x328] ss:$40 sps:$4 sm:$0xff]   ;;  %v12267_v45 = vld [vmem:[#allocation5 + $0x37c] ss:$40 sps:$4 sm:$0xff]   ;;  %v12270_v49 = vld [vmem:[#allocation5 + $0x378] ss:$40 sps:$4 sm:$0xff]  }
  0x5c   :  { %5460 = vmatprep.subr.bf16.mxu1 %v12225_v17  ;;  %v72_v46 = vld [vmem:[#allocation2] sm:$0xff]  ;;  %v12269_v48 = vld [vmem:[#allocation5 + $0x370] ss:$40 sps:$4 sm:$0xff]   ;;  %v12273_v52 = vld [vmem:[#allocation5 + $0x3cc] ss:$40 sps:$4 sm:$0xff]   ;;  %s13423_s3 = smov [#allocation10]  }
  0x5d   :  { %v76_v47 = vld [vmem:[#allocation2 + $0x20] sm:$0xff]  ;;  %v12276_v54 = vld [vmem:[#allocation5 + $0x3c8] ss:$40 sps:$4 sm:$0xff]   ;;  %v12277_v55 = vld [vmem:[#allocation5 + $0x414] ss:$40 sps:$4 sm:$0xff]   ;;  %s10075_s14 = sshll.u32 %s13423_s3, 4  ;;  %s10076_s14 = int_to_ptr.vmem [resolvable:$true] %s10075_s14 }
  0x5e   :  { %4689 = vmatpush1.bf16.msra.mxu0 %v12227_v18  ;;  %v12271_v50 = vld [vmem:[#allocation5 + $0x3c4] ss:$40 sps:$4 sm:$0xff]   ;;  %v13499_v51 = vcombine.high %v72_v46, %v76_v47  ;;  %v12275_v53 = vld [vmem:[#allocation5 + $0x3c0] ss:$40 sps:$4 sm:$0xff]   ;;  %v12281_v57 = vld [vmem:[#allocation5 + $0x410] ss:$40 sps:$4 sm:$0xff]   ;;  %v13503_v7 = vcombine.low %v72_v46, %v76_v47  ;;  %p13388_p5 = scmp.lt.s32.totalorder %s10076_s14, %s10076_s14 }
  0x5f   :  { %5461 = vmatpush1.bf16.msra.mxu1 %v12228_v19  ;;  %4690 = vmatprep.subr.bf16.mxu0 %v12229_v20  ;;  %v12279_v56 = vld [vmem:[#allocation5 + $0x41c] ss:$40 sps:$4 sm:$0xff]   ;;  %v12282_v58 = vld [vmem:[#allocation5 + $0x418] ss:$40 sps:$4 sm:$0xff]   ;;  %v12285_v60 = vld [vmem:[#allocation5 + $0x46c] ss:$40 sps:$4 sm:$0xff]  }
  0x60   :  { %5462 = vmatprep.subr.bf16.mxu1 %v12231_v21  ;;  %16080 = vst [vmem:[#allocation15_spill] sm:$0xff] %v13499_v51  ;;  %4712 = vmatprep.mubr.bf16.mxu0 %v13499_v51  ;;  %v12283_v59 = vld [vmem:[#allocation5 + $0x464] ss:$40 sps:$4 sm:$0xff]   ;;  %v12287_v61 = vld [vmem:[#allocation5 + $0x460] ss:$40 sps:$4 sm:$0xff]   ;;  %s13383_s15 = scalar_lea.vmem %s10076_s14, 4096 }
  0x61   :  { %5484 = vmatprep.mubr.bf16.mxu1 %v13499_v51  ;;  %v12288_v62 = vld [vmem:[#allocation5 + $0x468] ss:$40 sps:$4 sm:$0xff]   ;;  %v12289_v63 = vld [vmem:[#allocation5 + $0x4b4] ss:$40 sps:$4 sm:$0xff]   ;;  %v12294_v2 = vld [vmem:[#allocation5 + $0x4b8] ss:$40 sps:$4 sm:$0xff]   ;;  %p13384_p4 = scmp.ne.s32.totalorder %s10076_s14, %s13383_s15  ;;  %p13389_p6 = scmp.lt.s32.totalorder %s13383_s15, %s13383_s15 }
  0x62   :  { %4691 = vmatpush1.bf16.msra.mxu0 %v12233_v22  ;;  %v12291_v0 = vld [vmem:[#allocation5 + $0x4bc] ss:$40 sps:$4 sm:$0xff]   ;;  %v12293_v1 = vld [vmem:[#allocation5 + $0x4b0] ss:$40 sps:$4 sm:$0xff]   ;;  %v12324_v6 = vld [vmem:[#allocation5 + $0x50c] ss:$40 sps:$4 sm:$0xff]  }
  0x63   :  { %5463 = vmatpush1.bf16.msra.mxu1 %v12234_v23  ;;  %4692 = vmatprep.subr.bf16.mxu0 %v12235_v24  ;;  %v12297_v3 = vld [vmem:[#allocation5 + $0x504] ss:$40 sps:$4 sm:$0xff]   ;;  %v12295_v8 = vld [vmem:[#allocation5 + $0x500] ss:$40 sps:$4 sm:$0xff]   ;;  %v12300_v10 = vld [vmem:[#allocation5 + $0x554] ss:$40 sps:$4 sm:$0xff]   ;;  %p13390_p7 = por %p13389_p6, %p13388_p5 }
  0x64   :  { %5464 = vmatprep.subr.bf16.mxu1 %v12237_v25  ;;  %v80_v4 = vld [vmem:[#allocation2 + $0x40] sm:$0xff]  ;;  %v12322_v11 = vld [vmem:[#allocation5 + $0x508] ss:$40 sps:$4 sm:$0xff]   ;;  %v12333_v21 = vld [vmem:[#allocation5 + $0x5ac] ss:$40 sps:$4 sm:$0xff]  }
  0x65   :  { %v84_v5 = vld [vmem:[#allocation2 + $0x60] sm:$0xff]  ;;  %v12298_v13 = vld [vmem:[#allocation5 + $0x550] ss:$40 sps:$4 sm:$0xff]   ;;  %v12306_v22 = vld [vmem:[#allocation5 + $0x5f4] ss:$40 sps:$4 sm:$0xff]   ;;  %p13391_p8 = pnand %p13390_p7, %p13384_p4 }
  0x66   :  { %4693 = vmatpush1.bf16.msra.mxu0 %v12239_v26  ;;  %v13505_v9 = vcombine.high %v80_v4, %v84_v5  ;;  %v12327_v12 = vld [vmem:[#allocation5 + $0x55c] ss:$40 sps:$4 sm:$0xff]   ;;  %v12325_v17 = vld [vmem:[#allocation5 + $0x558] ss:$40 sps:$4 sm:$0xff]   ;;  %v13511_v18 = vcombine.low %v80_v4, %v84_v5  ;;  %v12331_v23 = vld [vmem:[#allocation5 + $0x5a8] ss:$40 sps:$4 sm:$0xff]  }
  0x67   :  { %5465 = vmatpush1.bf16.msra.mxu1 %v12240_v27  ;;  %4694 = vmatprep.subr.bf16.mxu0 %v12241_v28  ;;  %v88_v14 = vld [vmem:[#allocation2 + $0x80] sm:$0xff]  ;;  %v12304_v27 = vld [vmem:[#allocation5 + $0x5f0] ss:$40 sps:$4 sm:$0xff]   ;;  %v12351_v46 = vld [vmem:[#allocation5 + $0x6ec] ss:$40 sps:$4 sm:$0xff]  }
  0x68   :  { %5466 = vmatprep.subr.bf16.mxu1 %v12243_v29  ;;  %v92_v15 = vld [vmem:[#allocation2 + $0xa0] sm:$0xff]  ;;  %16081 = vst [vmem:[#allocation16_spill] sm:$0xff] %v13511_v18  ;;  %v12349_v47 = vld [vmem:[#allocation5 + $0x6e8] ss:$40 sps:$4 sm:$0xff]  }
  0x69   :  { %v12303_v16 = vld [vmem:[#allocation5 + $0x5a4] ss:$40 sps:$4 sm:$0xff]   ;;  %v13513_v19 = vcombine.high %v88_v14, %v92_v15  ;;  %v12301_v20 = vld [vmem:[#allocation5 + $0x5a0] ss:$40 sps:$4 sm:$0xff]  }
  0x6a   :  { %4695 = vmatpush1.bf16.msra.mxu0 %v12245_v30  ;;  %v12336_v24 = vld [vmem:[#allocation5 + $0x5fc] ss:$40 sps:$4 sm:$0xff]   ;;  %v12334_v29 = vld [vmem:[#allocation5 + $0x5f8] ss:$40 sps:$4 sm:$0xff]   ;;  %v13519_v30 = vcombine.low %v88_v14, %v92_v15 }
  0x6b   :  { %5467 = vmatpush1.bf16.msra.mxu1 %v12246_v31  ;;  %4696 = vmatprep.subr.bf16.mxu0 %v12247_v32  ;;  %16082 = vst [vmem:[#allocation17_spill] sm:$0xff] %v13513_v19  ;;  %v96_v25 = vld [vmem:[#allocation2 + $0xc0] sm:$0xff] }
  0x6c   :  { %5468 = vmatprep.subr.bf16.mxu1 %v12249_v33  ;;  %v100_v26 = vld [vmem:[#allocation2 + $0xe0] sm:$0xff]  ;;  %v12342_v33 = vld [vmem:[#allocation5 + $0x64c] ss:$40 sps:$4 sm:$0xff]  }
  0x6d   :  { %v12309_v28 = vld [vmem:[#allocation5 + $0x644] ss:$40 sps:$4 sm:$0xff]   ;;  %v13521_v31 = vcombine.high %v96_v25, %v100_v26  ;;  %v12307_v32 = vld [vmem:[#allocation5 + $0x640] ss:$40 sps:$4 sm:$0xff]  }
  0x6e   :  { %4697 = vmatpush1.bf16.msra.mxu0 %v12251_v34  ;;  %v12312_v34 = vld [vmem:[#allocation5 + $0x694] ss:$40 sps:$4 sm:$0xff]   ;;  %v12337_v5 = vld [vmem:[#allocation5 + $0x820] ss:$40 sps:$4 sm:$0xff]   ;;  %v12357_v15 = vld [vmem:[#allocation5 + $0x8c4] ss:$40 sps:$4 sm:$0xff]  }
  0x6f   :  { %5469 = vmatpush1.bf16.msra.mxu1 %v12252_v35  ;;  %4698 = vmatprep.subr.bf16.mxu0 %v12253_v36  ;;  %v12340_v35 = vld [vmem:[#allocation5 + $0x648] ss:$40 sps:$4 sm:$0xff]   ;;  %v104_v36 = vld [vmem:[#allocation2 + $0x100] sm:$0xff] }
  0x70   :  { %5470 = vmatprep.subr.bf16.mxu1 %v12255_v37  ;;  %v12345_v37 = vld [vmem:[#allocation5 + $0x69c] ss:$40 sps:$4 sm:$0xff]  }
  0x71   :  { %v12372_v14 = vld [vmem:[#allocation5 + $0x87c] ss:$40 sps:$4 sm:$0xff]  }
  0x72   :  { %4699 = vmatpush1.bf16.msra.mxu0 %v12257_v38  ;;  %v108_v38 = vld [vmem:[#allocation2 + $0x120] sm:$0xff] }
  0x73   :  { %5471 = vmatpush1.bf16.msra.mxu1 %v12258_v39  ;;  %4700 = vmatprep.subr.bf16.mxu0 %v12259_v40  ;;  %v12310_v39 = vld [vmem:[#allocation5 + $0x690] ss:$40 sps:$4 sm:$0xff]   ;;  %v12315_v40 = vld [vmem:[#allocation5 + $0x6e4] ss:$40 sps:$4 sm:$0xff]  }
  0x74   :  { %5472 = vmatprep.subr.bf16.mxu1 %v12261_v41  ;;  %v12343_v41 = vld [vmem:[#allocation5 + $0x698] ss:$40 sps:$4 sm:$0xff]  }
  0x76   :  { %4701 = vmatpush1.bf16.msra.mxu0 %v12263_v42  ;;  %v13527_v42 = vcombine.low %v96_v25, %v100_v26  ;;  %v136_v25 = vld [vmem:[#allocation2 + $0x200] sm:$0xff] }
  0x77   :  { %5473 = vmatpush1.bf16.msra.mxu1 %v12264_v43  ;;  %4702 = vmatprep.subr.bf16.mxu0 %v12265_v44  ;;  %v13529_v43 = vcombine.high %v104_v36, %v108_v38  ;;  %v12313_v44 = vld [vmem:[#allocation5 + $0x6e0] ss:$40 sps:$4 sm:$0xff]  }
  0x78   :  { %5474 = vmatprep.subr.bf16.mxu1 %v12267_v45  ;;  %v12318_v45 = vld [vmem:[#allocation5 + $0x734] ss:$40 sps:$4 sm:$0xff]   ;;  %v140_v26 = vld [vmem:[#allocation2 + $0x220] sm:$0xff] }
  0x7a   :  { %4703 = vmatpush1.bf16.msra.mxu0 %v12269_v48  ;;  %v112_v48 = vld [vmem:[#allocation2 + $0x140] sm:$0xff] }
  0x7b   :  { %5475 = vmatpush1.bf16.msra.mxu1 %v12270_v49  ;;  %4704 = vmatprep.subr.bf16.mxu0 %v12271_v50  ;;  %v12354_v49 = vld [vmem:[#allocation5 + $0x73c] ss:$40 sps:$4 sm:$0xff]  }
  0x7c   :  { %5476 = vmatprep.subr.bf16.mxu1 %v12273_v52  ;;  %v116_v50 = vld [vmem:[#allocation2 + $0x160] sm:$0xff]  ;;  %v12316_v52 = vld [vmem:[#allocation5 + $0x730] ss:$40 sps:$4 sm:$0xff]  }
  0x7e   :  { %4705 = vmatpush1.bf16.msra.mxu0 %v12275_v53  ;;  %v12321_v53 = vld [vmem:[#allocation5 + $0x784] ss:$40 sps:$4 sm:$0xff]  }
  0x7f   :  { %5477 = vmatpush1.bf16.msra.mxu1 %v12276_v54  ;;  %4706 = vmatprep.subr.bf16.mxu0 %v12277_v55  ;;  %v12352_v54 = vld [vmem:[#allocation5 + $0x738] ss:$40 sps:$4 sm:$0xff]   ;;  %v13535_v55 = vcombine.low %v104_v36, %v108_v38  ;;  %v13561_v36 = vcombine.high %v136_v25, %v140_v26  ;;  %v12385_v38 = vld [vmem:[#allocation5 + $0x968] ss:$40 sps:$4 sm:$0xff]  }
  0x80   :  { %5478 = vmatprep.subr.bf16.mxu1 %v12279_v56  ;;  %v13537_v56 = vcombine.high %v112_v48, %v116_v50 }
  0x82   :  { %4707 = vmatpush1.bf16.msra.mxu0 %v12281_v57  ;;  %v12319_v57 = vld [vmem:[#allocation5 + $0x780] ss:$40 sps:$4 sm:$0xff]  }
  0x83   :  { %5479 = vmatpush1.bf16.msra.mxu1 %v12282_v58  ;;  %4708 = vmatprep.subr.bf16.mxu0 %v12283_v59  ;;  %v12360_v58 = vld [vmem:[#allocation5 + $0x78c] ss:$40 sps:$4 sm:$0xff]  }
  0x84   :  { %5480 = vmatprep.subr.bf16.mxu1 %v12285_v60  ;;  %v12330_v59 = vld [vmem:[#allocation5 + $0x7d4] ss:$40 sps:$4 sm:$0xff]   ;;  %v12358_v60 = vld [vmem:[#allocation5 + $0x788] ss:$40 sps:$4 sm:$0xff]  }
  0x86   :  { %4709 = vmatpush1.bf16.msra.mxu0 %v12287_v61  ;;  %v12363_v61 = vld [vmem:[#allocation5 + $0x7dc] ss:$40 sps:$4 sm:$0xff]  }
  0x87   :  { %5481 = vmatpush1.bf16.msra.mxu1 %v12288_v62  ;;  %4710 = vmatprep.subr.bf16.mxu0 %v12289_v63  ;;  %v120_v62 = vld [vmem:[#allocation2 + $0x180] sm:$0xff] }
  0x88   :  { %5482 = vmatprep.subr.bf16.mxu1 %v12291_v0  ;;  %v124_v63 = vld [vmem:[#allocation2 + $0x1a0] sm:$0xff]  ;;  %v12328_v0 = vld [vmem:[#allocation5 + $0x7d0] ss:$40 sps:$4 sm:$0xff]  }
  0x89   :  { %v13545_v4 = vcombine.high %v120_v62, %v124_v63 }
  0x8a   :  { %4711 = vmatpush1.bf16.msra.mxu0 %v12293_v1  ;;  %v12339_v1 = vld [vmem:[#allocation5 + $0x824] ss:$40 sps:$4 sm:$0xff]  }
  0x8b   :  { %5483 = vmatpush1.bf16.msra.mxu1 %v12294_v2  ;;  %4873 = vmatprep.subr.bf16.mxu0 %v12297_v3  ;;  %v12361_v2 = vld [vmem:[#allocation5 + $0x7d8] ss:$40 sps:$4 sm:$0xff]   ;;  %v13543_v3 = vcombine.low %v112_v48, %v116_v50 }
  0x8c   :  { %5645 = vmatprep.subr.bf16.mxu1 %v12324_v6  ;;  %v12369_v6 = vld [vmem:[#allocation5 + $0x82c] ss:$40 sps:$4 sm:$0xff]   ;;  %v152_v50 = vld [vmem:[#allocation2 + $0x280] sm:$0xff] }
  0x8d   :  { %4713 = vmatmul.mubr.bf16.vlgmr.msra.gmra.mrb[0].mxu0 %v13503_v7 }
  0x8e   :  { %5485 = vmatmul.mubr.bf16.vlgmr.msra.gmra.mrb[0].mxu1 %v13503_v7  ;;  %4874 = vmatpush1.bf16.msra.mxu0 %v12295_v8  ;;  %v12348_v8 = vld [vmem:[#allocation5 + $0x874] ss:$40 sps:$4 sm:$0xff]  }
  0x8f   :  { %4722 = vmatprep.mubr.bf16.mxu0 %v13505_v9  ;;  %5494 = vmatprep.mubr.bf16.mxu1 %v13505_v9 }
  0x90   :  { %4875 = vmatprep.subr.bf16.mxu0 %v12300_v10  ;;  %5646 = vmatpush1.bf16.msra.mxu1 %v12322_v11  ;;  %v12367_v10 = vld [vmem:[#allocation5 + $0x828] ss:$40 sps:$4 sm:$0xff]   ;;  %v128_v11 = vld [vmem:[#allocation2 + $0x1c0] sm:$0xff] }
  0x91   :  { %5647 = vmatprep.subr.bf16.mxu1 %v12327_v12  ;;  %v132_v12 = vld [vmem:[#allocation2 + $0x1e0] sm:$0xff] }
  0x92   :  { %4876 = vmatpush1.bf16.msra.mxu0 %v12298_v13  ;;  %v12346_v13 = vld [vmem:[#allocation5 + $0x870] ss:$40 sps:$4 sm:$0xff]  }
  0x93   :  { %4877 = vmatprep.subr.bf16.mxu0 %v12303_v16  ;;  %v12370_v16 = vld [vmem:[#allocation5 + $0x878] ss:$40 sps:$4 sm:$0xff]  }
  0x94   :  { %5648 = vmatpush1.bf16.msra.mxu1 %v12325_v17  ;;  %v13551_v17 = vcombine.low %v120_v62, %v124_v63  ;;  %v172_v62 = vld [vmem:[#allocation2 + $0x320] sm:$0xff] }
  0x95   :  { %4723 = vmatmul.mubr.bf16.gmra.mrb[4].mxu0 %v13511_v18  ;;  %5649 = vmatprep.subr.bf16.mxu1 %v12333_v21  ;;  %v12378_v21 = vld [vmem:[#allocation5 + $0x8cc] ss:$40 sps:$4 sm:$0xff]  }
  0x96   :  { %5495 = vmatmul.mubr.bf16.gmra.mrb[4].mxu1 %v13511_v18  ;;  %4732 = vmatprep.mubr.bf16.mxu0 %v13513_v19 }
  0x97   :  { %5504 = vmatprep.mubr.bf16.mxu1 %v13513_v19  ;;  %4878 = vmatpush1.bf16.msra.mxu0 %v12301_v20  ;;  %v12355_v20 = vld [vmem:[#allocation5 + $0x8c0] ss:$40 sps:$4 sm:$0xff]  }
  0x98   :  { %4879 = vmatprep.subr.bf16.mxu0 %v12306_v22  ;;  %5650 = vmatpush1.bf16.msra.mxu1 %v12331_v23  ;;  %v13553_v22 = vcombine.high %v128_v11, %v132_v12  ;;  %v12366_v23 = vld [vmem:[#allocation5 + $0x914] ss:$40 sps:$4 sm:$0xff]  }
  0x99   :  { %5651 = vmatprep.subr.bf16.mxu1 %v12336_v24  ;;  %v12376_v24 = vld [vmem:[#allocation5 + $0x8c8] ss:$40 sps:$4 sm:$0xff]  }
  0x9b   :  { %4880 = vmatpush1.bf16.msra.mxu0 %v12304_v27  ;;  %v12364_v27 = vld [vmem:[#allocation5 + $0x910] ss:$40 sps:$4 sm:$0xff]  }
  0x9c   :  { %4881 = vmatprep.subr.bf16.mxu0 %v12309_v28  ;;  %5652 = vmatpush1.bf16.msra.mxu1 %v12334_v29  ;;  %v12381_v28 = vld [vmem:[#allocation5 + $0x91c] ss:$40 sps:$4 sm:$0xff]  }
  0x9d   :  { %4733 = vmatmul.mubr.bf16.gmra.mrb[8].mxu0 %v13519_v30  ;;  %5653 = vmatprep.subr.bf16.mxu1 %v12342_v33  ;;  %v12375_v29 = vld [vmem:[#allocation5 + $0x964] ss:$40 sps:$4 sm:$0xff]   ;;  %v13559_v33 = vcombine.low %v128_v11, %v132_v12 }
  0x9e   :  { %5505 = vmatmul.mubr.bf16.gmra.mrb[8].mxu1 %v13519_v30  ;;  %4742 = vmatprep.mubr.bf16.mxu0 %v13521_v31 }
  0x9f   :  { %5514 = vmatprep.mubr.bf16.mxu1 %v13521_v31  ;;  %4882 = vmatpush1.bf16.msra.mxu0 %v12307_v32  ;;  %v12379_v32 = vld [vmem:[#allocation5 + $0x918] ss:$40 sps:$4 sm:$0xff]  }
  0xa0   :  { %4883 = vmatprep.subr.bf16.mxu0 %v12312_v34  ;;  %5654 = vmatpush1.bf16.msra.mxu1 %v12340_v35  ;;  %v12373_v34 = vld [vmem:[#allocation5 + $0x960] ss:$40 sps:$4 sm:$0xff]   ;;  %v12387_v35 = vld [vmem:[#allocation5 + $0x96c] ss:$40 sps:$4 sm:$0xff]  }
  0xa1   :  { %5655 = vmatprep.subr.bf16.mxu1 %v12345_v37  ;;  %v12384_v37 = vld [vmem:[#allocation5 + $0x9b4] ss:$40 sps:$4 sm:$0xff]  }
  0xa3   :  { %4884 = vmatpush1.bf16.msra.mxu0 %v12310_v39  ;;  %v144_v39 = vld [vmem:[#allocation2 + $0x240] sm:$0xff] }
  0xa4   :  { %4885 = vmatprep.subr.bf16.mxu0 %v12315_v40  ;;  %5656 = vmatpush1.bf16.msra.mxu1 %v12343_v41  ;;  %v148_v40 = vld [vmem:[#allocation2 + $0x260] sm:$0xff]  ;;  %v12382_v41 = vld [vmem:[#allocation5 + $0x9b0] ss:$40 sps:$4 sm:$0xff]  }
  0xa5   :  { %4743 = vmatmul.mubr.bf16.gmra.mrb[12].mxu0 %v13527_v42  ;;  %5657 = vmatprep.subr.bf16.mxu1 %v12351_v46  ;;  %v12393_v46 = vld [vmem:[#allocation5 + $0xa04] ss:$40 sps:$4 sm:$0xff]   ;;  %v13569_v48 = vcombine.high %v144_v39, %v148_v40 }
  0xa6   :  { %5515 = vmatmul.mubr.bf16.gmra.mrb[12].mxu1 %v13527_v42  ;;  %4752 = vmatprep.mubr.bf16.mxu0 %v13529_v43 }
  0xa7   :  { %5524 = vmatprep.mubr.bf16.mxu1 %v13529_v43  ;;  %4886 = vmatpush1.bf16.msra.mxu0 %v12313_v44  ;;  %v12390_v44 = vld [vmem:[#allocation5 + $0x9bc] ss:$40 sps:$4 sm:$0xff]  }
  0xa8   :  { %4887 = vmatprep.subr.bf16.mxu0 %v12318_v45  ;;  %5658 = vmatpush1.bf16.msra.mxu1 %v12349_v47  ;;  %v12388_v45 = vld [vmem:[#allocation5 + $0x9b8] ss:$40 sps:$4 sm:$0xff]   ;;  %v13567_v47 = vcombine.low %v136_v25, %v140_v26  ;;  %v81_v25 = vld [vmem:[#allocation2 + $0x48] sm:$0xff] }
  0xa9   :  { %5659 = vmatprep.subr.bf16.mxu1 %v12354_v49  ;;  %v12420_v49 = vld [vmem:[#allocation5 + $0xa0c] ss:$40 sps:$4 sm:$0xff]  }
  0xaa   :  { %v85_v26 = vld [vmem:[#allocation2 + $0x68] sm:$0xff] }
  0xab   :  { %4888 = vmatpush1.bf16.msra.mxu0 %v12316_v52  ;;  %v156_v52 = vld [vmem:[#allocation2 + $0x2a0] sm:$0xff] }
  0xac   :  { %4889 = vmatprep.subr.bf16.mxu0 %v12321_v53  ;;  %5660 = vmatpush1.bf16.msra.mxu1 %v12352_v54  ;;  %v13575_v53 = vcombine.low %v144_v39, %v148_v40  ;;  %v13577_v54 = vcombine.high %v152_v50, %v156_v52  ;;  %v12423_v39 = vld [vmem:[#allocation5 + $0xa5c] ss:$40 sps:$4 sm:$0xff]  }
  0xad   :  { %4753 = vmatmul.mubr.bf16.gmra.mrb[16].mxu0 %v13535_v55  ;;  %5661 = vmatprep.subr.bf16.mxu1 %v12360_v58  ;;  %v164_v58 = vld [vmem:[#allocation2 + $0x2e0] sm:$0xff] }
  0xae   :  { %5525 = vmatmul.mubr.bf16.gmra.mrb[16].mxu1 %v13535_v55  ;;  %4762 = vmatprep.mubr.bf16.mxu0 %v13537_v56  ;;  %v12399_v40 = vld [vmem:[#allocation5 + $0xaa4] ss:$40 sps:$4 sm:$0xff]  }
  0xaf   :  { %5534 = vmatprep.mubr.bf16.mxu1 %v13537_v56  ;;  %4890 = vmatpush1.bf16.msra.mxu0 %v12319_v57  ;;  %v160_v57 = vld [vmem:[#allocation2 + $0x2c0] sm:$0xff] }
  0xb0   :  { %4891 = vmatprep.subr.bf16.mxu0 %v12330_v59  ;;  %5662 = vmatpush1.bf16.msra.mxu1 %v12358_v60  ;;  %v13583_v59 = vcombine.low %v152_v50, %v156_v52  ;;  %v13585_v60 = vcombine.high %v160_v57, %v164_v58  ;;  %v13591_v63 = vcombine.low %v160_v57, %v164_v58  ;;  %v12402_v50 = vld [vmem:[#allocation5 + $0xaf4] ss:$40 sps:$4 sm:$0xff]   ;;  %v12427_v52 = vld [vmem:[#allocation5 + $0xaa8] ss:$40 sps:$4 sm:$0xff]  }
  0xb1   :  { %5663 = vmatprep.subr.bf16.mxu1 %v12363_v61  ;;  %v168_v61 = vld [vmem:[#allocation2 + $0x300] sm:$0xff]  ;;  %v97_v57 = vld [vmem:[#allocation2 + $0xc8] sm:$0xff] }
  0xb2   :  { %v101_v58 = vld [vmem:[#allocation2 + $0xe8] sm:$0xff] }
  0xb3   :  { %4892 = vmatpush1.bf16.msra.mxu0 %v12328_v0  ;;  %v13593_v0 = vcombine.high %v168_v61, %v172_v62 }
  0xb4   :  { %4893 = vmatprep.subr.bf16.mxu0 %v12339_v1  ;;  %5664 = vmatpush1.bf16.msra.mxu1 %v12361_v2  ;;  %v176_v1 = vld [vmem:[#allocation2 + $0x340] sm:$0xff] }
  0xb5   :  { %4763 = vmatmul.mubr.bf16.gmra.mrb[20].mxu0 %v13543_v3  ;;  %5665 = vmatprep.subr.bf16.mxu1 %v12369_v6  ;;  %v180_v2 = vld [vmem:[#allocation2 + $0x360] sm:$0xff] }
  0xb6   :  { %5535 = vmatmul.mubr.bf16.gmra.mrb[20].mxu1 %v13543_v3  ;;  %4772 = vmatprep.mubr.bf16.mxu0 %v13545_v4  ;;  %v13601_v6 = vcombine.high %v176_v1, %v180_v2  ;;  %v13607_v11 = vcombine.low %v176_v1, %v180_v2  ;;  %v12405_v1 = vld [vmem:[#allocation5 + $0xb44] ss:$40 sps:$4 sm:$0xff]   ;;  %v12430_v2 = vld [vmem:[#allocation5 + $0xaf8] ss:$40 sps:$4 sm:$0xff]  }
  0xb7   :  { %5544 = vmatprep.mubr.bf16.mxu1 %v13545_v4  ;;  %4894 = vmatpush1.bf16.msra.mxu0 %v12337_v5  ;;  %v13599_v5 = vcombine.low %v168_v61, %v172_v62  ;;  %v12400_v61 = vld [vmem:[#allocation5 + $0xaf0] ss:$40 sps:$4 sm:$0xff]   ;;  %v12432_v62 = vld [vmem:[#allocation5 + $0xafc] ss:$40 sps:$4 sm:$0xff]  }
  0xb8   :  { %4895 = vmatprep.subr.bf16.mxu0 %v12348_v8  ;;  %5666 = vmatpush1.bf16.msra.mxu1 %v12367_v10  ;;  %v184_v8 = vld [vmem:[#allocation2 + $0x380] sm:$0xff] }
  0xb9   :  { %5667 = vmatprep.subr.bf16.mxu1 %v12372_v14  ;;  %v188_v10 = vld [vmem:[#allocation2 + $0x3a0] sm:$0xff] }
  0xba   :  { %v13609_v12 = vcombine.high %v184_v8, %v188_v10  ;;  %v196_v14 = vld [vmem:[#allocation2 + $0x3e0] sm:$0xff] }
  0xbb   :  { %4896 = vmatpush1.bf16.msra.mxu0 %v12346_v13  ;;  %v192_v13 = vld [vmem:[#allocation2 + $0x3c0] sm:$0xff] }
  0xbc   :  { %4897 = vmatprep.subr.bf16.mxu0 %v12357_v15  ;;  %5668 = vmatpush1.bf16.msra.mxu1 %v12370_v16  ;;  %v13615_v15 = vcombine.low %v184_v8, %v188_v10  ;;  %v13617_v16 = vcombine.high %v192_v13, %v196_v14  ;;  %v12403_v10 = vld [vmem:[#allocation5 + $0xb40] ss:$40 sps:$4 sm:$0xff]  }
  0xbd   :  { %4773 = vmatmul.mubr.bf16.gmra.mrb[24].mxu0 %v13551_v17  ;;  %5669 = vmatprep.subr.bf16.mxu1 %v12378_v21  ;;  %v77_v21 = vld [vmem:[#allocation2 + $0x28] sm:$0xff] }
  0xbe   :  { %5545 = vmatmul.mubr.bf16.gmra.mrb[24].mxu1 %v13551_v17  ;;  %4782 = vmatprep.mubr.bf16.mxu0 %v13553_v22  ;;  %16083 = vst [vmem:[#allocation18_spill] sm:$0xff] %v13615_v15  ;;  %16084 = vst [vmem:[#allocation19_spill] sm:$0xff] %v13617_v16 }
  0xbf   :  { %5554 = vmatprep.mubr.bf16.mxu1 %v13553_v22  ;;  %4898 = vmatpush1.bf16.msra.mxu0 %v12355_v20  ;;  %v73_v20 = vld [vmem:[#allocation2 + $0x8] sm:$0xff] }
  0xc0   :  { %4899 = vmatprep.subr.bf16.mxu0 %v12366_v23  ;;  %5670 = vmatpush1.bf16.msra.mxu1 %v12376_v24  ;;  %v13623_v23 = vcombine.low %v192_v13, %v196_v14  ;;  %v13625_v24 = vcombine.high %v73_v20, %v77_v21  ;;  %v12438_v13 = vld [vmem:[#allocation5 + $0xb4c] ss:$40 sps:$4 sm:$0xff]   ;;  %v13649_v14 = vcombine.high %v97_v57, %v101_v58 }
  0xc1   :  { %5671 = vmatprep.subr.bf16.mxu1 %v12381_v28  ;;  %v13631_v28 = vcombine.low %v73_v20, %v77_v21  ;;  %v12408_v20 = vld [vmem:[#allocation5 + $0xb94] ss:$40 sps:$4 sm:$0xff]   ;;  %v12436_v21 = vld [vmem:[#allocation5 + $0xb48] ss:$40 sps:$4 sm:$0xff]  }
  0xc2   :  { %16085 = vst [vmem:[#allocation20_spill] sm:$0xff] %v13623_v23  ;;  %16086 = vst [vmem:[#allocation21_spill] sm:$0xff] %v13625_v24 }
  0xc3   :  { %4900 = vmatpush1.bf16.msra.mxu0 %v12364_v27  ;;  %v12391_v27 = vld [vmem:[#allocation5 + $0xa00] ss:$40 sps:$4 sm:$0xff]   ;;  %16087 = vst [vmem:[#allocation22_spill] sm:$0xff] %v13631_v28  ;;  %16092 = vst [vmem:[#allocation27_spill] sm:$0xff] %v13649_v14 }
  0xc4   :  { %4901 = vmatprep.subr.bf16.mxu0 %v12375_v29  ;;  %5672 = vmatpush1.bf16.msra.mxu1 %v12379_v32  ;;  %v12396_v29 = vld [vmem:[#allocation5 + $0xa54] ss:$40 sps:$4 sm:$0xff]   ;;  %v13633_v32 = vcombine.high %v81_v25, %v85_v26 }
  0xc5   :  { %4783 = vmatmul.mubr.bf16.gmra.mrb[28].mxu0 %v13559_v33  ;;  %5673 = vmatprep.subr.bf16.mxu1 %v12387_v35  ;;  %v12394_v35 = vld [vmem:[#allocation5 + $0xa50] ss:$40 sps:$4 sm:$0xff]  }
  0xc6   :  { %5555 = vmatmul.mubr.bf16.gmra.mrb[28].mxu1 %v13559_v33  ;;  %4792 = vmatprep.mubr.bf16.mxu0 %v13561_v36  ;;  %16088 = vst [vmem:[#allocation23_spill] sm:$0xff] %v13633_v32 }
  0xc7   :  { %5564 = vmatprep.mubr.bf16.mxu1 %v13561_v36  ;;  %4902 = vmatpush1.bf16.msra.mxu0 %v12373_v34  ;;  %v12418_v34 = vld [vmem:[#allocation5 + $0xa08] ss:$40 sps:$4 sm:$0xff]  }
  0xc8   :  { %4903 = vmatprep.subr.bf16.mxu0 %v12384_v37  ;;  %5674 = vmatpush1.bf16.msra.mxu1 %v12385_v38  ;;  %v89_v37 = vld [vmem:[#allocation2 + $0x88] sm:$0xff] }
  0xc9   :  { %5675 = vmatprep.subr.bf16.mxu1 %v12390_v44  ;;  %v93_v38 = vld [vmem:[#allocation2 + $0xa8] sm:$0xff]  ;;  %v13639_v44 = vcombine.low %v81_v25, %v85_v26 }
  0xca   :  { %v13647_v8 = vcombine.low %v89_v37, %v93_v38  ;;  %v105_v25 = vld [vmem:[#allocation2 + $0x108] sm:$0xff] }
  0xcb   :  { %4904 = vmatpush1.bf16.msra.mxu0 %v12382_v41  ;;  %v12421_v41 = vld [vmem:[#allocation5 + $0xa58] ss:$40 sps:$4 sm:$0xff]   ;;  %16089 = vst [vmem:[#allocation24_spill] sm:$0xff] %v13639_v44  ;;  %v109_v26 = vld [vmem:[#allocation2 + $0x128] sm:$0xff] }
  0xcc   :  { %5676 = vmatpush1.bf16.msra.mxu1 %v12388_v45  ;;  %5066 = vmatprep.subr.bf16.mxu0 %v12393_v46  ;;  %v12397_v45 = vld [vmem:[#allocation5 + $0xaa0] ss:$40 sps:$4 sm:$0xff]   ;;  %v12429_v46 = vld [vmem:[#allocation5 + $0xaac] ss:$40 sps:$4 sm:$0xff]   ;;  %16091 = vst [vmem:[#allocation26_spill] sm:$0xff] %v13647_v8 }
  0xcd   :  { %4793 = vmatmul.mubr.bf16.gmra.mrb[32].mxu0 %v13567_v47  ;;  %5838 = vmatprep.subr.bf16.mxu1 %v12420_v49  ;;  %v13641_v49 = vcombine.high %v89_v37, %v93_v38  ;;  %v13655_v37 = vcombine.low %v97_v57, %v101_v58  ;;  %v12409_v38 = vld [vmem:[#allocation5 + $0xbe0] ss:$40 sps:$4 sm:$0xff]   ;;  %v12417_v57 = vld [vmem:[#allocation5 + $0xc84] ss:$40 sps:$4 sm:$0xff]  }
  0xce   :  { %5565 = vmatmul.mubr.bf16.gmra.mrb[32].mxu1 %v13567_v47  ;;  %4802 = vmatprep.mubr.bf16.mxu0 %v13569_v48  ;;  %v12448_v58 = vld [vmem:[#allocation5 + $0xc38] ss:$40 sps:$4 sm:$0xff]  }
  0xcf   :  { %5574 = vmatprep.mubr.bf16.mxu1 %v13569_v48  ;;  %16090 = vst [vmem:[#allocation25_spill] sm:$0xff] %v13641_v49  ;;  %16093 = vst [vmem:[#allocation28_spill] sm:$0xff] %v13655_v37 }
  0xd5   :  { %4803 = vmatmul.mubr.bf16.gmra.mrb[36].mxu0 %v13575_v53 }
  0xd6   :  { %5575 = vmatmul.mubr.bf16.gmra.mrb[36].mxu1 %v13575_v53  ;;  %4812 = vmatprep.mubr.bf16.mxu0 %v13577_v54 }
  0xd7   :  { %5584 = vmatprep.mubr.bf16.mxu1 %v13577_v54 }
  0xdd   :  { %4813 = vmatmul.mubr.bf16.gmra.mrb[40].mxu0 %v13583_v59 }
  0xde   :  { %5585 = vmatmul.mubr.bf16.gmra.mrb[40].mxu1 %v13583_v59  ;;  %4822 = vmatprep.mubr.bf16.mxu0 %v13585_v60 }
  0xdf   :  { %5594 = vmatprep.mubr.bf16.mxu1 %v13585_v60 }
  0xe5   :  { %4823 = vmatmul.mubr.bf16.gmra.mrb[44].mxu0 %v13591_v63 }
  0xe6   :  { %5595 = vmatmul.mubr.bf16.gmra.mrb[44].mxu1 %v13591_v63  ;;  %4832 = vmatprep.mubr.bf16.mxu0 %v13593_v0 }
  0xe7   :  { %5604 = vmatprep.mubr.bf16.mxu1 %v13593_v0 }
  0xed   :  { %4833 = vmatmul.mubr.bf16.gmra.mrb[48].mxu0 %v13599_v5 }
  0xee   :  { %5605 = vmatmul.mubr.bf16.gmra.mrb[48].mxu1 %v13599_v5  ;;  %4842 = vmatprep.mubr.bf16.mxu0 %v13601_v6 }
  0xef   :  { %5614 = vmatprep.mubr.bf16.mxu1 %v13601_v6 }
  0xf5   :  { %4843 = vmatmul.mubr.bf16.gmra.mrb[52].mxu0 %v13607_v11 }
  0xf6   :  { %5615 = vmatmul.mubr.bf16.gmra.mrb[52].mxu1 %v13607_v11  ;;  %4852 = vmatprep.mubr.bf16.mxu0 %v13609_v12 }
  0xf7   :  { %5624 = vmatprep.mubr.bf16.mxu1 %v13609_v12 }
  0xfd   :  { %4853 = vmatmul.mubr.bf16.gmra.mrb[56].mxu0 %v13615_v15 }
  0xfe   :  { %5625 = vmatmul.mubr.bf16.gmra.mrb[56].mxu1 %v13615_v15  ;;  %4862 = vmatprep.mubr.bf16.mxu0 %v13617_v16 }
  0xff   :  { %5634 = vmatprep.mubr.bf16.mxu1 %v13617_v16 }
 0x105   :  { %4863 = vmatmul.mubr.bf16.gmra.mrb[60].mxu0 %v13623_v23 }
 0x106   :  { %5635 = vmatmul.mubr.bf16.gmra.mrb[60].mxu1 %v13623_v23  ;;  %4905 = vmatprep.mubr.bf16.mxu0 %v13625_v24 }
 0x107   :  { %5677 = vmatprep.mubr.bf16.mxu1 %v13625_v24 }
 0x10d   :  { %4906 = vmatmul.mubr.bf16.vlgmr.msra.gmra.mrb[0].mxu0 %v13631_v28 }
 0x10e   :  { %5678 = vmatmul.mubr.bf16.vlgmr.msra.gmra.mrb[0].mxu1 %v13631_v28  ;;  %5067 = vmatpush1.bf16.msra.mxu0 %v12391_v27  ;;  %v12406_v27 = vld [vmem:[#allocation5 + $0xb90] ss:$40 sps:$4 sm:$0xff]  }
 0x10f   :  { %4915 = vmatprep.mubr.bf16.mxu0 %v13633_v32  ;;  %5687 = vmatprep.mubr.bf16.mxu1 %v13633_v32 }
 0x110   :  { %5068 = vmatprep.subr.bf16.mxu0 %v12396_v29  ;;  %5839 = vmatpush1.bf16.msra.mxu1 %v12418_v34  ;;  %v12441_v29 = vld [vmem:[#allocation5 + $0xb9c] ss:$40 sps:$4 sm:$0xff]  }
 0x111   :  { %5840 = vmatprep.subr.bf16.mxu1 %v12423_v39  ;;  %v12411_v34 = vld [vmem:[#allocation5 + $0xbe4] ss:$40 sps:$4 sm:$0xff]  }
 0x112   :  { %5069 = vmatpush1.bf16.msra.mxu0 %v12394_v35  ;;  %v12439_v35 = vld [vmem:[#allocation5 + $0xb98] ss:$40 sps:$4 sm:$0xff]   ;;  %v12447_v39 = vld [vmem:[#allocation5 + $0xbec] ss:$40 sps:$4 sm:$0xff]  }
 0x113   :  { %5070 = vmatprep.subr.bf16.mxu0 %v12399_v40  ;;  %v13657_v40 = vcombine.high %v105_v25, %v109_v26 }
 0x114   :  { %5841 = vmatpush1.bf16.msra.mxu1 %v12421_v41  ;;  %v12414_v41 = vld [vmem:[#allocation5 + $0xc34] ss:$40 sps:$4 sm:$0xff]  }
 0x115   :  { %4916 = vmatmul.mubr.bf16.gmra.mrb[4].mxu0 %v13639_v44  ;;  %5842 = vmatprep.subr.bf16.mxu1 %v12429_v46  ;;  %16094 = vst [vmem:[#allocation29_spill] sm:$0xff] %v13657_v40  ;;  %v113_v46 = vld [vmem:[#allocation2 + $0x148] sm:$0xff] }
 0x116   :  { %5688 = vmatmul.mubr.bf16.gmra.mrb[4].mxu1 %v13639_v44  ;;  %4925 = vmatprep.mubr.bf16.mxu0 %v13641_v49 }
 0x117   :  { %5697 = vmatprep.mubr.bf16.mxu1 %v13641_v49  ;;  %5071 = vmatpush1.bf16.msra.mxu0 %v12397_v45  ;;  %v12445_v45 = vld [vmem:[#allocation5 + $0xbe8] ss:$40 sps:$4 sm:$0xff]  }
 0x118   :  { %5072 = vmatprep.subr.bf16.mxu0 %v12402_v50  ;;  %5843 = vmatpush1.bf16.msra.mxu1 %v12427_v52  ;;  %v117_v50 = vld [vmem:[#allocation2 + $0x168] sm:$0xff]  ;;  %v12412_v52 = vld [vmem:[#allocation5 + $0xc30] ss:$40 sps:$4 sm:$0xff]  }
 0x119   :  { %5844 = vmatprep.subr.bf16.mxu1 %v12432_v62  ;;  %v13663_v62 = vcombine.low %v105_v25, %v109_v26  ;;  %v12435_v25 = vld [vmem:[#allocation5 + $0xd24] ss:$40 sps:$4 sm:$0xff]   ;;  %v12457_v26 = vld [vmem:[#allocation5 + $0xcd8] ss:$40 sps:$4 sm:$0xff]  }
 0x11b   :  { %5073 = vmatpush1.bf16.msra.mxu0 %v12400_v61  ;;  %v12450_v61 = vld [vmem:[#allocation5 + $0xc3c] ss:$40 sps:$4 sm:$0xff]   ;;  %16095 = vst [vmem:[#allocation30_spill] sm:$0xff] %v13663_v62 }
 0x11c   :  { %5074 = vmatprep.subr.bf16.mxu0 %v12405_v1  ;;  %5845 = vmatpush1.bf16.msra.mxu1 %v12430_v2  ;;  %v12415_v1 = vld [vmem:[#allocation5 + $0xc80] ss:$40 sps:$4 sm:$0xff]   ;;  %v12456_v2 = vld [vmem:[#allocation5 + $0xc8c] ss:$40 sps:$4 sm:$0xff]  }
 0x11d   :  { %4926 = vmatmul.mubr.bf16.gmra.mrb[8].mxu0 %v13647_v8  ;;  %5846 = vmatprep.subr.bf16.mxu1 %v12438_v13  ;;  %v12426_v13 = vld [vmem:[#allocation5 + $0xcd4] ss:$40 sps:$4 sm:$0xff]  }
 0x11e   :  { %5698 = vmatmul.mubr.bf16.gmra.mrb[8].mxu1 %v13647_v8  ;;  %4935 = vmatprep.mubr.bf16.mxu0 %v13649_v14 }
 0x11f   :  { %5707 = vmatprep.mubr.bf16.mxu1 %v13649_v14  ;;  %5075 = vmatpush1.bf16.msra.mxu0 %v12403_v10  ;;  %v13665_v10 = vcombine.high %v113_v46, %v117_v50 }
 0x120   :  { %5076 = vmatprep.subr.bf16.mxu0 %v12408_v20  ;;  %5847 = vmatpush1.bf16.msra.mxu1 %v12436_v21  ;;  %v12454_v20 = vld [vmem:[#allocation5 + $0xc88] ss:$40 sps:$4 sm:$0xff]  }
 0x121   :  { %5848 = vmatprep.subr.bf16.mxu1 %v12441_v29  ;;  %16096 = vst [vmem:[#allocation31_spill] sm:$0xff] %v13665_v10  ;;  %v121_v21 = vld [vmem:[#allocation2 + $0x188] sm:$0xff]  ;;  %v12424_v29 = vld [vmem:[#allocation5 + $0xcd0] ss:$40 sps:$4 sm:$0xff]  }
 0x123   :  { %5077 = vmatpush1.bf16.msra.mxu0 %v12406_v27  ;;  %v125_v27 = vld [vmem:[#allocation2 + $0x1a8] sm:$0xff] }
 0x124   :  { %5078 = vmatprep.subr.bf16.mxu0 %v12411_v34  ;;  %5849 = vmatpush1.bf16.msra.mxu1 %v12439_v35  ;;  %v12459_v34 = vld [vmem:[#allocation5 + $0xcdc] ss:$40 sps:$4 sm:$0xff]   ;;  %v13671_v35 = vcombine.low %v113_v46, %v117_v50  ;;  %v12466_v50 = vld [vmem:[#allocation5 + $0xd78] ss:$40 sps:$4 sm:$0xff]  }
 0x125   :  { %4936 = vmatmul.mubr.bf16.gmra.mrb[12].mxu0 %v13655_v37  ;;  %5850 = vmatprep.subr.bf16.mxu1 %v12447_v39  ;;  %v12465_v39 = vld [vmem:[#allocation5 + $0xd2c] ss:$40 sps:$4 sm:$0xff]  }
 0x126   :  { %5708 = vmatmul.mubr.bf16.gmra.mrb[12].mxu1 %v13655_v37  ;;  %4945 = vmatprep.mubr.bf16.mxu0 %v13657_v40  ;;  %16097 = vst [vmem:[#allocation32_spill] sm:$0xff] %v13671_v35  ;;  %v12453_v46 = vld [vmem:[#allocation5 + $0xdc4] ss:$40 sps:$4 sm:$0xff]  }
 0x127   :  { %5717 = vmatprep.mubr.bf16.mxu1 %v13657_v40  ;;  %5079 = vmatpush1.bf16.msra.mxu0 %v12409_v38  ;;  %v12433_v38 = vld [vmem:[#allocation5 + $0xd20] ss:$40 sps:$4 sm:$0xff]  }
 0x128   :  { %5080 = vmatprep.subr.bf16.mxu0 %v12414_v41  ;;  %5851 = vmatpush1.bf16.msra.mxu1 %v12445_v45  ;;  %v13673_v41 = vcombine.high %v121_v21, %v125_v27  ;;  %v12444_v45 = vld [vmem:[#allocation5 + $0xd74] ss:$40 sps:$4 sm:$0xff]  }
 0x129   :  { %5852 = vmatprep.subr.bf16.mxu1 %v12450_v61  ;;  %v129_v61 = vld [vmem:[#allocation2 + $0x1c8] sm:$0xff] }
 0x12a   :  { %16098 = vst [vmem:[#allocation33_spill] sm:$0xff] %v13673_v41 }
 0x12b   :  { %5081 = vmatpush1.bf16.msra.mxu0 %v12412_v52  ;;  %v12463_v52 = vld [vmem:[#allocation5 + $0xd28] ss:$40 sps:$4 sm:$0xff]  }
 0x12c   :  { %5082 = vmatprep.subr.bf16.mxu0 %v12417_v57  ;;  %5853 = vmatpush1.bf16.msra.mxu1 %v12448_v58  ;;  %v133_v57 = vld [vmem:[#allocation2 + $0x1e8] sm:$0xff]  ;;  %v12442_v58 = vld [vmem:[#allocation5 + $0xd70] ss:$40 sps:$4 sm:$0xff]  }
 0x12d   :  { %4946 = vmatmul.mubr.bf16.gmra.mrb[16].mxu0 %v13663_v62  ;;  %5854 = vmatprep.subr.bf16.mxu1 %v12456_v2  ;;  %v13679_v2 = vcombine.low %v121_v21, %v125_v27  ;;  %v12471_v21 = vld [vmem:[#allocation5 + $0xe64] ss:$40 sps:$4 sm:$0xff]   ;;  %v12475_v27 = vld [vmem:[#allocation5 + $0xe18] ss:$40 sps:$4 sm:$0xff]  }
 0x12e   :  { %5718 = vmatmul.mubr.bf16.gmra.mrb[16].mxu1 %v13663_v62  ;;  %4955 = vmatprep.mubr.bf16.mxu0 %v13665_v10 }
 0x12f   :  { %5727 = vmatprep.mubr.bf16.mxu1 %v13665_v10  ;;  %5083 = vmatpush1.bf16.msra.mxu0 %v12415_v1  ;;  %v12468_v1 = vld [vmem:[#allocation5 + $0xd7c] ss:$40 sps:$4 sm:$0xff]   ;;  %16099 = vst [vmem:[#allocation34_spill] sm:$0xff] %v13679_v2 }
 0x130   :  { %5084 = vmatprep.subr.bf16.mxu0 %v12426_v13  ;;  %5855 = vmatpush1.bf16.msra.mxu1 %v12454_v20  ;;  %v12451_v13 = vld [vmem:[#allocation5 + $0xdc0] ss:$40 sps:$4 sm:$0xff]   ;;  %v12474_v20 = vld [vmem:[#allocation5 + $0xdcc] ss:$40 sps:$4 sm:$0xff]  }
 0x131   :  { %5856 = vmatprep.subr.bf16.mxu1 %v12459_v34  ;;  %v12462_v34 = vld [vmem:[#allocation5 + $0xe14] ss:$40 sps:$4 sm:$0xff]  }
 0x133   :  { %5085 = vmatpush1.bf16.msra.mxu0 %v12424_v29  ;;  %v13681_v29 = vcombine.high %v129_v61, %v133_v57 }
 0x134   :  { %5086 = vmatprep.subr.bf16.mxu0 %v12435_v25  ;;  %5857 = vmatpush1.bf16.msra.mxu1 %v12457_v26  ;;  %v12472_v25 = vld [vmem:[#allocation5 + $0xdc8] ss:$40 sps:$4 sm:$0xff]  }
 0x135   :  { %4956 = vmatmul.mubr.bf16.gmra.mrb[20].mxu0 %v13671_v35  ;;  %5858 = vmatprep.subr.bf16.mxu1 %v12465_v39  ;;  %16100 = vst [vmem:[#allocation35_spill] sm:$0xff] %v13681_v29  ;;  %v137_v26 = vld [vmem:[#allocation2 + $0x208] sm:$0xff]  ;;  %v12460_v39 = vld [vmem:[#allocation5 + $0xe10] ss:$40 sps:$4 sm:$0xff]  }
 0x136   :  { %5728 = vmatmul.mubr.bf16.gmra.mrb[20].mxu1 %v13671_v35  ;;  %4965 = vmatprep.mubr.bf16.mxu0 %v13673_v41 }
 0x137   :  { %5737 = vmatprep.mubr.bf16.mxu1 %v13673_v41  ;;  %5087 = vmatpush1.bf16.msra.mxu0 %v12433_v38  ;;  %v141_v38 = vld [vmem:[#allocation2 + $0x228] sm:$0xff] }
 0x138   :  { %5088 = vmatprep.subr.bf16.mxu0 %v12444_v45  ;;  %5859 = vmatpush1.bf16.msra.mxu1 %v12463_v52  ;;  %v12477_v45 = vld [vmem:[#allocation5 + $0xe1c] ss:$40 sps:$4 sm:$0xff]   ;;  %v13687_v52 = vcombine.low %v129_v61, %v133_v57  ;;  %v12484_v61 = vld [vmem:[#allocation5 + $0xeb8] ss:$40 sps:$4 sm:$0xff]  }
 0x139   :  { %5860 = vmatprep.subr.bf16.mxu1 %v12468_v1  ;;  %v12483_v1 = vld [vmem:[#allocation5 + $0xe6c] ss:$40 sps:$4 sm:$0xff]  }
 0x13a   :  { %16101 = vst [vmem:[#allocation36_spill] sm:$0xff] %v13687_v52  ;;  %v12489_v57 = vld [vmem:[#allocation5 + $0xf04] ss:$40 sps:$4 sm:$0xff]  }
 0x13b   :  { %5089 = vmatpush1.bf16.msra.mxu0 %v12442_v58  ;;  %v12469_v58 = vld [vmem:[#allocation5 + $0xe60] ss:$40 sps:$4 sm:$0xff]  }
 0x13c   :  { %5090 = vmatprep.subr.bf16.mxu0 %v12453_v46  ;;  %5861 = vmatpush1.bf16.msra.mxu1 %v12466_v50  ;;  %v13689_v46 = vcombine.high %v137_v26, %v141_v38  ;;  %v12480_v50 = vld [vmem:[#allocation5 + $0xeb4] ss:$40 sps:$4 sm:$0xff]  }
 0x13d   :  { %4966 = vmatmul.mubr.bf16.gmra.mrb[24].mxu0 %v13679_v2  ;;  %5862 = vmatprep.subr.bf16.mxu1 %v12474_v20  ;;  %v149_v20 = vld [vmem:[#allocation2 + $0x268] sm:$0xff] }
 0x13e   :  { %5738 = vmatmul.mubr.bf16.gmra.mrb[24].mxu1 %v13679_v2  ;;  %4975 = vmatprep.mubr.bf16.mxu0 %v13681_v29  ;;  %16102 = vst [vmem:[#allocation37_spill] sm:$0xff] %v13689_v46  ;;  %v12481_v2 = vld [vmem:[#allocation5 + $0xe68] ss:$40 sps:$4 sm:$0xff]  }
 0x13f   :  { %5747 = vmatprep.mubr.bf16.mxu1 %v13681_v29  ;;  %5091 = vmatpush1.bf16.msra.mxu0 %v12451_v13  ;;  %v145_v13 = vld [vmem:[#allocation2 + $0x248] sm:$0xff] }
 0x140   :  { %5092 = vmatprep.subr.bf16.mxu0 %v12462_v34  ;;  %5863 = vmatpush1.bf16.msra.mxu1 %v12472_v25  ;;  %v12478_v34 = vld [vmem:[#allocation5 + $0xeb0] ss:$40 sps:$4 sm:$0xff]   ;;  %v12486_v25 = vld [vmem:[#allocation5 + $0xebc] ss:$40 sps:$4 sm:$0xff]  }
 0x141   :  { %5864 = vmatprep.subr.bf16.mxu1 %v12477_v45  ;;  %v13697_v45 = vcombine.high %v145_v13, %v149_v20  ;;  %v12532_v29 = vld [vmem:[#allocation5 + $0x1048] ss:$40 sps:$4 sm:$0xff]  }
 0x143   :  { %5093 = vmatpush1.bf16.msra.mxu0 %v12460_v39  ;;  %v13695_v39 = vcombine.low %v137_v26, %v141_v38  ;;  %16104 = vst [vmem:[#allocation39_spill] sm:$0xff] %v13697_v45  ;;  %v161_v38 = vld [vmem:[#allocation2 + $0x2c8] sm:$0xff] }
 0x144   :  { %5094 = vmatprep.subr.bf16.mxu0 %v12471_v21  ;;  %5865 = vmatpush1.bf16.msra.mxu1 %v12475_v27  ;;  %v12516_v21 = vld [vmem:[#allocation5 + $0xf0c] ss:$40 sps:$4 sm:$0xff]  }
 0x145   :  { %4976 = vmatmul.mubr.bf16.gmra.mrb[28].mxu0 %v13687_v52  ;;  %5866 = vmatprep.subr.bf16.mxu1 %v12483_v1  ;;  %16103 = vst [vmem:[#allocation38_spill] sm:$0xff] %v13695_v39  ;;  %v153_v27 = vld [vmem:[#allocation2 + $0x288] sm:$0xff] }
 0x146   :  { %5748 = vmatmul.mubr.bf16.gmra.mrb[28].mxu1 %v13687_v52  ;;  %4985 = vmatprep.mubr.bf16.mxu0 %v13689_v46  ;;  %v165_v1 = vld [vmem:[#allocation2 + $0x2e8] sm:$0xff] }
 0x147   :  { %5757 = vmatprep.mubr.bf16.mxu1 %v13689_v46  ;;  %5095 = vmatpush1.bf16.msra.mxu0 %v12469_v58  ;;  %v157_v58 = vld [vmem:[#allocation2 + $0x2a8] sm:$0xff] }
 0x148   :  { %5096 = vmatprep.subr.bf16.mxu0 %v12480_v50  ;;  %5867 = vmatpush1.bf16.msra.mxu1 %v12481_v2  ;;  %v13703_v2 = vcombine.low %v145_v13, %v149_v20  ;;  %v13705_v26 = vcombine.high %v153_v27, %v157_v58  ;;  %v13711_v50 = vcombine.low %v153_v27, %v157_v58  ;;  %v169_v13 = vld [vmem:[#allocation2 + $0x308] sm:$0xff] }
 0x149   :  { %5868 = vmatprep.subr.bf16.mxu1 %v12486_v25  ;;  %v173_v20 = vld [vmem:[#allocation2 + $0x328] sm:$0xff]  ;;  %v13719_v25 = vcombine.low %v161_v38, %v165_v1 }
 0x14a   :  { %16105 = vst [vmem:[#allocation40_spill] sm:$0xff] %v13703_v2  ;;  %16106 = vst [vmem:[#allocation41_spill] sm:$0xff] %v13705_v26  ;;  %v13727_v27 = vcombine.low %v169_v13, %v173_v20  ;;  %v12523_v52 = vld [vmem:[#allocation5 + $0xfa8] ss:$40 sps:$4 sm:$0xff]  }
 0x14b   :  { %5097 = vmatpush1.bf16.msra.mxu0 %v12478_v34  ;;  %16107 = vst [vmem:[#allocation42_spill] sm:$0xff] %v13711_v50  ;;  %v13713_v34 = vcombine.high %v161_v38, %v165_v1  ;;  %16109 = vst [vmem:[#allocation44_spill] sm:$0xff] %v13719_v25  ;;  %v185_v38 = vld [vmem:[#allocation2 + $0x388] sm:$0xff] }
 0x14c   :  { %5869 = vmatpush1.bf16.msra.mxu1 %v12484_v61  ;;  %5259 = vmatprep.subr.bf16.mxu0 %v12489_v57  ;;  %v13721_v61 = vcombine.high %v169_v13, %v173_v20  ;;  %v177_v57 = vld [vmem:[#allocation2 + $0x348] sm:$0xff]  ;;  %16111 = vst [vmem:[#allocation46_spill] sm:$0xff] %v13727_v27 }
 0x14d   :  { %4986 = vmatmul.mubr.bf16.gmra.mrb[32].mxu0 %v13695_v39  ;;  %6031 = vmatprep.subr.bf16.mxu1 %v12516_v21  ;;  %16108 = vst [vmem:[#allocation43_spill] sm:$0xff] %v13713_v34  ;;  %v181_v21 = vld [vmem:[#allocation2 + $0x368] sm:$0xff] }
 0x14e   :  { %5758 = vmatmul.mubr.bf16.gmra.mrb[32].mxu1 %v13695_v39  ;;  %4995 = vmatprep.mubr.bf16.mxu0 %v13697_v45  ;;  %16110 = vst [vmem:[#allocation45_spill] sm:$0xff] %v13721_v61  ;;  %v13729_v58 = vcombine.high %v177_v57, %v181_v21  ;;  %v189_v1 = vld [vmem:[#allocation2 + $0x3a8] sm:$0xff] }
 0x14f   :  { %5767 = vmatprep.mubr.bf16.mxu1 %v13697_v45  ;;  %v193_v13 = vld [vmem:[#allocation2 + $0x3c8] sm:$0xff]  ;;  %v12517_v45 = vld [vmem:[#allocation5 + $0xf58] ss:$40 sps:$4 sm:$0xff]  }
 0x150   :  { %16112 = vst [vmem:[#allocation47_spill] sm:$0xff] %v13729_v58  ;;  %v197_v20 = vld [vmem:[#allocation2 + $0x3e8] sm:$0xff] }
 0x151   :  { %v12525_v39 = vld [vmem:[#allocation5 + $0xfac] ss:$40 sps:$4 sm:$0xff]  }
 0x155   :  { %4996 = vmatmul.mubr.bf16.gmra.mrb[36].mxu0 %v13703_v2 }
 0x156   :  { %5768 = vmatmul.mubr.bf16.gmra.mrb[36].mxu1 %v13703_v2  ;;  %5005 = vmatprep.mubr.bf16.mxu0 %v13705_v26  ;;  %v12519_v2 = vld [vmem:[#allocation5 + $0xf5c] ss:$40 sps:$4 sm:$0xff]  }
 0x157   :  { %5777 = vmatprep.mubr.bf16.mxu1 %v13705_v26  ;;  %v90_v26 = vld [vmem:[#allocation2 + $0x90] sm:$0xff] }
 0x15d   :  { %5006 = vmatmul.mubr.bf16.gmra.mrb[40].mxu0 %v13711_v50 }
 0x15e   :  { %5778 = vmatmul.mubr.bf16.gmra.mrb[40].mxu1 %v13711_v50  ;;  %5015 = vmatprep.mubr.bf16.mxu0 %v13713_v34 }
 0x15f   :  { %5787 = vmatprep.mubr.bf16.mxu1 %v13713_v34  ;;  %v13737_v34 = vcombine.high %v185_v38, %v189_v1 }
 0x161   :  { %16114 = vst [vmem:[#allocation49_spill] sm:$0xff] %v13737_v34 }
 0x165   :  { %5016 = vmatmul.mubr.bf16.gmra.mrb[44].mxu0 %v13719_v25 }
 0x166   :  { %5788 = vmatmul.mubr.bf16.gmra.mrb[44].mxu1 %v13719_v25  ;;  %5025 = vmatprep.mubr.bf16.mxu0 %v13721_v61  ;;  %v13735_v25 = vcombine.low %v177_v57, %v181_v21  ;;  %v74_v57 = vld [vmem:[#allocation2 + $0x10] sm:$0xff] }
 0x167   :  { %5797 = vmatprep.mubr.bf16.mxu1 %v13721_v61  ;;  %v13745_v61 = vcombine.high %v193_v13, %v197_v20  ;;  %v78_v21 = vld [vmem:[#allocation2 + $0x30] sm:$0xff] }
 0x168   :  { %16113 = vst [vmem:[#allocation48_spill] sm:$0xff] %v13735_v25 }
 0x169   :  { %16116 = vst [vmem:[#allocation51_spill] sm:$0xff] %v13745_v61 }
 0x16d   :  { %5026 = vmatmul.mubr.bf16.gmra.mrb[48].mxu0 %v13727_v27 }
 0x16e   :  { %5798 = vmatmul.mubr.bf16.gmra.mrb[48].mxu1 %v13727_v27  ;;  %5035 = vmatprep.mubr.bf16.mxu0 %v13729_v58  ;;  %v13743_v27 = vcombine.low %v185_v38, %v189_v1  ;;  %v82_v38 = vld [vmem:[#allocation2 + $0x50] sm:$0xff] }
 0x16f   :  { %5807 = vmatprep.mubr.bf16.mxu1 %v13729_v58  ;;  %v13753_v58 = vcombine.high %v74_v57, %v78_v21  ;;  %v86_v1 = vld [vmem:[#allocation2 + $0x70] sm:$0xff] }
 0x170   :  { %16115 = vst [vmem:[#allocation50_spill] sm:$0xff] %v13743_v27  ;;  %v13761_v50 = vcombine.high %v82_v38, %v86_v1 }
 0x171   :  { %16118 = vst [vmem:[#allocation53_spill] sm:$0xff] %v13753_v58 }
 0x172   :  { %16120 = vst [vmem:[#allocation55_spill] sm:$0xff] %v13761_v50 }
 0x175   :  { %5036 = vmatmul.mubr.bf16.gmra.mrb[52].mxu0 %v13735_v25 }
 0x176   :  { %5808 = vmatmul.mubr.bf16.gmra.mrb[52].mxu1 %v13735_v25  ;;  %5045 = vmatprep.mubr.bf16.mxu0 %v13737_v34  ;;  %v13751_v25 = vcombine.low %v193_v13, %v197_v20  ;;  %v12514_v13 = vld [vmem:[#allocation5 + $0xf08] ss:$40 sps:$4 sm:$0xff]  }
 0x177   :  { %5817 = vmatprep.mubr.bf16.mxu1 %v13737_v34  ;;  %v13759_v34 = vcombine.low %v74_v57, %v78_v21  ;;  %v12490_v20 = vld [vmem:[#allocation5 + $0xf50] ss:$40 sps:$4 sm:$0xff]   ;;  %v13767_v57 = vcombine.low %v82_v38, %v86_v1  ;;  %v12493_v21 = vld [vmem:[#allocation5 + $0xfa0] ss:$40 sps:$4 sm:$0xff]   ;;  %v12534_v1 = vld [vmem:[#allocation5 + $0x104c] ss:$40 sps:$4 sm:$0xff]  }
 0x178   :  { %16117 = vst [vmem:[#allocation52_spill] sm:$0xff] %v13751_v25  ;;  %v12526_v38 = vld [vmem:[#allocation5 + $0xff8] ss:$40 sps:$4 sm:$0xff]  }
 0x179   :  { %16119 = vst [vmem:[#allocation54_spill] sm:$0xff] %v13759_v34  ;;  %16121 = vst [vmem:[#allocation56_spill] sm:$0xff] %v13767_v57 }
 0x17d   :  { %5046 = vmatmul.mubr.bf16.gmra.mrb[56].mxu0 %v13743_v27 }
 0x17e   :  { %5818 = vmatmul.mubr.bf16.gmra.mrb[56].mxu1 %v13743_v27  ;;  %5055 = vmatprep.mubr.bf16.mxu0 %v13745_v61  ;;  %v12487_v27 = vld [vmem:[#allocation5 + $0xf00] ss:$40 sps:$4 sm:$0xff]  }
 0x17f   :  { %5827 = vmatprep.mubr.bf16.mxu1 %v13745_v61  ;;  %v12492_v61 = vld [vmem:[#allocation5 + $0xf54] ss:$40 sps:$4 sm:$0xff]  }
 0x185   :  { %5056 = vmatmul.mubr.bf16.gmra.mrb[60].mxu0 %v13751_v25 }
 0x186   :  { %5828 = vmatmul.mubr.bf16.gmra.mrb[60].mxu1 %v13751_v25  ;;  %5098 = vmatprep.mubr.bf16.mxu0 %v13753_v58  ;;  %v94_v25 = vld [vmem:[#allocation2 + $0xb0] sm:$0xff] }
 0x187   :  { %5870 = vmatprep.mubr.bf16.mxu1 %v13753_v58  ;;  %v12495_v58 = vld [vmem:[#allocation5 + $0xfa4] ss:$40 sps:$4 sm:$0xff]   ;;  %v13769_v46 = vcombine.high %v90_v26, %v94_v25 }
 0x189   :  { %16122 = vst [vmem:[#allocation57_spill] sm:$0xff] %v13769_v46 }
 0x18d   :  { %5099 = vmatmul.mubr.bf16.vlgmr.msra.gmra.mrb[0].mxu0 %v13759_v34 }
 0x18e   :  { %5871 = vmatmul.mubr.bf16.vlgmr.msra.gmra.mrb[0].mxu1 %v13759_v34  ;;  %5260 = vmatpush1.bf16.msra.mxu0 %v12487_v27  ;;  %v12498_v34 = vld [vmem:[#allocation5 + $0xff4] ss:$40 sps:$4 sm:$0xff]  }
 0x18f   :  { %5108 = vmatprep.mubr.bf16.mxu0 %v13761_v50  ;;  %5880 = vmatprep.mubr.bf16.mxu1 %v13761_v50  ;;  %v98_v27 = vld [vmem:[#allocation2 + $0xd0] sm:$0xff] }
 0x190   :  { %5261 = vmatprep.subr.bf16.mxu0 %v12492_v61  ;;  %6032 = vmatpush1.bf16.msra.mxu1 %v12514_v13  ;;  %v102_v50 = vld [vmem:[#allocation2 + $0xf0] sm:$0xff]  ;;  %v12528_v13 = vld [vmem:[#allocation5 + $0xffc] ss:$40 sps:$4 sm:$0xff]  }
 0x191   :  { %6033 = vmatprep.subr.bf16.mxu1 %v12519_v2  ;;  %v12496_v61 = vld [vmem:[#allocation5 + $0xff0] ss:$40 sps:$4 sm:$0xff]   ;;  %v12501_v2 = vld [vmem:[#allocation5 + $0x1044] ss:$40 sps:$4 sm:$0xff]  }
 0x192   :  { %5262 = vmatpush1.bf16.msra.mxu0 %v12490_v20  ;;  %v13777_v20 = vcombine.high %v98_v27, %v102_v50 }
 0x193   :  { %5263 = vmatprep.subr.bf16.mxu0 %v12495_v58  ;;  %v13775_v58 = vcombine.low %v90_v26, %v94_v25  ;;  %v12507_v26 = vld [vmem:[#allocation5 + $0x10e4] ss:$40 sps:$4 sm:$0xff]   ;;  %v12535_v25 = vld [vmem:[#allocation5 + $0x1098] ss:$40 sps:$4 sm:$0xff]  }
 0x194   :  { %6034 = vmatpush1.bf16.msra.mxu1 %v12517_v45  ;;  %v12499_v45 = vld [vmem:[#allocation5 + $0x1040] ss:$40 sps:$4 sm:$0xff]   ;;  %16124 = vst [vmem:[#allocation59_spill] sm:$0xff] %v13777_v20 }
 0x195   :  { %5109 = vmatmul.mubr.bf16.gmra.mrb[4].mxu0 %v13767_v57  ;;  %6035 = vmatprep.subr.bf16.mxu1 %v12525_v39  ;;  %16123 = vst [vmem:[#allocation58_spill] sm:$0xff] %v13775_v58  ;;  %v110_v39 = vld [vmem:[#allocation2 + $0x130] sm:$0xff] }
 0x196   :  { %5881 = vmatmul.mubr.bf16.gmra.mrb[4].mxu1 %v13767_v57  ;;  %5118 = vmatprep.mubr.bf16.mxu0 %v13769_v46  ;;  %v12504_v57 = vld [vmem:[#allocation5 + $0x1094] ss:$40 sps:$4 sm:$0xff]  }
 0x197   :  { %5890 = vmatprep.mubr.bf16.mxu1 %v13769_v46  ;;  %5264 = vmatpush1.bf16.msra.mxu0 %v12493_v21  ;;  %v106_v21 = vld [vmem:[#allocation2 + $0x110] sm:$0xff] }
 0x198   :  { %5265 = vmatprep.subr.bf16.mxu0 %v12498_v34  ;;  %6036 = vmatpush1.bf16.msra.mxu1 %v12523_v52  ;;  %v12502_v34 = vld [vmem:[#allocation5 + $0x1090] ss:$40 sps:$4 sm:$0xff]   ;;  %v12537_v52 = vld [vmem:[#allocation5 + $0x109c] ss:$40 sps:$4 sm:$0xff]  }
 0x199   :  { %6037 = vmatprep.subr.bf16.mxu1 %v12528_v13  ;;  %v12505_v13 = vld [vmem:[#allocation5 + $0x10e0] ss:$40 sps:$4 sm:$0xff]  }
 0x19a   :  { %v12541_v46 = vld [vmem:[#allocation5 + $0x10e8] ss:$40 sps:$4 sm:$0xff]  }
 0x19b   :  { %5266 = vmatpush1.bf16.msra.mxu0 %v12496_v61  ;;  %v13783_v61 = vcombine.low %v98_v27, %v102_v50  ;;  %v12513_v50 = vld [vmem:[#allocation5 + $0x1184] ss:$40 sps:$4 sm:$0xff]   ;;  %v12544_v27 = vld [vmem:[#allocation5 + $0x1138] ss:$40 sps:$4 sm:$0xff]  }
 0x19c   :  { %5267 = vmatprep.subr.bf16.mxu0 %v12501_v2  ;;  %6038 = vmatpush1.bf16.msra.mxu1 %v12526_v38  ;;  %v12543_v2 = vld [vmem:[#allocation5 + $0x10ec] ss:$40 sps:$4 sm:$0xff]   ;;  %v13785_v38 = vcombine.high %v106_v21, %v110_v39 }
 0x19d   :  { %5119 = vmatmul.mubr.bf16.gmra.mrb[8].mxu0 %v13775_v58  ;;  %6039 = vmatprep.subr.bf16.mxu1 %v12534_v1  ;;  %16125 = vst [vmem:[#allocation60_spill] sm:$0xff] %v13783_v61  ;;  %v118_v1 = vld [vmem:[#allocation2 + $0x170] sm:$0xff] }
 0x19e   :  { %5891 = vmatmul.mubr.bf16.gmra.mrb[8].mxu1 %v13775_v58  ;;  %5128 = vmatprep.mubr.bf16.mxu0 %v13777_v20  ;;  %16126 = vst [vmem:[#allocation61_spill] sm:$0xff] %v13785_v38  ;;  %v12510_v58 = vld [vmem:[#allocation5 + $0x1134] ss:$40 sps:$4 sm:$0xff]  }
 0x19f   :  { %5900 = vmatprep.mubr.bf16.mxu1 %v13777_v20  ;;  %5268 = vmatpush1.bf16.msra.mxu0 %v12499_v45  ;;  %v114_v45 = vld [vmem:[#allocation2 + $0x150] sm:$0xff] }
 0x1a0   :  { %5269 = vmatprep.subr.bf16.mxu0 %v12504_v57  ;;  %6040 = vmatpush1.bf16.msra.mxu1 %v12532_v29  ;;  %v12508_v57 = vld [vmem:[#allocation5 + $0x1130] ss:$40 sps:$4 sm:$0xff]   ;;  %v12546_v29 = vld [vmem:[#allocation5 + $0x113c] ss:$40 sps:$4 sm:$0xff]  }
 0x1a1   :  { %6041 = vmatprep.subr.bf16.mxu1 %v12537_v52  ;;  %v12511_v52 = vld [vmem:[#allocation5 + $0x1180] ss:$40 sps:$4 sm:$0xff]  }
 0x1a2   :  { %v12550_v20 = vld [vmem:[#allocation5 + $0x1188] ss:$40 sps:$4 sm:$0xff]  }
 0x1a3   :  { %5270 = vmatpush1.bf16.msra.mxu0 %v12502_v34  ;;  %v13791_v34 = vcombine.low %v106_v21, %v110_v39  ;;  %v12531_v21 = vld [vmem:[#allocation5 + $0x1224] ss:$40 sps:$4 sm:$0xff]   ;;  %v12553_v39 = vld [vmem:[#allocation5 + $0x11d8] ss:$40 sps:$4 sm:$0xff]  }
 0x1a4   :  { %5271 = vmatprep.subr.bf16.mxu0 %v12507_v26  ;;  %6042 = vmatpush1.bf16.msra.mxu1 %v12535_v25  ;;  %v12552_v26 = vld [vmem:[#allocation5 + $0x118c] ss:$40 sps:$4 sm:$0xff]   ;;  %v13793_v25 = vcombine.high %v114_v45, %v118_v1 }
 0x1a5   :  { %5129 = vmatmul.mubr.bf16.gmra.mrb[12].mxu0 %v13783_v61  ;;  %6043 = vmatprep.subr.bf16.mxu1 %v12543_v2  ;;  %16127 = vst [vmem:[#allocation62_spill] sm:$0xff] %v13791_v34  ;;  %v126_v2 = vld [vmem:[#allocation2 + $0x1b0] sm:$0xff] }
 0x1a6   :  { %5901 = vmatmul.mubr.bf16.gmra.mrb[12].mxu1 %v13783_v61  ;;  %5138 = vmatprep.mubr.bf16.mxu0 %v13785_v38  ;;  %16128 = vst [vmem:[#allocation63_spill] sm:$0xff] %v13793_v25  ;;  %v12522_v61 = vld [vmem:[#allocation5 + $0x11d4] ss:$40 sps:$4 sm:$0xff]  }
 0x1a7   :  { %5910 = vmatprep.mubr.bf16.mxu1 %v13785_v38  ;;  %5272 = vmatpush1.bf16.msra.mxu0 %v12505_v13  ;;  %v122_v13 = vld [vmem:[#allocation2 + $0x190] sm:$0xff] }
 0x1a8   :  { %5273 = vmatprep.subr.bf16.mxu0 %v12510_v58  ;;  %6044 = vmatpush1.bf16.msra.mxu1 %v12541_v46  ;;  %v12520_v58 = vld [vmem:[#allocation5 + $0x11d0] ss:$40 sps:$4 sm:$0xff]   ;;  %v12555_v46 = vld [vmem:[#allocation5 + $0x11dc] ss:$40 sps:$4 sm:$0xff]  }
 0x1a9   :  { %6045 = vmatprep.subr.bf16.mxu1 %v12546_v29  ;;  %v12529_v29 = vld [vmem:[#allocation5 + $0x1220] ss:$40 sps:$4 sm:$0xff]  }
 0x1aa   :  { %v12559_v38 = vld [vmem:[#allocation5 + $0x1228] ss:$40 sps:$4 sm:$0xff]  }
 0x1ab   :  { %5274 = vmatpush1.bf16.msra.mxu0 %v12508_v57  ;;  %v13799_v57 = vcombine.low %v114_v45, %v118_v1  ;;  %v12549_v45 = vld [vmem:[#allocation5 + $0x12c4] ss:$40 sps:$4 sm:$0xff]   ;;  %v12562_v1 = vld [vmem:[#allocation5 + $0x1278] ss:$40 sps:$4 sm:$0xff]  }
 0x1ac   :  { %5275 = vmatprep.subr.bf16.mxu0 %v12513_v50  ;;  %6046 = vmatpush1.bf16.msra.mxu1 %v12544_v27  ;;  %v12561_v50 = vld [vmem:[#allocation5 + $0x122c] ss:$40 sps:$4 sm:$0xff]   ;;  %v13801_v27 = vcombine.high %v122_v13, %v126_v2 }
 0x1ad   :  { %5139 = vmatmul.mubr.bf16.gmra.mrb[16].mxu0 %v13791_v34  ;;  %6047 = vmatprep.subr.bf16.mxu1 %v12552_v26  ;;  %16129 = vst [vmem:[#allocation64_spill] sm:$0xff] %v13799_v57  ;;  %v134_v26 = vld [vmem:[#allocation2 + $0x1f0] sm:$0xff] }
 0x1ae   :  { %5911 = vmatmul.mubr.bf16.gmra.mrb[16].mxu1 %v13791_v34  ;;  %5148 = vmatprep.mubr.bf16.mxu0 %v13793_v25  ;;  %16130 = vst [vmem:[#allocation65_spill] sm:$0xff] %v13801_v27  ;;  %v12540_v34 = vld [vmem:[#allocation5 + $0x1274] ss:$40 sps:$4 sm:$0xff]  }
 0x1af   :  { %5920 = vmatprep.mubr.bf16.mxu1 %v13793_v25  ;;  %5276 = vmatpush1.bf16.msra.mxu0 %v12511_v52  ;;  %v130_v52 = vld [vmem:[#allocation2 + $0x1d0] sm:$0xff] }
 0x1b0   :  { %5277 = vmatprep.subr.bf16.mxu0 %v12522_v61  ;;  %6048 = vmatpush1.bf16.msra.mxu1 %v12550_v20  ;;  %v12564_v61 = vld [vmem:[#allocation5 + $0x127c] ss:$40 sps:$4 sm:$0xff]   ;;  %v12538_v20 = vld [vmem:[#allocation5 + $0x1270] ss:$40 sps:$4 sm:$0xff]  }
 0x1b1   :  { %6049 = vmatprep.subr.bf16.mxu1 %v12555_v46  ;;  %v13809_v46 = vcombine.high %v130_v52, %v134_v26  ;;  %v12568_v25 = vld [vmem:[#allocation5 + $0x12c8] ss:$40 sps:$4 sm:$0xff]  }
 0x1b3   :  { %5278 = vmatpush1.bf16.msra.mxu0 %v12520_v58  ;;  %v13807_v58 = vcombine.low %v122_v13, %v126_v2  ;;  %16132 = vst [vmem:[#allocation67_spill] sm:$0xff] %v13809_v46  ;;  %v142_v13 = vld [vmem:[#allocation2 + $0x230] sm:$0xff] }
 0x1b4   :  { %5279 = vmatprep.subr.bf16.mxu0 %v12531_v21  ;;  %6050 = vmatpush1.bf16.msra.mxu1 %v12553_v39  ;;  %v12547_v21 = vld [vmem:[#allocation5 + $0x12c0] ss:$40 sps:$4 sm:$0xff]   ;;  %v12570_v39 = vld [vmem:[#allocation5 + $0x12cc] ss:$40 sps:$4 sm:$0xff]   ;;  %v12556_v2 = vld [vmem:[#allocation5 + $0x1310] ss:$40 sps:$4 sm:$0xff]  }
 0x1b5   :  { %5149 = vmatmul.mubr.bf16.gmra.mrb[20].mxu0 %v13799_v57  ;;  %6051 = vmatprep.subr.bf16.mxu1 %v12561_v50  ;;  %16131 = vst [vmem:[#allocation66_spill] sm:$0xff] %v13807_v58  ;;  %v12571_v50 = vld [vmem:[#allocation5 + $0x1318] ss:$40 sps:$4 sm:$0xff]  }
 0x1b6   :  { %5921 = vmatmul.mubr.bf16.gmra.mrb[20].mxu1 %v13799_v57  ;;  %5158 = vmatprep.mubr.bf16.mxu0 %v13801_v27  ;;  %v12558_v57 = vld [vmem:[#allocation5 + $0x1314] ss:$40 sps:$4 sm:$0xff]  }
 0x1b7   :  { %5930 = vmatprep.mubr.bf16.mxu1 %v13801_v27  ;;  %5280 = vmatpush1.bf16.msra.mxu0 %v12529_v29  ;;  %v12567_v29 = vld [vmem:[#allocation5 + $0x1364] ss:$40 sps:$4 sm:$0xff]  }
 0x1b8   :  { %5281 = vmatprep.subr.bf16.mxu0 %v12540_v34  ;;  %6052 = vmatpush1.bf16.msra.mxu1 %v12559_v38  ;;  %v12573_v34 = vld [vmem:[#allocation5 + $0x131c] ss:$40 sps:$4 sm:$0xff]   ;;  %v138_v38 = vld [vmem:[#allocation2 + $0x210] sm:$0xff] }
 0x1b9   :  { %6053 = vmatprep.subr.bf16.mxu1 %v12564_v61  ;;  %v13815_v61 = vcombine.low %v130_v52, %v134_v26  ;;  %v150_v52 = vld [vmem:[#allocation2 + $0x270] sm:$0xff] }
 0x1ba   :  { %v12574_v26 = vld [vmem:[#allocation5 + $0x13b0] ss:$40 sps:$4 sm:$0xff]  }
 0x1bb   :  { %5282 = vmatpush1.bf16.msra.mxu0 %v12538_v20  ;;  %16133 = vst [vmem:[#allocation68_spill] sm:$0xff] %v13815_v61  ;;  %v13817_v20 = vcombine.high %v138_v38, %v142_v13 }
 0x1bc   :  { %5283 = vmatprep.subr.bf16.mxu0 %v12549_v45  ;;  %6054 = vmatpush1.bf16.msra.mxu1 %v12562_v1  ;;  %v12565_v45 = vld [vmem:[#allocation5 + $0x1360] ss:$40 sps:$4 sm:$0xff]   ;;  %v12579_v1 = vld [vmem:[#allocation5 + $0x136c] ss:$40 sps:$4 sm:$0xff]  }
 0x1bd   :  { %5159 = vmatmul.mubr.bf16.gmra.mrb[24].mxu0 %v13807_v58  ;;  %6055 = vmatprep.subr.bf16.mxu1 %v12570_v39  ;;  %16134 = vst [vmem:[#allocation69_spill] sm:$0xff] %v13817_v20  ;;  %v12585_v39 = vld [vmem:[#allocation5 + $0x14] ss:$40 sps:$4 sm:$0xff]  }
 0x1be   :  { %5931 = vmatmul.mubr.bf16.gmra.mrb[24].mxu1 %v13807_v58  ;;  %5168 = vmatprep.mubr.bf16.mxu0 %v13809_v46  ;;  %v12577_v58 = vld [vmem:[#allocation5 + $0x1368] ss:$40 sps:$4 sm:$0xff]  }
 0x1bf   :  { %5940 = vmatprep.mubr.bf16.mxu1 %v13809_v46  ;;  %5284 = vmatpush1.bf16.msra.mxu0 %v12547_v21  ;;  %v12576_v46 = vld [vmem:[#allocation5 + $0x13b4] ss:$40 sps:$4 sm:$0xff]   ;;  %v12580_v21 = vld [vmem:[#allocation5 + $0x13b8] ss:$40 sps:$4 sm:$0xff]  }
 0x1c0   :  { %5285 = vmatprep.subr.bf16.mxu0 %v12558_v57  ;;  %6056 = vmatpush1.bf16.msra.mxu1 %v12568_v25  ;;  %v12582_v57 = vld [vmem:[#allocation5 + $0x13bc] ss:$40 sps:$4 sm:$0xff]   ;;  %v146_v25 = vld [vmem:[#allocation2 + $0x250] sm:$0xff] }
 0x1c1   :  { %6057 = vmatprep.subr.bf16.mxu1 %v12573_v34  ;;  %v13823_v34 = vcombine.low %v138_v38, %v142_v13  ;;  %v13831_v38 = vcombine.low %v146_v25, %v150_v52 }
 0x1c3   :  { %5286 = vmatpush1.bf16.msra.mxu0 %v12556_v2  ;;  %16135 = vst [vmem:[#allocation70_spill] sm:$0xff] %v13823_v34  ;;  %v13825_v2 = vcombine.high %v146_v25, %v150_v52  ;;  %16137 = vst [vmem:[#allocation72_spill] sm:$0xff] %v13831_v38  ;;  %v170_v25 = vld [vmem:[#allocation2 + $0x310] sm:$0xff] }
 0x1c4   :  { %5287 = vmatprep.subr.bf16.mxu0 %v12567_v29  ;;  %6058 = vmatpush1.bf16.msra.mxu1 %v12571_v50  ;;  %v12612_v29 = vld [vmem:[#allocation5 + $0x1c] ss:$40 sps:$4 sm:$0xff]   ;;  %v162_v50 = vld [vmem:[#allocation2 + $0x2d0] sm:$0xff] }
 0x1c5   :  { %5169 = vmatmul.mubr.bf16.gmra.mrb[28].mxu0 %v13815_v61  ;;  %6059 = vmatprep.subr.bf16.mxu1 %v12579_v1  ;;  %16136 = vst [vmem:[#allocation71_spill] sm:$0xff] %v13825_v2  ;;  %v174_v52 = vld [vmem:[#allocation2 + $0x330] sm:$0xff] }
 0x1c6   :  { %5941 = vmatmul.mubr.bf16.gmra.mrb[28].mxu1 %v13815_v61  ;;  %5178 = vmatprep.mubr.bf16.mxu0 %v13817_v20  ;;  %v12600_v61 = vld [vmem:[#allocation5 + $0x1a4] ss:$40 sps:$4 sm:$0xff]  }
 0x1c7   :  { %5950 = vmatprep.mubr.bf16.mxu1 %v13817_v20  ;;  %5288 = vmatpush1.bf16.msra.mxu0 %v12565_v45  ;;  %v166_v45 = vld [vmem:[#allocation2 + $0x2f0] sm:$0xff]  ;;  %v12619_v20 = vld [vmem:[#allocation5 + $0xb8] ss:$40 sps:$4 sm:$0xff]  }
 0x1c8   :  { %5289 = vmatprep.subr.bf16.mxu0 %v12576_v46  ;;  %6060 = vmatpush1.bf16.msra.mxu1 %v12577_v58  ;;  %v154_v58 = vld [vmem:[#allocation2 + $0x290] sm:$0xff] }
 0x1c9   :  { %6061 = vmatprep.subr.bf16.mxu1 %v12582_v57  ;;  %v158_v46 = vld [vmem:[#allocation2 + $0x2b0] sm:$0xff]  ;;  %v13841_v57 = vcombine.high %v162_v50, %v166_v45 }
 0x1ca   :  { %v13833_v13 = vcombine.high %v154_v58, %v158_v46  ;;  %v13839_v1 = vcombine.low %v154_v58, %v158_v46  ;;  %v13855_v58 = vcombine.low %v170_v25, %v174_v52 }
 0x1cb   :  { %5290 = vmatpush1.bf16.msra.mxu0 %v12574_v26  ;;  %16140 = vst [vmem:[#allocation75_spill] sm:$0xff] %v13841_v57  ;;  %v13847_v26 = vcombine.low %v162_v50, %v166_v45  ;;  %v186_v50 = vld [vmem:[#allocation2 + $0x390] sm:$0xff] }
 0x1cc   :  { %6062 = vmatpush1.bf16.msra.mxu1 %v12580_v21  ;;  %6224 = vmatprep.subr.bf16.mxu0 %v12585_v39  ;;  %16138 = vst [vmem:[#allocation73_spill] sm:$0xff] %v13833_v13  ;;  %16139 = vst [vmem:[#allocation74_spill] sm:$0xff] %v13839_v1  ;;  %v13849_v21 = vcombine.high %v170_v25, %v174_v52  ;;  %v178_v39 = vld [vmem:[#allocation2 + $0x350] sm:$0xff] }
 0x1cd   :  { %5179 = vmatmul.mubr.bf16.gmra.mrb[32].mxu0 %v13823_v34  ;;  %6996 = vmatprep.subr.bf16.mxu1 %v12612_v29  ;;  %16141 = vst [vmem:[#allocation76_spill] sm:$0xff] %v13847_v26  ;;  %v182_v29 = vld [vmem:[#allocation2 + $0x370] sm:$0xff]  ;;  %16143 = vst [vmem:[#allocation78_spill] sm:$0xff] %v13855_v58 }
 0x1ce   :  { %5951 = vmatmul.mubr.bf16.gmra.mrb[32].mxu1 %v13823_v34  ;;  %5188 = vmatprep.mubr.bf16.mxu0 %v13825_v2  ;;  %16142 = vst [vmem:[#allocation77_spill] sm:$0xff] %v13849_v21  ;;  %v13857_v46 = vcombine.high %v178_v39, %v182_v29  ;;  %v190_v45 = vld [vmem:[#allocation2 + $0x3b0] sm:$0xff]  ;;  %v12594_v34 = vld [vmem:[#allocation5 + $0x104] ss:$40 sps:$4 sm:$0xff]  }
 0x1cf   :  { %5960 = vmatprep.mubr.bf16.mxu1 %v13825_v2  ;;  %v194_v25 = vld [vmem:[#allocation2 + $0x3d0] sm:$0xff] }
 0x1d0   :  { %16144 = vst [vmem:[#allocation79_spill] sm:$0xff] %v13857_v46  ;;  %v198_v52 = vld [vmem:[#allocation2 + $0x3f0] sm:$0xff] }
 0x1d5   :  { %5189 = vmatmul.mubr.bf16.gmra.mrb[36].mxu0 %v13831_v38 }
 0x1d6   :  { %5961 = vmatmul.mubr.bf16.gmra.mrb[36].mxu1 %v13831_v38  ;;  %5198 = vmatprep.mubr.bf16.mxu0 %v13833_v13 }
 0x1d7   :  { %5970 = vmatprep.mubr.bf16.mxu1 %v13833_v13  ;;  %v12613_v13 = vld [vmem:[#allocation5 + $0x68] ss:$40 sps:$4 sm:$0xff]  }
 0x1dd   :  { %5199 = vmatmul.mubr.bf16.gmra.mrb[40].mxu0 %v13839_v1 }
 0x1de   :  { %5971 = vmatmul.mubr.bf16.gmra.mrb[40].mxu1 %v13839_v1  ;;  %5208 = vmatprep.mubr.bf16.mxu0 %v13841_v57  ;;  %v12588_v1 = vld [vmem:[#allocation5 + $0x64] ss:$40 sps:$4 sm:$0xff]  }
 0x1df   :  { %5980 = vmatprep.mubr.bf16.mxu1 %v13841_v57  ;;  %v13865_v57 = vcombine.high %v186_v50, %v190_v45 }
 0x1e1   :  { %16146 = vst [vmem:[#allocation81_spill] sm:$0xff] %v13865_v57 }
 0x1e5   :  { %5209 = vmatmul.mubr.bf16.gmra.mrb[44].mxu0 %v13847_v26 }
 0x1e6   :  { %5981 = vmatmul.mubr.bf16.gmra.mrb[44].mxu1 %v13847_v26  ;;  %5218 = vmatprep.mubr.bf16.mxu0 %v13849_v21  ;;  %v13863_v26 = vcombine.low %v178_v39, %v182_v29  ;;  %v75_v39 = vld [vmem:[#allocation2 + $0x18] sm:$0xff] }
 0x1e7   :  { %5990 = vmatprep.mubr.bf16.mxu1 %v13849_v21  ;;  %v13873_v21 = vcombine.high %v194_v25, %v198_v52  ;;  %v79_v29 = vld [vmem:[#allocation2 + $0x38] sm:$0xff] }
 0x1e8   :  { %16145 = vst [vmem:[#allocation80_spill] sm:$0xff] %v13863_v26 }
 0x1e9   :  { %16148 = vst [vmem:[#allocation83_spill] sm:$0xff] %v13873_v21 }
 0x1ed   :  { %5219 = vmatmul.mubr.bf16.gmra.mrb[48].mxu0 %v13855_v58 }
 0x1ee   :  { %5991 = vmatmul.mubr.bf16.gmra.mrb[48].mxu1 %v13855_v58  ;;  %5228 = vmatprep.mubr.bf16.mxu0 %v13857_v46  ;;  %v13871_v58 = vcombine.low %v186_v50, %v190_v45  ;;  %v83_v50 = vld [vmem:[#allocation2 + $0x58] sm:$0xff] }
 0x1ef   :  { %6000 = vmatprep.mubr.bf16.mxu1 %v13857_v46  ;;  %v13881_v46 = vcombine.high %v75_v39, %v79_v29  ;;  %v87_v45 = vld [vmem:[#allocation2 + $0x78] sm:$0xff] }
 0x1f0   :  { %16147 = vst [vmem:[#allocation82_spill] sm:$0xff] %v13871_v58  ;;  %v13895_v38 = vcombine.low %v83_v50, %v87_v45 }
 0x1f1   :  { %16150 = vst [vmem:[#allocation85_spill] sm:$0xff] %v13881_v46 }
 0x1f2   :  { %16153 = vst [vmem:[#allocation88_spill] sm:$0xff] %v13895_v38 }
 0x1f5   :  { %5229 = vmatmul.mubr.bf16.gmra.mrb[52].mxu0 %v13863_v26 }
 0x1f6   :  { %6001 = vmatmul.mubr.bf16.gmra.mrb[52].mxu1 %v13863_v26  ;;  %5238 = vmatprep.mubr.bf16.mxu0 %v13865_v57  ;;  %v13879_v26 = vcombine.low %v194_v25, %v198_v52  ;;  %v12610_v25 = vld [vmem:[#allocation5 + $0x18] ss:$40 sps:$4 sm:$0xff]   ;;  %v12615_v52 = vld [vmem:[#allocation5 + $0x6c] ss:$40 sps:$4 sm:$0xff]  }
 0x1f7   :  { %6010 = vmatprep.mubr.bf16.mxu1 %v13865_v57  ;;  %v12583_v57 = vld [vmem:[#allocation5 + $0x10] ss:$40 sps:$4 sm:$0xff]  }
 0x1f8   :  { %16149 = vst [vmem:[#allocation84_spill] sm:$0xff] %v13879_v26 }
 0x1fd   :  { %5239 = vmatmul.mubr.bf16.gmra.mrb[56].mxu0 %v13871_v58 }
 0x1fe   :  { %6011 = vmatmul.mubr.bf16.gmra.mrb[56].mxu1 %v13871_v58  ;;  %5248 = vmatprep.mubr.bf16.mxu0 %v13873_v21  ;;  %v13887_v58 = vcombine.low %v75_v39, %v79_v29  ;;  %v95_v39 = vld [vmem:[#allocation2 + $0xb8] sm:$0xff] }
 0x1ff   :  { %6020 = vmatprep.mubr.bf16.mxu1 %v13873_v21  ;;  %v13889_v21 = vcombine.high %v83_v50, %v87_v45  ;;  %v12591_v29 = vld [vmem:[#allocation5 + $0xb4] ss:$40 sps:$4 sm:$0xff]   ;;  %v12592_v45 = vld [vmem:[#allocation5 + $0x100] ss:$40 sps:$4 sm:$0xff]  }
 0x200   :  { %16151 = vst [vmem:[#allocation86_spill] sm:$0xff] %v13887_v58  ;;  %v99_v50 = vld [vmem:[#allocation2 + $0xd8] sm:$0xff] }
 0x201   :  { %16152 = vst [vmem:[#allocation87_spill] sm:$0xff] %v13889_v21 }
 0x205   :  { %5249 = vmatmul.mubr.bf16.gmra.mrb[60].mxu0 %v13879_v26 }
 0x206   :  { %6021 = vmatmul.mubr.bf16.gmra.mrb[60].mxu1 %v13879_v26  ;;  %5291 = vmatprep.mubr.bf16.mxu0 %v13881_v46  ;;  %v12586_v26 = vld [vmem:[#allocation5 + $0x60] ss:$40 sps:$4 sm:$0xff]  }
 0x207   :  { %6063 = vmatprep.mubr.bf16.mxu1 %v13881_v46  ;;  %v91_v46 = vld [vmem:[#allocation2 + $0x98] sm:$0xff] }
 0x208   :  { %v13897_v2 = vcombine.high %v91_v46, %v95_v39 }
 0x20a   :  { %16154 = vst [vmem:[#allocation89_spill] sm:$0xff] %v13897_v2 }
 0x20d   :  { %5292 = vmatmul.mubr.bf16.vlgmr.msra.gmra.mrb[0].mxu0 %v13887_v58 }
 0x20e   :  { %6064 = vmatmul.mubr.bf16.vlgmr.msra.gmra.mrb[0].mxu1 %v13887_v58  ;;  %6225 = vmatpush1.bf16.msra.mxu0 %v12583_v57  ;;  %v12589_v58 = vld [vmem:[#allocation5 + $0xb0] ss:$40 sps:$4 sm:$0xff]   ;;  %v12621_v57 = vld [vmem:[#allocation5 + $0xbc] ss:$40 sps:$4 sm:$0xff]  }
 0x20f   :  { %5301 = vmatprep.mubr.bf16.mxu0 %v13889_v21  ;;  %6073 = vmatprep.mubr.bf16.mxu1 %v13889_v21  ;;  %v12630_v21 = vld [vmem:[#allocation5 + $0x15c] ss:$40 sps:$4 sm:$0xff]  }
 0x210   :  { %6226 = vmatprep.subr.bf16.mxu0 %v12588_v1  ;;  %6997 = vmatpush1.bf16.msra.mxu1 %v12610_v25  ;;  %v12624_v1 = vld [vmem:[#allocation5 + $0x10c] ss:$40 sps:$4 sm:$0xff]  }
 0x211   :  { %6998 = vmatprep.subr.bf16.mxu1 %v12615_v52  ;;  %v12597_v25 = vld [vmem:[#allocation5 + $0x154] ss:$40 sps:$4 sm:$0xff]   ;;  %v12622_v52 = vld [vmem:[#allocation5 + $0x108] ss:$40 sps:$4 sm:$0xff]  }
 0x212   :  { %6227 = vmatpush1.bf16.msra.mxu0 %v12586_v26  ;;  %v103_v26 = vld [vmem:[#allocation2 + $0xf8] sm:$0xff] }
 0x213   :  { %6228 = vmatprep.subr.bf16.mxu0 %v12591_v29  ;;  %v13905_v29 = vcombine.high %v99_v50, %v103_v26 }
 0x214   :  { %6999 = vmatpush1.bf16.msra.mxu1 %v12613_v13  ;;  %v13903_v13 = vcombine.low %v91_v46, %v95_v39  ;;  %v111_v46 = vld [vmem:[#allocation2 + $0x138] sm:$0xff]  ;;  %v12598_v39 = vld [vmem:[#allocation5 + $0x1a0] ss:$40 sps:$4 sm:$0xff]  }
 0x215   :  { %5302 = vmatmul.mubr.bf16.gmra.mrb[4].mxu0 %v13895_v38  ;;  %7000 = vmatprep.subr.bf16.mxu1 %v12621_v57  ;;  %16156 = vst [vmem:[#allocation91_spill] sm:$0xff] %v13905_v29  ;;  %v12603_v57 = vld [vmem:[#allocation5 + $0x1f4] ss:$40 sps:$4 sm:$0xff]  }
 0x216   :  { %6074 = vmatmul.mubr.bf16.gmra.mrb[4].mxu1 %v13895_v38  ;;  %5311 = vmatprep.mubr.bf16.mxu0 %v13897_v2  ;;  %16155 = vst [vmem:[#allocation90_spill] sm:$0xff] %v13903_v13  ;;  %v12595_v38 = vld [vmem:[#allocation5 + $0x150] ss:$40 sps:$4 sm:$0xff]  }
 0x217   :  { %6083 = vmatprep.mubr.bf16.mxu1 %v13897_v2  ;;  %6229 = vmatpush1.bf16.msra.mxu0 %v12589_v58  ;;  %v12628_v58 = vld [vmem:[#allocation5 + $0x158] ss:$40 sps:$4 sm:$0xff]   ;;  %v12606_v2 = vld [vmem:[#allocation5 + $0x244] ss:$40 sps:$4 sm:$0xff]  }
 0x218   :  { %6230 = vmatprep.subr.bf16.mxu0 %v12594_v34  ;;  %7001 = vmatpush1.bf16.msra.mxu1 %v12619_v20  ;;  %v12633_v34 = vld [vmem:[#allocation5 + $0x1ac] ss:$40 sps:$4 sm:$0xff]   ;;  %v107_v20 = vld [vmem:[#allocation2 + $0x118] sm:$0xff] }
 0x219   :  { %7002 = vmatprep.subr.bf16.mxu1 %v12624_v1  ;;  %v12631_v1 = vld [vmem:[#allocation5 + $0x1a8] ss:$40 sps:$4 sm:$0xff]  }
 0x21b   :  { %6231 = vmatpush1.bf16.msra.mxu0 %v12592_v45  ;;  %v13911_v45 = vcombine.low %v99_v50, %v103_v26  ;;  %v12604_v50 = vld [vmem:[#allocation5 + $0x240] ss:$40 sps:$4 sm:$0xff]   ;;  %v12609_v26 = vld [vmem:[#allocation5 + $0x294] ss:$40 sps:$4 sm:$0xff]  }
 0x21c   :  { %6232 = vmatprep.subr.bf16.mxu0 %v12597_v25  ;;  %7003 = vmatpush1.bf16.msra.mxu1 %v12622_v52  ;;  %v13913_v25 = vcombine.high %v107_v20, %v111_v46  ;;  %v12601_v52 = vld [vmem:[#allocation5 + $0x1f0] ss:$40 sps:$4 sm:$0xff]  }
 0x21d   :  { %5312 = vmatmul.mubr.bf16.gmra.mrb[8].mxu0 %v13903_v13  ;;  %7004 = vmatprep.subr.bf16.mxu1 %v12630_v21  ;;  %16157 = vst [vmem:[#allocation92_spill] sm:$0xff] %v13911_v45  ;;  %v119_v21 = vld [vmem:[#allocation2 + $0x178] sm:$0xff] }
 0x21e   :  { %6084 = vmatmul.mubr.bf16.gmra.mrb[8].mxu1 %v13903_v13  ;;  %5321 = vmatprep.mubr.bf16.mxu0 %v13905_v29  ;;  %16158 = vst [vmem:[#allocation93_spill] sm:$0xff] %v13913_v25  ;;  %v12639_v13 = vld [vmem:[#allocation5 + $0x1fc] ss:$40 sps:$4 sm:$0xff]  }
 0x21f   :  { %6093 = vmatprep.mubr.bf16.mxu1 %v13905_v29  ;;  %6233 = vmatpush1.bf16.msra.mxu0 %v12595_v38  ;;  %v12637_v29 = vld [vmem:[#allocation5 + $0x1f8] ss:$40 sps:$4 sm:$0xff]  }
 0x220   :  { %6234 = vmatprep.subr.bf16.mxu0 %v12600_v61  ;;  %7005 = vmatpush1.bf16.msra.mxu1 %v12628_v58  ;;  %v12642_v61 = vld [vmem:[#allocation5 + $0x24c] ss:$40 sps:$4 sm:$0xff]   ;;  %v115_v38 = vld [vmem:[#allocation2 + $0x158] sm:$0xff]  ;;  %v12640_v58 = vld [vmem:[#allocation5 + $0x248] ss:$40 sps:$4 sm:$0xff]  }
 0x221   :  { %7006 = vmatprep.subr.bf16.mxu1 %v12633_v34  ;;  %v13919_v34 = vcombine.low %v107_v20, %v111_v46  ;;  %v12616_v20 = vld [vmem:[#allocation5 + $0x2e0] ss:$40 sps:$4 sm:$0xff]   ;;  %v12627_v46 = vld [vmem:[#allocation5 + $0x334] ss:$40 sps:$4 sm:$0xff]  }
 0x223   :  { %6235 = vmatpush1.bf16.msra.mxu0 %v12598_v39  ;;  %16159 = vst [vmem:[#allocation94_spill] sm:$0xff] %v13919_v34  ;;  %v13921_v39 = vcombine.high %v115_v38, %v119_v21 }
 0x224   :  { %6236 = vmatprep.subr.bf16.mxu0 %v12603_v57  ;;  %7007 = vmatpush1.bf16.msra.mxu1 %v12631_v1  ;;  %v12607_v57 = vld [vmem:[#allocation5 + $0x290] ss:$40 sps:$4 sm:$0xff]   ;;  %v12648_v1 = vld [vmem:[#allocation5 + $0x29c] ss:$40 sps:$4 sm:$0xff]  }
 0x225   :  { %5322 = vmatmul.mubr.bf16.gmra.mrb[12].mxu0 %v13911_v45  ;;  %7008 = vmatprep.subr.bf16.mxu1 %v12639_v13  ;;  %16160 = vst [vmem:[#allocation95_spill] sm:$0xff] %v13921_v39  ;;  %v123_v13 = vld [vmem:[#allocation2 + $0x198] sm:$0xff] }
 0x226   :  { %6094 = vmatmul.mubr.bf16.gmra.mrb[12].mxu1 %v13911_v45  ;;  %5331 = vmatprep.mubr.bf16.mxu0 %v13913_v25  ;;  %v12618_v45 = vld [vmem:[#allocation5 + $0x2e4] ss:$40 sps:$4 sm:$0xff]  }
 0x227   :  { %6103 = vmatprep.mubr.bf16.mxu1 %v13913_v25  ;;  %6237 = vmatpush1.bf16.msra.mxu0 %v12601_v52  ;;  %v12646_v25 = vld [vmem:[#allocation5 + $0x298] ss:$40 sps:$4 sm:$0xff]   ;;  %v12649_v52 = vld [vmem:[#allocation5 + $0x2e8] ss:$40 sps:$4 sm:$0xff]  }
 0x228   :  { %6238 = vmatprep.subr.bf16.mxu0 %v12606_v2  ;;  %7009 = vmatpush1.bf16.msra.mxu1 %v12637_v29  ;;  %v12651_v2 = vld [vmem:[#allocation5 + $0x2ec] ss:$40 sps:$4 sm:$0xff]   ;;  %v127_v29 = vld [vmem:[#allocation2 + $0x1b8] sm:$0xff] }
 0x229   :  { %7010 = vmatprep.subr.bf16.mxu1 %v12642_v61  ;;  %v13927_v61 = vcombine.low %v115_v38, %v119_v21  ;;  %v135_v38 = vld [vmem:[#allocation2 + $0x1f8] sm:$0xff]  ;;  %v12634_v21 = vld [vmem:[#allocation5 + $0x380] ss:$40 sps:$4 sm:$0xff]  }
 0x22b   :  { %6239 = vmatpush1.bf16.msra.mxu0 %v12604_v50  ;;  %16161 = vst [vmem:[#allocation96_spill] sm:$0xff] %v13927_v61  ;;  %v13929_v50 = vcombine.high %v123_v13, %v127_v29 }
 0x22c   :  { %6240 = vmatprep.subr.bf16.mxu0 %v12609_v26  ;;  %7011 = vmatpush1.bf16.msra.mxu1 %v12640_v58  ;;  %v12625_v26 = vld [vmem:[#allocation5 + $0x330] ss:$40 sps:$4 sm:$0xff]   ;;  %v12657_v58 = vld [vmem:[#allocation5 + $0x33c] ss:$40 sps:$4 sm:$0xff]  }
 0x22d   :  { %5332 = vmatmul.mubr.bf16.gmra.mrb[16].mxu0 %v13919_v34  ;;  %7012 = vmatprep.subr.bf16.mxu1 %v12648_v1  ;;  %16162 = vst [vmem:[#allocation97_spill] sm:$0xff] %v13929_v50  ;;  %v12658_v1 = vld [vmem:[#allocation5 + $0x388] ss:$40 sps:$4 sm:$0xff]  }
 0x22e   :  { %6104 = vmatmul.mubr.bf16.gmra.mrb[16].mxu1 %v13919_v34  ;;  %5341 = vmatprep.mubr.bf16.mxu0 %v13921_v39  ;;  %v12636_v34 = vld [vmem:[#allocation5 + $0x384] ss:$40 sps:$4 sm:$0xff]  }
 0x22f   :  { %6113 = vmatprep.mubr.bf16.mxu1 %v13921_v39  ;;  %6241 = vmatpush1.bf16.msra.mxu0 %v12607_v57  ;;  %v12655_v39 = vld [vmem:[#allocation5 + $0x338] ss:$40 sps:$4 sm:$0xff]   ;;  %v12645_v57 = vld [vmem:[#allocation5 + $0x3d4] ss:$40 sps:$4 sm:$0xff]  }
 0x230   :  { %6242 = vmatprep.subr.bf16.mxu0 %v12618_v45  ;;  %7013 = vmatpush1.bf16.msra.mxu1 %v12646_v25  ;;  %v12660_v45 = vld [vmem:[#allocation5 + $0x38c] ss:$40 sps:$4 sm:$0xff]   ;;  %v131_v25 = vld [vmem:[#allocation2 + $0x1d8] sm:$0xff] }
 0x231   :  { %7014 = vmatprep.subr.bf16.mxu1 %v12651_v2  ;;  %v13935_v2 = vcombine.low %v123_v13, %v127_v29  ;;  %v143_v13 = vld [vmem:[#allocation2 + $0x238] sm:$0xff]  ;;  %v12652_v29 = vld [vmem:[#allocation5 + $0x420] ss:$40 sps:$4 sm:$0xff]  }
 0x233   :  { %6243 = vmatpush1.bf16.msra.mxu0 %v12616_v20  ;;  %16163 = vst [vmem:[#allocation98_spill] sm:$0xff] %v13935_v2  ;;  %v13937_v20 = vcombine.high %v131_v25, %v135_v38 }
 0x234   :  { %6244 = vmatprep.subr.bf16.mxu0 %v12627_v46  ;;  %7015 = vmatpush1.bf16.msra.mxu1 %v12649_v52  ;;  %v12643_v46 = vld [vmem:[#allocation5 + $0x3d0] ss:$40 sps:$4 sm:$0xff]   ;;  %v12666_v52 = vld [vmem:[#allocation5 + $0x3dc] ss:$40 sps:$4 sm:$0xff]  }
 0x235   :  { %5342 = vmatmul.mubr.bf16.gmra.mrb[20].mxu0 %v13927_v61  ;;  %7016 = vmatprep.subr.bf16.mxu1 %v12657_v58  ;;  %16164 = vst [vmem:[#allocation99_spill] sm:$0xff] %v13937_v20  ;;  %v12667_v58 = vld [vmem:[#allocation5 + $0x428] ss:$40 sps:$4 sm:$0xff]  }
 0x236   :  { %6114 = vmatmul.mubr.bf16.gmra.mrb[20].mxu1 %v13927_v61  ;;  %5351 = vmatprep.mubr.bf16.mxu0 %v13929_v50  ;;  %v12654_v61 = vld [vmem:[#allocation5 + $0x424] ss:$40 sps:$4 sm:$0xff]  }
 0x237   :  { %6123 = vmatprep.mubr.bf16.mxu1 %v13929_v50  ;;  %6245 = vmatpush1.bf16.msra.mxu0 %v12625_v26  ;;  %v12664_v50 = vld [vmem:[#allocation5 + $0x3d8] ss:$40 sps:$4 sm:$0xff]   ;;  %v12663_v26 = vld [vmem:[#allocation5 + $0x474] ss:$40 sps:$4 sm:$0xff]  }
 0x238   :  { %6246 = vmatprep.subr.bf16.mxu0 %v12636_v34  ;;  %7017 = vmatpush1.bf16.msra.mxu1 %v12655_v39  ;;  %v12669_v34 = vld [vmem:[#allocation5 + $0x42c] ss:$40 sps:$4 sm:$0xff]   ;;  %v139_v39 = vld [vmem:[#allocation2 + $0x218] sm:$0xff] }
 0x239   :  { %7018 = vmatprep.subr.bf16.mxu1 %v12660_v45  ;;  %v13943_v45 = vcombine.low %v131_v25, %v135_v38  ;;  %v151_v25 = vld [vmem:[#allocation2 + $0x278] sm:$0xff]  ;;  %v12670_v38 = vld [vmem:[#allocation5 + $0x4c0] ss:$40 sps:$4 sm:$0xff]  }
 0x23b   :  { %6247 = vmatpush1.bf16.msra.mxu0 %v12634_v21  ;;  %v13945_v21 = vcombine.high %v139_v39, %v143_v13 }
 0x23c   :  { %6248 = vmatprep.subr.bf16.mxu0 %v12645_v57  ;;  %7019 = vmatpush1.bf16.msra.mxu1 %v12658_v1  ;;  %v12661_v57 = vld [vmem:[#allocation5 + $0x470] ss:$40 sps:$4 sm:$0xff]   ;;  %v12675_v1 = vld [vmem:[#allocation5 + $0x47c] ss:$40 sps:$4 sm:$0xff]  }
 0x23d   :  { %5352 = vmatmul.mubr.bf16.gmra.mrb[24].mxu0 %v13935_v2  ;;  %7020 = vmatprep.subr.bf16.mxu1 %v12666_v52  ;;  %v12681_v52 = vld [vmem:[#allocation5 + $0x514] ss:$40 sps:$4 sm:$0xff]  }
 0x23e   :  { %6124 = vmatmul.mubr.bf16.gmra.mrb[24].mxu1 %v13935_v2  ;;  %5361 = vmatprep.mubr.bf16.mxu0 %v13937_v20  ;;  %v12673_v2 = vld [vmem:[#allocation5 + $0x478] ss:$40 sps:$4 sm:$0xff]  }
 0x23f   :  { %6133 = vmatprep.mubr.bf16.mxu1 %v13937_v20  ;;  %6249 = vmatpush1.bf16.msra.mxu0 %v12643_v46  ;;  %v12672_v20 = vld [vmem:[#allocation5 + $0x4c4] ss:$40 sps:$4 sm:$0xff]   ;;  %v12676_v46 = vld [vmem:[#allocation5 + $0x4c8] ss:$40 sps:$4 sm:$0xff]  }
 0x240   :  { %6250 = vmatprep.subr.bf16.mxu0 %v12654_v61  ;;  %7021 = vmatpush1.bf16.msra.mxu1 %v12664_v50  ;;  %v12678_v61 = vld [vmem:[#allocation5 + $0x4cc] ss:$40 sps:$4 sm:$0xff]   ;;  %v147_v50 = vld [vmem:[#allocation2 + $0x258] sm:$0xff] }
 0x241   :  { %7022 = vmatprep.subr.bf16.mxu1 %v12669_v34  ;;  %v13951_v34 = vcombine.low %v139_v39, %v143_v13  ;;  %v13959_v39 = vcombine.low %v147_v50, %v151_v25 }
 0x243   :  { %6251 = vmatpush1.bf16.msra.mxu0 %v12652_v29  ;;  %v13953_v29 = vcombine.high %v147_v50, %v151_v25  ;;  %v171_v50 = vld [vmem:[#allocation2 + $0x318] sm:$0xff] }
 0x244   :  { %6252 = vmatprep.subr.bf16.mxu0 %v12663_v26  ;;  %7023 = vmatpush1.bf16.msra.mxu1 %v12667_v58  ;;  %v12708_v26 = vld [vmem:[#allocation5 + $0x51c] ss:$40 sps:$4 sm:$0xff]  }
 0x245   :  { %5362 = vmatmul.mubr.bf16.gmra.mrb[28].mxu0 %v13943_v45  ;;  %7024 = vmatprep.subr.bf16.mxu1 %v12675_v1  ;;  %v163_v58 = vld [vmem:[#allocation2 + $0x2d8] sm:$0xff] }
 0x246   :  { %6134 = vmatmul.mubr.bf16.gmra.mrb[28].mxu1 %v13943_v45  ;;  %5371 = vmatprep.mubr.bf16.mxu0 %v13945_v21  ;;  %v175_v25 = vld [vmem:[#allocation2 + $0x338] sm:$0xff] }
 0x247   :  { %6143 = vmatprep.mubr.bf16.mxu1 %v13945_v21  ;;  %6253 = vmatpush1.bf16.msra.mxu0 %v12661_v57  ;;  %v167_v57 = vld [vmem:[#allocation2 + $0x2f8] sm:$0xff] }
 0x248   :  { %6254 = vmatprep.subr.bf16.mxu0 %v12672_v20  ;;  %7025 = vmatpush1.bf16.msra.mxu1 %v12673_v2  ;;  %v155_v2 = vld [vmem:[#allocation2 + $0x298] sm:$0xff] }
 0x249   :  { %7026 = vmatprep.subr.bf16.mxu1 %v12678_v61  ;;  %v159_v20 = vld [vmem:[#allocation2 + $0x2b8] sm:$0xff]  ;;  %v13969_v61 = vcombine.high %v163_v58, %v167_v57 }
 0x24a   :  { %v13961_v13 = vcombine.high %v155_v2, %v159_v20  ;;  %v13967_v1 = vcombine.low %v155_v2, %v159_v20  ;;  %v13983_v2 = vcombine.low %v171_v50, %v175_v25 }
 0x24b   :  { %6255 = vmatpush1.bf16.msra.mxu0 %v12670_v38  ;;  %16165 = vst [vmem:[#allocation100_spill] sm:$0xff] %v13969_v61  ;;  %v13975_v38 = vcombine.low %v163_v58, %v167_v57  ;;  %v187_v58 = vld [vmem:[#allocation2 + $0x398] sm:$0xff] }
 0x24c   :  { %7027 = vmatpush1.bf16.msra.mxu1 %v12676_v46  ;;  %6417 = vmatprep.subr.bf16.mxu0 %v12681_v52  ;;  %v13977_v46 = vcombine.high %v171_v50, %v175_v25  ;;  %v179_v52 = vld [vmem:[#allocation2 + $0x358] sm:$0xff]  ;;  %16168 = vst [vmem:[#allocation103_spill] sm:$0xff] %v13983_v2 }
 0x24d   :  { %5372 = vmatmul.mubr.bf16.gmra.mrb[32].mxu0 %v13951_v34  ;;  %7189 = vmatprep.subr.bf16.mxu1 %v12708_v26  ;;  %16166 = vst [vmem:[#allocation101_spill] sm:$0xff] %v13975_v38  ;;  %v183_v26 = vld [vmem:[#allocation2 + $0x378] sm:$0xff] }
 0x24e   :  { %6144 = vmatmul.mubr.bf16.gmra.mrb[32].mxu1 %v13951_v34  ;;  %5381 = vmatprep.mubr.bf16.mxu0 %v13953_v29  ;;  %16167 = vst [vmem:[#allocation102_spill] sm:$0xff] %v13977_v46  ;;  %v13985_v20 = vcombine.high %v179_v52, %v183_v26  ;;  %v191_v57 = vld [vmem:[#allocation2 + $0x3b8] sm:$0xff] }
 0x24f   :  { %6153 = vmatprep.mubr.bf16.mxu1 %v13953_v29  ;;  %v195_v50 = vld [vmem:[#allocation2 + $0x3d8] sm:$0xff] }
 0x250   :  { %v199_v25 = vld [vmem:[#allocation2 + $0x3f8] sm:$0xff] }
 0x255   :  { %5382 = vmatmul.mubr.bf16.gmra.mrb[36].mxu0 %v13959_v39 }
 0x256   :  { %6154 = vmatmul.mubr.bf16.gmra.mrb[36].mxu1 %v13959_v39  ;;  %5391 = vmatprep.mubr.bf16.mxu0 %v13961_v13 }
 0x257   :  { %6163 = vmatprep.mubr.bf16.mxu1 %v13961_v13 }
 0x25d   :  { %5392 = vmatmul.mubr.bf16.gmra.mrb[40].mxu0 %v13967_v1 }
 0x25e   :  { %6164 = vmatmul.mubr.bf16.gmra.mrb[40].mxu1 %v13967_v1  ;;  %5401 = vmatprep.mubr.bf16.mxu0 %v13969_v61 }
 0x25f   :  { %6173 = vmatprep.mubr.bf16.mxu1 %v13969_v61  ;;  %v13993_v61 = vcombine.high %v187_v58, %v191_v57 }
 0x261   :  { %16170 = vst [vmem:[#allocation105_spill] sm:$0xff] %v13993_v61 }
 0x265   :  { %5402 = vmatmul.mubr.bf16.gmra.mrb[44].mxu0 %v13975_v38 }
 0x266   :  { %6174 = vmatmul.mubr.bf16.gmra.mrb[44].mxu1 %v13975_v38  ;;  %5411 = vmatprep.mubr.bf16.mxu0 %v13977_v46  ;;  %v13991_v38 = vcombine.low %v179_v52, %v183_v26  ;;  %v14007_v52 = vcombine.low %v195_v50, %v199_v25  ;;  %v12679_v26 = vld [vmem:[#allocation5 + $0x510] ss:$40 sps:$4 sm:$0xff]  }
 0x267   :  { %6183 = vmatprep.mubr.bf16.mxu1 %v13977_v46  ;;  %v14001_v46 = vcombine.high %v195_v50, %v199_v25  ;;  %v12682_v50 = vld [vmem:[#allocation5 + $0x560] ss:$40 sps:$4 sm:$0xff]   ;;  %v12687_v25 = vld [vmem:[#allocation5 + $0x5b4] ss:$40 sps:$4 sm:$0xff]  }
 0x268   :  { %16169 = vst [vmem:[#allocation104_spill] sm:$0xff] %v13991_v38  ;;  %16173 = vst [vmem:[#allocation108_spill] sm:$0xff] %v14007_v52 }
 0x269   :  { %16172 = vst [vmem:[#allocation107_spill] sm:$0xff] %v14001_v46 }
 0x26d   :  { %5412 = vmatmul.mubr.bf16.gmra.mrb[48].mxu0 %v13983_v2 }
 0x26e   :  { %6184 = vmatmul.mubr.bf16.gmra.mrb[48].mxu1 %v13983_v2  ;;  %5421 = vmatprep.mubr.bf16.mxu0 %v13985_v20  ;;  %v13999_v2 = vcombine.low %v187_v58, %v191_v57  ;;  %v12684_v58 = vld [vmem:[#allocation5 + $0x564] ss:$40 sps:$4 sm:$0xff]   ;;  %v12706_v57 = vld [vmem:[#allocation5 + $0x518] ss:$40 sps:$4 sm:$0xff]  }
 0x26f   :  { %6193 = vmatprep.mubr.bf16.mxu1 %v13985_v20 }
 0x270   :  { %16171 = vst [vmem:[#allocation106_spill] sm:$0xff] %v13999_v2 }
 0x275   :  { %5422 = vmatmul.mubr.bf16.gmra.mrb[52].mxu0 %v13991_v38 }
 0x276   :  { %6194 = vmatmul.mubr.bf16.gmra.mrb[52].mxu1 %v13991_v38  ;;  %5431 = vmatprep.mubr.bf16.mxu0 %v13993_v61  ;;  %v12715_v38 = vld [vmem:[#allocation5 + $0x5b8] ss:$40 sps:$4 sm:$0xff]  }
 0x277   :  { %6203 = vmatprep.mubr.bf16.mxu1 %v13993_v61  ;;  %v12690_v61 = vld [vmem:[#allocation5 + $0x604] ss:$40 sps:$4 sm:$0xff]  }
 0x27d   :  { %5432 = vmatmul.mubr.bf16.gmra.mrb[56].mxu0 %v13999_v2 }
 0x27e   :  { %6204 = vmatmul.mubr.bf16.gmra.mrb[56].mxu1 %v13999_v2  ;;  %5441 = vmatprep.mubr.bf16.mxu0 %v14001_v46  ;;  %v12711_v2 = vld [vmem:[#allocation5 + $0x56c] ss:$40 sps:$4 sm:$0xff]  }
 0x27f   :  { %6213 = vmatprep.mubr.bf16.mxu1 %v14001_v46  ;;  %v12717_v46 = vld [vmem:[#allocation5 + $0x5bc] ss:$40 sps:$4 sm:$0xff]  }
 0x285   :  { %5442 = vmatmul.mubr.bf16.gmra.mrb[60].mxu0 %v14007_v52 }
 0x286   :  { %6214 = vmatmul.mubr.bf16.gmra.mrb[60].mxu1 %v14007_v52  ;;  %6256 = vmatprep.mubr.bf16.mxu0 %v13499_v51  ;;  %v12709_v52 = vld [vmem:[#allocation5 + $0x568] ss:$40 sps:$4 sm:$0xff]  }
 0x287   :  { %7028 = vmatprep.mubr.bf16.mxu1 %v13499_v51  ;;  %v12685_v51 = vld [vmem:[#allocation5 + $0x5b0] ss:$40 sps:$4 sm:$0xff]  }
 0x28d   :  { %6257 = vmatmul.mubr.bf16.vlgmr.msra.gmra.mrb[64].mxu0 %v13503_v7 }
 0x28e   :  { %7029 = vmatmul.mubr.bf16.vlgmr.msra.gmra.mrb[64].mxu1 %v13503_v7  ;;  %6418 = vmatpush1.bf16.msra.mxu0 %v12679_v26  ;;  %v12720_v26 = vld [vmem:[#allocation5 + $0x60c] ss:$40 sps:$4 sm:$0xff]  }
 0x28f   :  { %6266 = vmatprep.mubr.bf16.mxu0 %v13505_v9  ;;  %7038 = vmatprep.mubr.bf16.mxu1 %v13505_v9 }
 0x290   :  { %6419 = vmatprep.subr.bf16.mxu0 %v12684_v58  ;;  %7190 = vmatpush1.bf16.msra.mxu1 %v12706_v57  ;;  %v12688_v58 = vld [vmem:[#allocation5 + $0x600] ss:$40 sps:$4 sm:$0xff]  }
 0x291   :  { %7191 = vmatprep.subr.bf16.mxu1 %v12711_v2  ;;  %v12693_v2 = vld [vmem:[#allocation5 + $0x654] ss:$40 sps:$4 sm:$0xff]   ;;  %v12718_v57 = vld [vmem:[#allocation5 + $0x608] ss:$40 sps:$4 sm:$0xff]  }
 0x292   :  { %6420 = vmatpush1.bf16.msra.mxu0 %v12682_v50  ;;  %v12726_v50 = vld [vmem:[#allocation5 + $0x65c] ss:$40 sps:$4 sm:$0xff]  }
 0x293   :  { %6421 = vmatprep.subr.bf16.mxu0 %v12687_v25  ;;  %v12696_v25 = vld [vmem:[#allocation5 + $0x6a4] ss:$40 sps:$4 sm:$0xff]  }
 0x294   :  { %7192 = vmatpush1.bf16.msra.mxu1 %v12709_v52  ;;  %v12691_v52 = vld [vmem:[#allocation5 + $0x650] ss:$40 sps:$4 sm:$0xff]  }
 0x295   :  { %6267 = vmatmul.mubr.bf16.gmra.mrb[68].mxu0 %v13511_v18  ;;  %7193 = vmatprep.subr.bf16.mxu1 %v12717_v46  ;;  %v12697_v46 = vld [vmem:[#allocation5 + $0x6f0] ss:$40 sps:$4 sm:$0xff]  }
 0x296   :  { %7039 = vmatmul.mubr.bf16.gmra.mrb[68].mxu1 %v13511_v18  ;;  %6276 = vmatprep.mubr.bf16.mxu0 %v13513_v19  ;;  %v12724_v18 = vld [vmem:[#allocation5 + $0x658] ss:$40 sps:$4 sm:$0xff]  }
 0x297   :  { %7048 = vmatprep.mubr.bf16.mxu1 %v13513_v19  ;;  %6422 = vmatpush1.bf16.msra.mxu0 %v12685_v51  ;;  %v12729_v19 = vld [vmem:[#allocation5 + $0x6ac] ss:$40 sps:$4 sm:$0xff]   ;;  %v12694_v51 = vld [vmem:[#allocation5 + $0x6a0] ss:$40 sps:$4 sm:$0xff]  }
 0x298   :  { %6423 = vmatprep.subr.bf16.mxu0 %v12690_v61  ;;  %7194 = vmatpush1.bf16.msra.mxu1 %v12715_v38  ;;  %v12699_v61 = vld [vmem:[#allocation5 + $0x6f4] ss:$40 sps:$4 sm:$0xff]   ;;  %v12727_v38 = vld [vmem:[#allocation5 + $0x6a8] ss:$40 sps:$4 sm:$0xff]  }
 0x299   :  { %7195 = vmatprep.subr.bf16.mxu1 %v12720_v26  ;;  %v12735_v26 = vld [vmem:[#allocation5 + $0x6fc] ss:$40 sps:$4 sm:$0xff]  }
 0x29b   :  { %6424 = vmatpush1.bf16.msra.mxu0 %v12688_v58  ;;  %v12702_v58 = vld [vmem:[#allocation5 + $0x744] ss:$40 sps:$4 sm:$0xff]  }
 0x29c   :  { %6425 = vmatprep.subr.bf16.mxu0 %v12693_v2  ;;  %7196 = vmatpush1.bf16.msra.mxu1 %v12718_v57  ;;  %v12733_v2 = vld [vmem:[#allocation5 + $0x6f8] ss:$40 sps:$4 sm:$0xff]   ;;  %v12738_v57 = vld [vmem:[#allocation5 + $0x74c] ss:$40 sps:$4 sm:$0xff]  }
 0x29d   :  { %6277 = vmatmul.mubr.bf16.gmra.mrb[72].mxu0 %v13519_v30  ;;  %7197 = vmatprep.subr.bf16.mxu1 %v12726_v50  ;;  %v12703_v50 = vld [vmem:[#allocation5 + $0x790] ss:$40 sps:$4 sm:$0xff]  }
 0x29e   :  { %7049 = vmatmul.mubr.bf16.gmra.mrb[72].mxu1 %v13519_v30  ;;  %6286 = vmatprep.mubr.bf16.mxu0 %v13521_v31 }
 0x29f   :  { %7058 = vmatprep.mubr.bf16.mxu1 %v13521_v31  ;;  %6426 = vmatpush1.bf16.msra.mxu0 %v12691_v52  ;;  %v12736_v52 = vld [vmem:[#allocation5 + $0x748] ss:$40 sps:$4 sm:$0xff]  }
 0x2a0   :  { %6427 = vmatprep.subr.bf16.mxu0 %v12696_v25  ;;  %7198 = vmatpush1.bf16.msra.mxu1 %v12724_v18  ;;  %v12700_v18 = vld [vmem:[#allocation5 + $0x740] ss:$40 sps:$4 sm:$0xff]   ;;  %v12744_v25 = vld [vmem:[#allocation5 + $0x79c] ss:$40 sps:$4 sm:$0xff]  }
 0x2a1   :  { %7199 = vmatprep.subr.bf16.mxu1 %v12729_v19  ;;  %v12705_v19 = vld [vmem:[#allocation5 + $0x794] ss:$40 sps:$4 sm:$0xff]  }
 0x2a3   :  { %6428 = vmatpush1.bf16.msra.mxu0 %v12694_v51  ;;  %v12714_v51 = vld [vmem:[#allocation5 + $0x7e4] ss:$40 sps:$4 sm:$0xff]  }
 0x2a4   :  { %6429 = vmatprep.subr.bf16.mxu0 %v12699_v61  ;;  %7200 = vmatpush1.bf16.msra.mxu1 %v12727_v38  ;;  %v12742_v61 = vld [vmem:[#allocation5 + $0x798] ss:$40 sps:$4 sm:$0xff]   ;;  %v12747_v38 = vld [vmem:[#allocation5 + $0x7ec] ss:$40 sps:$4 sm:$0xff]  }
 0x2a5   :  { %6287 = vmatmul.mubr.bf16.gmra.mrb[76].mxu0 %v13527_v42  ;;  %7201 = vmatprep.subr.bf16.mxu1 %v12735_v26  ;;  %v12723_v26 = vld [vmem:[#allocation5 + $0x834] ss:$40 sps:$4 sm:$0xff]  }
 0x2a6   :  { %7059 = vmatmul.mubr.bf16.gmra.mrb[76].mxu1 %v13527_v42  ;;  %6296 = vmatprep.mubr.bf16.mxu0 %v13529_v43 }
 0x2a7   :  { %7068 = vmatprep.mubr.bf16.mxu1 %v13529_v43  ;;  %6430 = vmatpush1.bf16.msra.mxu0 %v12697_v46  ;;  %v12712_v46 = vld [vmem:[#allocation5 + $0x7e0] ss:$40 sps:$4 sm:$0xff]  }
 0x2a8   :  { %6431 = vmatprep.subr.bf16.mxu0 %v12702_v58  ;;  %7202 = vmatpush1.bf16.msra.mxu1 %v12733_v2  ;;  %v12745_v58 = vld [vmem:[#allocation5 + $0x7e8] ss:$40 sps:$4 sm:$0xff]  }
 0x2a9   :  { %7203 = vmatprep.subr.bf16.mxu1 %v12738_v57  ;;  %v12721_v2 = vld [vmem:[#allocation5 + $0x830] ss:$40 sps:$4 sm:$0xff]   ;;  %v12753_v57 = vld [vmem:[#allocation5 + $0x83c] ss:$40 sps:$4 sm:$0xff]  }
 0x2ab   :  { %6432 = vmatpush1.bf16.msra.mxu0 %v12700_v18  ;;  %v12732_v18 = vld [vmem:[#allocation5 + $0x884] ss:$40 sps:$4 sm:$0xff]  }
 0x2ac   :  { %6433 = vmatprep.subr.bf16.mxu0 %v12705_v19  ;;  %7204 = vmatpush1.bf16.msra.mxu1 %v12736_v52  ;;  %v12751_v19 = vld [vmem:[#allocation5 + $0x838] ss:$40 sps:$4 sm:$0xff]   ;;  %v12756_v52 = vld [vmem:[#allocation5 + $0x88c] ss:$40 sps:$4 sm:$0xff]  }
 0x2ad   :  { %6297 = vmatmul.mubr.bf16.gmra.mrb[80].mxu0 %v13535_v55  ;;  %7205 = vmatprep.subr.bf16.mxu1 %v12744_v25  ;;  %v12741_v25 = vld [vmem:[#allocation5 + $0x8d4] ss:$40 sps:$4 sm:$0xff]  }
 0x2ae   :  { %7069 = vmatmul.mubr.bf16.gmra.mrb[80].mxu1 %v13535_v55  ;;  %6306 = vmatprep.mubr.bf16.mxu0 %v13537_v56 }
 0x2af   :  { %7078 = vmatprep.mubr.bf16.mxu1 %v13537_v56  ;;  %6434 = vmatpush1.bf16.msra.mxu0 %v12703_v50  ;;  %v12730_v50 = vld [vmem:[#allocation5 + $0x880] ss:$40 sps:$4 sm:$0xff]  }
 0x2b0   :  { %6435 = vmatprep.subr.bf16.mxu0 %v12714_v51  ;;  %7206 = vmatpush1.bf16.msra.mxu1 %v12742_v61  ;;  %v12754_v51 = vld [vmem:[#allocation5 + $0x888] ss:$40 sps:$4 sm:$0xff]  }
 0x2b1   :  { %7207 = vmatprep.subr.bf16.mxu1 %v12747_v38  ;;  %v12739_v61 = vld [vmem:[#allocation5 + $0x8d0] ss:$40 sps:$4 sm:$0xff]   ;;  %v12762_v38 = vld [vmem:[#allocation5 + $0x8dc] ss:$40 sps:$4 sm:$0xff]  }
 0x2b3   :  { %6436 = vmatpush1.bf16.msra.mxu0 %v12712_v46  ;;  %v12750_v46 = vld [vmem:[#allocation5 + $0x924] ss:$40 sps:$4 sm:$0xff]  }
 0x2b4   :  { %6437 = vmatprep.subr.bf16.mxu0 %v12723_v26  ;;  %7208 = vmatpush1.bf16.msra.mxu1 %v12745_v58  ;;  %v12760_v26 = vld [vmem:[#allocation5 + $0x8d8] ss:$40 sps:$4 sm:$0xff]   ;;  %v12765_v58 = vld [vmem:[#allocation5 + $0x92c] ss:$40 sps:$4 sm:$0xff]  }
 0x2b5   :  { %6307 = vmatmul.mubr.bf16.gmra.mrb[84].mxu0 %v13543_v3  ;;  %7209 = vmatprep.subr.bf16.mxu1 %v12753_v57  ;;  %v12759_v57 = vld [vmem:[#allocation5 + $0x974] ss:$40 sps:$4 sm:$0xff]  }
 0x2b6   :  { %7079 = vmatmul.mubr.bf16.gmra.mrb[84].mxu1 %v13543_v3  ;;  %6316 = vmatprep.mubr.bf16.mxu0 %v13545_v4 }
 0x2b7   :  { %7088 = vmatprep.mubr.bf16.mxu1 %v13545_v4  ;;  %6438 = vmatpush1.bf16.msra.mxu0 %v12721_v2  ;;  %v12748_v2 = vld [vmem:[#allocation5 + $0x920] ss:$40 sps:$4 sm:$0xff]  }
 0x2b8   :  { %6439 = vmatprep.subr.bf16.mxu0 %v12732_v18  ;;  %7210 = vmatpush1.bf16.msra.mxu1 %v12751_v19  ;;  %v12763_v18 = vld [vmem:[#allocation5 + $0x928] ss:$40 sps:$4 sm:$0xff]  }
 0x2b9   :  { %7211 = vmatprep.subr.bf16.mxu1 %v12756_v52  ;;  %v12757_v19 = vld [vmem:[#allocation5 + $0x970] ss:$40 sps:$4 sm:$0xff]   ;;  %v12771_v52 = vld [vmem:[#allocation5 + $0x97c] ss:$40 sps:$4 sm:$0xff]  }
 0x2bb   :  { %6440 = vmatpush1.bf16.msra.mxu0 %v12730_v50  ;;  %v12768_v50 = vld [vmem:[#allocation5 + $0x9c4] ss:$40 sps:$4 sm:$0xff]  }
 0x2bc   :  { %6441 = vmatprep.subr.bf16.mxu0 %v12741_v25  ;;  %7212 = vmatpush1.bf16.msra.mxu1 %v12754_v51  ;;  %v12769_v25 = vld [vmem:[#allocation5 + $0x978] ss:$40 sps:$4 sm:$0xff]   ;;  %v12774_v51 = vld [vmem:[#allocation5 + $0x9cc] ss:$40 sps:$4 sm:$0xff]  }
 0x2bd   :  { %6317 = vmatmul.mubr.bf16.gmra.mrb[88].mxu0 %v13551_v17  ;;  %7213 = vmatprep.subr.bf16.mxu1 %v12762_v38  ;;  %v12772_v38 = vld [vmem:[#allocation5 + $0x9c8] ss:$40 sps:$4 sm:$0xff]  }
 0x2be   :  { %7089 = vmatmul.mubr.bf16.gmra.mrb[88].mxu1 %v13551_v17  ;;  %6326 = vmatprep.mubr.bf16.mxu0 %v13553_v22 }
 0x2bf   :  { %7098 = vmatprep.mubr.bf16.mxu1 %v13553_v22  ;;  %6442 = vmatpush1.bf16.msra.mxu0 %v12739_v61  ;;  %v12766_v61 = vld [vmem:[#allocation5 + $0x9c0] ss:$40 sps:$4 sm:$0xff]  }
 0x2c0   :  { %6443 = vmatprep.subr.bf16.mxu0 %v12750_v46  ;;  %7214 = vmatpush1.bf16.msra.mxu1 %v12760_v26  ;;  %v12777_v46 = vld [vmem:[#allocation5 + $0xa14] ss:$40 sps:$4 sm:$0xff]  }
 0x2c1   :  { %7215 = vmatprep.subr.bf16.mxu1 %v12765_v58  ;;  %v12804_v26 = vld [vmem:[#allocation5 + $0xa1c] ss:$40 sps:$4 sm:$0xff]  }
 0x2c3   :  { %6444 = vmatpush1.bf16.msra.mxu0 %v12748_v2 }
 0x2c4   :  { %6445 = vmatprep.subr.bf16.mxu0 %v12759_v57  ;;  %7216 = vmatpush1.bf16.msra.mxu1 %v12763_v18 }
 0x2c5   :  { %6327 = vmatmul.mubr.bf16.gmra.mrb[92].mxu0 %v13559_v33  ;;  %7217 = vmatprep.subr.bf16.mxu1 %v12771_v52 }
 0x2c6   :  { %7099 = vmatmul.mubr.bf16.gmra.mrb[92].mxu1 %v13559_v33  ;;  %6336 = vmatprep.mubr.bf16.mxu0 %v13561_v36 }
 0x2c7   :  { %7108 = vmatprep.mubr.bf16.mxu1 %v13561_v36  ;;  %6446 = vmatpush1.bf16.msra.mxu0 %v12757_v19 }
 0x2c8   :  { %6447 = vmatprep.subr.bf16.mxu0 %v12768_v50  ;;  %7218 = vmatpush1.bf16.msra.mxu1 %v12769_v25 }
 0x2c9   :  { %7219 = vmatprep.subr.bf16.mxu1 %v12774_v51 }
 0x2cb   :  { %6448 = vmatpush1.bf16.msra.mxu0 %v12766_v61 }
 0x2cc   :  { %7220 = vmatpush1.bf16.msra.mxu1 %v12772_v38  ;;  %6610 = vmatprep.subr.bf16.mxu0 %v12777_v46 }
 0x2cd   :  { %6337 = vmatmul.mubr.bf16.gmra.mrb[96].mxu0 %v13567_v47  ;;  %7382 = vmatprep.subr.bf16.mxu1 %v12804_v26 }
 0x2ce   :  { %7109 = vmatmul.mubr.bf16.gmra.mrb[96].mxu1 %v13567_v47  ;;  %6346 = vmatprep.mubr.bf16.mxu0 %v13569_v48 }
 0x2cf   :  { %7118 = vmatprep.mubr.bf16.mxu1 %v13569_v48 }
 0x2d5   :  { %6347 = vmatmul.mubr.bf16.gmra.mrb[100].mxu0 %v13575_v53 }
 0x2d6   :  { %7119 = vmatmul.mubr.bf16.gmra.mrb[100].mxu1 %v13575_v53  ;;  %6356 = vmatprep.mubr.bf16.mxu0 %v13577_v54 }
 0x2d7   :  { %7128 = vmatprep.mubr.bf16.mxu1 %v13577_v54 }
 0x2dd   :  { %6357 = vmatmul.mubr.bf16.gmra.mrb[104].mxu0 %v13583_v59 }
 0x2de   :  { %7129 = vmatmul.mubr.bf16.gmra.mrb[104].mxu1 %v13583_v59  ;;  %6366 = vmatprep.mubr.bf16.mxu0 %v13585_v60 }
 0x2df   :  { %7138 = vmatprep.mubr.bf16.mxu1 %v13585_v60 }
 0x2e0   :  { %v14057_v58 = vpop.f32.mrb[0].mxu0 }
 0x2e1   :  { %v14059_v2 = vpop.f32.mrb[0].mxu1  ;;  %v14061_v57 = vpop.f32.mrb[1].mxu0 }
 0x2e2   :  { %v14063_v18 = vpop.f32.mrb[1].mxu1  ;;  %v14065_v19 = vpop.f32.mrb[2].mxu0 }
 0x2e3   :  { %16174 = vst [vmem:[#allocation109_spill] sm:$0xff] %v14063_v18  ;;  %v14067_v52 = vpop.f32.mrb[2].mxu1  ;;  %v14069_v50 = vpop.f32.mrb[3].mxu0 }
 0x2e4   :  { %16175 = vst [vmem:[#allocation110_spill] sm:$0xff] %v14069_v50  ;;  %v14071_v25 = vpop.f32.mrb[3].mxu1 }
 0x2e5   :  { %16176 = vst [vmem:[#allocation111_spill] sm:$0xff] %v14071_v25  ;;  %6367 = vmatmul.mubr.bf16.gmra.mrb[108].mxu0 %v13591_v63 }
 0x2e6   :  { %7139 = vmatmul.mubr.bf16.gmra.mrb[108].mxu1 %v13591_v63  ;;  %6376 = vmatprep.mubr.bf16.mxu0 %v13593_v0 }
 0x2e7   :  { %7148 = vmatprep.mubr.bf16.mxu1 %v13593_v0 }
 0x2e8   :  { %v14077_v51 = vpop.f32.mrb[4].mxu0 }
 0x2e9   :  { %16177 = vst [vmem:[#allocation112_spill] sm:$0xff] %v14077_v51  ;;  %v14079_v61 = vpop.f32.mrb[4].mxu1  ;;  %v14081_v38 = vpop.f32.mrb[5].mxu0 }
 0x2ea   :  { %16178 = vst [vmem:[#allocation113_spill] sm:$0xff] %v14079_v61  ;;  %16179 = vst [vmem:[#allocation114_spill] sm:$0xff] %v14081_v38  ;;  %v14083_v46 = vpop.f32.mrb[5].mxu1  ;;  %v14085_v26 = vpop.f32.mrb[6].mxu0 }
 0x2eb   :  { %16180 = vst [vmem:[#allocation115_spill] sm:$0xff] %v14083_v46  ;;  %16181 = vst [vmem:[#allocation116_spill] sm:$0xff] %v14085_v26  ;;  %v14087_v18 = vpop.f32.mrb[6].mxu1  ;;  %v14089_v25 = vpop.f32.mrb[7].mxu0 }
 0x2ec   :  { %16182 = vst [vmem:[#allocation117_spill] sm:$0xff] %v14087_v18  ;;  %16183 = vst [vmem:[#allocation118_spill] sm:$0xff] %v14089_v25  ;;  %v14091_v50 = vpop.f32.mrb[7].mxu1 }
 0x2ed   :  { %16184 = vst [vmem:[#allocation119_spill] sm:$0xff] %v14091_v50  ;;  %6377 = vmatmul.mubr.bf16.gmra.mrb[112].mxu0 %v13599_v5 }
 0x2ee   :  { %7149 = vmatmul.mubr.bf16.gmra.mrb[112].mxu1 %v13599_v5  ;;  %6386 = vmatprep.mubr.bf16.mxu0 %v13601_v6 }
 0x2ef   :  { %7158 = vmatprep.mubr.bf16.mxu1 %v13601_v6 }
 0x2f0   :  { %v14097_v61 = vpop.f32.mrb[8].mxu0 }
 0x2f1   :  { %16185 = vst [vmem:[#allocation120_spill] sm:$0xff] %v14097_v61  ;;  %v14099_v38 = vpop.f32.mrb[8].mxu1  ;;  %v14101_v46 = vpop.f32.mrb[9].mxu0 }
 0x2f2   :  { %16186 = vst [vmem:[#allocation121_spill] sm:$0xff] %v14099_v38  ;;  %16187 = vst [vmem:[#allocation122_spill] sm:$0xff] %v14101_v46  ;;  %v14103_v26 = vpop.f32.mrb[9].mxu1  ;;  %v14105_v18 = vpop.f32.mrb[10].mxu0 }
 0x2f3   :  { %16188 = vst [vmem:[#allocation123_spill] sm:$0xff] %v14103_v26  ;;  %16189 = vst [vmem:[#allocation124_spill] sm:$0xff] %v14105_v18  ;;  %v14107_v25 = vpop.f32.mrb[10].mxu1  ;;  %v14109_v50 = vpop.f32.mrb[11].mxu0 }
 0x2f4   :  { %16190 = vst [vmem:[#allocation125_spill] sm:$0xff] %v14107_v25  ;;  %16191 = vst [vmem:[#allocation126_spill] sm:$0xff] %v14109_v50  ;;  %v14111_v51 = vpop.f32.mrb[11].mxu1 }
 0x2f5   :  { %16192 = vst [vmem:[#allocation127_spill] sm:$0xff] %v14111_v51  ;;  %6387 = vmatmul.mubr.bf16.gmra.mrb[116].mxu0 %v13607_v11 }
 0x2f6   :  { %7159 = vmatmul.mubr.bf16.gmra.mrb[116].mxu1 %v13607_v11  ;;  %6396 = vmatprep.mubr.bf16.mxu0 %v13609_v12 }
 0x2f7   :  { %7168 = vmatprep.mubr.bf16.mxu1 %v13609_v12 }
 0x2f8   :  { %v14117_v38 = vpop.f32.mrb[12].mxu0 }
 0x2f9   :  { %16193 = vst [vmem:[#allocation128_spill] sm:$0xff] %v14117_v38  ;;  %v14119_v46 = vpop.f32.mrb[12].mxu1  ;;  %v14121_v26 = vpop.f32.mrb[13].mxu0 }
 0x2fa   :  { %16194 = vst [vmem:[#allocation129_spill] sm:$0xff] %v14119_v46  ;;  %16195 = vst [vmem:[#allocation130_spill] sm:$0xff] %v14121_v26  ;;  %v14123_v18 = vpop.f32.mrb[13].mxu1  ;;  %v14125_v25 = vpop.f32.mrb[14].mxu0 }
 0x2fb   :  { %16196 = vst [vmem:[#allocation131_spill] sm:$0xff] %v14123_v18  ;;  %16197 = vst [vmem:[#allocation132_spill] sm:$0xff] %v14125_v25  ;;  %v14127_v50 = vpop.f32.mrb[14].mxu1  ;;  %v14129_v51 = vpop.f32.mrb[15].mxu0 }
 0x2fc   :  { %16198 = vst [vmem:[#allocation133_spill] sm:$0xff] %v14127_v50  ;;  %16199 = vst [vmem:[#allocation134_spill] sm:$0xff] %v14129_v51  ;;  %v14131_v61 = vpop.f32.mrb[15].mxu1 }
 0x2fd   :  { %16200 = vst [vmem:[#allocation135_spill] sm:$0xff] %v14131_v61  ;;  %6397 = vmatmul.mubr.bf16.gmra.mrb[120].mxu0 %v13615_v15 }
 0x2fe   :  { %7169 = vmatmul.mubr.bf16.gmra.mrb[120].mxu1 %v13615_v15  ;;  %6406 = vmatprep.mubr.bf16.mxu0 %v13617_v16  ;;  %v12802_v15 = vld [vmem:[#allocation5 + $0xa18] ss:$40 sps:$4 sm:$0xff]  }
 0x2ff   :  { %7178 = vmatprep.mubr.bf16.mxu1 %v13617_v16  ;;  %v12780_v16 = vld [vmem:[#allocation5 + $0xa64] ss:$40 sps:$4 sm:$0xff]  }
 0x300   :  { %v14137_v46 = vpop.f32.mrb[16].mxu0 }
 0x301   :  { %16201 = vst [vmem:[#allocation136_spill] sm:$0xff] %v14137_v46  ;;  %v14139_v26 = vpop.f32.mrb[16].mxu1  ;;  %v14141_v18 = vpop.f32.mrb[17].mxu0 }
 0x302   :  { %16202 = vst [vmem:[#allocation137_spill] sm:$0xff] %v14139_v26  ;;  %16203 = vst [vmem:[#allocation138_spill] sm:$0xff] %v14141_v18  ;;  %v14143_v25 = vpop.f32.mrb[17].mxu1  ;;  %v14145_v50 = vpop.f32.mrb[18].mxu0 }
 0x303   :  { %16204 = vst [vmem:[#allocation139_spill] sm:$0xff] %v14143_v25  ;;  %16205 = vst [vmem:[#allocation140_spill] sm:$0xff] %v14145_v50  ;;  %v14147_v51 = vpop.f32.mrb[18].mxu1  ;;  %v14149_v61 = vpop.f32.mrb[19].mxu0 }
 0x304   :  { %16206 = vst [vmem:[#allocation141_spill] sm:$0xff] %v14147_v51  ;;  %16207 = vst [vmem:[#allocation142_spill] sm:$0xff] %v14149_v61  ;;  %v14151_v38 = vpop.f32.mrb[19].mxu1 }
 0x305   :  { %16208 = vst [vmem:[#allocation143_spill] sm:$0xff] %v14151_v38  ;;  %6407 = vmatmul.mubr.bf16.gmra.mrb[124].mxu0 %v13623_v23  ;;  %v12775_v38 = vld [vmem:[#allocation5 + $0xa10] ss:$40 sps:$4 sm:$0xff]  }
 0x306   :  { %7179 = vmatmul.mubr.bf16.gmra.mrb[124].mxu1 %v13623_v23  ;;  %6449 = vmatprep.mubr.bf16.mxu0 %v13625_v24 }
 0x307   :  { %7221 = vmatprep.mubr.bf16.mxu1 %v13625_v24 }
 0x308   :  { %v14157_v26 = vpop.f32.mrb[20].mxu0 }
 0x309   :  { %16209 = vst [vmem:[#allocation144_spill] sm:$0xff] %v14157_v26  ;;  %v14159_v18 = vpop.f32.mrb[20].mxu1  ;;  %v14161_v25 = vpop.f32.mrb[21].mxu0 }
 0x30a   :  { %16210 = vst [vmem:[#allocation145_spill] sm:$0xff] %v14159_v18  ;;  %16211 = vst [vmem:[#allocation146_spill] sm:$0xff] %v14161_v25  ;;  %v14163_v50 = vpop.f32.mrb[21].mxu1  ;;  %v14165_v51 = vpop.f32.mrb[22].mxu0  ;;  %v12807_v18 = vld [vmem:[#allocation5 + $0xa6c] ss:$40 sps:$4 sm:$0xff]  }
 0x30b   :  { %16212 = vst [vmem:[#allocation147_spill] sm:$0xff] %v14163_v50  ;;  %16213 = vst [vmem:[#allocation148_spill] sm:$0xff] %v14165_v51  ;;  %v14167_v61 = vpop.f32.mrb[22].mxu1  ;;  %v14169_v46 = vpop.f32.mrb[23].mxu0  ;;  %v12778_v50 = vld [vmem:[#allocation5 + $0xa60] ss:$40 sps:$4 sm:$0xff]  }
 0x30c   :  { %16214 = vst [vmem:[#allocation149_spill] sm:$0xff] %v14167_v61  ;;  %16215 = vst [vmem:[#allocation150_spill] sm:$0xff] %v14169_v46  ;;  %v14171_v23 = vpop.f32.mrb[23].mxu1  ;;  %v12783_v61 = vld [vmem:[#allocation5 + $0xab4] ss:$40 sps:$4 sm:$0xff]  }
 0x30d   :  { %16216 = vst [vmem:[#allocation151_spill] sm:$0xff] %v14171_v23  ;;  %6450 = vmatmul.mubr.bf16.vlgmr.msra.gmra.mrb[64].mxu0 %v13631_v28  ;;  %v12805_v23 = vld [vmem:[#allocation5 + $0xa68] ss:$40 sps:$4 sm:$0xff]  }
 0x30e   :  { %7222 = vmatmul.mubr.bf16.vlgmr.msra.gmra.mrb[64].mxu1 %v13631_v28  ;;  %6611 = vmatpush1.bf16.msra.mxu0 %v12775_v38 }
 0x30f   :  { %6459 = vmatprep.mubr.bf16.mxu0 %v13633_v32  ;;  %7231 = vmatprep.mubr.bf16.mxu1 %v13633_v32  ;;  %v12781_v32 = vld [vmem:[#allocation5 + $0xab0] ss:$40 sps:$4 sm:$0xff]  }
 0x310   :  { %6612 = vmatprep.subr.bf16.mxu0 %v12780_v16  ;;  %v14177_v51 = vpop.f32.mrb[24].mxu0  ;;  %7383 = vmatpush1.bf16.msra.mxu1 %v12802_v15  ;;  %v12811_v15 = vld [vmem:[#allocation5 + $0xab8] ss:$40 sps:$4 sm:$0xff]  }
 0x311   :  { %16217 = vst [vmem:[#allocation152_spill] sm:$0xff] %v14177_v51  ;;  %v14179_v46 = vpop.f32.mrb[24].mxu1  ;;  %v14181_v25 = vpop.f32.mrb[25].mxu0  ;;  %7384 = vmatprep.subr.bf16.mxu1 %v12807_v18  ;;  %v12813_v51 = vld [vmem:[#allocation5 + $0xabc] ss:$40 sps:$4 sm:$0xff]  }
 0x312   :  { %16218 = vst [vmem:[#allocation153_spill] sm:$0xff] %v14179_v46  ;;  %16219 = vst [vmem:[#allocation154_spill] sm:$0xff] %v14181_v25  ;;  %v14183_v26 = vpop.f32.mrb[25].mxu1  ;;  %v14185_v28 = vpop.f32.mrb[26].mxu0  ;;  %6613 = vmatpush1.bf16.msra.mxu0 %v12778_v50  ;;  %v12786_v46 = vld [vmem:[#allocation5 + $0xb04] ss:$40 sps:$4 sm:$0xff]  }
 0x313   :  { %16220 = vst [vmem:[#allocation155_spill] sm:$0xff] %v14183_v26  ;;  %16221 = vst [vmem:[#allocation156_spill] sm:$0xff] %v14185_v28  ;;  %v14187_v38 = vpop.f32.mrb[26].mxu1  ;;  %v14189_v24 = vpop.f32.mrb[27].mxu0  ;;  %6614 = vmatprep.subr.bf16.mxu0 %v12783_v61  ;;  %v12816_v18 = vld [vmem:[#allocation5 + $0xb0c] ss:$40 sps:$4 sm:$0xff]  }
 0x314   :  { %16222 = vst [vmem:[#allocation157_spill] sm:$0xff] %v14187_v38  ;;  %16223 = vst [vmem:[#allocation158_spill] sm:$0xff] %v14189_v24  ;;  %v14191_v16 = vpop.f32.mrb[27].mxu1  ;;  %7385 = vmatpush1.bf16.msra.mxu1 %v12805_v23  ;;  %v12784_v50 = vld [vmem:[#allocation5 + $0xb00] ss:$40 sps:$4 sm:$0xff]  }
 0x315   :  { %16224 = vst [vmem:[#allocation159_spill] sm:$0xff] %v14191_v16  ;;  %6460 = vmatmul.mubr.bf16.gmra.mrb[68].mxu0 %v13639_v44  ;;  %7386 = vmatprep.subr.bf16.mxu1 %v12813_v51  ;;  %v12789_v61 = vld [vmem:[#allocation5 + $0xb54] ss:$40 sps:$4 sm:$0xff]   ;;  %v12814_v23 = vld [vmem:[#allocation5 + $0xb08] ss:$40 sps:$4 sm:$0xff]  }
 0x316   :  { %7232 = vmatmul.mubr.bf16.gmra.mrb[68].mxu1 %v13639_v44  ;;  %6469 = vmatprep.mubr.bf16.mxu0 %v13641_v49  ;;  %v13074_v25 = vld [vmem:[#allocation5 + $0x614] ss:$40 sps:$4 sm:$0xff]  }
 0x317   :  { %7241 = vmatprep.mubr.bf16.mxu1 %v13641_v49  ;;  %6615 = vmatpush1.bf16.msra.mxu0 %v12781_v32  ;;  %v13097_v49 = vld [vmem:[#allocation7 + $0x50] sm:$0xff]  }
 0x318   :  { %v14197_v26 = vpop.f32.mrb[28].mxu0  ;;  %6616 = vmatprep.subr.bf16.mxu0 %v12786_v46  ;;  %7387 = vmatpush1.bf16.msra.mxu1 %v12811_v15  ;;  %v12792_v46 = vld [vmem:[#allocation5 + $0xba4] ss:$40 sps:$4 sm:$0xff]   ;;  %v12820_v15 = vld [vmem:[#allocation5 + $0xb58] ss:$40 sps:$4 sm:$0xff]  }
 0x319   :  { %16225 = vst [vmem:[#allocation160_spill] sm:$0xff] %v14197_v26  ;;  %v14199_v16 = vpop.f32.mrb[28].mxu1  ;;  %v14201_v24 = vpop.f32.mrb[29].mxu0  ;;  %7388 = vmatprep.subr.bf16.mxu1 %v12816_v18  ;;  %v12787_v26 = vld [vmem:[#allocation5 + $0xb50] ss:$40 sps:$4 sm:$0xff]  }
 0x31a   :  { %16226 = vst [vmem:[#allocation161_spill] sm:$0xff] %v14199_v16  ;;  %16227 = vst [vmem:[#allocation162_spill] sm:$0xff] %v14201_v24  ;;  %v14203_v38 = vpop.f32.mrb[29].mxu1  ;;  %v14205_v44 = vpop.f32.mrb[30].mxu0  ;;  %v12822_v16 = vld [vmem:[#allocation5 + $0xb5c] ss:$40 sps:$4 sm:$0xff]  }
 0x31b   :  { %16228 = vst [vmem:[#allocation163_spill] sm:$0xff] %v14203_v38  ;;  %16229 = vst [vmem:[#allocation164_spill] sm:$0xff] %v14205_v44  ;;  %v14207_v28 = vpop.f32.mrb[30].mxu1  ;;  %v14209_v32 = vpop.f32.mrb[31].mxu0  ;;  %6617 = vmatpush1.bf16.msra.mxu0 %v12784_v50  ;;  %v12825_v18 = vld [vmem:[#allocation5 + $0xbac] ss:$40 sps:$4 sm:$0xff]  }
 0x31c   :  { %16230 = vst [vmem:[#allocation165_spill] sm:$0xff] %v14207_v28  ;;  %16231 = vst [vmem:[#allocation166_spill] sm:$0xff] %v14209_v32  ;;  %v14211_v51 = vpop.f32.mrb[31].mxu1  ;;  %6618 = vmatprep.subr.bf16.mxu0 %v12789_v61  ;;  %7389 = vmatpush1.bf16.msra.mxu1 %v12814_v23  ;;  %v12790_v38 = vld [vmem:[#allocation5 + $0xba0] ss:$40 sps:$4 sm:$0xff]  }
 0x31d   :  { %16232 = vst [vmem:[#allocation167_spill] sm:$0xff] %v14211_v51  ;;  %6470 = vmatmul.mubr.bf16.gmra.mrb[72].mxu0 %v13647_v8  ;;  %7390 = vmatprep.subr.bf16.mxu1 %v12822_v16  ;;  %v12795_v61 = vld [vmem:[#allocation5 + $0xbf4] ss:$40 sps:$4 sm:$0xff]   ;;  %v12823_v23 = vld [vmem:[#allocation5 + $0xba8] ss:$40 sps:$4 sm:$0xff]  }
 0x31e   :  { %7242 = vmatmul.mubr.bf16.gmra.mrb[72].mxu1 %v13647_v8  ;;  %6479 = vmatprep.mubr.bf16.mxu0 %v13649_v14  ;;  %v13071_v24 = vld [vmem:[#allocation5 + $0x5c4] ss:$40 sps:$4 sm:$0xff]  }
 0x31f   :  { %7251 = vmatprep.mubr.bf16.mxu1 %v13649_v14  ;;  %6619 = vmatpush1.bf16.msra.mxu0 %v12787_v26  ;;  %v13066_v14 = vld [vmem:[#allocation5 + $0x570] ss:$40 sps:$4 sm:$0xff]  }
 0x320   :  { %v14217_v51 = vpop.f32.mrb[32].mxu0  ;;  %6620 = vmatprep.subr.bf16.mxu0 %v12792_v46  ;;  %7391 = vmatpush1.bf16.msra.mxu1 %v12820_v15  ;;  %v12798_v46 = vld [vmem:[#allocation5 + $0xc44] ss:$40 sps:$4 sm:$0xff]   ;;  %v12829_v15 = vld [vmem:[#allocation5 + $0xbf8] ss:$40 sps:$4 sm:$0xff]  }
 0x321   :  { %16233 = vst [vmem:[#allocation168_spill] sm:$0xff] %v14217_v51  ;;  %v14219_v50 = vpop.f32.mrb[32].mxu1  ;;  %v14221_v32 = vpop.f32.mrb[33].mxu0  ;;  %7392 = vmatprep.subr.bf16.mxu1 %v12825_v18  ;;  %v12793_v51 = vld [vmem:[#allocation5 + $0xbf0] ss:$40 sps:$4 sm:$0xff]  }
 0x322   :  { %16234 = vst [vmem:[#allocation169_spill] sm:$0xff] %v14219_v50  ;;  %16235 = vst [vmem:[#allocation170_spill] sm:$0xff] %v14221_v32  ;;  %v14223_v28 = vpop.f32.mrb[33].mxu1  ;;  %v14225_v8 = vpop.f32.mrb[34].mxu0  ;;  %v12831_v50 = vld [vmem:[#allocation5 + $0xbfc] ss:$40 sps:$4 sm:$0xff]  }
 0x323   :  { %16236 = vst [vmem:[#allocation171_spill] sm:$0xff] %v14223_v28  ;;  %16237 = vst [vmem:[#allocation172_spill] sm:$0xff] %v14225_v8  ;;  %v14227_v44 = vpop.f32.mrb[34].mxu1  ;;  %v14229_v26 = vpop.f32.mrb[35].mxu0  ;;  %6621 = vmatpush1.bf16.msra.mxu0 %v12790_v38  ;;  %v12834_v18 = vld [vmem:[#allocation5 + $0xc4c] ss:$40 sps:$4 sm:$0xff]  }
 0x324   :  { %16238 = vst [vmem:[#allocation173_spill] sm:$0xff] %v14227_v44  ;;  %16239 = vst [vmem:[#allocation174_spill] sm:$0xff] %v14229_v26  ;;  %v14231_v16 = vpop.f32.mrb[35].mxu1  ;;  %6622 = vmatprep.subr.bf16.mxu0 %v12795_v61  ;;  %7393 = vmatpush1.bf16.msra.mxu1 %v12823_v23  ;;  %v12796_v28 = vld [vmem:[#allocation5 + $0xc40] ss:$40 sps:$4 sm:$0xff]  }
 0x325   :  { %16240 = vst [vmem:[#allocation175_spill] sm:$0xff] %v14231_v16  ;;  %6480 = vmatmul.mubr.bf16.gmra.mrb[76].mxu0 %v13655_v37  ;;  %7394 = vmatprep.subr.bf16.mxu1 %v12831_v50  ;;  %v12801_v61 = vld [vmem:[#allocation5 + $0xc94] ss:$40 sps:$4 sm:$0xff]   ;;  %v12832_v23 = vld [vmem:[#allocation5 + $0xc48] ss:$40 sps:$4 sm:$0xff]  }
 0x326   :  { %7252 = vmatmul.mubr.bf16.gmra.mrb[76].mxu1 %v13655_v37  ;;  %6489 = vmatprep.mubr.bf16.mxu0 %v13657_v40  ;;  %v13092_v32 = vld [vmem:[#allocation7 + $0x48] sm:$0xff]  }
 0x327   :  { %7261 = vmatprep.mubr.bf16.mxu1 %v13657_v40  ;;  %6623 = vmatpush1.bf16.msra.mxu0 %v12793_v51  ;;  %v13062_v40 = vld [vmem:[#allocation5 + $0x13d4] ss:$40 sps:$4 sm:$0xff]  }
 0x328   :  { %v14237_v16 = vpop.f32.mrb[36].mxu0  ;;  %6624 = vmatprep.subr.bf16.mxu0 %v12798_v46  ;;  %7395 = vmatpush1.bf16.msra.mxu1 %v12829_v15  ;;  %v12810_v46 = vld [vmem:[#allocation5 + $0xce4] ss:$40 sps:$4 sm:$0xff]   ;;  %v12838_v15 = vld [vmem:[#allocation5 + $0xc98] ss:$40 sps:$4 sm:$0xff]  }
 0x329   :  { %16241 = vst [vmem:[#allocation176_spill] sm:$0xff] %v14237_v16  ;;  %v14239_v38 = vpop.f32.mrb[36].mxu1  ;;  %v14241_v26 = vpop.f32.mrb[37].mxu0  ;;  %7396 = vmatprep.subr.bf16.mxu1 %v12834_v18  ;;  %v12799_v16 = vld [vmem:[#allocation5 + $0xc90] ss:$40 sps:$4 sm:$0xff]  }
 0x32a   :  { %16242 = vst [vmem:[#allocation177_spill] sm:$0xff] %v14239_v38  ;;  %16243 = vst [vmem:[#allocation178_spill] sm:$0xff] %v14241_v26  ;;  %v14243_v44 = vpop.f32.mrb[37].mxu1  ;;  %v14245_v37 = vpop.f32.mrb[38].mxu0  ;;  %v12840_v38 = vld [vmem:[#allocation5 + $0xc9c] ss:$40 sps:$4 sm:$0xff]  }
 0x32b   :  { %16244 = vst [vmem:[#allocation179_spill] sm:$0xff] %v14243_v44  ;;  %16245 = vst [vmem:[#allocation180_spill] sm:$0xff] %v14245_v37  ;;  %v14247_v8 = vpop.f32.mrb[38].mxu1  ;;  %v14249_v51 = vpop.f32.mrb[39].mxu0  ;;  %6625 = vmatpush1.bf16.msra.mxu0 %v12796_v28  ;;  %v12843_v18 = vld [vmem:[#allocation5 + $0xcec] ss:$40 sps:$4 sm:$0xff]  }
 0x32c   :  { %16246 = vst [vmem:[#allocation181_spill] sm:$0xff] %v14247_v8  ;;  %16247 = vst [vmem:[#allocation182_spill] sm:$0xff] %v14249_v51  ;;  %v14251_v50 = vpop.f32.mrb[39].mxu1  ;;  %6626 = vmatprep.subr.bf16.mxu0 %v12801_v61  ;;  %7397 = vmatpush1.bf16.msra.mxu1 %v12832_v23  ;;  %v12808_v44 = vld [vmem:[#allocation5 + $0xce0] ss:$40 sps:$4 sm:$0xff]  }
 0x32d   :  { %16248 = vst [vmem:[#allocation183_spill] sm:$0xff] %v14251_v50  ;;  %6490 = vmatmul.mubr.bf16.gmra.mrb[80].mxu0 %v13663_v62  ;;  %7398 = vmatprep.subr.bf16.mxu1 %v12840_v38  ;;  %v12819_v61 = vld [vmem:[#allocation5 + $0xd34] ss:$40 sps:$4 sm:$0xff]   ;;  %v12841_v23 = vld [vmem:[#allocation5 + $0xce8] ss:$40 sps:$4 sm:$0xff]  }
 0x32e   :  { %7262 = vmatmul.mubr.bf16.gmra.mrb[80].mxu1 %v13663_v62  ;;  %6499 = vmatprep.mubr.bf16.mxu0 %v13665_v10  ;;  %v13053_v26 = vld [vmem:[#allocation5 + $0x1334] ss:$40 sps:$4 sm:$0xff]  }
 0x32f   :  { %7271 = vmatprep.mubr.bf16.mxu1 %v13665_v10  ;;  %6627 = vmatpush1.bf16.msra.mxu0 %v12799_v16  ;;  %v16360_v10 = vld [vmem:[#allocation98_spill] sm:$0xff] }
 0x330   :  { %v14257_v50 = vpop.f32.mrb[40].mxu0  ;;  %6628 = vmatprep.subr.bf16.mxu0 %v12810_v46  ;;  %7399 = vmatpush1.bf16.msra.mxu1 %v12838_v15  ;;  %v12828_v46 = vld [vmem:[#allocation5 + $0xd84] ss:$40 sps:$4 sm:$0xff]   ;;  %v12847_v15 = vld [vmem:[#allocation5 + $0xd38] ss:$40 sps:$4 sm:$0xff]  }
 0x331   :  { %16249 = vst [vmem:[#allocation184_spill] sm:$0xff] %v14257_v50  ;;  %v14259_v28 = vpop.f32.mrb[40].mxu1  ;;  %v14261_v51 = vpop.f32.mrb[41].mxu0  ;;  %7400 = vmatprep.subr.bf16.mxu1 %v12843_v18  ;;  %v12817_v50 = vld [vmem:[#allocation5 + $0xd30] ss:$40 sps:$4 sm:$0xff]  }
 0x332   :  { %16250 = vst [vmem:[#allocation185_spill] sm:$0xff] %v14259_v28  ;;  %16251 = vst [vmem:[#allocation186_spill] sm:$0xff] %v14261_v51  ;;  %v14263_v8 = vpop.f32.mrb[41].mxu1  ;;  %v14265_v62 = vpop.f32.mrb[42].mxu0  ;;  %v12849_v28 = vld [vmem:[#allocation5 + $0xd3c] ss:$40 sps:$4 sm:$0xff]  }
 0x333   :  { %16252 = vst [vmem:[#allocation187_spill] sm:$0xff] %v14263_v8  ;;  %16253 = vst [vmem:[#allocation188_spill] sm:$0xff] %v14265_v62  ;;  %v14267_v37 = vpop.f32.mrb[42].mxu1  ;;  %v14269_v16 = vpop.f32.mrb[43].mxu0  ;;  %6629 = vmatpush1.bf16.msra.mxu0 %v12808_v44  ;;  %v12852_v18 = vld [vmem:[#allocation5 + $0xd8c] ss:$40 sps:$4 sm:$0xff]  }
 0x334   :  { %16254 = vst [vmem:[#allocation189_spill] sm:$0xff] %v14267_v37  ;;  %16255 = vst [vmem:[#allocation190_spill] sm:$0xff] %v14269_v16  ;;  %v14271_v38 = vpop.f32.mrb[43].mxu1  ;;  %6630 = vmatprep.subr.bf16.mxu0 %v12819_v61  ;;  %7401 = vmatpush1.bf16.msra.mxu1 %v12841_v23  ;;  %v12826_v8 = vld [vmem:[#allocation5 + $0xd80] ss:$40 sps:$4 sm:$0xff]  }
 0x335   :  { %16256 = vst [vmem:[#allocation191_spill] sm:$0xff] %v14271_v38  ;;  %6500 = vmatmul.mubr.bf16.gmra.mrb[84].mxu0 %v13671_v35  ;;  %7402 = vmatprep.subr.bf16.mxu1 %v12849_v28  ;;  %v12837_v61 = vld [vmem:[#allocation5 + $0xdd4] ss:$40 sps:$4 sm:$0xff]   ;;  %v12850_v23 = vld [vmem:[#allocation5 + $0xd88] ss:$40 sps:$4 sm:$0xff]  }
 0x336   :  { %7272 = vmatmul.mubr.bf16.gmra.mrb[84].mxu1 %v13671_v35  ;;  %6509 = vmatprep.mubr.bf16.mxu0 %v13673_v41  ;;  %v13044_v51 = vld [vmem:[#allocation5 + $0x1294] ss:$40 sps:$4 sm:$0xff]  }
 0x337   :  { %7281 = vmatprep.mubr.bf16.mxu1 %v13673_v41  ;;  %6631 = vmatpush1.bf16.msra.mxu0 %v12817_v50  ;;  %v16265_v41 = vld [vmem:[#allocation34_spill] sm:$0xff] }
 0x338   :  { %v14277_v38 = vpop.f32.mrb[44].mxu0  ;;  %6632 = vmatprep.subr.bf16.mxu0 %v12828_v46  ;;  %7403 = vmatpush1.bf16.msra.mxu1 %v12847_v15  ;;  %v12846_v46 = vld [vmem:[#allocation5 + $0xe24] ss:$40 sps:$4 sm:$0xff]   ;;  %v12856_v15 = vld [vmem:[#allocation5 + $0xdd8] ss:$40 sps:$4 sm:$0xff]  }
 0x339   :  { %16257 = vst [vmem:[#allocation192_spill] sm:$0xff] %v14277_v38  ;;  %v14279_v44 = vpop.f32.mrb[44].mxu1  ;;  %v14281_v16 = vpop.f32.mrb[45].mxu0  ;;  %7404 = vmatprep.subr.bf16.mxu1 %v12852_v18  ;;  %v12835_v38 = vld [vmem:[#allocation5 + $0xdd0] ss:$40 sps:$4 sm:$0xff]  }
 0x33a   :  { %16258 = vst [vmem:[#allocation193_spill] sm:$0xff] %v14279_v44  ;;  %16259 = vst [vmem:[#allocation194_spill] sm:$0xff] %v14281_v16  ;;  %v14283_v37 = vpop.f32.mrb[45].mxu1  ;;  %v14285_v35 = vpop.f32.mrb[46].mxu0  ;;  %v12858_v44 = vld [vmem:[#allocation5 + $0xddc] ss:$40 sps:$4 sm:$0xff]  }
 0x33b   :  { %16260 = vst [vmem:[#allocation195_spill] sm:$0xff] %v14283_v37  ;;  %16261 = vst [vmem:[#allocation196_spill] sm:$0xff] %v14285_v35  ;;  %v14287_v62 = vpop.f32.mrb[46].mxu1  ;;  %v14289_v50 = vpop.f32.mrb[47].mxu0  ;;  %6633 = vmatpush1.bf16.msra.mxu0 %v12826_v8  ;;  %v12861_v18 = vld [vmem:[#allocation5 + $0xe2c] ss:$40 sps:$4 sm:$0xff]  }
 0x33c   :  { %16262 = vst [vmem:[#allocation197_spill] sm:$0xff] %v14287_v62  ;;  %16263 = vst [vmem:[#allocation198_spill] sm:$0xff] %v14289_v50  ;;  %v14291_v28 = vpop.f32.mrb[47].mxu1  ;;  %6634 = vmatprep.subr.bf16.mxu0 %v12837_v61  ;;  %7405 = vmatpush1.bf16.msra.mxu1 %v12850_v23  ;;  %v16266_v37 = vld [vmem:[#allocation35_spill] sm:$0xff]  ;;  %v12855_v61 = vld [vmem:[#allocation5 + $0xe74] ss:$40 sps:$4 sm:$0xff]  }
 0x33d   :  { %16264 = vst [vmem:[#allocation199_spill] sm:$0xff] %v14291_v28  ;;  %6510 = vmatmul.mubr.bf16.gmra.mrb[88].mxu0 %v16265_v41  ;;  %v12844_v50 = vld [vmem:[#allocation5 + $0xe20] ss:$40 sps:$4 sm:$0xff]   ;;  %7406 = vmatprep.subr.bf16.mxu1 %v12858_v44 }
 0x33e   :  { %7282 = vmatmul.mubr.bf16.gmra.mrb[88].mxu1 %v16265_v41  ;;  %6519 = vmatprep.mubr.bf16.mxu0 %v16266_v37  ;;  %v12859_v23 = vld [vmem:[#allocation5 + $0xe28] ss:$40 sps:$4 sm:$0xff]  }
 0x33f   :  { %7291 = vmatprep.mubr.bf16.mxu1 %v16266_v37  ;;  %6635 = vmatpush1.bf16.msra.mxu0 %v12835_v38  ;;  %v16275_v37 = vld [vmem:[#allocation36_spill] sm:$0xff] }
 0x340   :  { %v14297_v28 = vpop.f32.mrb[48].mxu0  ;;  %6636 = vmatprep.subr.bf16.mxu0 %v12846_v46  ;;  %7407 = vmatpush1.bf16.msra.mxu1 %v12856_v15  ;;  %v12864_v46 = vld [vmem:[#allocation5 + $0xec4] ss:$40 sps:$4 sm:$0xff]   ;;  %v12865_v15 = vld [vmem:[#allocation5 + $0xe78] ss:$40 sps:$4 sm:$0xff]  }
 0x341   :  { %16267 = vst [vmem:[#allocation200_spill] sm:$0xff] %v14297_v28  ;;  %v14299_v8 = vpop.f32.mrb[48].mxu1  ;;  %v14301_v62 = vpop.f32.mrb[49].mxu0  ;;  %7408 = vmatprep.subr.bf16.mxu1 %v12861_v18  ;;  %v12853_v28 = vld [vmem:[#allocation5 + $0xe70] ss:$40 sps:$4 sm:$0xff]  }
 0x342   :  { %16268 = vst [vmem:[#allocation201_spill] sm:$0xff] %v14299_v8  ;;  %16269 = vst [vmem:[#allocation202_spill] sm:$0xff] %v14301_v62  ;;  %v14303_v35 = vpop.f32.mrb[49].mxu1  ;;  %v14305_v41 = vpop.f32.mrb[50].mxu0  ;;  %v12867_v8 = vld [vmem:[#allocation5 + $0xe7c] ss:$40 sps:$4 sm:$0xff]  }
 0x343   :  { %16270 = vst [vmem:[#allocation203_spill] sm:$0xff] %v14303_v35  ;;  %16271 = vst [vmem:[#allocation204_spill] sm:$0xff] %v14305_v41  ;;  %v14307_v16 = vpop.f32.mrb[50].mxu1  ;;  %v14309_v38 = vpop.f32.mrb[51].mxu0  ;;  %6637 = vmatpush1.bf16.msra.mxu0 %v12844_v50  ;;  %v12870_v18 = vld [vmem:[#allocation5 + $0xecc] ss:$40 sps:$4 sm:$0xff]  }
 0x344   :  { %16272 = vst [vmem:[#allocation205_spill] sm:$0xff] %v14307_v16  ;;  %16273 = vst [vmem:[#allocation206_spill] sm:$0xff] %v14309_v38  ;;  %v14311_v44 = vpop.f32.mrb[51].mxu1  ;;  %6638 = vmatprep.subr.bf16.mxu0 %v12855_v61  ;;  %7409 = vmatpush1.bf16.msra.mxu1 %v12859_v23  ;;  %v16276_v35 = vld [vmem:[#allocation37_spill] sm:$0xff]  ;;  %v12862_v38 = vld [vmem:[#allocation5 + $0xec0] ss:$40 sps:$4 sm:$0xff]  }
 0x345   :  { %16274 = vst [vmem:[#allocation207_spill] sm:$0xff] %v14311_v44  ;;  %6520 = vmatmul.mubr.bf16.gmra.mrb[92].mxu0 %v16275_v37  ;;  %7410 = vmatprep.subr.bf16.mxu1 %v12867_v8  ;;  %v12868_v61 = vld [vmem:[#allocation5 + $0xec8] ss:$40 sps:$4 sm:$0xff]   ;;  %v12873_v23 = vld [vmem:[#allocation5 + $0xf14] ss:$40 sps:$4 sm:$0xff]  }
 0x346   :  { %7292 = vmatmul.mubr.bf16.gmra.mrb[92].mxu1 %v16275_v37  ;;  %6529 = vmatprep.mubr.bf16.mxu0 %v16276_v35 }
 0x347   :  { %7301 = vmatprep.mubr.bf16.mxu1 %v16276_v35  ;;  %6639 = vmatpush1.bf16.msra.mxu0 %v12853_v28  ;;  %v16358_v35 = vld [vmem:[#allocation96_spill] sm:$0xff] }
 0x348   :  { %v14317_v44 = vpop.f32.mrb[52].mxu0  ;;  %6640 = vmatprep.subr.bf16.mxu0 %v12864_v46  ;;  %7411 = vmatpush1.bf16.msra.mxu1 %v12865_v15  ;;  %v16285_v46 = vld [vmem:[#allocation38_spill] sm:$0xff]  ;;  %v16286_v15 = vld [vmem:[#allocation39_spill] sm:$0xff] }
 0x349   :  { %16277 = vst [vmem:[#allocation208_spill] sm:$0xff] %v14317_v44  ;;  %v14319_v50 = vpop.f32.mrb[52].mxu1  ;;  %v14321_v16 = vpop.f32.mrb[53].mxu0  ;;  %7412 = vmatprep.subr.bf16.mxu1 %v12870_v18  ;;  %v12900_v44 = vld [vmem:[#allocation5 + $0xf1c] ss:$40 sps:$4 sm:$0xff]  }
 0x34a   :  { %16278 = vst [vmem:[#allocation209_spill] sm:$0xff] %v14319_v50  ;;  %16279 = vst [vmem:[#allocation210_spill] sm:$0xff] %v14321_v16  ;;  %v14323_v41 = vpop.f32.mrb[53].mxu1  ;;  %v14325_v37 = vpop.f32.mrb[54].mxu0  ;;  %v12907_v50 = vld [vmem:[#allocation5 + $0xfb8] ss:$40 sps:$4 sm:$0xff]  }
 0x34b   :  { %16280 = vst [vmem:[#allocation211_spill] sm:$0xff] %v14323_v41  ;;  %16281 = vst [vmem:[#allocation212_spill] sm:$0xff] %v14325_v37  ;;  %v14327_v62 = vpop.f32.mrb[54].mxu1  ;;  %v14329_v28 = vpop.f32.mrb[55].mxu0  ;;  %6641 = vmatpush1.bf16.msra.mxu0 %v12862_v38  ;;  %v12882_v37 = vld [vmem:[#allocation5 + $0x1004] ss:$40 sps:$4 sm:$0xff]  }
 0x34c   :  { %16282 = vst [vmem:[#allocation213_spill] sm:$0xff] %v14327_v62  ;;  %16283 = vst [vmem:[#allocation214_spill] sm:$0xff] %v14329_v28  ;;  %v14331_v8 = vpop.f32.mrb[55].mxu1  ;;  %7413 = vmatpush1.bf16.msra.mxu1 %v12868_v61  ;;  %6803 = vmatprep.subr.bf16.mxu0 %v12873_v23  ;;  %v16295_v62 = vld [vmem:[#allocation40_spill] sm:$0xff]  ;;  %v16320_v16 = vld [vmem:[#allocation57_spill] sm:$0xff] }
 0x34d   :  { %16284 = vst [vmem:[#allocation215_spill] sm:$0xff] %v14331_v8  ;;  %6530 = vmatmul.mubr.bf16.gmra.mrb[96].mxu0 %v16285_v46  ;;  %7575 = vmatprep.subr.bf16.mxu1 %v12900_v44  ;;  %v16296_v44 = vld [vmem:[#allocation41_spill] sm:$0xff] }
 0x34e   :  { %7302 = vmatmul.mubr.bf16.gmra.mrb[96].mxu1 %v16285_v46  ;;  %6539 = vmatprep.mubr.bf16.mxu0 %v16286_v15 }
 0x34f   :  { %7311 = vmatprep.mubr.bf16.mxu1 %v16286_v15  ;;  %v12909_v15 = vld [vmem:[#allocation5 + $0xfbc] ss:$40 sps:$4 sm:$0xff]  }
 0x350   :  { %v14337_v18 = vpop.f32.mrb[56].mxu0 }
 0x351   :  { %16287 = vst [vmem:[#allocation216_spill] sm:$0xff] %v14337_v18  ;;  %v14339_v41 = vpop.f32.mrb[56].mxu1  ;;  %v14341_v28 = vpop.f32.mrb[57].mxu0 }
 0x352   :  { %16288 = vst [vmem:[#allocation217_spill] sm:$0xff] %v14339_v41  ;;  %16289 = vst [vmem:[#allocation218_spill] sm:$0xff] %v14341_v28  ;;  %v14343_v8 = vpop.f32.mrb[57].mxu1  ;;  %v14345_v38 = vpop.f32.mrb[58].mxu0 }
 0x353   :  { %16290 = vst [vmem:[#allocation219_spill] sm:$0xff] %v14343_v8  ;;  %16291 = vst [vmem:[#allocation220_spill] sm:$0xff] %v14345_v38  ;;  %v14347_v61 = vpop.f32.mrb[58].mxu1  ;;  %v14349_v23 = vpop.f32.mrb[59].mxu0 }
 0x354   :  { %16292 = vst [vmem:[#allocation221_spill] sm:$0xff] %v14347_v61  ;;  %16293 = vst [vmem:[#allocation222_spill] sm:$0xff] %v14349_v23  ;;  %v14351_v46 = vpop.f32.mrb[59].mxu1 }
 0x355   :  { %16294 = vst [vmem:[#allocation223_spill] sm:$0xff] %v14351_v46  ;;  %6540 = vmatmul.mubr.bf16.gmra.mrb[100].mxu0 %v16295_v62 }
 0x356   :  { %7312 = vmatmul.mubr.bf16.gmra.mrb[100].mxu1 %v16295_v62  ;;  %6549 = vmatprep.mubr.bf16.mxu0 %v16296_v44  ;;  %v16305_v62 = vld [vmem:[#allocation42_spill] sm:$0xff] }
 0x357   :  { %7321 = vmatprep.mubr.bf16.mxu1 %v16296_v44  ;;  %v16306_v44 = vld [vmem:[#allocation43_spill] sm:$0xff] }
 0x358   :  { %v14357_v41 = vpop.f32.mrb[60].mxu0 }
 0x359   :  { %16297 = vst [vmem:[#allocation224_spill] sm:$0xff] %v14357_v41  ;;  %v14359_v28 = vpop.f32.mrb[60].mxu1  ;;  %v14361_v8 = vpop.f32.mrb[61].mxu0  ;;  %v12901_v41 = vld [vmem:[#allocation5 + $0xf68] ss:$40 sps:$4 sm:$0xff]  }
 0x35a   :  { %16298 = vst [vmem:[#allocation225_spill] sm:$0xff] %v14359_v28  ;;  %16299 = vst [vmem:[#allocation226_spill] sm:$0xff] %v14361_v8  ;;  %v14363_v38 = vpop.f32.mrb[61].mxu1  ;;  %v14365_v61 = vpop.f32.mrb[62].mxu0  ;;  %v16307_v28 = vld [vmem:[#allocation44_spill] sm:$0xff]  ;;  %v16318_v8 = vld [vmem:[#allocation55_spill] sm:$0xff] }
 0x35b   :  { %16300 = vst [vmem:[#allocation227_spill] sm:$0xff] %v14363_v38  ;;  %16301 = vst [vmem:[#allocation228_spill] sm:$0xff] %v14365_v61  ;;  %v14367_v23 = vpop.f32.mrb[62].mxu1  ;;  %v14369_v46 = vpop.f32.mrb[63].mxu0  ;;  %v16308_v38 = vld [vmem:[#allocation45_spill] sm:$0xff] }
 0x35c   :  { %16302 = vst [vmem:[#allocation229_spill] sm:$0xff] %v14367_v23  ;;  %16303 = vst [vmem:[#allocation230_spill] sm:$0xff] %v14369_v46  ;;  %v14371_v18 = vpop.f32.mrb[63].mxu1  ;;  %v16309_v23 = vld [vmem:[#allocation46_spill] sm:$0xff]  ;;  %v12876_v46 = vld [vmem:[#allocation5 + $0xf64] ss:$40 sps:$4 sm:$0xff]  }
 0x35d   :  { %16304 = vst [vmem:[#allocation231_spill] sm:$0xff] %v14371_v18  ;;  %6550 = vmatmul.mubr.bf16.gmra.mrb[104].mxu0 %v16305_v62  ;;  %v16310_v18 = vld [vmem:[#allocation47_spill] sm:$0xff] }
 0x35e   :  { %7322 = vmatmul.mubr.bf16.gmra.mrb[104].mxu1 %v16305_v62  ;;  %6559 = vmatprep.mubr.bf16.mxu0 %v16306_v44  ;;  %v16311_v62 = vld [vmem:[#allocation48_spill] sm:$0xff]  ;;  %v12898_v61 = vld [vmem:[#allocation5 + $0xf18] ss:$40 sps:$4 sm:$0xff]  }
 0x35f   :  { %7331 = vmatprep.mubr.bf16.mxu1 %v16306_v44  ;;  %v16312_v44 = vld [vmem:[#allocation49_spill] sm:$0xff] }
 0x365   :  { %6560 = vmatmul.mubr.bf16.gmra.mrb[108].mxu0 %v16307_v28 }
 0x366   :  { %7332 = vmatmul.mubr.bf16.gmra.mrb[108].mxu1 %v16307_v28  ;;  %6569 = vmatprep.mubr.bf16.mxu0 %v16308_v38  ;;  %v16313_v28 = vld [vmem:[#allocation50_spill] sm:$0xff] }
 0x367   :  { %7341 = vmatprep.mubr.bf16.mxu1 %v16308_v38  ;;  %v16314_v38 = vld [vmem:[#allocation51_spill] sm:$0xff] }
 0x36d   :  { %6570 = vmatmul.mubr.bf16.gmra.mrb[112].mxu0 %v16309_v23 }
 0x36e   :  { %7342 = vmatmul.mubr.bf16.gmra.mrb[112].mxu1 %v16309_v23  ;;  %6579 = vmatprep.mubr.bf16.mxu0 %v16310_v18  ;;  %v16315_v23 = vld [vmem:[#allocation52_spill] sm:$0xff] }
 0x36f   :  { %7351 = vmatprep.mubr.bf16.mxu1 %v16310_v18  ;;  %v16316_v18 = vld [vmem:[#allocation53_spill] sm:$0xff] }
 0x375   :  { %6580 = vmatmul.mubr.bf16.gmra.mrb[116].mxu0 %v16311_v62 }
 0x376   :  { %7352 = vmatmul.mubr.bf16.gmra.mrb[116].mxu1 %v16311_v62  ;;  %6589 = vmatprep.mubr.bf16.mxu0 %v16312_v44  ;;  %v12871_v62 = vld [vmem:[#allocation5 + $0xf10] ss:$40 sps:$4 sm:$0xff]  }
 0x377   :  { %7361 = vmatprep.mubr.bf16.mxu1 %v16312_v44  ;;  %v16317_v44 = vld [vmem:[#allocation54_spill] sm:$0xff] }
 0x37d   :  { %6590 = vmatmul.mubr.bf16.gmra.mrb[120].mxu0 %v16313_v28 }
 0x37e   :  { %7362 = vmatmul.mubr.bf16.gmra.mrb[120].mxu1 %v16313_v28  ;;  %6599 = vmatprep.mubr.bf16.mxu0 %v16314_v38  ;;  %v12903_v28 = vld [vmem:[#allocation5 + $0xf6c] ss:$40 sps:$4 sm:$0xff]  }
 0x37f   :  { %7371 = vmatprep.mubr.bf16.mxu1 %v16314_v38  ;;  %v12874_v38 = vld [vmem:[#allocation5 + $0xf60] ss:$40 sps:$4 sm:$0xff]  }
 0x385   :  { %6600 = vmatmul.mubr.bf16.gmra.mrb[124].mxu0 %v16315_v23 }
 0x386   :  { %7372 = vmatmul.mubr.bf16.gmra.mrb[124].mxu1 %v16315_v23  ;;  %6642 = vmatprep.mubr.bf16.mxu0 %v16316_v18  ;;  %v12879_v23 = vld [vmem:[#allocation5 + $0xfb4] ss:$40 sps:$4 sm:$0xff]  }
 0x387   :  { %7414 = vmatprep.mubr.bf16.mxu1 %v16316_v18  ;;  %v12877_v18 = vld [vmem:[#allocation5 + $0xfb0] ss:$40 sps:$4 sm:$0xff]  }
 0x38d   :  { %6643 = vmatmul.mubr.bf16.vlgmr.msra.gmra.mrb[64].mxu0 %v16317_v44 }
 0x38e   :  { %7415 = vmatmul.mubr.bf16.vlgmr.msra.gmra.mrb[64].mxu1 %v16317_v44  ;;  %6804 = vmatpush1.bf16.msra.mxu0 %v12871_v62  ;;  %v16319_v44 = vld [vmem:[#allocation56_spill] sm:$0xff] }
 0x38f   :  { %6652 = vmatprep.mubr.bf16.mxu0 %v16318_v8  ;;  %7424 = vmatprep.mubr.bf16.mxu1 %v16318_v8  ;;  %v12912_v62 = vld [vmem:[#allocation5 + $0x100c] ss:$40 sps:$4 sm:$0xff]   ;;  %v16321_v8 = vld [vmem:[#allocation58_spill] sm:$0xff] }
 0x390   :  { %6805 = vmatprep.subr.bf16.mxu0 %v12876_v46  ;;  %7576 = vmatpush1.bf16.msra.mxu1 %v12898_v61  ;;  %v12880_v46 = vld [vmem:[#allocation5 + $0x1000] ss:$40 sps:$4 sm:$0xff]   ;;  %v12918_v61 = vld [vmem:[#allocation5 + $0x105c] ss:$40 sps:$4 sm:$0xff]  }
 0x391   :  { %7577 = vmatprep.subr.bf16.mxu1 %v12903_v28  ;;  %v12885_v28 = vld [vmem:[#allocation5 + $0x1054] ss:$40 sps:$4 sm:$0xff]  }
 0x392   :  { %6806 = vmatpush1.bf16.msra.mxu0 %v12874_v38  ;;  %v12910_v38 = vld [vmem:[#allocation5 + $0x1008] ss:$40 sps:$4 sm:$0xff]  }
 0x393   :  { %6807 = vmatprep.subr.bf16.mxu0 %v12879_v23  ;;  %v12888_v23 = vld [vmem:[#allocation5 + $0x10a4] ss:$40 sps:$4 sm:$0xff]  }
 0x394   :  { %7578 = vmatpush1.bf16.msra.mxu1 %v12901_v41  ;;  %v12883_v41 = vld [vmem:[#allocation5 + $0x1050] ss:$40 sps:$4 sm:$0xff]  }
 0x395   :  { %6653 = vmatmul.mubr.bf16.gmra.mrb[68].mxu0 %v16319_v44  ;;  %7579 = vmatprep.subr.bf16.mxu1 %v12909_v15  ;;  %v12919_v15 = vld [vmem:[#allocation5 + $0x10a8] ss:$40 sps:$4 sm:$0xff]  }
 0x396   :  { %7425 = vmatmul.mubr.bf16.gmra.mrb[68].mxu1 %v16319_v44  ;;  %6662 = vmatprep.mubr.bf16.mxu0 %v16320_v16  ;;  %v12916_v44 = vld [vmem:[#allocation5 + $0x1058] ss:$40 sps:$4 sm:$0xff]  }
 0x397   :  { %7434 = vmatprep.mubr.bf16.mxu1 %v16320_v16  ;;  %6808 = vmatpush1.bf16.msra.mxu0 %v12877_v18  ;;  %v12921_v16 = vld [vmem:[#allocation5 + $0x10ac] ss:$40 sps:$4 sm:$0xff]   ;;  %v16322_v18 = vld [vmem:[#allocation59_spill] sm:$0xff] }
 0x398   :  { %6809 = vmatprep.subr.bf16.mxu0 %v12882_v37  ;;  %7580 = vmatpush1.bf16.msra.mxu1 %v12907_v50  ;;  %v12886_v37 = vld [vmem:[#allocation5 + $0x10a0] ss:$40 sps:$4 sm:$0xff]   ;;  %v12891_v50 = vld [vmem:[#allocation5 + $0x10f4] ss:$40 sps:$4 sm:$0xff]  }
 0x399   :  { %7581 = vmatprep.subr.bf16.mxu1 %v12912_v62  ;;  %v12889_v62 = vld [vmem:[#allocation5 + $0x10f0] ss:$40 sps:$4 sm:$0xff]  }
 0x39b   :  { %6810 = vmatpush1.bf16.msra.mxu0 %v12880_v46  ;;  %v12927_v46 = vld [vmem:[#allocation5 + $0x10fc] ss:$40 sps:$4 sm:$0xff]  }
 0x39c   :  { %6811 = vmatprep.subr.bf16.mxu0 %v12885_v28  ;;  %7582 = vmatpush1.bf16.msra.mxu1 %v12910_v38  ;;  %v12894_v28 = vld [vmem:[#allocation5 + $0x1144] ss:$40 sps:$4 sm:$0xff]   ;;  %v12925_v38 = vld [vmem:[#allocation5 + $0x10f8] ss:$40 sps:$4 sm:$0xff]  }
 0x39d   :  { %6663 = vmatmul.mubr.bf16.gmra.mrb[72].mxu0 %v16321_v8  ;;  %7583 = vmatprep.subr.bf16.mxu1 %v12918_v61  ;;  %v12928_v61 = vld [vmem:[#allocation5 + $0x1148] ss:$40 sps:$4 sm:$0xff]  }
 0x39e   :  { %7435 = vmatmul.mubr.bf16.gmra.mrb[72].mxu1 %v16321_v8  ;;  %6672 = vmatprep.mubr.bf16.mxu0 %v16322_v18  ;;  %v16323_v8 = vld [vmem:[#allocation60_spill] sm:$0xff] }
 0x39f   :  { %7444 = vmatprep.mubr.bf16.mxu1 %v16322_v18  ;;  %6812 = vmatpush1.bf16.msra.mxu0 %v12883_v41  ;;  %v12930_v18 = vld [vmem:[#allocation5 + $0x114c] ss:$40 sps:$4 sm:$0xff]  }
 0x3a0   :  { %6813 = vmatprep.subr.bf16.mxu0 %v12888_v23  ;;  %7584 = vmatpush1.bf16.msra.mxu1 %v12916_v44  ;;  %v16324_v41 = vld [vmem:[#allocation61_spill] sm:$0xff]  ;;  %v12892_v44 = vld [vmem:[#allocation5 + $0x1140] ss:$40 sps:$4 sm:$0xff]  }
 0x3a1   :  { %7585 = vmatprep.subr.bf16.mxu1 %v12921_v16  ;;  %v12897_v16 = vld [vmem:[#allocation5 + $0x1194] ss:$40 sps:$4 sm:$0xff]   ;;  %v12895_v23 = vld [vmem:[#allocation5 + $0x1190] ss:$40 sps:$4 sm:$0xff]  }
 0x3a3   :  { %6814 = vmatpush1.bf16.msra.mxu0 %v12886_v37  ;;  %v12936_v37 = vld [vmem:[#allocation5 + $0x119c] ss:$40 sps:$4 sm:$0xff]  }
 0x3a4   :  { %6815 = vmatprep.subr.bf16.mxu0 %v12891_v50  ;;  %7586 = vmatpush1.bf16.msra.mxu1 %v12919_v15  ;;  %v12906_v50 = vld [vmem:[#allocation5 + $0x11e4] ss:$40 sps:$4 sm:$0xff]   ;;  %v12934_v15 = vld [vmem:[#allocation5 + $0x1198] ss:$40 sps:$4 sm:$0xff]  }
 0x3a5   :  { %6673 = vmatmul.mubr.bf16.gmra.mrb[76].mxu0 %v16323_v8  ;;  %7587 = vmatprep.subr.bf16.mxu1 %v12927_v46  ;;  %v12904_v46 = vld [vmem:[#allocation5 + $0x11e0] ss:$40 sps:$4 sm:$0xff]  }
 0x3a6   :  { %7445 = vmatmul.mubr.bf16.gmra.mrb[76].mxu1 %v16323_v8  ;;  %6682 = vmatprep.mubr.bf16.mxu0 %v16324_v41  ;;  %v16325_v8 = vld [vmem:[#allocation62_spill] sm:$0xff] }
 0x3a7   :  { %7454 = vmatprep.mubr.bf16.mxu1 %v16324_v41  ;;  %6816 = vmatpush1.bf16.msra.mxu0 %v12889_v62  ;;  %v12939_v41 = vld [vmem:[#allocation5 + $0x11ec] ss:$40 sps:$4 sm:$0xff]   ;;  %v16326_v62 = vld [vmem:[#allocation63_spill] sm:$0xff] }
 0x3a8   :  { %6817 = vmatprep.subr.bf16.mxu0 %v12894_v28  ;;  %7588 = vmatpush1.bf16.msra.mxu1 %v12925_v38  ;;  %v12937_v28 = vld [vmem:[#allocation5 + $0x11e8] ss:$40 sps:$4 sm:$0xff]  }
 0x3a9   :  { %7589 = vmatprep.subr.bf16.mxu1 %v12930_v18  ;;  %v12915_v18 = vld [vmem:[#allocation5 + $0x1234] ss:$40 sps:$4 sm:$0xff]   ;;  %v12913_v38 = vld [vmem:[#allocation5 + $0x1230] ss:$40 sps:$4 sm:$0xff]  }
 0x3ab   :  { %6818 = vmatpush1.bf16.msra.mxu0 %v12892_v44  ;;  %v12945_v44 = vld [vmem:[#allocation5 + $0x123c] ss:$40 sps:$4 sm:$0xff]  }
 0x3ac   :  { %6819 = vmatprep.subr.bf16.mxu0 %v12897_v16  ;;  %7590 = vmatpush1.bf16.msra.mxu1 %v12928_v61  ;;  %v12924_v16 = vld [vmem:[#allocation5 + $0x1284] ss:$40 sps:$4 sm:$0xff]   ;;  %v12943_v61 = vld [vmem:[#allocation5 + $0x1238] ss:$40 sps:$4 sm:$0xff]  }
 0x3ad   :  { %6683 = vmatmul.mubr.bf16.gmra.mrb[80].mxu0 %v16325_v8  ;;  %7591 = vmatprep.subr.bf16.mxu1 %v12936_v37  ;;  %v12946_v37 = vld [vmem:[#allocation5 + $0x1288] ss:$40 sps:$4 sm:$0xff]  }
 0x3ae   :  { %7455 = vmatmul.mubr.bf16.gmra.mrb[80].mxu1 %v16325_v8  ;;  %6692 = vmatprep.mubr.bf16.mxu0 %v16326_v62  ;;  %v16327_v8 = vld [vmem:[#allocation64_spill] sm:$0xff] }
 0x3af   :  { %7464 = vmatprep.mubr.bf16.mxu1 %v16326_v62  ;;  %6820 = vmatpush1.bf16.msra.mxu0 %v12895_v23  ;;  %v12948_v62 = vld [vmem:[#allocation5 + $0x128c] ss:$40 sps:$4 sm:$0xff]   ;;  %v12922_v23 = vld [vmem:[#allocation5 + $0x1280] ss:$40 sps:$4 sm:$0xff]  }
 0x3b0   :  { %6821 = vmatprep.subr.bf16.mxu0 %v12906_v50  ;;  %7592 = vmatpush1.bf16.msra.mxu1 %v12934_v15  ;;  %v12931_v50 = vld [vmem:[#allocation5 + $0x12d0] ss:$40 sps:$4 sm:$0xff]   ;;  %v12954_v15 = vld [vmem:[#allocation5 + $0x12dc] ss:$40 sps:$4 sm:$0xff]  }
 0x3b1   :  { %7593 = vmatprep.subr.bf16.mxu1 %v12939_v41  ;;  %v12933_v41 = vld [vmem:[#allocation5 + $0x12d4] ss:$40 sps:$4 sm:$0xff]  }
 0x3b3   :  { %6822 = vmatpush1.bf16.msra.mxu0 %v12904_v46  ;;  %v12942_v46 = vld [vmem:[#allocation5 + $0x1324] ss:$40 sps:$4 sm:$0xff]  }
 0x3b4   :  { %6823 = vmatprep.subr.bf16.mxu0 %v12915_v18  ;;  %7594 = vmatpush1.bf16.msra.mxu1 %v12937_v28  ;;  %v12952_v18 = vld [vmem:[#allocation5 + $0x12d8] ss:$40 sps:$4 sm:$0xff]  }
 0x3b5   :  { %6693 = vmatmul.mubr.bf16.gmra.mrb[84].mxu0 %v16327_v8  ;;  %7595 = vmatprep.subr.bf16.mxu1 %v12945_v44  ;;  %v16328_v28 = vld [vmem:[#allocation66_spill] sm:$0xff] }
 0x3b6   :  { %7465 = vmatmul.mubr.bf16.gmra.mrb[84].mxu1 %v16327_v8  ;;  %6702 = vmatprep.mubr.bf16.mxu0 %v13801_v27  ;;  %v12940_v44 = vld [vmem:[#allocation5 + $0x1320] ss:$40 sps:$4 sm:$0xff]   ;;  %v13035_v8 = vld [vmem:[#allocation5 + $0x11f4] ss:$40 sps:$4 sm:$0xff]  }
 0x3b7   :  { %7474 = vmatprep.mubr.bf16.mxu1 %v13801_v27  ;;  %6824 = vmatpush1.bf16.msra.mxu0 %v12913_v38  ;;  %v12957_v27 = vld [vmem:[#allocation5 + $0x132c] ss:$40 sps:$4 sm:$0xff]   ;;  %v16329_v38 = vld [vmem:[#allocation67_spill] sm:$0xff] }
 0x3b8   :  { %6825 = vmatprep.subr.bf16.mxu0 %v12924_v16  ;;  %7596 = vmatpush1.bf16.msra.mxu1 %v12943_v61  ;;  %v12955_v16 = vld [vmem:[#allocation5 + $0x1328] ss:$40 sps:$4 sm:$0xff]  }
 0x3b9   :  { %7597 = vmatprep.subr.bf16.mxu1 %v12948_v62  ;;  %v12951_v62 = vld [vmem:[#allocation5 + $0x1374] ss:$40 sps:$4 sm:$0xff]   ;;  %v12949_v61 = vld [vmem:[#allocation5 + $0x1370] ss:$40 sps:$4 sm:$0xff]  }
 0x3bb   :  { %6826 = vmatpush1.bf16.msra.mxu0 %v12922_v23  ;;  %v12963_v23 = vld [vmem:[#allocation5 + $0x137c] ss:$40 sps:$4 sm:$0xff]  }
 0x3bc   :  { %6827 = vmatprep.subr.bf16.mxu0 %v12933_v41  ;;  %7598 = vmatpush1.bf16.msra.mxu1 %v12946_v37  ;;  %v12960_v41 = vld [vmem:[#allocation5 + $0x13c4] ss:$40 sps:$4 sm:$0xff]   ;;  %v12961_v37 = vld [vmem:[#allocation5 + $0x1378] ss:$40 sps:$4 sm:$0xff]  }
 0x3bd   :  { %6703 = vmatmul.mubr.bf16.gmra.mrb[88].mxu0 %v16328_v28  ;;  %7599 = vmatprep.subr.bf16.mxu1 %v12954_v15  ;;  %v12958_v15 = vld [vmem:[#allocation5 + $0x13c0] ss:$40 sps:$4 sm:$0xff]  }
 0x3be   :  { %7475 = vmatmul.mubr.bf16.gmra.mrb[88].mxu1 %v16328_v28  ;;  %6712 = vmatprep.mubr.bf16.mxu0 %v16329_v38  ;;  %v16330_v28 = vld [vmem:[#allocation68_spill] sm:$0xff] }
 0x3bf   :  { %7484 = vmatprep.mubr.bf16.mxu1 %v16329_v38  ;;  %6828 = vmatpush1.bf16.msra.mxu0 %v12931_v50  ;;  %v12966_v38 = vld [vmem:[#allocation5 + $0x13cc] ss:$40 sps:$4 sm:$0xff]  }
 0x3c0   :  { %6829 = vmatprep.subr.bf16.mxu0 %v12942_v46  ;;  %7600 = vmatpush1.bf16.msra.mxu1 %v12952_v18  ;;  %v16331_v50 = vld [vmem:[#allocation69_spill] sm:$0xff]  ;;  %v12969_v46 = vld [vmem:[#allocation5 + $0x24] ss:$40 sps:$4 sm:$0xff]  }
 0x3c1   :  { %7601 = vmatprep.subr.bf16.mxu1 %v12957_v27  ;;  %v12964_v27 = vld [vmem:[#allocation5 + $0x13c8] ss:$40 sps:$4 sm:$0xff]   ;;  %v12996_v18 = vld [vmem:[#allocation5 + $0xf24] ss:$40 sps:$4 sm:$0xff]  }
 0x3c3   :  { %6830 = vmatpush1.bf16.msra.mxu0 %v12940_v44  ;;  %v16332_v44 = vld [vmem:[#allocation70_spill] sm:$0xff] }
 0x3c4   :  { %6831 = vmatprep.subr.bf16.mxu0 %v12951_v62  ;;  %7602 = vmatpush1.bf16.msra.mxu1 %v12955_v16  ;;  %v16333_v62 = vld [vmem:[#allocation71_spill] sm:$0xff]  ;;  %v16334_v16 = vld [vmem:[#allocation72_spill] sm:$0xff] }
 0x3c5   :  { %6713 = vmatmul.mubr.bf16.gmra.mrb[92].mxu0 %v16330_v28  ;;  %7603 = vmatprep.subr.bf16.mxu1 %v12963_v23  ;;  %v16337_v23 = vld [vmem:[#allocation75_spill] sm:$0xff] }
 0x3c6   :  { %7485 = vmatmul.mubr.bf16.gmra.mrb[92].mxu1 %v16330_v28  ;;  %6722 = vmatprep.mubr.bf16.mxu0 %v16331_v50  ;;  %v16351_v28 = vld [vmem:[#allocation89_spill] sm:$0xff] }
 0x3c7   :  { %7494 = vmatprep.mubr.bf16.mxu1 %v16331_v50  ;;  %6832 = vmatpush1.bf16.msra.mxu0 %v12949_v61  ;;  %v16335_v61 = vld [vmem:[#allocation73_spill] sm:$0xff]  ;;  %v13003_v50 = vld [vmem:[#allocation5 + $0xfc0] ss:$40 sps:$4 sm:$0xff]  }
 0x3c8   :  { %6833 = vmatprep.subr.bf16.mxu0 %v12960_v41  ;;  %7604 = vmatpush1.bf16.msra.mxu1 %v12961_v37  ;;  %v16338_v41 = vld [vmem:[#allocation76_spill] sm:$0xff]  ;;  %v16339_v37 = vld [vmem:[#allocation77_spill] sm:$0xff] }
 0x3c9   :  { %7605 = vmatprep.subr.bf16.mxu1 %v12966_v38  ;;  %v16336_v38 = vld [vmem:[#allocation74_spill] sm:$0xff] }
 0x3cb   :  { %6834 = vmatpush1.bf16.msra.mxu0 %v12958_v15  ;;  %v16340_v15 = vld [vmem:[#allocation78_spill] sm:$0xff] }
 0x3cc   :  { %7606 = vmatpush1.bf16.msra.mxu1 %v12964_v27  ;;  %7768 = vmatprep.subr.bf16.mxu0 %v12969_v46  ;;  %v16341_v27 = vld [vmem:[#allocation79_spill] sm:$0xff]  ;;  %v16342_v46 = vld [vmem:[#allocation80_spill] sm:$0xff] }
 0x3cd   :  { %6723 = vmatmul.mubr.bf16.gmra.mrb[96].mxu0 %v16332_v44  ;;  %11194 = vmatprep.subr.bf16.mxu1 %v12996_v18  ;;  %v16343_v18 = vld [vmem:[#allocation81_spill] sm:$0xff] }
 0x3ce   :  { %7495 = vmatmul.mubr.bf16.gmra.mrb[96].mxu1 %v16332_v44  ;;  %6732 = vmatprep.mubr.bf16.mxu0 %v16333_v62  ;;  %v12978_v44 = vld [vmem:[#allocation5 + $0x114] ss:$40 sps:$4 sm:$0xff]  }
 0x3cf   :  { %7504 = vmatprep.mubr.bf16.mxu1 %v16333_v62  ;;  %v13005_v62 = vld [vmem:[#allocation5 + $0xfc4] ss:$40 sps:$4 sm:$0xff]  }
 0x3d5   :  { %6733 = vmatmul.mubr.bf16.gmra.mrb[100].mxu0 %v16334_v16 }
 0x3d6   :  { %7505 = vmatmul.mubr.bf16.gmra.mrb[100].mxu1 %v16334_v16  ;;  %6742 = vmatprep.mubr.bf16.mxu0 %v16335_v61  ;;  %v12997_v16 = vld [vmem:[#allocation5 + $0xf70] ss:$40 sps:$4 sm:$0xff]  }
 0x3d7   :  { %7514 = vmatprep.mubr.bf16.mxu1 %v16335_v61  ;;  %v16349_v61 = vld [vmem:[#allocation87_spill] sm:$0xff] }
 0x3dd   :  { %6743 = vmatmul.mubr.bf16.gmra.mrb[104].mxu0 %v16336_v38 }
 0x3de   :  { %7515 = vmatmul.mubr.bf16.gmra.mrb[104].mxu1 %v16336_v38  ;;  %6752 = vmatprep.mubr.bf16.mxu0 %v16337_v23  ;;  %v12994_v38 = vld [vmem:[#allocation5 + $0xf20] ss:$40 sps:$4 sm:$0xff]  }
 0x3df   :  { %7524 = vmatprep.mubr.bf16.mxu1 %v16337_v23  ;;  %v12972_v23 = vld [vmem:[#allocation5 + $0x74] ss:$40 sps:$4 sm:$0xff]  }
 0x3e5   :  { %6753 = vmatmul.mubr.bf16.gmra.mrb[108].mxu0 %v16338_v41 }
 0x3e6   :  { %7525 = vmatmul.mubr.bf16.gmra.mrb[108].mxu1 %v16338_v41  ;;  %6762 = vmatprep.mubr.bf16.mxu0 %v16339_v37  ;;  %v16344_v41 = vld [vmem:[#allocation82_spill] sm:$0xff] }
 0x3e7   :  { %7534 = vmatprep.mubr.bf16.mxu1 %v16339_v37  ;;  %v16345_v37 = vld [vmem:[#allocation83_spill] sm:$0xff] }
 0x3ed   :  { %6763 = vmatmul.mubr.bf16.gmra.mrb[112].mxu0 %v16340_v15 }
 0x3ee   :  { %7535 = vmatmul.mubr.bf16.gmra.mrb[112].mxu1 %v16340_v15  ;;  %6772 = vmatprep.mubr.bf16.mxu0 %v16341_v27  ;;  %v16346_v15 = vld [vmem:[#allocation84_spill] sm:$0xff] }
 0x3ef   :  { %7544 = vmatprep.mubr.bf16.mxu1 %v16341_v27  ;;  %v16347_v27 = vld [vmem:[#allocation85_spill] sm:$0xff] }
 0x3f5   :  { %6773 = vmatmul.mubr.bf16.gmra.mrb[116].mxu0 %v16342_v46 }
 0x3f6   :  { %7545 = vmatmul.mubr.bf16.gmra.mrb[116].mxu1 %v16342_v46  ;;  %6782 = vmatprep.mubr.bf16.mxu0 %v16343_v18  ;;  %v12967_v46 = vld [vmem:[#allocation5 + $0x20] ss:$40 sps:$4 sm:$0xff]  }
 0x3f7   :  { %7554 = vmatprep.mubr.bf16.mxu1 %v16343_v18  ;;  %v16348_v18 = vld [vmem:[#allocation86_spill] sm:$0xff] }
 0x3fd   :  { %6783 = vmatmul.mubr.bf16.gmra.mrb[120].mxu0 %v16344_v41 }
 0x3fe   :  { %7555 = vmatmul.mubr.bf16.gmra.mrb[120].mxu1 %v16344_v41  ;;  %6792 = vmatprep.mubr.bf16.mxu0 %v16345_v37  ;;  %v12999_v41 = vld [vmem:[#allocation5 + $0xf74] ss:$40 sps:$4 sm:$0xff]  }
 0x3ff   :  { %7564 = vmatprep.mubr.bf16.mxu1 %v16345_v37  ;;  %v12970_v37 = vld [vmem:[#allocation5 + $0x70] ss:$40 sps:$4 sm:$0xff]  }
 0x405   :  { %6793 = vmatmul.mubr.bf16.gmra.mrb[124].mxu0 %v16346_v15 }
 0x406   :  { %7565 = vmatmul.mubr.bf16.gmra.mrb[124].mxu1 %v16346_v15  ;;  %6835 = vmatprep.mubr.bf16.mxu0 %v16347_v27  ;;  %v12975_v15 = vld [vmem:[#allocation5 + $0xc4] ss:$40 sps:$4 sm:$0xff]  }
 0x407   :  { %7607 = vmatprep.mubr.bf16.mxu1 %v16347_v27  ;;  %v12973_v27 = vld [vmem:[#allocation5 + $0xc0] ss:$40 sps:$4 sm:$0xff]  }
 0x40d   :  { %6836 = vmatmul.mubr.bf16.vlgmr.msra.gmra.mrb[64].mxu0 %v16348_v18 }
 0x40e   :  { %7608 = vmatmul.mubr.bf16.vlgmr.msra.gmra.mrb[64].mxu1 %v16348_v18  ;;  %7769 = vmatpush1.bf16.msra.mxu0 %v12967_v46  ;;  %v16350_v18 = vld [vmem:[#allocation88_spill] sm:$0xff]  ;;  %v13008_v46 = vld [vmem:[#allocation5 + $0x1014] ss:$40 sps:$4 sm:$0xff]  }
 0x40f   :  { %6845 = vmatprep.mubr.bf16.mxu0 %v16349_v61  ;;  %7617 = vmatprep.mubr.bf16.mxu1 %v16349_v61  ;;  %v16352_v61 = vld [vmem:[#allocation90_spill] sm:$0xff] }
 0x410   :  { %7770 = vmatprep.subr.bf16.mxu0 %v12972_v23  ;;  %11210 = vmatpush1.bf16.msra.mxu1 %v12994_v38  ;;  %v12976_v38 = vld [vmem:[#allocation5 + $0x110] ss:$40 sps:$4 sm:$0xff]   ;;  %v12981_v23 = vld [vmem:[#allocation5 + $0x164] ss:$40 sps:$4 sm:$0xff]  }
 0x411   :  { %11195 = vmatprep.subr.bf16.mxu1 %v12999_v41  ;;  %v13006_v41 = vld [vmem:[#allocation5 + $0x1010] ss:$40 sps:$4 sm:$0xff]  }
 0x412   :  { %7771 = vmatpush1.bf16.msra.mxu0 %v12970_v37  ;;  %v13014_v37 = vld [vmem:[#allocation5 + $0x1064] ss:$40 sps:$4 sm:$0xff]  }
 0x413   :  { %7772 = vmatprep.subr.bf16.mxu0 %v12975_v15  ;;  %v12984_v15 = vld [vmem:[#allocation5 + $0x1b4] ss:$40 sps:$4 sm:$0xff]  }
 0x414   :  { %11211 = vmatpush1.bf16.msra.mxu1 %v12997_v16  ;;  %v12979_v16 = vld [vmem:[#allocation5 + $0x160] ss:$40 sps:$4 sm:$0xff]  }
 0x415   :  { %6846 = vmatmul.mubr.bf16.gmra.mrb[68].mxu0 %v16350_v18  ;;  %11196 = vmatprep.subr.bf16.mxu1 %v13005_v62  ;;  %v13015_v62 = vld [vmem:[#allocation5 + $0x10b0] ss:$40 sps:$4 sm:$0xff]  }
 0x416   :  { %7618 = vmatmul.mubr.bf16.gmra.mrb[68].mxu1 %v16350_v18  ;;  %6855 = vmatprep.mubr.bf16.mxu0 %v16351_v28  ;;  %v13012_v18 = vld [vmem:[#allocation5 + $0x1060] ss:$40 sps:$4 sm:$0xff]  }
 0x417   :  { %7627 = vmatprep.mubr.bf16.mxu1 %v16351_v28  ;;  %7773 = vmatpush1.bf16.msra.mxu0 %v12973_v27  ;;  %v13017_v28 = vld [vmem:[#allocation5 + $0x10b4] ss:$40 sps:$4 sm:$0xff]   ;;  %v16353_v27 = vld [vmem:[#allocation91_spill] sm:$0xff] }
 0x418   :  { %7774 = vmatprep.subr.bf16.mxu0 %v12978_v44  ;;  %11212 = vmatpush1.bf16.msra.mxu1 %v13003_v50  ;;  %v12982_v50 = vld [vmem:[#allocation5 + $0x1b0] ss:$40 sps:$4 sm:$0xff]   ;;  %v12987_v44 = vld [vmem:[#allocation5 + $0x204] ss:$40 sps:$4 sm:$0xff]  }
 0x419   :  { %11197 = vmatprep.subr.bf16.mxu1 %v13008_v46  ;;  %v12985_v46 = vld [vmem:[#allocation5 + $0x200] ss:$40 sps:$4 sm:$0xff]  }
 0x41b   :  { %7775 = vmatpush1.bf16.msra.mxu0 %v12976_v38  ;;  %v13023_v38 = vld [vmem:[#allocation5 + $0x1104] ss:$40 sps:$4 sm:$0xff]  }
 0x41c   :  { %7776 = vmatprep.subr.bf16.mxu0 %v12981_v23  ;;  %11213 = vmatpush1.bf16.msra.mxu1 %v13006_v41  ;;  %v12990_v23 = vld [vmem:[#allocation5 + $0x254] ss:$40 sps:$4 sm:$0xff]   ;;  %v13021_v41 = vld [vmem:[#allocation5 + $0x1100] ss:$40 sps:$4 sm:$0xff]  }
 0x41d   :  { %6856 = vmatmul.mubr.bf16.gmra.mrb[72].mxu0 %v16352_v61  ;;  %11198 = vmatprep.subr.bf16.mxu1 %v13014_v37  ;;  %v13024_v37 = vld [vmem:[#allocation5 + $0x1150] ss:$40 sps:$4 sm:$0xff]  }
 0x41e   :  { %7628 = vmatmul.mubr.bf16.gmra.mrb[72].mxu1 %v16352_v61  ;;  %6865 = vmatprep.mubr.bf16.mxu0 %v16353_v27  ;;  %v16354_v61 = vld [vmem:[#allocation92_spill] sm:$0xff] }
 0x41f   :  { %7637 = vmatprep.mubr.bf16.mxu1 %v16353_v27  ;;  %7777 = vmatpush1.bf16.msra.mxu0 %v12979_v16  ;;  %v13026_v27 = vld [vmem:[#allocation5 + $0x1154] ss:$40 sps:$4 sm:$0xff]  }
 0x420   :  { %7778 = vmatprep.subr.bf16.mxu0 %v12984_v15  ;;  %11214 = vmatpush1.bf16.msra.mxu1 %v13012_v18  ;;  %v16355_v16 = vld [vmem:[#allocation93_spill] sm:$0xff]  ;;  %v12991_v15 = vld [vmem:[#allocation5 + $0x2a0] ss:$40 sps:$4 sm:$0xff]  }
 0x421   :  { %11199 = vmatprep.subr.bf16.mxu1 %v13017_v28  ;;  %v12988_v18 = vld [vmem:[#allocation5 + $0x250] ss:$40 sps:$4 sm:$0xff]   ;;  %v12993_v28 = vld [vmem:[#allocation5 + $0x2a4] ss:$40 sps:$4 sm:$0xff]  }
 0x423   :  { %7779 = vmatpush1.bf16.msra.mxu0 %v12982_v50  ;;  %v13032_v50 = vld [vmem:[#allocation5 + $0x11a4] ss:$40 sps:$4 sm:$0xff]  }
 0x424   :  { %7780 = vmatprep.subr.bf16.mxu0 %v12987_v44  ;;  %11215 = vmatpush1.bf16.msra.mxu1 %v13015_v62  ;;  %v13002_v44 = vld [vmem:[#allocation5 + $0x2f4] ss:$40 sps:$4 sm:$0xff]   ;;  %v13030_v62 = vld [vmem:[#allocation5 + $0x11a0] ss:$40 sps:$4 sm:$0xff]  }
 0x425   :  { %6866 = vmatmul.mubr.bf16.gmra.mrb[76].mxu0 %v16354_v61  ;;  %11200 = vmatprep.subr.bf16.mxu1 %v13023_v38  ;;  %v13000_v38 = vld [vmem:[#allocation5 + $0x2f0] ss:$40 sps:$4 sm:$0xff]  }
 0x426   :  { %7638 = vmatmul.mubr.bf16.gmra.mrb[76].mxu1 %v16354_v61  ;;  %6875 = vmatprep.mubr.bf16.mxu0 %v16355_v16  ;;  %v16356_v61 = vld [vmem:[#allocation94_spill] sm:$0xff] }
 0x427   :  { %7647 = vmatprep.mubr.bf16.mxu1 %v16355_v16  ;;  %7781 = vmatpush1.bf16.msra.mxu0 %v12985_v46  ;;  %v16357_v46 = vld [vmem:[#allocation95_spill] sm:$0xff] }
 0x428   :  { %7782 = vmatprep.subr.bf16.mxu0 %v12990_v23  ;;  %11216 = vmatpush1.bf16.msra.mxu1 %v13021_v41  ;;  %v13033_v23 = vld [vmem:[#allocation5 + $0x11f0] ss:$40 sps:$4 sm:$0xff]   ;;  %v13009_v41 = vld [vmem:[#allocation5 + $0x340] ss:$40 sps:$4 sm:$0xff]  }
 0x429   :  { %11201 = vmatprep.subr.bf16.mxu1 %v13026_v27  ;;  %v13011_v27 = vld [vmem:[#allocation5 + $0x344] ss:$40 sps:$4 sm:$0xff]  }
 0x42b   :  { %7783 = vmatpush1.bf16.msra.mxu0 %v12988_v18  ;;  %v13041_v18 = vld [vmem:[#allocation5 + $0x1244] ss:$40 sps:$4 sm:$0xff]  }
 0x42c   :  { %7784 = vmatprep.subr.bf16.mxu0 %v12993_v28  ;;  %11217 = vmatpush1.bf16.msra.mxu1 %v13024_v37  ;;  %v13020_v28 = vld [vmem:[#allocation5 + $0x394] ss:$40 sps:$4 sm:$0xff]   ;;  %v13039_v37 = vld [vmem:[#allocation5 + $0x1240] ss:$40 sps:$4 sm:$0xff]  }
 0x42d   :  { %6876 = vmatmul.mubr.bf16.gmra.mrb[80].mxu0 %v16356_v61  ;;  %11202 = vmatprep.subr.bf16.mxu1 %v13032_v50  ;;  %v13018_v50 = vld [vmem:[#allocation5 + $0x390] ss:$40 sps:$4 sm:$0xff]  }
 0x42e   :  { %7648 = vmatmul.mubr.bf16.gmra.mrb[80].mxu1 %v16356_v61  ;;  %6885 = vmatprep.mubr.bf16.mxu0 %v16357_v46 }
 0x42f   :  { %7657 = vmatprep.mubr.bf16.mxu1 %v16357_v46  ;;  %7785 = vmatpush1.bf16.msra.mxu0 %v12991_v15  ;;  %v16359_v15 = vld [vmem:[#allocation97_spill] sm:$0xff] }
 0x430   :  { %7786 = vmatprep.subr.bf16.mxu0 %v13002_v44  ;;  %11218 = vmatpush1.bf16.msra.mxu1 %v13030_v62  ;;  %v13042_v44 = vld [vmem:[#allocation5 + $0x1290] ss:$40 sps:$4 sm:$0xff]   ;;  %v13027_v62 = vld [vmem:[#allocation5 + $0x3e0] ss:$40 sps:$4 sm:$0xff]  }
 0x431   :  { %11203 = vmatprep.subr.bf16.mxu1 %v13035_v8  ;;  %v13029_v8 = vld [vmem:[#allocation5 + $0x3e4] ss:$40 sps:$4 sm:$0xff]  }
 0x433   :  { %7787 = vmatpush1.bf16.msra.mxu0 %v13000_v38  ;;  %v13050_v38 = vld [vmem:[#allocation5 + $0x12e4] ss:$40 sps:$4 sm:$0xff]  }
 0x434   :  { %7788 = vmatprep.subr.bf16.mxu0 %v13011_v27  ;;  %11219 = vmatpush1.bf16.msra.mxu1 %v13033_v23  ;;  %v13038_v27 = vld [vmem:[#allocation5 + $0x434] ss:$40 sps:$4 sm:$0xff]   ;;  %v13048_v23 = vld [vmem:[#allocation5 + $0x12e0] ss:$40 sps:$4 sm:$0xff]  }
 0x435   :  { %6886 = vmatmul.mubr.bf16.gmra.mrb[84].mxu0 %v16358_v35  ;;  %11204 = vmatprep.subr.bf16.mxu1 %v13041_v18  ;;  %v13036_v18 = vld [vmem:[#allocation5 + $0x430] ss:$40 sps:$4 sm:$0xff]  }
 0x436   :  { %7658 = vmatmul.mubr.bf16.gmra.mrb[84].mxu1 %v16358_v35  ;;  %6895 = vmatprep.mubr.bf16.mxu0 %v16359_v15 }
 0x437   :  { %7667 = vmatprep.mubr.bf16.mxu1 %v16359_v15  ;;  %7789 = vmatpush1.bf16.msra.mxu0 %v13009_v41  ;;  %v16361_v41 = vld [vmem:[#allocation99_spill] sm:$0xff] }
 0x438   :  { %7790 = vmatprep.subr.bf16.mxu0 %v13020_v28  ;;  %11220 = vmatpush1.bf16.msra.mxu1 %v13039_v37  ;;  %v13051_v28 = vld [vmem:[#allocation5 + $0x1330] ss:$40 sps:$4 sm:$0xff]   ;;  %v13045_v37 = vld [vmem:[#allocation5 + $0x480] ss:$40 sps:$4 sm:$0xff]  }
 0x439   :  { %11205 = vmatprep.subr.bf16.mxu1 %v13044_v51  ;;  %v13047_v51 = vld [vmem:[#allocation5 + $0x484] ss:$40 sps:$4 sm:$0xff]  }
 0x43b   :  { %7791 = vmatpush1.bf16.msra.mxu0 %v13018_v50  ;;  %v13059_v50 = vld [vmem:[#allocation5 + $0x1384] ss:$40 sps:$4 sm:$0xff]  }
 0x43c   :  { %7792 = vmatprep.subr.bf16.mxu0 %v13029_v8  ;;  %11221 = vmatpush1.bf16.msra.mxu1 %v13042_v44  ;;  %v13056_v8 = vld [vmem:[#allocation5 + $0x4d4] ss:$40 sps:$4 sm:$0xff]   ;;  %v13057_v44 = vld [vmem:[#allocation5 + $0x1380] ss:$40 sps:$4 sm:$0xff]  }
 0x43d   :  { %6896 = vmatmul.mubr.bf16.gmra.mrb[88].mxu0 %v16360_v10  ;;  %11206 = vmatprep.subr.bf16.mxu1 %v13050_v38  ;;  %v13065_v38 = vld [vmem:[#allocation5 + $0x524] ss:$40 sps:$4 sm:$0xff]  }
 0x43e   :  { %7668 = vmatmul.mubr.bf16.gmra.mrb[88].mxu1 %v16360_v10  ;;  %6905 = vmatprep.mubr.bf16.mxu0 %v16361_v41 }
 0x43f   :  { %7677 = vmatprep.mubr.bf16.mxu1 %v16361_v41  ;;  %7793 = vmatpush1.bf16.msra.mxu0 %v13027_v62  ;;  %v13054_v62 = vld [vmem:[#allocation5 + $0x4d0] ss:$40 sps:$4 sm:$0xff]  }
 0x440   :  { %7794 = vmatprep.subr.bf16.mxu0 %v13038_v27  ;;  %11222 = vmatpush1.bf16.msra.mxu1 %v13048_v23  ;;  %v13090_v27 = vld [vmem:[#allocation7 + $0x40] sm:$0xff]   ;;  %v16363_v23 = vld [vmem:[#allocation101_spill] sm:$0xff] }
 0x441   :  { %11207 = vmatprep.subr.bf16.mxu1 %v13053_v26  ;;  %v13060_v26 = vld [vmem:[#allocation5 + $0x13d0] ss:$40 sps:$4 sm:$0xff]  }
 0x443   :  { %7795 = vmatpush1.bf16.msra.mxu0 %v13036_v18  ;;  %v16364_v18 = vld [vmem:[#allocation102_spill] sm:$0xff] }
 0x444   :  { %7796 = vmatprep.subr.bf16.mxu0 %v13047_v51  ;;  %11223 = vmatpush1.bf16.msra.mxu1 %v13051_v28  ;;  %v16365_v51 = vld [vmem:[#allocation103_spill] sm:$0xff]  ;;  %v16366_v28 = vld [vmem:[#allocation104_spill] sm:$0xff] }
 0x445   :  { %6906 = vmatmul.mubr.bf16.gmra.mrb[92].mxu0 %v13943_v45  ;;  %11208 = vmatprep.subr.bf16.mxu1 %v13059_v50  ;;  %v16368_v50 = vld [vmem:[#allocation106_spill] sm:$0xff] }
 0x446   :  { %7678 = vmatmul.mubr.bf16.gmra.mrb[92].mxu1 %v13943_v45  ;;  %6915 = vmatprep.mubr.bf16.mxu0 %v13945_v21 }
 0x447   :  { %7687 = vmatprep.mubr.bf16.mxu1 %v13945_v21  ;;  %7797 = vmatpush1.bf16.msra.mxu0 %v13045_v37  ;;  %v16367_v37 = vld [vmem:[#allocation105_spill] sm:$0xff] }
 0x448   :  { %7798 = vmatprep.subr.bf16.mxu0 %v13056_v8  ;;  %11224 = vmatpush1.bf16.msra.mxu1 %v13057_v44  ;;  %v16369_v8 = vld [vmem:[#allocation107_spill] sm:$0xff]  ;;  %v16370_v44 = vld [vmem:[#allocation108_spill] sm:$0xff] }
 0x449   :  { %11209 = vmatprep.subr.bf16.mxu1 %v13062_v40  ;;  %v16362_v40 = vld [vmem:[#allocation100_spill] sm:$0xff] }
 0x44b   :  { %7799 = vmatpush1.bf16.msra.mxu0 %v13054_v62  ;;  %v16371_v62 = vld [vmem:[#allocation15_spill] sm:$0xff] }
 0x44c   :  { %11225 = vmatpush1.bf16.msra.mxu1 %v13060_v26  ;;  %7961 = vmatprep.subr.bf16.mxu0 %v13065_v38  ;;  %v13063_v26 = vld [vmem:[#allocation5 + $0x520] ss:$40 sps:$4 sm:$0xff]   ;;  %v13068_v38 = vld [vmem:[#allocation5 + $0x574] ss:$40 sps:$4 sm:$0xff]  }
 0x44d   :  { %6916 = vmatmul.mubr.bf16.gmra.mrb[96].mxu0 %v13951_v34  ;;  %10898 = vmatprep.subr.bf16.mxu1 %v13090_v27  ;;  %v13091_v27 = vld [vmem:[#allocation7] sm:$0xff]  }
 0x44e   :  { %7688 = vmatmul.mubr.bf16.gmra.mrb[96].mxu1 %v13951_v34  ;;  %6925 = vmatprep.mubr.bf16.mxu0 %v13953_v29 }
 0x44f   :  { %7697 = vmatprep.mubr.bf16.mxu1 %v13953_v29 }
 0x455   :  { %6926 = vmatmul.mubr.bf16.gmra.mrb[100].mxu0 %v13959_v39 }
 0x456   :  { %7698 = vmatmul.mubr.bf16.gmra.mrb[100].mxu1 %v13959_v39  ;;  %6935 = vmatprep.mubr.bf16.mxu0 %v13961_v13 }
 0x457   :  { %7707 = vmatprep.mubr.bf16.mxu1 %v13961_v13 }
 0x45d   :  { %6936 = vmatmul.mubr.bf16.gmra.mrb[104].mxu0 %v13967_v1 }
 0x45e   :  { %7708 = vmatmul.mubr.bf16.gmra.mrb[104].mxu1 %v13967_v1  ;;  %6945 = vmatprep.mubr.bf16.mxu0 %v16362_v40 }
 0x45f   :  { %7717 = vmatprep.mubr.bf16.mxu1 %v16362_v40 }
 0x465   :  { %6946 = vmatmul.mubr.bf16.gmra.mrb[108].mxu0 %v16363_v23 }
 0x466   :  { %7718 = vmatmul.mubr.bf16.gmra.mrb[108].mxu1 %v16363_v23  ;;  %6955 = vmatprep.mubr.bf16.mxu0 %v16364_v18 }
 0x467   :  { %7727 = vmatprep.mubr.bf16.mxu1 %v16364_v18 }
 0x46d   :  { %6956 = vmatmul.mubr.bf16.gmra.mrb[112].mxu0 %v16365_v51 }
 0x46e   :  { %7728 = vmatmul.mubr.bf16.gmra.mrb[112].mxu1 %v16365_v51  ;;  %6965 = vmatprep.mubr.bf16.mxu0 %v13985_v20 }
 0x46f   :  { %7737 = vmatprep.mubr.bf16.mxu1 %v13985_v20 }
 0x475   :  { %6966 = vmatmul.mubr.bf16.gmra.mrb[116].mxu0 %v16366_v28 }
 0x476   :  { %7738 = vmatmul.mubr.bf16.gmra.mrb[116].mxu1 %v16366_v28  ;;  %6975 = vmatprep.mubr.bf16.mxu0 %v16367_v37 }
 0x477   :  { %7747 = vmatprep.mubr.bf16.mxu1 %v16367_v37 }
 0x47d   :  { %6976 = vmatmul.mubr.bf16.gmra.mrb[120].mxu0 %v16368_v50 }
 0x47e   :  { %7748 = vmatmul.mubr.bf16.gmra.mrb[120].mxu1 %v16368_v50  ;;  %6985 = vmatprep.mubr.bf16.mxu0 %v16369_v8 }
 0x47f   :  { %7757 = vmatprep.mubr.bf16.mxu1 %v16369_v8 }
 0x485   :  { %6986 = vmatmul.mubr.bf16.gmra.mrb[124].mxu0 %v16370_v44 }
 0x486   :  { %7758 = vmatmul.mubr.bf16.gmra.mrb[124].mxu1 %v16370_v44  ;;  %7800 = vmatprep.mubr.bf16.mxu0 %v16371_v62  ;;  %v13093_v62 = vld [vmem:[#allocation7 + $0x8] sm:$0xff]  }
 0x487   :  { %8419 = vmatprep.mubr.bf16.mxu1 %v16355_v16  ;;  %v13069_v16 = vld [vmem:[#allocation5 + $0x5c0] ss:$40 sps:$4 sm:$0xff]  }
 0x48d   :  { %7801 = vmatmul.mubr.bf16.vlgmr.msra.gmra.mrb[128].mxu0 %v13503_v7  ;;  %v13098_v7 = vld [vmem:[#allocation7 + $0x10] sm:$0xff]  }
 0x48e   :  { %8420 = vmatmul.mubr.bf16.vlgmr.msra.gmra.mrb[128].mxu1 %v16356_v61  ;;  %7962 = vmatpush1.bf16.msra.mxu0 %v13063_v26  ;;  %v16372_v61 = vld [vmem:[#allocation16_spill] sm:$0xff]  ;;  %v16373_v26 = vld [vmem:[#allocation17_spill] sm:$0xff] }
 0x48f   :  { %7810 = vmatprep.mubr.bf16.mxu0 %v13505_v9  ;;  %8429 = vmatprep.mubr.bf16.mxu1 %v16357_v46  ;;  %v13099_v9 = vld [vmem:[#allocation7 + $0x58] sm:$0xff]  }
 0x490   :  { %7963 = vmatprep.subr.bf16.mxu0 %v13068_v38  ;;  %10899 = vmatpush3.bf16.msra.mxu1 %v13091_v27  ;;  %v13072_v46 = vld [vmem:[#allocation5 + $0x610] ss:$40 sps:$4 sm:$0xff]   ;;  %v13104_v38 = vld [vmem:[#allocation7 + $0x60] sm:$0xff]   ;;  %v13080_v27 = vld [vmem:[#allocation5 + $0x6b4] ss:$40 sps:$4 sm:$0xff]  }
 0x491   :  { %10900 = vmatprep.subr.bf16.mxu1 %v13092_v32  ;;  %v13075_v32 = vld [vmem:[#allocation5 + $0x660] ss:$40 sps:$4 sm:$0xff]  }
 0x492   :  { %7964 = vmatpush1.bf16.msra.mxu0 %v13066_v14  ;;  %v13077_v14 = vld [vmem:[#allocation5 + $0x664] ss:$40 sps:$4 sm:$0xff]  }
 0x493   :  { %7965 = vmatprep.subr.bf16.mxu0 %v13071_v24  ;;  %v13100_v24 = vld [vmem:[#allocation7 + $0x18] sm:$0xff]  }
 0x494   :  { %10901 = vmatpush3.bf16.msra.mxu1 %v13093_v62  ;;  %v13107_v62 = vld [vmem:[#allocation7 + $0x28] sm:$0xff]  }
 0x495   :  { %7811 = vmatmul.mubr.bf16.gmra.mrb[132].mxu0 %v16372_v61  ;;  %10902 = vmatprep.subr.bf16.mxu1 %v13097_v49  ;;  %v13078_v49 = vld [vmem:[#allocation5 + $0x6b0] ss:$40 sps:$4 sm:$0xff]   ;;  %v13089_v61 = vld [vmem:[#allocation5 + $0x7a4] ss:$40 sps:$4 sm:$0xff]  }
 0x496   :  { %8430 = vmatmul.mubr.bf16.gmra.mrb[132].mxu1 %v16358_v35  ;;  %7820 = vmatprep.mubr.bf16.mxu0 %v16373_v26  ;;  %v13105_v35 = vld [vmem:[#allocation7 + $0x20] sm:$0xff]  }
 0x497   :  { %8439 = vmatprep.mubr.bf16.mxu1 %v16359_v15  ;;  %7966 = vmatpush1.bf16.msra.mxu0 %v13069_v16  ;;  %v13106_v15 = vld [vmem:[#allocation7 + $0x68] sm:$0xff]  }
 0x498   :  { %7967 = vmatprep.subr.bf16.mxu0 %v13074_v25  ;;  %10903 = vmatpush3.bf16.msra.mxu1 %v13098_v7  ;;  %v13083_v25 = vld [vmem:[#allocation5 + $0x704] ss:$40 sps:$4 sm:$0xff]   ;;  %v13081_v16 = vld [vmem:[#allocation5 + $0x700] ss:$40 sps:$4 sm:$0xff]   ;;  %v13111_v7 = vld [vmem:[#allocation7 + $0x70] sm:$0xff]  }
 0x499   :  { %10904 = vmatprep.subr.bf16.mxu1 %v13099_v9  ;;  %v13114_v9 = vld [vmem:[#allocation7 + $0x38] sm:$0xff]   ;;  %v13087_v26 = vld [vmem:[#allocation5 + $0x7a0] ss:$40 sps:$4 sm:$0xff]  }
 0x49b   :  { %7968 = vmatpush1.bf16.msra.mxu0 %v13072_v46  ;;  %v13096_v46 = vld [vmem:[#allocation5 + $0x7f4] ss:$40 sps:$4 sm:$0xff]  }
 0x49c   :  { %7969 = vmatprep.subr.bf16.mxu0 %v13077_v14  ;;  %10905 = vmatpush3.bf16.msra.mxu1 %v13100_v24 }
 0x49d   :  { %7821 = vmatmul.mubr.bf16.gmra.mrb[136].mxu0 %v13519_v30  ;;  %10906 = vmatprep.subr.bf16.mxu1 %v13104_v38  ;;  %v13086_v30 = vld [vmem:[#allocation5 + $0x754] ss:$40 sps:$4 sm:$0xff]  }
 0x49e   :  { %8440 = vmatmul.mubr.bf16.gmra.mrb[136].mxu1 %v16360_v10  ;;  %7830 = vmatprep.mubr.bf16.mxu0 %v13521_v31  ;;  %v13112_v10 = vld [vmem:[#allocation7 + $0x30] sm:$0xff]   ;;  %v13113_v31 = vld [vmem:[#allocation7 + $0x78] sm:$0xff]  }
 0x49f   :  { %8449 = vmatprep.mubr.bf16.mxu1 %v16361_v41  ;;  %7970 = vmatpush1.bf16.msra.mxu0 %v13075_v32  ;;  %v13084_v41 = vld [vmem:[#allocation5 + $0x750] ss:$40 sps:$4 sm:$0xff]  }
 0x4a0   :  { %7971 = vmatprep.subr.bf16.mxu0 %v13080_v27  ;;  %10907 = vmatpush3.bf16.msra.mxu1 %v13105_v35 }
 0x4a1   :  { %10908 = vmatprep.subr.bf16.mxu1 %v13106_v15 }
 0x4a3   :  { %7972 = vmatpush1.bf16.msra.mxu0 %v13078_v49 }
 0x4a4   :  { %7973 = vmatprep.subr.bf16.mxu0 %v13083_v25  ;;  %10909 = vmatpush3.bf16.msra.mxu1 %v13107_v62  ;;  %v16380_v62 = vld [vmem:[#allocation112_spill] sm:$0xff] }
 0x4a5   :  { %7831 = vmatmul.mubr.bf16.gmra.mrb[140].mxu0 %v13527_v42  ;;  %10910 = vmatprep.subr.bf16.mxu1 %v13111_v7  ;;  %v13094_v42 = vld [vmem:[#allocation5 + $0x7f0] ss:$40 sps:$4 sm:$0xff]  }
 0x4a6   :  { %8450 = vmatmul.mubr.bf16.gmra.mrb[140].mxu1 %v13943_v45  ;;  %7840 = vmatprep.mubr.bf16.mxu0 %v13529_v43  ;;  %v13103_v43 = vld [vmem:[#allocation5 + $0x844] ss:$40 sps:$4 sm:$0xff]   ;;  %v13101_v45 = vld [vmem:[#allocation5 + $0x840] ss:$40 sps:$4 sm:$0xff]  }
 0x4a7   :  { %8459 = vmatprep.mubr.bf16.mxu1 %v13945_v21  ;;  %7974 = vmatpush1.bf16.msra.mxu0 %v13081_v16  ;;  %v13110_v21 = vld [vmem:[#allocation5 + $0x894] ss:$40 sps:$4 sm:$0xff]   ;;  %v8550_v16 = vmul.f32 %v16380_v62, %v16380_v62 }
 0x4a8   :  { %7975 = vmatprep.subr.bf16.mxu0 %v13086_v30  ;;  %10911 = vmatpush3.bf16.msra.mxu1 %v13112_v10  ;;  %v16381_v7 = vld [vmem:[#allocation114_spill] sm:$0xff] }
 0x4a9   :  { %10912 = vmatprep.subr.bf16.mxu1 %v13113_v31  ;;  %v16382_v31 = vld [vmem:[#allocation113_spill] sm:$0xff] }
 0x4ab   :  { %7976 = vmatpush1.bf16.msra.mxu0 %v13084_v41  ;;  %v16383_v41 = vld [vmem:[#allocation116_spill] sm:$0xff] }
 0x4ac   :  { %7977 = vmatprep.subr.bf16.mxu0 %v13089_v61  ;;  %10913 = vmatpush3.bf16.msra.mxu1 %v13114_v9  ;;  %v8555_v61 = vmul.f32 %v16383_v41, %v16383_v41 }
 0x4ad   :  { %7841 = vmatmul.mubr.bf16.gmra.mrb[144].mxu0 %v13535_v55  ;;  %v13108_v55 = vld [vmem:[#allocation5 + $0x890] ss:$40 sps:$4 sm:$0xff]  }
 0x4ae   :  { %8460 = vmatmul.mubr.bf16.gmra.mrb[144].mxu1 %v13951_v34  ;;  %7850 = vmatprep.mubr.bf16.mxu0 %v13537_v56  ;;  %v13117_v56 = vld [vmem:[#allocation5 + $0x8e4] ss:$40 sps:$4 sm:$0xff]   ;;  %v13115_v34 = vld [vmem:[#allocation5 + $0x8e0] ss:$40 sps:$4 sm:$0xff]  }
 0x4af   :  { %8469 = vmatprep.mubr.bf16.mxu1 %v13953_v29  ;;  %7978 = vmatpush1.bf16.msra.mxu0 %v13087_v26  ;;  %v13120_v29 = vld [vmem:[#allocation5 + $0x934] ss:$40 sps:$4 sm:$0xff]  }
 0x4b0   :  { %7979 = vmatprep.subr.bf16.mxu0 %v13096_v46 }
 0x4b3   :  { %7980 = vmatpush1.bf16.msra.mxu0 %v13094_v42 }
 0x4b4   :  { %7981 = vmatprep.subr.bf16.mxu0 %v13103_v43  ;;  %v16385_v43 = vld [vmem:[#allocation117_spill] sm:$0xff] }
 0x4b5   :  { %7851 = vmatmul.mubr.bf16.gmra.mrb[148].mxu0 %v13543_v3  ;;  %v13118_v3 = vld [vmem:[#allocation5 + $0x930] ss:$40 sps:$4 sm:$0xff]  }
 0x4b6   :  { %8470 = vmatmul.mubr.bf16.gmra.mrb[148].mxu1 %v13959_v39  ;;  %7860 = vmatprep.mubr.bf16.mxu0 %v13545_v4  ;;  %v13123_v4 = vld [vmem:[#allocation5 + $0x984] ss:$40 sps:$4 sm:$0xff]   ;;  %v13121_v39 = vld [vmem:[#allocation5 + $0x980] ss:$40 sps:$4 sm:$0xff]  }
 0x4b7   :  { %8479 = vmatprep.mubr.bf16.mxu1 %v13961_v13  ;;  %7982 = vmatpush1.bf16.msra.mxu0 %v13101_v45  ;;  %v13126_v13 = vld [vmem:[#allocation5 + $0x9d4] ss:$40 sps:$4 sm:$0xff]   ;;  %v8557_v45 = vmul.f32 %v16385_v43, %v16385_v43  ;;  %v16400_v43 = vld [vmem:[#allocation128_spill] sm:$0xff] }
 0x4b8   :  { %7983 = vmatprep.subr.bf16.mxu0 %v13110_v21  ;;  %v16386_v21 = vld [vmem:[#allocation118_spill] sm:$0xff] }
 0x4bb   :  { %7984 = vmatpush1.bf16.msra.mxu0 %v13108_v55  ;;  %v8556_v55 = vmul.f32 %v16386_v21, %v16386_v21  ;;  %v16401_v21 = vld [vmem:[#allocation130_spill] sm:$0xff] }
 0x4bc   :  { %7985 = vmatprep.subr.bf16.mxu0 %v13117_v56 }
 0x4bd   :  { %7861 = vmatmul.mubr.bf16.gmra.mrb[152].mxu0 %v13551_v17  ;;  %v13124_v17 = vld [vmem:[#allocation5 + $0x9d0] ss:$40 sps:$4 sm:$0xff]  }
 0x4be   :  { %8480 = vmatmul.mubr.bf16.gmra.mrb[152].mxu1 %v13967_v1  ;;  %7870 = vmatprep.mubr.bf16.mxu0 %v13553_v22  ;;  %v13129_v22 = vld [vmem:[#allocation5 + $0xa24] ss:$40 sps:$4 sm:$0xff]  }
 0x4bf   :  { %8489 = vmatprep.mubr.bf16.mxu1 %v16362_v40  ;;  %7986 = vmatpush1.bf16.msra.mxu0 %v13115_v34 }
 0x4c0   :  { %7987 = vmatprep.subr.bf16.mxu0 %v13120_v29 }
 0x4c3   :  { %7988 = vmatpush1.bf16.msra.mxu0 %v13118_v3 }
 0x4c4   :  { %7989 = vmatprep.subr.bf16.mxu0 %v13123_v4 }
 0x4c5   :  { %7871 = vmatmul.mubr.bf16.gmra.mrb[156].mxu0 %v13559_v33 }
 0x4c6   :  { %8490 = vmatmul.mubr.bf16.gmra.mrb[156].mxu1 %v16363_v23  ;;  %7880 = vmatprep.mubr.bf16.mxu0 %v13561_v36 }
 0x4c7   :  { %8499 = vmatprep.mubr.bf16.mxu1 %v16364_v18  ;;  %7990 = vmatpush1.bf16.msra.mxu0 %v13121_v39 }
 0x4c8   :  { %7991 = vmatprep.subr.bf16.mxu0 %v13126_v13 }
 0x4cb   :  { %7992 = vmatpush1.bf16.msra.mxu0 %v13124_v17 }
 0x4cc   :  { %8154 = vmatprep.subr.bf16.mxu0 %v13129_v22 }
 0x4cd   :  { %7881 = vmatmul.mubr.bf16.gmra.mrb[160].mxu0 %v13567_v47  ;;  %v8540_v47 = vmul.f32 %v14057_v58, %v14057_v58  ;;  %v8547_v58 = vmul.f32 %v14067_v52, %v14067_v52 }
 0x4ce   :  { %8500 = vmatmul.mubr.bf16.gmra.mrb[160].mxu1 %v16365_v51  ;;  %7890 = vmatprep.mubr.bf16.mxu0 %v13569_v48  ;;  %v8541_v48 = vmul.f32 %v14061_v57, %v14061_v57  ;;  %v16376_v51 = vld [vmem:[#allocation110_spill] sm:$0xff] }
 0x4cf   :  { %8509 = vmatprep.mubr.bf16.mxu1 %v13985_v20  ;;  %v8546_v57 = vmul.f32 %v16376_v51, %v16376_v51 }
 0x4d5   :  { %7891 = vmatmul.mubr.bf16.gmra.mrb[164].mxu0 %v13575_v53 }
 0x4d6   :  { %8510 = vmatmul.mubr.bf16.gmra.mrb[164].mxu1 %v16366_v28  ;;  %7900 = vmatprep.mubr.bf16.mxu0 %v13577_v54 }
 0x4d7   :  { %8519 = vmatprep.mubr.bf16.mxu1 %v16367_v37 }
 0x4dd   :  { %7901 = vmatmul.mubr.bf16.gmra.mrb[168].mxu0 %v13583_v59  ;;  %v8542_v59 = vmul.f32 %v14059_v2, %v14059_v2 }
 0x4de   :  { %8520 = vmatmul.mubr.bf16.gmra.mrb[168].mxu1 %v16368_v50  ;;  %7910 = vmatprep.mubr.bf16.mxu0 %v13585_v60  ;;  %v8545_v60 = vmul.f32 %v14065_v19, %v14065_v19 }
 0x4df   :  { %8529 = vmatprep.mubr.bf16.mxu1 %v16369_v8 }
 0x4e0   :  { %v14569_v33 = vpop.f32.mrb[64].mxu0 }
 0x4e1   :  { %16374 = vst [vmem:[#allocation93_spill] sm:$0xff] %v14569_v33  ;;  %v7609_v36 = vpop.f32.mrb[64].mxu1  ;;  %v6839_v54 = vpop.f32.mrb[65].mxu0 }
 0x4e2   :  { %v8701_v53 = vmul.f32 %v7609_v36, %v7609_v36  ;;  %v7611_v1 = vpop.f32.mrb[65].mxu1  ;;  %v8700_v20 = vmul.f32 %v6839_v54, %v6839_v54  ;;  %v14579_v23 = vpop.f32.mrb[66].mxu0 }
 0x4e3   :  { %v8702_v40 = vmul.f32 %v7611_v1, %v7611_v1  ;;  %16375 = vst [vmem:[#allocation94_spill] sm:$0xff] %v14579_v23  ;;  %v7613_v18 = vpop.f32.mrb[66].mxu1  ;;  %v6843_v50 = vpop.f32.mrb[67].mxu0  ;;  %v16553_v23 = vld [vmem:[#allocation58_spill] sm:$0xff] }
 0x4e4   :  { %v8861_v28 = vadd.f32 %v8701_v53, %v8541_v48  ;;  %v8706_v37 = vmul.f32 %v7613_v18, %v7613_v18  ;;  %v7615_v8 = vpop.f32.mrb[67].mxu1  ;;  %v8860_v14 = vadd.f32 %v8700_v20, %v8540_v47  ;;  %v8705_v24 = vmul.f32 %v6843_v50, %v6843_v50 }
 0x4e5   :  { %v14585_v2 = vadd.f32 %v8702_v40, %v8542_v59  ;;  %v8707_v19 = vmul.f32 %v7615_v8, %v7615_v8  ;;  %7911 = vmatmul.mubr.bf16.gmra.mrb[172].mxu0 %v13591_v63  ;;  %v8551_v63 = vmul.f32 %v16381_v7, %v16381_v7  ;;  %v16391_v40 = vld [vmem:[#allocation122_spill] sm:$0xff] }
 0x4e6   :  { %v8866_v32 = vadd.f32 %v8706_v37, %v8546_v57  ;;  %8530 = vmatmul.mubr.bf16.gmra.mrb[172].mxu1 %v16370_v44  ;;  %v8865_v38 = vadd.f32 %v8705_v24, %v8545_v60  ;;  %7920 = vmatprep.mubr.bf16.mxu0 %v13593_v0  ;;  %v8552_v0 = vmul.f32 %v16382_v31, %v16382_v31  ;;  %v16390_v60 = vld [vmem:[#allocation120_spill] sm:$0xff]  ;;  %v16392_v57 = vld [vmem:[#allocation121_spill] sm:$0xff] }
 0x4e7   :  { %16377 = vst [vmem:[#allocation95_spill] sm:$0xff] %v14585_v2  ;;  %v14589_v27 = vadd.f32 %v8707_v19, %v8547_v58  ;;  %v8560_v20 = vmul.f32 %v16390_v60, %v16390_v60  ;;  %v16395_v19 = vld [vmem:[#allocation125_spill] sm:$0xff] }
 0x4e8   :  { %v9021_v52 = vpack.c.bf16 %v8866_v32, %v8861_v28  ;;  %v9020_v35 = vpack.c.bf16 %v8865_v38, %v8860_v14  ;;  %v14594_v49 = vpop.f32.mrb[68].mxu0  ;;  %v16393_v28 = vld [vmem:[#allocation124_spill] sm:$0xff]  ;;  %v8567_v32 = vmul.f32 %v16395_v19, %v16395_v19  ;;  %v16396_v38 = vld [vmem:[#allocation126_spill] sm:$0xff] }
 0x4e9   :  { %16378 = vst [vmem:[#allocation96_spill] sm:$0xff] %v14589_v27  ;;  %16379 = vst [vmem:[#allocation97_spill] sm:$0xff] %v14594_v49  ;;  %v7619_v25 = vpop.f32.mrb[68].mxu1  ;;  %v6849_v30 = vpop.f32.mrb[69].mxu0  ;;  %v8565_v37 = vmul.f32 %v16393_v28, %v16393_v28  ;;  %v13270_v27 = vld [vmem:[#allocation5 + $0x1010] ss:$40 sps:$4 sm:$0xff]  }
 0x4ea   :  { %v8711_v44 = vmul.f32 %v7619_v25, %v7619_v25  ;;  %v7621_v10 = vpop.f32.mrb[69].mxu1  ;;  %9452 = vmatprep.mubr.bf16.mxu1 %v9021_v52  ;;  %v8710_v9 = vmul.f32 %v6849_v30, %v6849_v30  ;;  %v14604_v46 = vpop.f32.mrb[70].mxu0  ;;  %v8566_v52 = vmul.f32 %v16396_v38, %v16396_v38  ;;  %v13271_v49 = vld [vmem:[#allocation5 + $0x1064] ss:$40 sps:$4 sm:$0xff]  }
 0x4eb   :  { %v8712_v26 = vmul.f32 %v7621_v10, %v7621_v10  ;;  %16384 = vst [vmem:[#allocation98_spill] sm:$0xff] %v14604_v46  ;;  %v7623_v42 = vpop.f32.mrb[70].mxu1  ;;  %v6853_v29 = vpop.f32.mrb[71].mxu0  ;;  %v16551_v46 = vld [vmem:[#allocation56_spill] sm:$0xff] }
 0x4ec   :  { %v8871_v56 = vadd.f32 %v8711_v44, %v8551_v63  ;;  %v8716_v34 = vmul.f32 %v7623_v42, %v7623_v42  ;;  %v7625_v3 = vpop.f32.mrb[71].mxu1  ;;  %v8870_v4 = vadd.f32 %v8710_v9, %v8550_v16  ;;  %v8715_v13 = vmul.f32 %v6853_v29, %v6853_v29  ;;  %v16402_v29 = vld [vmem:[#allocation129_spill] sm:$0xff] }
 0x4ed   :  { %v14610_v39 = vadd.f32 %v8712_v26, %v8552_v0  ;;  %v8717_v17 = vmul.f32 %v7625_v3, %v7625_v3  ;;  %7921 = vmatmul.mubr.bf16.gmra.mrb[176].mxu0 %v13599_v5  ;;  %v8561_v5 = vmul.f32 %v16391_v40, %v16391_v40  ;;  %v16403_v3 = vld [vmem:[#allocation132_spill] sm:$0xff]  ;;  %v16460_v42 = vld [vmem:[#allocation29_spill] sm:$0xff] }
 0x4ee   :  { %v8876_v22 = vadd.f32 %v8716_v34, %v8556_v55  ;;  %9453 = vmatmul.mubr.bf16.vlgmr.msra.gmra.mrb[176].mxu1 %v9020_v35  ;;  %v8875_v36 = vadd.f32 %v8715_v13, %v8555_v61  ;;  %7930 = vmatprep.mubr.bf16.mxu0 %v13601_v6  ;;  %v8562_v6 = vmul.f32 %v16392_v57, %v16392_v57 }
 0x4ef   :  { %16387 = vst [vmem:[#allocation99_spill] sm:$0xff] %v14610_v39  ;;  %v14613_v47 = vadd.f32 %v8717_v17, %v8557_v45  ;;  %v8570_v45 = vmul.f32 %v16400_v43, %v16400_v43 }
 0x4f0   :  { %v9026_v48 = vpack.c.bf16 %v8876_v22, %v8871_v56  ;;  %v14616_v53 = vpop.f32.mrb[72].mxu0  ;;  %v9025_v1 = vpack.c.bf16 %v8875_v36, %v8870_v4  ;;  %v8575_v4 = vmul.f32 %v16403_v3, %v16403_v3 }
 0x4f1   :  { %16388 = vst [vmem:[#allocation100_spill] sm:$0xff] %v14613_v47  ;;  %16389 = vst [vmem:[#allocation101_spill] sm:$0xff] %v14616_v53  ;;  %v7629_v54 = vpop.f32.mrb[72].mxu1  ;;  %v6859_v58 = vpop.f32.mrb[73].mxu0  ;;  %v13267_v47 = vld [vmem:[#allocation5 + $0xfc4] ss:$40 sps:$4 sm:$0xff]  }
 0x4f2   :  { %v8721_v18 = vmul.f32 %v7629_v54, %v7629_v54  ;;  %v7631_v51 = vpop.f32.mrb[73].mxu1  ;;  %9460 = vmatprep.mubr.bf16.mxu1 %v9026_v48  ;;  %v8720_v50 = vmul.f32 %v6859_v58, %v6859_v58  ;;  %v14628_v14 = vpop.f32.mrb[74].mxu0  ;;  %v16405_v48 = vld [vmem:[#allocation133_spill] sm:$0xff] }
 0x4f3   :  { %v8722_v8 = vmul.f32 %v7631_v51, %v7631_v51  ;;  %16394 = vst [vmem:[#allocation102_spill] sm:$0xff] %v14628_v14  ;;  %v7633_v24 = vpop.f32.mrb[74].mxu1  ;;  %v6863_v62 = vpop.f32.mrb[75].mxu0  ;;  %v8577_v54 = vmul.f32 %v16405_v48, %v16405_v48 }
 0x4f4   :  { %v8881_v35 = vadd.f32 %v8721_v18, %v8561_v5  ;;  %v8726_v25 = vmul.f32 %v7633_v24, %v7633_v24  ;;  %v7635_v16 = vpop.f32.mrb[75].mxu1  ;;  %v8880_v7 = vadd.f32 %v8720_v50, %v8560_v20  ;;  %v8725_v44 = vmul.f32 %v6863_v62, %v6863_v62  ;;  %v16410_v24 = vld [vmem:[#allocation19_spill] sm:$0xff] }
 0x4f5   :  { %v14634_v63 = vadd.f32 %v8722_v8, %v8562_v6  ;;  %v8727_v30 = vmul.f32 %v7635_v16, %v7635_v16  ;;  %7931 = vmatmul.mubr.bf16.gmra.mrb[180].mxu0 %v13607_v11  ;;  %v8571_v11 = vmul.f32 %v16401_v21, %v16401_v21  ;;  %v16412_v16 = vld [vmem:[#allocation138_spill] sm:$0xff] }
 0x4f6   :  { %v8886_v10 = vadd.f32 %v8726_v25, %v8566_v52  ;;  %9461 = vmatmul.mubr.bf16.gmra.mrb[180].mxu1 %v9025_v1  ;;  %v8885_v31 = vadd.f32 %v8725_v44, %v8565_v37  ;;  %7940 = vmatprep.mubr.bf16.mxu0 %v13609_v12  ;;  %v8572_v12 = vmul.f32 %v16402_v29, %v16402_v29  ;;  %v16406_v1 = vld [vmem:[#allocation134_spill] sm:$0xff]  ;;  %v16411_v25 = vld [vmem:[#allocation136_spill] sm:$0xff] }
 0x4f7   :  { %16397 = vst [vmem:[#allocation103_spill] sm:$0xff] %v14634_v63  ;;  %v14637_v0 = vadd.f32 %v8727_v30, %v8567_v32  ;;  %v8576_v60 = vmul.f32 %v16406_v1, %v16406_v1  ;;  %v16408_v37 = vld [vmem:[#allocation18_spill] sm:$0xff]  ;;  %v8580_v62 = vmul.f32 %v16411_v25, %v16411_v25 }
 0x4f8   :  { %v9031_v41 = vpack.c.bf16 %v8886_v10, %v8881_v35  ;;  %v14640_v61 = vpop.f32.mrb[76].mxu0  ;;  %v9030_v26 = vpack.c.bf16 %v8885_v31, %v8880_v7  ;;  %v8581_v7 = vmul.f32 %v16412_v16, %v16412_v16  ;;  %v16413_v31 = vld [vmem:[#allocation137_spill] sm:$0xff]  ;;  %v13264_v63 = vld [vmem:[#allocation5 + $0xf20] ss:$40 sps:$4 sm:$0xff]  }
 0x4f9   :  { %16398 = vst [vmem:[#allocation104_spill] sm:$0xff] %v14637_v0  ;;  %16399 = vst [vmem:[#allocation105_spill] sm:$0xff] %v14640_v61  ;;  %v7639_v9 = vpop.f32.mrb[76].mxu1  ;;  %v6869_v56 = vpop.f32.mrb[77].mxu0  ;;  %v16550_v0 = vld [vmem:[#allocation55_spill] sm:$0xff] }
 0x4fa   :  { %v8731_v55 = vmul.f32 %v7639_v9, %v7639_v9  ;;  %v7641_v34 = vpop.f32.mrb[77].mxu1  ;;  %9468 = vmatprep.mubr.bf16.mxu1 %v9031_v41  ;;  %v8730_v13 = vmul.f32 %v6869_v56, %v6869_v56  ;;  %v14652_v22 = vpop.f32.mrb[78].mxu0  ;;  %v8582_v41 = vmul.f32 %v16413_v31, %v16413_v31  ;;  %v16414_v9 = vld [vmem:[#allocation140_spill] sm:$0xff]  ;;  %v13265_v61 = vld [vmem:[#allocation5 + $0xf74] ss:$40 sps:$4 sm:$0xff]  }
 0x4fb   :  { %v8732_v17 = vmul.f32 %v7641_v34, %v7641_v34  ;;  %16404 = vst [vmem:[#allocation106_spill] sm:$0xff] %v14652_v22  ;;  %v7643_v36 = vpop.f32.mrb[78].mxu1  ;;  %v6873_v5 = vpop.f32.mrb[79].mxu0  ;;  %v16416_v34 = vld [vmem:[#allocation142_spill] sm:$0xff] }
 0x4fc   :  { %v8891_v20 = vadd.f32 %v8731_v55, %v8571_v11  ;;  %v8736_v40 = vmul.f32 %v7643_v36, %v7643_v36  ;;  %v7645_v18 = vpop.f32.mrb[79].mxu1  ;;  %v8890_v58 = vadd.f32 %v8730_v13, %v8570_v45  ;;  %v8735_v57 = vmul.f32 %v6873_v5, %v6873_v5  ;;  %v16415_v55 = vld [vmem:[#allocation141_spill] sm:$0xff] }
 0x4fd   :  { %v14658_v51 = vadd.f32 %v8732_v17, %v8572_v12  ;;  %v8737_v6 = vmul.f32 %v7645_v18, %v7645_v18  ;;  %7941 = vmatmul.mubr.bf16.gmra.mrb[184].mxu0 %v16408_v37  ;;  %v8587_v56 = vmul.f32 %v16415_v55, %v16415_v55  ;;  %v8586_v29 = vmul.f32 %v16416_v34, %v16416_v34  ;;  %v16420_v5 = vld [vmem:[#allocation21_spill] sm:$0xff]  ;;  %v16421_v37 = vld [vmem:[#allocation144_spill] sm:$0xff] }
 0x4fe   :  { %v8896_v28 = vadd.f32 %v8736_v40, %v8576_v60  ;;  %9469 = vmatmul.mubr.bf16.gmra.mrb[184].mxu1 %v9030_v26  ;;  %v8895_v50 = vadd.f32 %v8735_v57, %v8575_v4  ;;  %7950 = vmatprep.mubr.bf16.mxu0 %v16410_v24  ;;  %v8585_v26 = vmul.f32 %v16414_v9, %v16414_v9  ;;  %v16418_v60 = vld [vmem:[#allocation20_spill] sm:$0xff]  ;;  %v16422_v24 = vld [vmem:[#allocation146_spill] sm:$0xff] }
 0x4ff   :  { %16407 = vst [vmem:[#allocation107_spill] sm:$0xff] %v14658_v51  ;;  %v14661_v8 = vadd.f32 %v8737_v6, %v8577_v54  ;;  %v13127_v9 = vld [vmem:[#allocation5 + $0xa20] ss:$40 sps:$4 sm:$0xff]  }
 0x500   :  { %v9036_v19 = vpack.c.bf16 %v8896_v28, %v8891_v20  ;;  %v14664_v32 = vpop.f32.mrb[80].mxu0  ;;  %v9035_v52 = vpack.c.bf16 %v8895_v50, %v8890_v58  ;;  %v8590_v50 = vmul.f32 %v16421_v37, %v16421_v37 }
 0x501   :  { %16409 = vst [vmem:[#allocation108_spill] sm:$0xff] %v14661_v8  ;;  %v7649_v38 = vpop.f32.mrb[80].mxu1  ;;  %v6879_v30 = vpop.f32.mrb[81].mxu0 }
 0x502   :  { %v8741_v44 = vmul.f32 %v7649_v38, %v7649_v38  ;;  %v7651_v10 = vpop.f32.mrb[81].mxu1  ;;  %9476 = vmatprep.mubr.bf16.mxu1 %v9036_v19  ;;  %v8740_v43 = vmul.f32 %v6879_v30, %v6879_v30  ;;  %v14676_v21 = vpop.f32.mrb[82].mxu0  ;;  %v8591_v19 = vmul.f32 %v16422_v24, %v16422_v24 }
 0x503   :  { %v8742_v45 = vmul.f32 %v7651_v10, %v7651_v10  ;;  %v7653_v11 = vpop.f32.mrb[82].mxu1  ;;  %v6883_v4 = vpop.f32.mrb[83].mxu0 }
 0x504   :  { %v8901_v12 = vadd.f32 %v8741_v44, %v8581_v7  ;;  %v8746_v3 = vmul.f32 %v7653_v11, %v7653_v11  ;;  %v7655_v13 = vpop.f32.mrb[83].mxu1  ;;  %v8900_v17 = vadd.f32 %v8740_v43, %v8580_v62  ;;  %v8745_v48 = vmul.f32 %v6883_v4, %v6883_v4  ;;  %v16423_v62 = vld [vmem:[#allocation145_spill] sm:$0xff]  ;;  %v16424_v7 = vld [vmem:[#allocation148_spill] sm:$0xff] }
 0x505   :  { %v14682_v36 = vadd.f32 %v8742_v45, %v8582_v41  ;;  %v8747_v54 = vmul.f32 %v7655_v13, %v7655_v13  ;;  %7951 = vmatmul.mubr.bf16.gmra.mrb[188].mxu0 %v16418_v60  ;;  %v8592_v16 = vmul.f32 %v16423_v62, %v16423_v62  ;;  %v8595_v44 = vmul.f32 %v16424_v7, %v16424_v7  ;;  %v16426_v45 = vld [vmem:[#allocation150_spill] sm:$0xff] }
 0x506   :  { %v8906_v1 = vadd.f32 %v8746_v3, %v8586_v29  ;;  %9477 = vmatmul.mubr.bf16.gmra.mrb[188].mxu1 %v9035_v52  ;;  %v8905_v20 = vadd.f32 %v8745_v48, %v8585_v26  ;;  %7993 = vmatprep.mubr.bf16.mxu0 %v16420_v5  ;;  %v16425_v26 = vld [vmem:[#allocation149_spill] sm:$0xff]  ;;  %v8596_v11 = vmul.f32 %v16426_v45, %v16426_v45 }
 0x507   :  { %16417 = vst [vmem:[#allocation15_spill] sm:$0xff] %v14682_v36  ;;  %v14685_v40 = vadd.f32 %v8747_v54, %v8587_v56  ;;  %v8597_v43 = vmul.f32 %v16425_v26, %v16425_v26  ;;  %v16428_v54 = vld [vmem:[#allocation22_spill] sm:$0xff] }
 0x508   :  { %v9041_v18 = vpack.c.bf16 %v8906_v1, %v8901_v12  ;;  %v14690_v57 = vpop.f32.mrb[84].mxu0  ;;  %v9040_v28 = vpack.c.bf16 %v8905_v20, %v8900_v17  ;;  %v13132_v12 = vld [vmem:[#allocation5 + $0xa74] ss:$40 sps:$4 sm:$0xff]   ;;  %v16430_v20 = vld [vmem:[#allocation23_spill] sm:$0xff]  ;;  %v13130_v5 = vld [vmem:[#allocation5 + $0xa70] ss:$40 sps:$4 sm:$0xff]  }
 0x509   :  { %16419 = vst [vmem:[#allocation16_spill] sm:$0xff] %v14685_v40  ;;  %v7659_v6 = vpop.f32.mrb[84].mxu1  ;;  %v6889_v52 = vpop.f32.mrb[85].mxu0 }
 0x50a   :  { %v8751_v38 = vmul.f32 %v7659_v6, %v7659_v6  ;;  %v7661_v25 = vpop.f32.mrb[85].mxu1  ;;  %9484 = vmatprep.mubr.bf16.mxu1 %v9041_v18  ;;  %v8750_v30 = vmul.f32 %v6889_v52, %v6889_v52  ;;  %v14700_v31 = vpop.f32.mrb[86].mxu0  ;;  %v13135_v6 = vld [vmem:[#allocation5 + $0xac4] ss:$40 sps:$4 sm:$0xff]   ;;  %v16432_v52 = vld [vmem:[#allocation154_spill] sm:$0xff] }
 0x50b   :  { %v8752_v10 = vmul.f32 %v7661_v25, %v7661_v25  ;;  %v7663_v41 = vpop.f32.mrb[86].mxu1  ;;  %v6893_v34 = vpop.f32.mrb[87].mxu0  ;;  %v8601_v25 = vmul.f32 %v16432_v52, %v16432_v52 }
 0x50c   :  { %v8911_v55 = vadd.f32 %v8751_v38, %v8591_v19  ;;  %v8756_v56 = vmul.f32 %v7663_v41, %v7663_v41  ;;  %v7665_v29 = vpop.f32.mrb[87].mxu1  ;;  %v8910_v3 = vadd.f32 %v8750_v30, %v8590_v50  ;;  %v8755_v13 = vmul.f32 %v6893_v34, %v6893_v34  ;;  %v16431_v38 = vld [vmem:[#allocation152_spill] sm:$0xff]  ;;  %v16436_v34 = vld [vmem:[#allocation158_spill] sm:$0xff] }
 0x50d   :  { %v14706_v4 = vadd.f32 %v8752_v10, %v8592_v16  ;;  %v8757_v17 = vmul.f32 %v7665_v29, %v7665_v29  ;;  %7994 = vmatmul.mubr.bf16.vlgmr.msra.gmra.mrb[128].mxu0 %v16428_v54  ;;  %v16434_v10 = vld [vmem:[#allocation156_spill] sm:$0xff]  ;;  %v8606_v29 = vmul.f32 %v16436_v34, %v16436_v34 }
 0x50e   :  { %v8916_v48 = vadd.f32 %v8756_v56, %v8596_v11  ;;  %9485 = vmatmul.mubr.bf16.gmra.mrb[192].mxu1 %v9040_v28  ;;  %v8915_v1 = vadd.f32 %v8755_v13, %v8595_v44  ;;  %8155 = vmatpush1.bf16.msra.mxu0 %v13127_v9  ;;  %v8600_v28 = vmul.f32 %v16431_v38, %v16431_v38  ;;  %v16433_v44 = vld [vmem:[#allocation153_spill] sm:$0xff]  ;;  %v13133_v11 = vld [vmem:[#allocation5 + $0xac0] ss:$40 sps:$4 sm:$0xff]  }
 0x50f   :  { %16427 = vst [vmem:[#allocation17_spill] sm:$0xff] %v14706_v4  ;;  %v14709_v60 = vadd.f32 %v8757_v17, %v8597_v43  ;;  %8003 = vmatprep.mubr.bf16.mxu0 %v16430_v20  ;;  %8156 = vmatprep.subr.bf16.mxu0 %v13132_v12  ;;  %v8602_v30 = vmul.f32 %v16433_v44, %v16433_v44  ;;  %v16444_v34 = vld [vmem:[#allocation164_spill] sm:$0xff] }
 0x510   :  { %v9046_v18 = vpack.c.bf16 %v8916_v48, %v8911_v55  ;;  %v14714_v50 = vpop.f32.mrb[88].mxu0  ;;  %v9045_v19 = vpack.c.bf16 %v8915_v1, %v8910_v3  ;;  %v8605_v41 = vmul.f32 %v16434_v10, %v16434_v10  ;;  %v16435_v55 = vld [vmem:[#allocation157_spill] sm:$0xff]  ;;  %v16441_v10 = vld [vmem:[#allocation160_spill] sm:$0xff] }
 0x511   :  { %16429 = vst [vmem:[#allocation110_spill] sm:$0xff] %v14709_v60  ;;  %v7669_v24 = vpop.f32.mrb[88].mxu1  ;;  %v6899_v16 = vpop.f32.mrb[89].mxu0  ;;  %v8607_v56 = vmul.f32 %v16435_v55, %v16435_v55  ;;  %v13138_v48 = vld [vmem:[#allocation5 + $0xb14] ss:$40 sps:$4 sm:$0xff]  }
 0x512   :  { %v8761_v62 = vmul.f32 %v7669_v24, %v7669_v24  ;;  %v7671_v7 = vpop.f32.mrb[89].mxu1  ;;  %9492 = vmatprep.mubr.bf16.mxu1 %v9046_v18  ;;  %v8760_v9 = vmul.f32 %v6899_v16, %v6899_v16  ;;  %v14724_v43 = vpop.f32.mrb[90].mxu0  ;;  %8157 = vmatpush1.bf16.msra.mxu0 %v13130_v5  ;;  %v16438_v5 = vld [vmem:[#allocation24_spill] sm:$0xff]  ;;  %v16440_v16 = vld [vmem:[#allocation25_spill] sm:$0xff] }
 0x513   :  { %v8762_v26 = vmul.f32 %v7671_v7, %v7671_v7  ;;  %v7673_v45 = vpop.f32.mrb[90].mxu1  ;;  %v6903_v13 = vpop.f32.mrb[91].mxu0  ;;  %8158 = vmatprep.subr.bf16.mxu0 %v13135_v6  ;;  %v13141_v6 = vld [vmem:[#allocation5 + $0xb64] ss:$40 sps:$4 sm:$0xff]   ;;  %v16443_v55 = vld [vmem:[#allocation161_spill] sm:$0xff] }
 0x514   :  { %v8921_v12 = vadd.f32 %v8761_v62, %v8601_v25  ;;  %v8766_v3 = vmul.f32 %v7673_v45, %v7673_v45  ;;  %v7675_v17 = vpop.f32.mrb[91].mxu1  ;;  %v8920_v54 = vadd.f32 %v8760_v9, %v8600_v28  ;;  %v8765_v20 = vmul.f32 %v6903_v13, %v6903_v13  ;;  %v13136_v25 = vld [vmem:[#allocation5 + $0xb10] ss:$40 sps:$4 sm:$0xff]   ;;  %v16450_v28 = vld [vmem:[#allocation27_spill] sm:$0xff] }
 0x515   :  { %v14730_v1 = vadd.f32 %v8762_v26, %v8602_v30  ;;  %v8767_v18 = vmul.f32 %v7675_v17, %v7675_v17  ;;  %8004 = vmatmul.mubr.bf16.gmra.mrb[132].mxu0 %v16438_v5  ;;  %v16502_v60 = vld [vmem:[#allocation37_spill] sm:$0xff] }
 0x516   :  { %v8926_v24 = vadd.f32 %v8766_v3, %v8606_v29  ;;  %9493 = vmatmul.mubr.bf16.gmra.mrb[196].mxu1 %v9045_v19  ;;  %v8925_v38 = vadd.f32 %v8765_v20, %v8605_v41  ;;  %8013 = vmatprep.mubr.bf16.mxu0 %v16440_v16  ;;  %v8610_v19 = vmul.f32 %v16441_v10, %v16441_v10  ;;  %v16442_v41 = vld [vmem:[#allocation162_spill] sm:$0xff] }
 0x517   :  { %16437 = vst [vmem:[#allocation112_spill] sm:$0xff] %v14730_v1  ;;  %v14733_v52 = vadd.f32 %v8767_v18, %v8607_v56  ;;  %8159 = vmatpush1.bf16.msra.mxu0 %v13133_v11  ;;  %v8611_v9 = vmul.f32 %v16442_v41, %v16442_v41  ;;  %v8612_v56 = vmul.f32 %v16443_v55, %v16443_v55  ;;  %v16446_v18 = vld [vmem:[#allocation166_spill] sm:$0xff] }
 0x518   :  { %v9051_v62 = vpack.c.bf16 %v8926_v24, %v8921_v12  ;;  %8160 = vmatprep.subr.bf16.mxu0 %v13138_v48  ;;  %v14738_v7 = vpop.f32.mrb[92].mxu0  ;;  %v9050_v30 = vpack.c.bf16 %v8925_v38, %v8920_v54  ;;  %v8615_v29 = vmul.f32 %v16444_v34, %v16444_v34  ;;  %v13139_v48 = vld [vmem:[#allocation5 + $0xb60] ss:$40 sps:$4 sm:$0xff]   ;;  %v16445_v54 = vld [vmem:[#allocation165_spill] sm:$0xff]  ;;  %v8616_v24 = vmul.f32 %v16446_v18, %v16446_v18 }
 0x519   :  { %16439 = vst [vmem:[#allocation114_spill] sm:$0xff] %v14733_v52  ;;  %v7679_v44 = vpop.f32.mrb[92].mxu1  ;;  %v6909_v45 = vpop.f32.mrb[93].mxu0  ;;  %v8617_v20 = vmul.f32 %v16445_v54, %v16445_v54  ;;  %v16490_v52 = vld [vmem:[#allocation35_spill] sm:$0xff] }
 0x51a   :  { %v8771_v26 = vmul.f32 %v7679_v44, %v7679_v44  ;;  %v7681_v11 = vpop.f32.mrb[93].mxu1  ;;  %9500 = vmatprep.mubr.bf16.mxu1 %v9051_v62  ;;  %v8770_v12 = vmul.f32 %v6909_v45, %v6909_v45  ;;  %v14748_v13 = vpop.f32.mrb[94].mxu0  ;;  %v13144_v44 = vld [vmem:[#allocation5 + $0xbb4] ss:$40 sps:$4 sm:$0xff]  }
 0x51b   :  { %v8772_v3 = vmul.f32 %v7681_v11, %v7681_v11  ;;  %v7683_v17 = vpop.f32.mrb[94].mxu1  ;;  %8161 = vmatpush1.bf16.msra.mxu0 %v13136_v25  ;;  %v6913_v16 = vpop.f32.mrb[95].mxu0  ;;  %v16448_v25 = vld [vmem:[#allocation26_spill] sm:$0xff] }
 0x51c   :  { %v8931_v5 = vadd.f32 %v8771_v26, %v8611_v9  ;;  %v8776_v38 = vmul.f32 %v7683_v17, %v7683_v17  ;;  %v7685_v62 = vpop.f32.mrb[95].mxu1  ;;  %8162 = vmatprep.subr.bf16.mxu0 %v13141_v6  ;;  %v8930_v10 = vadd.f32 %v8770_v12, %v8610_v19  ;;  %v8775_v45 = vmul.f32 %v6913_v16, %v6913_v16  ;;  %v13142_v9 = vld [vmem:[#allocation5 + $0xbb0] ss:$40 sps:$4 sm:$0xff]   ;;  %v13147_v6 = vld [vmem:[#allocation5 + $0xc04] ss:$40 sps:$4 sm:$0xff]  }
 0x51d   :  { %v14754_v41 = vadd.f32 %v8772_v3, %v8612_v56  ;;  %v8777_v11 = vmul.f32 %v7685_v62, %v7685_v62  ;;  %8014 = vmatmul.mubr.bf16.gmra.mrb[136].mxu0 %v16448_v25  ;;  %v16451_v17 = vld [vmem:[#allocation168_spill] sm:$0xff]  ;;  %v13150_v19 = vld [vmem:[#allocation5 + $0xc54] ss:$40 sps:$4 sm:$0xff]  }
 0x51e   :  { %v8936_v55 = vadd.f32 %v8776_v38, %v8616_v24  ;;  %9501 = vmatmul.mubr.bf16.gmra.mrb[200].mxu1 %v9050_v30  ;;  %v8935_v34 = vadd.f32 %v8775_v45, %v8615_v29  ;;  %8023 = vmatprep.mubr.bf16.mxu0 %v16450_v28  ;;  %v8620_v30 = vmul.f32 %v16451_v17, %v16451_v17  ;;  %v16452_v29 = vld [vmem:[#allocation170_spill] sm:$0xff]  ;;  %v16453_v24 = vld [vmem:[#allocation169_spill] sm:$0xff]  ;;  %v16454_v38 = vld [vmem:[#allocation172_spill] sm:$0xff] }
 0x51f   :  { %16447 = vst [vmem:[#allocation113_spill] sm:$0xff] %v14754_v41  ;;  %v14757_v54 = vadd.f32 %v8777_v11, %v8617_v20  ;;  %8163 = vmatpush1.bf16.msra.mxu0 %v13139_v48  ;;  %v8621_v20 = vmul.f32 %v16452_v29, %v16452_v29  ;;  %v8625_v16 = vmul.f32 %v16454_v38, %v16454_v38  ;;  %v13145_v11 = vld [vmem:[#allocation5 + $0xc00] ss:$40 sps:$4 sm:$0xff]  }
 0x520   :  { %v9056_v26 = vpack.c.bf16 %v8936_v55, %v8931_v5  ;;  %8164 = vmatprep.subr.bf16.mxu0 %v13144_v44  ;;  %v14762_v56 = vpop.f32.mrb[96].mxu0  ;;  %v9055_v3 = vpack.c.bf16 %v8935_v34, %v8930_v10  ;;  %v8622_v5 = vmul.f32 %v16453_v24, %v16453_v24  ;;  %v16455_v55 = vld [vmem:[#allocation173_spill] sm:$0xff]  ;;  %v16456_v34 = vld [vmem:[#allocation174_spill] sm:$0xff] }
 0x521   :  { %16449 = vst [vmem:[#allocation116_spill] sm:$0xff] %v14757_v54  ;;  %v7689_v12 = vpop.f32.mrb[96].mxu1  ;;  %v6919_v28 = vpop.f32.mrb[97].mxu0  ;;  %v8627_v25 = vmul.f32 %v16455_v55, %v16455_v55  ;;  %v16480_v54 = vld [vmem:[#allocation33_spill] sm:$0xff] }
 0x522   :  { %v8781_v18 = vmul.f32 %v7689_v12, %v7689_v12  ;;  %v7691_v48 = vpop.f32.mrb[97].mxu1  ;;  %9508 = vmatprep.mubr.bf16.mxu1 %v9056_v26  ;;  %v8780_v62 = vmul.f32 %v6919_v28, %v6919_v28  ;;  %v14772_v45 = vpop.f32.mrb[98].mxu0  ;;  %v8626_v12 = vmul.f32 %v16456_v34, %v16456_v34  ;;  %v16464_v34 = vld [vmem:[#allocation180_spill] sm:$0xff] }
 0x523   :  { %v8782_v44 = vmul.f32 %v7691_v48, %v7691_v48  ;;  %v7693_v10 = vpop.f32.mrb[98].mxu1  ;;  %8165 = vmatpush1.bf16.msra.mxu0 %v13142_v9  ;;  %v6923_v29 = vpop.f32.mrb[99].mxu0  ;;  %v16458_v9 = vld [vmem:[#allocation28_spill] sm:$0xff] }
 0x524   :  { %v8941_v26 = vadd.f32 %v8781_v18, %v8621_v20  ;;  %v8786_v17 = vmul.f32 %v7693_v10, %v7693_v10  ;;  %v7695_v24 = vpop.f32.mrb[99].mxu1  ;;  %8166 = vmatprep.subr.bf16.mxu0 %v13147_v6  ;;  %v8940_v38 = vadd.f32 %v8780_v62, %v8620_v30  ;;  %v8785_v48 = vmul.f32 %v6923_v29, %v6923_v29  ;;  %v13148_v20 = vld [vmem:[#allocation5 + $0xc50] ss:$40 sps:$4 sm:$0xff]   ;;  %v13153_v6 = vld [vmem:[#allocation5 + $0xca4] ss:$40 sps:$4 sm:$0xff]  }
 0x525   :  { %v14778_v28 = vadd.f32 %v8782_v44, %v8622_v5  ;;  %v8787_v37 = vmul.f32 %v7695_v24, %v7695_v24  ;;  %8024 = vmatmul.mubr.bf16.gmra.mrb[140].mxu0 %v16458_v9  ;;  %v16461_v10 = vld [vmem:[#allocation176_spill] sm:$0xff]  ;;  %v16466_v9 = vld [vmem:[#allocation182_spill] sm:$0xff] }
 0x526   :  { %v8946_v58 = vadd.f32 %v8786_v17, %v8626_v12  ;;  %9509 = vmatmul.mubr.bf16.gmra.mrb[204].mxu1 %v9055_v3  ;;  %v8945_v35 = vadd.f32 %v8785_v48, %v8625_v16  ;;  %8033 = vmatprep.mubr.bf16.mxu0 %v16460_v42  ;;  %v8630_v3 = vmul.f32 %v16461_v10, %v16461_v10  ;;  %v16462_v16 = vld [vmem:[#allocation178_spill] sm:$0xff] }
 0x527   :  { %16457 = vst [vmem:[#allocation117_spill] sm:$0xff] %v14778_v28  ;;  %v14781_v55 = vadd.f32 %v8787_v37, %v8627_v25  ;;  %8167 = vmatpush1.bf16.msra.mxu0 %v13145_v11  ;;  %v8631_v37 = vmul.f32 %v16462_v16, %v16462_v16  ;;  %v8635_v12 = vmul.f32 %v16464_v34, %v16464_v34  ;;  %v13151_v24 = vld [vmem:[#allocation5 + $0xca0] ss:$40 sps:$4 sm:$0xff]   ;;  %v13156_v30 = vld [vmem:[#allocation5 + $0xcf4] ss:$40 sps:$4 sm:$0xff]  }
 0x528   :  { %v9061_v18 = vpack.c.bf16 %v8946_v58, %v8941_v26  ;;  %8168 = vmatprep.subr.bf16.mxu0 %v13150_v19  ;;  %v14786_v5 = vpop.f32.mrb[100].mxu0  ;;  %v9060_v44 = vpack.c.bf16 %v8945_v35, %v8940_v38  ;;  %v16463_v58 = vld [vmem:[#allocation177_spill] sm:$0xff] }
 0x529   :  { %16459 = vst [vmem:[#allocation118_spill] sm:$0xff] %v14781_v55  ;;  %v7699_v62 = vpop.f32.mrb[100].mxu1  ;;  %v6929_v42 = vpop.f32.mrb[101].mxu0  ;;  %v8632_v19 = vmul.f32 %v16463_v58, %v16463_v58  ;;  %v16465_v38 = vld [vmem:[#allocation181_spill] sm:$0xff]  ;;  %v16470_v55 = vld [vmem:[#allocation31_spill] sm:$0xff] }
 0x52a   :  { %v8791_v25 = vmul.f32 %v7699_v62, %v7699_v62  ;;  %v7701_v11 = vpop.f32.mrb[101].mxu1  ;;  %9516 = vmatprep.mubr.bf16.mxu1 %v9061_v18  ;;  %v8790_v26 = vmul.f32 %v6929_v42, %v6929_v42  ;;  %v14796_v29 = vpop.f32.mrb[102].mxu0  ;;  %v8637_v48 = vmul.f32 %v16465_v38, %v16465_v38  ;;  %v8636_v62 = vmul.f32 %v16466_v9, %v16466_v9  ;;  %v16474_v9 = vld [vmem:[#allocation188_spill] sm:$0xff] }
 0x52b   :  { %v8792_v17 = vmul.f32 %v7701_v11, %v7701_v11  ;;  %v7703_v35 = vpop.f32.mrb[102].mxu1  ;;  %8169 = vmatpush1.bf16.msra.mxu0 %v13148_v20  ;;  %v6933_v16 = vpop.f32.mrb[103].mxu0  ;;  %v16468_v20 = vld [vmem:[#allocation30_spill] sm:$0xff] }
 0x52c   :  { %v8951_v18 = vadd.f32 %v8791_v25, %v8631_v37  ;;  %v8796_v10 = vmul.f32 %v7703_v35, %v7703_v35  ;;  %v7705_v58 = vpop.f32.mrb[103].mxu1  ;;  %8170 = vmatprep.subr.bf16.mxu0 %v13153_v6  ;;  %v8950_v34 = vadd.f32 %v8790_v26, %v8630_v3  ;;  %v8795_v11 = vmul.f32 %v6933_v16, %v6933_v16  ;;  %v13154_v37 = vld [vmem:[#allocation5 + $0xcf0] ss:$40 sps:$4 sm:$0xff]   ;;  %v13159_v6 = vld [vmem:[#allocation5 + $0xd44] ss:$40 sps:$4 sm:$0xff]  }
 0x52d   :  { %v14802_v42 = vadd.f32 %v8792_v17, %v8632_v19  ;;  %v8797_v59 = vmul.f32 %v7705_v58, %v7705_v58  ;;  %8034 = vmatmul.mubr.bf16.gmra.mrb[144].mxu0 %v16468_v20  ;;  %v16471_v35 = vld [vmem:[#allocation184_spill] sm:$0xff]  ;;  %v16476_v20 = vld [vmem:[#allocation190_spill] sm:$0xff] }
 0x52e   :  { %v8956_v15 = vadd.f32 %v8796_v10, %v8636_v62  ;;  %9517 = vmatmul.mubr.bf16.gmra.mrb[208].mxu1 %v9060_v44  ;;  %v8955_v28 = vadd.f32 %v8795_v11, %v8635_v12  ;;  %8043 = vmatprep.mubr.bf16.mxu0 %v16470_v55  ;;  %v8640_v44 = vmul.f32 %v16471_v35, %v16471_v35  ;;  %v16472_v12 = vld [vmem:[#allocation186_spill] sm:$0xff] }
 0x52f   :  { %16467 = vst [vmem:[#allocation120_spill] sm:$0xff] %v14802_v42  ;;  %v14805_v38 = vadd.f32 %v8797_v59, %v8637_v48  ;;  %8171 = vmatpush1.bf16.msra.mxu0 %v13151_v24  ;;  %v8641_v59 = vmul.f32 %v16472_v12, %v16472_v12  ;;  %v8645_v62 = vmul.f32 %v16474_v9, %v16474_v9  ;;  %v13157_v58 = vld [vmem:[#allocation5 + $0xd40] ss:$40 sps:$4 sm:$0xff]   ;;  %v13162_v3 = vld [vmem:[#allocation5 + $0xd94] ss:$40 sps:$4 sm:$0xff]  }
 0x530   :  { %v9066_v25 = vpack.c.bf16 %v8956_v15, %v8951_v18  ;;  %8172 = vmatprep.subr.bf16.mxu0 %v13156_v30  ;;  %v14810_v19 = vpop.f32.mrb[104].mxu0  ;;  %v9065_v17 = vpack.c.bf16 %v8955_v28, %v8950_v34  ;;  %v16473_v15 = vld [vmem:[#allocation185_spill] sm:$0xff] }
 0x531   :  { %16469 = vst [vmem:[#allocation122_spill] sm:$0xff] %v14805_v38  ;;  %v7709_v26 = vpop.f32.mrb[104].mxu1  ;;  %v6939_v55 = vpop.f32.mrb[105].mxu0  ;;  %v8642_v30 = vmul.f32 %v16473_v15, %v16473_v15  ;;  %v16475_v34 = vld [vmem:[#allocation189_spill] sm:$0xff] }
 0x532   :  { %v8801_v48 = vmul.f32 %v7709_v26, %v7709_v26  ;;  %v7711_v24 = vpop.f32.mrb[105].mxu1  ;;  %9524 = vmatprep.mubr.bf16.mxu1 %v9066_v25  ;;  %v8800_v18 = vmul.f32 %v6939_v55, %v6939_v55  ;;  %v14820_v16 = vpop.f32.mrb[106].mxu0  ;;  %v8647_v11 = vmul.f32 %v16475_v34, %v16475_v34  ;;  %v8646_v26 = vmul.f32 %v16476_v20, %v16476_v20  ;;  %v16484_v20 = vld [vmem:[#allocation196_spill] sm:$0xff] }
 0x533   :  { %v8802_v10 = vmul.f32 %v7711_v24, %v7711_v24  ;;  %v7713_v28 = vpop.f32.mrb[106].mxu1  ;;  %8173 = vmatpush1.bf16.msra.mxu0 %v13154_v37  ;;  %v6943_v12 = vpop.f32.mrb[107].mxu0  ;;  %v16478_v37 = vld [vmem:[#allocation32_spill] sm:$0xff] }
 0x534   :  { %v8961_v25 = vadd.f32 %v8801_v48, %v8641_v59  ;;  %v8806_v35 = vmul.f32 %v7713_v28, %v7713_v28  ;;  %v7715_v15 = vpop.f32.mrb[107].mxu1  ;;  %8174 = vmatprep.subr.bf16.mxu0 %v13159_v6  ;;  %v8960_v9 = vadd.f32 %v8800_v18, %v8640_v44  ;;  %v8805_v24 = vmul.f32 %v6943_v12, %v6943_v12  ;;  %v13160_v59 = vld [vmem:[#allocation5 + $0xd90] ss:$40 sps:$4 sm:$0xff]   ;;  %v13165_v6 = vld [vmem:[#allocation5 + $0xde4] ss:$40 sps:$4 sm:$0xff]  }
 0x535   :  { %v14826_v55 = vadd.f32 %v8802_v10, %v8642_v30  ;;  %v8807_v42 = vmul.f32 %v7715_v15, %v7715_v15  ;;  %8044 = vmatmul.mubr.bf16.gmra.mrb[148].mxu0 %v16478_v37  ;;  %v16481_v28 = vld [vmem:[#allocation192_spill] sm:$0xff]  ;;  %v16486_v37 = vld [vmem:[#allocation198_spill] sm:$0xff] }
 0x536   :  { %v8966_v38 = vadd.f32 %v8806_v35, %v8646_v26  ;;  %9525 = vmatmul.mubr.bf16.gmra.mrb[212].mxu1 %v9065_v17  ;;  %v8965_v41 = vadd.f32 %v8805_v24, %v8645_v62  ;;  %8053 = vmatprep.mubr.bf16.mxu0 %v16480_v54  ;;  %v8650_v17 = vmul.f32 %v16481_v28, %v16481_v28  ;;  %v16482_v62 = vld [vmem:[#allocation194_spill] sm:$0xff] }
 0x537   :  { %16477 = vst [vmem:[#allocation121_spill] sm:$0xff] %v14826_v55  ;;  %v14829_v34 = vadd.f32 %v8807_v42, %v8647_v11  ;;  %8175 = vmatpush1.bf16.msra.mxu0 %v13157_v58  ;;  %v8651_v42 = vmul.f32 %v16482_v62, %v16482_v62  ;;  %v8655_v26 = vmul.f32 %v16484_v20, %v16484_v20  ;;  %v13163_v15 = vld [vmem:[#allocation5 + $0xde0] ss:$40 sps:$4 sm:$0xff]   ;;  %v13168_v44 = vld [vmem:[#allocation5 + $0xe34] ss:$40 sps:$4 sm:$0xff]  }
 0x538   :  { %v9071_v48 = vpack.c.bf16 %v8966_v38, %v8961_v25  ;;  %8176 = vmatprep.subr.bf16.mxu0 %v13162_v3  ;;  %v14834_v30 = vpop.f32.mrb[108].mxu0  ;;  %v9070_v10 = vpack.c.bf16 %v8965_v41, %v8960_v9  ;;  %v16483_v38 = vld [vmem:[#allocation193_spill] sm:$0xff] }
 0x539   :  { %16479 = vst [vmem:[#allocation124_spill] sm:$0xff] %v14829_v34  ;;  %v7719_v18 = vpop.f32.mrb[108].mxu1  ;;  %v6949_v54 = vpop.f32.mrb[109].mxu0  ;;  %v8652_v3 = vmul.f32 %v16483_v38, %v16483_v38  ;;  %v16485_v9 = vld [vmem:[#allocation197_spill] sm:$0xff] }
 0x53a   :  { %v8811_v11 = vmul.f32 %v7719_v18, %v7719_v18  ;;  %v7721_v58 = vpop.f32.mrb[109].mxu1  ;;  %9532 = vmatprep.mubr.bf16.mxu1 %v9071_v48  ;;  %v8810_v25 = vmul.f32 %v6949_v54, %v6949_v54  ;;  %v14844_v12 = vpop.f32.mrb[110].mxu0  ;;  %v8657_v24 = vmul.f32 %v16485_v9, %v16485_v9  ;;  %v8656_v18 = vmul.f32 %v16486_v37, %v16486_v37  ;;  %v16495_v37 = vld [vmem:[#allocation204_spill] sm:$0xff] }
 0x53b   :  { %v8812_v35 = vmul.f32 %v7721_v58, %v7721_v58  ;;  %v7723_v41 = vpop.f32.mrb[110].mxu1  ;;  %8177 = vmatpush1.bf16.msra.mxu0 %v13160_v59  ;;  %v6953_v62 = vpop.f32.mrb[111].mxu0  ;;  %v16488_v59 = vld [vmem:[#allocation34_spill] sm:$0xff] }
 0x53c   :  { %v8971_v48 = vadd.f32 %v8811_v11, %v8651_v42  ;;  %v8816_v28 = vmul.f32 %v7723_v41, %v7723_v41  ;;  %v7725_v38 = vpop.f32.mrb[111].mxu1  ;;  %8178 = vmatprep.subr.bf16.mxu0 %v13165_v6  ;;  %v8970_v20 = vadd.f32 %v8810_v25, %v8650_v17  ;;  %v8815_v58 = vmul.f32 %v6953_v62, %v6953_v62  ;;  %v13166_v42 = vld [vmem:[#allocation5 + $0xe30] ss:$40 sps:$4 sm:$0xff]   ;;  %v13171_v6 = vld [vmem:[#allocation5 + $0xe84] ss:$40 sps:$4 sm:$0xff]  }
 0x53d   :  { %v14850_v54 = vadd.f32 %v8812_v35, %v8652_v3  ;;  %v8817_v55 = vmul.f32 %v7725_v38, %v7725_v38  ;;  %8054 = vmatmul.mubr.bf16.gmra.mrb[152].mxu0 %v16488_v59  ;;  %v16492_v41 = vld [vmem:[#allocation200_spill] sm:$0xff]  ;;  %v16498_v59 = vld [vmem:[#allocation206_spill] sm:$0xff] }
 0x53e   :  { %v8976_v34 = vadd.f32 %v8816_v28, %v8656_v18  ;;  %9533 = vmatmul.mubr.bf16.gmra.mrb[216].mxu1 %v9070_v10  ;;  %v8975_v1 = vadd.f32 %v8815_v58, %v8655_v26  ;;  %8063 = vmatprep.mubr.bf16.mxu0 %v16490_v52  ;;  %v8660_v10 = vmul.f32 %v16492_v41, %v16492_v41  ;;  %v16493_v26 = vld [vmem:[#allocation202_spill] sm:$0xff] }
 0x53f   :  { %16487 = vst [vmem:[#allocation125_spill] sm:$0xff] %v14850_v54  ;;  %v14853_v9 = vadd.f32 %v8817_v55, %v8657_v24  ;;  %8179 = vmatpush1.bf16.msra.mxu0 %v13163_v15  ;;  %v8661_v55 = vmul.f32 %v16493_v26, %v16493_v26  ;;  %v8665_v18 = vmul.f32 %v16495_v37, %v16495_v37  ;;  %v13169_v38 = vld [vmem:[#allocation5 + $0xe80] ss:$40 sps:$4 sm:$0xff]   ;;  %v13174_v17 = vld [vmem:[#allocation5 + $0xed4] ss:$40 sps:$4 sm:$0xff]  }
 0x540   :  { %v9076_v11 = vpack.c.bf16 %v8976_v34, %v8971_v48  ;;  %8180 = vmatprep.subr.bf16.mxu0 %v13168_v44  ;;  %v14858_v3 = vpop.f32.mrb[112].mxu0  ;;  %v9075_v35 = vpack.c.bf16 %v8975_v1, %v8970_v20  ;;  %v16494_v34 = vld [vmem:[#allocation201_spill] sm:$0xff] }
 0x541   :  { %16489 = vst [vmem:[#allocation126_spill] sm:$0xff] %v14853_v9  ;;  %16491 = vst [vmem:[#allocation128_spill] sm:$0xff] %v14858_v3  ;;  %v7729_v25 = vpop.f32.mrb[112].mxu1  ;;  %v6959_v52 = vpop.f32.mrb[113].mxu0  ;;  %v8662_v44 = vmul.f32 %v16494_v34, %v16494_v34  ;;  %v16497_v20 = vld [vmem:[#allocation205_spill] sm:$0xff] }
 0x542   :  { %v8821_v24 = vmul.f32 %v7729_v25, %v7729_v25  ;;  %v7731_v15 = vpop.f32.mrb[113].mxu1  ;;  %9540 = vmatprep.mubr.bf16.mxu1 %v9076_v11  ;;  %v8820_v48 = vmul.f32 %v6959_v52, %v6959_v52  ;;  %v14868_v62 = vpop.f32.mrb[114].mxu0  ;;  %v8667_v58 = vmul.f32 %v16497_v20, %v16497_v20  ;;  %v8666_v25 = vmul.f32 %v16498_v59, %v16498_v59  ;;  %v13290_v3 = vld [vmem:[#allocation5 + $0x1330] ss:$40 sps:$4 sm:$0xff]  }
 0x543   :  { %v8822_v28 = vmul.f32 %v7731_v15, %v7731_v15  ;;  %16496 = vst [vmem:[#allocation130_spill] sm:$0xff] %v14868_v62  ;;  %v7733_v1 = vpop.f32.mrb[114].mxu1  ;;  %8181 = vmatpush1.bf16.msra.mxu0 %v13166_v42  ;;  %v6963_v26 = vpop.f32.mrb[115].mxu0  ;;  %v16500_v42 = vld [vmem:[#allocation36_spill] sm:$0xff] }
 0x544   :  { %v8981_v11 = vadd.f32 %v8821_v24, %v8661_v55  ;;  %v8826_v41 = vmul.f32 %v7733_v1, %v7733_v1  ;;  %v7735_v34 = vpop.f32.mrb[115].mxu1  ;;  %8182 = vmatprep.subr.bf16.mxu0 %v13171_v6  ;;  %v8980_v37 = vadd.f32 %v8820_v48, %v8660_v10  ;;  %v8825_v15 = vmul.f32 %v6963_v26, %v6963_v26  ;;  %v13172_v55 = vld [vmem:[#allocation5 + $0xed0] ss:$40 sps:$4 sm:$0xff]   ;;  %v13279_v62 = vld [vmem:[#allocation5 + $0x11a4] ss:$40 sps:$4 sm:$0xff]  }
 0x545   :  { %v14874_v52 = vadd.f32 %v8822_v28, %v8662_v44  ;;  %v8827_v54 = vmul.f32 %v7735_v34, %v7735_v34  ;;  %8064 = vmatmul.mubr.bf16.gmra.mrb[156].mxu0 %v16500_v42  ;;  %v16504_v28 = vld [vmem:[#allocation208_spill] sm:$0xff]  ;;  %v16509_v26 = vld [vmem:[#allocation213_spill] sm:$0xff] }
 0x546   :  { %v8986_v9 = vadd.f32 %v8826_v41, %v8666_v25  ;;  %9541 = vmatmul.mubr.bf16.gmra.mrb[220].mxu1 %v9075_v35  ;;  %v8985_v4 = vadd.f32 %v8825_v15, %v8665_v18  ;;  %8073 = vmatprep.mubr.bf16.mxu0 %v16502_v60  ;;  %v8670_v1 = vmul.f32 %v16504_v28, %v16504_v28  ;;  %v16505_v35 = vld [vmem:[#allocation210_spill] sm:$0xff] }
 0x547   :  { %16499 = vst [vmem:[#allocation129_spill] sm:$0xff] %v14874_v52  ;;  %v14877_v20 = vadd.f32 %v8827_v54, %v8667_v58  ;;  %8183 = vmatpush1.bf16.msra.mxu0 %v13169_v38  ;;  %v8671_v54 = vmul.f32 %v16505_v35, %v16505_v35  ;;  %v16506_v38 = vld [vmem:[#allocation209_spill] sm:$0xff]  ;;  %v8677_v34 = vmul.f32 %v16509_v26, %v16509_v26  ;;  %v13263_v35 = vld [vmem:[#allocation5 + $0xf24] ss:$40 sps:$4 sm:$0xff]   ;;  %v16512_v52 = vld [vmem:[#allocation38_spill] sm:$0xff] }
 0x548   :  { %v9081_v24 = vpack.c.bf16 %v8986_v9, %v8981_v11  ;;  %8184 = vmatprep.subr.bf16.mxu0 %v13174_v17  ;;  %v14882_v10 = vpop.f32.mrb[116].mxu0  ;;  %v9080_v48 = vpack.c.bf16 %v8985_v4, %v8980_v37  ;;  %v8672_v9 = vmul.f32 %v16506_v38, %v16506_v38  ;;  %v16507_v17 = vld [vmem:[#allocation212_spill] sm:$0xff]  ;;  %v16510_v37 = vld [vmem:[#allocation214_spill] sm:$0xff] }
 0x549   :  { %16501 = vst [vmem:[#allocation132_spill] sm:$0xff] %v14877_v20  ;;  %16503 = vst [vmem:[#allocation133_spill] sm:$0xff] %v14882_v10  ;;  %v7739_v44 = vpop.f32.mrb[116].mxu1  ;;  %v6969_v58 = vpop.f32.mrb[117].mxu0  ;;  %v8675_v59 = vmul.f32 %v16507_v17, %v16507_v17  ;;  %v8676_v15 = vmul.f32 %v16510_v37, %v16510_v37  ;;  %v16514_v20 = vld [vmem:[#allocation39_spill] sm:$0xff]  ;;  %v16517_v37 = vld [vmem:[#allocation218_spill] sm:$0xff] }
 0x54a   :  { %v8831_v18 = vmul.f32 %v7739_v44, %v7739_v44  ;;  %v7741_v60 = vpop.f32.mrb[117].mxu1  ;;  %9548 = vmatprep.mubr.bf16.mxu1 %v9081_v24  ;;  %v8830_v25 = vmul.f32 %v6969_v58, %v6969_v58  ;;  %v14892_v41 = vpop.f32.mrb[118].mxu0  ;;  %v13278_v10 = vld [vmem:[#allocation5 + $0x1150] ss:$40 sps:$4 sm:$0xff]  }
 0x54b   :  { %v8832_v11 = vmul.f32 %v7741_v60, %v7741_v60  ;;  %16508 = vst [vmem:[#allocation134_spill] sm:$0xff] %v14892_v41  ;;  %v7743_v4 = vpop.f32.mrb[118].mxu1  ;;  %8185 = vmatpush1.bf16.msra.mxu0 %v13172_v55  ;;  %v6973_v44 = vpop.f32.mrb[119].mxu0 }
 0x54c   :  { %v8991_v42 = vadd.f32 %v8831_v18, %v8671_v54  ;;  %v8836_v24 = vmul.f32 %v7743_v4, %v7743_v4  ;;  %v7745_v28 = vpop.f32.mrb[119].mxu1  ;;  %8347 = vmatprep.subr.bf16.mxu0 %v13263_v35  ;;  %v8990_v38 = vadd.f32 %v8830_v25, %v8670_v1  ;;  %v8835_v58 = vmul.f32 %v6973_v44, %v6973_v44  ;;  %v16516_v25 = vld [vmem:[#allocation216_spill] sm:$0xff] }
 0x54d   :  { %v14898_v17 = vadd.f32 %v8832_v11, %v8672_v9  ;;  %v8837_v60 = vmul.f32 %v7745_v28, %v7745_v28  ;;  %8074 = vmatmul.mubr.bf16.gmra.mrb[160].mxu0 %v16512_v52  ;;  %v8680_v11 = vmul.f32 %v16516_v25, %v16516_v25  ;;  %v8681_v52 = vmul.f32 %v16517_v37, %v16517_v37 }
 0x54e   :  { %v8996_v6 = vadd.f32 %v8836_v24, %v8676_v15  ;;  %9549 = vmatmul.mubr.bf16.gmra.mrb[224].mxu1 %v9080_v48  ;;  %v8995_v55 = vadd.f32 %v8835_v58, %v8675_v59  ;;  %8083 = vmatprep.mubr.bf16.mxu0 %v16514_v20  ;;  %v16518_v15 = vld [vmem:[#allocation217_spill] sm:$0xff] }
 0x54f   :  { %16511 = vst [vmem:[#allocation18_spill] sm:$0xff] %v14898_v17  ;;  %v14901_v26 = vadd.f32 %v8837_v60, %v8677_v34  ;;  %v8682_v20 = vmul.f32 %v16518_v15, %v16518_v15  ;;  %v16522_v60 = vld [vmem:[#allocation222_spill] sm:$0xff] }
 0x550   :  { %v9086_v54 = vpack.c.bf16 %v8996_v6, %v8991_v42  ;;  %v14906_v4 = vpop.f32.mrb[120].mxu0  ;;  %v9085_v9 = vpack.c.bf16 %v8995_v55, %v8990_v38  ;;  %v16519_v6 = vld [vmem:[#allocation220_spill] sm:$0xff]  ;;  %v16521_v38 = vld [vmem:[#allocation221_spill] sm:$0xff]  ;;  %v8686_v55 = vmul.f32 %v16522_v60, %v16522_v60 }
 0x551   :  { %16513 = vst [vmem:[#allocation19_spill] sm:$0xff] %v14901_v26  ;;  %16515 = vst [vmem:[#allocation136_spill] sm:$0xff] %v14906_v4  ;;  %v7749_v1 = vpop.f32.mrb[120].mxu1  ;;  %v6979_v59 = vpop.f32.mrb[121].mxu0  ;;  %v8685_v42 = vmul.f32 %v16519_v6, %v16519_v6  ;;  %v8687_v58 = vmul.f32 %v16521_v38, %v16521_v38  ;;  %v16526_v38 = vld [vmem:[#allocation41_spill] sm:$0xff] }
 0x552   :  { %v8841_v48 = vmul.f32 %v7749_v1, %v7749_v1  ;;  %v7751_v34 = vpop.f32.mrb[121].mxu1  ;;  %9556 = vmatprep.mubr.bf16.mxu1 %v9086_v54  ;;  %v8840_v24 = vmul.f32 %v6979_v59, %v6979_v59  ;;  %v14916_v28 = vpop.f32.mrb[122].mxu0 }
 0x553   :  { %v8842_v44 = vmul.f32 %v7751_v34, %v7751_v34  ;;  %16520 = vst [vmem:[#allocation138_spill] sm:$0xff] %v14916_v28  ;;  %v7753_v35 = vpop.f32.mrb[122].mxu1  ;;  %v6983_v54 = vpop.f32.mrb[123].mxu0  ;;  %v16524_v34 = vld [vmem:[#allocation40_spill] sm:$0xff] }
 0x554   :  { %v9001_v1 = vadd.f32 %v8841_v48, %v8681_v52  ;;  %v8846_v25 = vmul.f32 %v7753_v35, %v7753_v35  ;;  %v7755_v37 = vpop.f32.mrb[123].mxu1  ;;  %v9000_v18 = vadd.f32 %v8840_v24, %v8680_v11  ;;  %v8845_v17 = vmul.f32 %v6983_v54, %v6983_v54  ;;  %v16528_v24 = vld [vmem:[#allocation224_spill] sm:$0xff]  ;;  %v16529_v35 = vld [vmem:[#allocation226_spill] sm:$0xff] }
 0x555   :  { %v14922_v15 = vadd.f32 %v8842_v44, %v8682_v20  ;;  %v8847_v6 = vmul.f32 %v7755_v37, %v7755_v37  ;;  %8084 = vmatmul.mubr.bf16.gmra.mrb[164].mxu0 %v16524_v34  ;;  %v8690_v44 = vmul.f32 %v16528_v24, %v16528_v24  ;;  %v8691_v60 = vmul.f32 %v16529_v35, %v16529_v35  ;;  %v16534_v34 = vld [vmem:[#allocation230_spill] sm:$0xff]  ;;  %v16559_v28 = vld [vmem:[#allocation60_spill] sm:$0xff] }
 0x556   :  { %v9006_v59 = vadd.f32 %v8846_v25, %v8686_v55  ;;  %9557 = vmatmul.mubr.bf16.gmra.mrb[228].mxu1 %v9085_v9  ;;  %v9005_v26 = vadd.f32 %v8845_v17, %v8685_v42  ;;  %8093 = vmatprep.mubr.bf16.mxu0 %v16526_v38  ;;  %v8696_v38 = vmul.f32 %v16534_v34, %v16534_v34 }
 0x557   :  { %16523 = vst [vmem:[#allocation137_spill] sm:$0xff] %v14922_v15  ;;  %v14925_v36 = vadd.f32 %v8847_v6, %v8687_v58  ;;  %v16530_v58 = vld [vmem:[#allocation225_spill] sm:$0xff] }
 0x558   :  { %v9091_v40 = vpack.c.bf16 %v9006_v59, %v9001_v1  ;;  %v14930_v48 = vpop.f32.mrb[124].mxu0  ;;  %v9090_v20 = vpack.c.bf16 %v9005_v26, %v9000_v18  ;;  %v8692_v55 = vmul.f32 %v16530_v58, %v16530_v58  ;;  %v16531_v1 = vld [vmem:[#allocation228_spill] sm:$0xff]  ;;  %v16533_v18 = vld [vmem:[#allocation229_spill] sm:$0xff] }
 0x559   :  { %16525 = vst [vmem:[#allocation140_spill] sm:$0xff] %v14925_v36  ;;  %16527 = vst [vmem:[#allocation141_spill] sm:$0xff] %v14930_v48  ;;  %v7759_v11 = vpop.f32.mrb[124].mxu1  ;;  %v6989_v17 = vpop.f32.mrb[125].mxu0  ;;  %v8695_v25 = vmul.f32 %v16531_v1, %v16531_v1  ;;  %v8697_v59 = vmul.f32 %v16533_v18, %v16533_v18  ;;  %v16538_v18 = vld [vmem:[#allocation43_spill] sm:$0xff] }
 0x55a   :  { %v8851_v9 = vmul.f32 %v7759_v11, %v7759_v11  ;;  %v7761_v42 = vpop.f32.mrb[125].mxu1  ;;  %9564 = vmatprep.mubr.bf16.mxu1 %v9091_v40  ;;  %v8850_v54 = vmul.f32 %v6989_v17, %v6989_v17  ;;  %v14940_v6 = vpop.f32.mrb[126].mxu0 }
 0x55b   :  { %v8852_v37 = vmul.f32 %v7761_v42, %v7761_v42  ;;  %16532 = vst [vmem:[#allocation142_spill] sm:$0xff] %v14940_v6  ;;  %v7763_v26 = vpop.f32.mrb[126].mxu1  ;;  %v6993_v40 = vpop.f32.mrb[127].mxu0  ;;  %v16536_v42 = vld [vmem:[#allocation42_spill] sm:$0xff] }
 0x55c   :  { %v9011_v11 = vadd.f32 %v8851_v9, %v8691_v60  ;;  %v8856_v24 = vmul.f32 %v7763_v26, %v7763_v26  ;;  %v7765_v35 = vpop.f32.mrb[127].mxu1  ;;  %v9010_v52 = vadd.f32 %v8850_v54, %v8690_v44  ;;  %v8855_v15 = vmul.f32 %v6993_v40, %v6993_v40  ;;  %v16543_v40 = vld [vmem:[#allocation48_spill] sm:$0xff]  ;;  %v16548_v60 = vld [vmem:[#allocation53_spill] sm:$0xff] }
 0x55d   :  { %v14946_v58 = vadd.f32 %v8852_v37, %v8692_v55  ;;  %v8857_v1 = vmul.f32 %v7765_v35, %v7765_v35  ;;  %8094 = vmatmul.mubr.bf16.gmra.mrb[168].mxu0 %v16536_v42  ;;  %v16544_v35 = vld [vmem:[#allocation49_spill] sm:$0xff] }
 0x55e   :  { %v9016_v17 = vadd.f32 %v8856_v24, %v8696_v38  ;;  %9565 = vmatmul.mubr.bf16.gmra.mrb[232].mxu1 %v9090_v20  ;;  %v9015_v36 = vadd.f32 %v8855_v15, %v8695_v25  ;;  %8103 = vmatprep.mubr.bf16.mxu0 %v16538_v18  ;;  %v16539_v20 = vld [vmem:[#allocation44_spill] sm:$0xff]  ;;  %v16540_v15 = vld [vmem:[#allocation45_spill] sm:$0xff] }
 0x55f   :  { %16535 = vst [vmem:[#allocation20_spill] sm:$0xff] %v14946_v58  ;;  %v14949_v51 = vadd.f32 %v8857_v1, %v8697_v59 }
 0x560   :  { %v9096_v8 = vpack.c.bf16 %v9016_v17, %v9011_v11  ;;  %v9095_v9 = vpack.c.bf16 %v9015_v36, %v9010_v52  ;;  %v16542_v52 = vld [vmem:[#allocation47_spill] sm:$0xff] }
 0x561   :  { %16537 = vst [vmem:[#allocation21_spill] sm:$0xff] %v14949_v51  ;;  %v14954_v26 = vpop.f32.mrb[128].mxu1 }
 0x562   :  { %9572 = vmatprep.mubr.bf16.mxu1 %v9096_v8  ;;  %v14956_v44 = vpop.f32.mrb[129].mxu1  ;;  %v16541_v8 = vld [vmem:[#allocation46_spill] sm:$0xff] }
 0x563   :  { %v14958_v55 = vpop.f32.mrb[130].mxu1 }
 0x564   :  { %v14960_v54 = vpop.f32.mrb[131].mxu1 }
 0x565   :  { %8104 = vmatmul.mubr.bf16.gmra.mrb[172].mxu0 %v16539_v20  ;;  %v16546_v20 = vld [vmem:[#allocation51_spill] sm:$0xff] }
 0x566   :  { %9573 = vmatmul.mubr.bf16.gmra.mrb[236].mxu1 %v9095_v9  ;;  %8113 = vmatprep.mubr.bf16.mxu0 %v16540_v15  ;;  %v16545_v9 = vld [vmem:[#allocation50_spill] sm:$0xff] }
 0x569   :  { %v14964_v25 = vpop.f32.mrb[132].mxu1 }
 0x56a   :  { %v14966_v37 = vpop.f32.mrb[133].mxu1 }
 0x56b   :  { %v14968_v59 = vpop.f32.mrb[134].mxu1 }
 0x56c   :  { %v14970_v36 = vpop.f32.mrb[135].mxu1 }
 0x56d   :  { %8114 = vmatmul.mubr.bf16.gmra.mrb[176].mxu0 %v16541_v8 }
 0x56e   :  { %8123 = vmatprep.mubr.bf16.mxu0 %v16542_v52 }
 0x571   :  { %v14974_v34 = vpop.f32.mrb[136].mxu1 }
 0x572   :  { %v14976_v38 = vpop.f32.mrb[137].mxu1 }
 0x573   :  { %v14978_v11 = vpop.f32.mrb[138].mxu1 }
 0x574   :  { %v14980_v24 = vpop.f32.mrb[139].mxu1 }
 0x575   :  { %8124 = vmatmul.mubr.bf16.gmra.mrb[180].mxu0 %v16543_v40 }
 0x576   :  { %8133 = vmatprep.mubr.bf16.mxu0 %v16544_v35  ;;  %v16547_v35 = vld [vmem:[#allocation52_spill] sm:$0xff] }
 0x579   :  { %v14984_v1 = vpop.f32.mrb[140].mxu1 }
 0x57a   :  { %v14986_v17 = vpop.f32.mrb[141].mxu1 }
 0x57b   :  { %v14988_v42 = vpop.f32.mrb[142].mxu1 }
 0x57c   :  { %v14990_v18 = vpop.f32.mrb[143].mxu1 }
 0x57d   :  { %8134 = vmatmul.mubr.bf16.gmra.mrb[184].mxu0 %v16545_v9 }
 0x57e   :  { %8143 = vmatprep.mubr.bf16.mxu0 %v16546_v20  ;;  %v16549_v20 = vld [vmem:[#allocation54_spill] sm:$0xff] }
 0x581   :  { %v14994_v15 = vpop.f32.mrb[144].mxu1 }
 0x582   :  { %v14996_v8 = vpop.f32.mrb[145].mxu1 }
 0x583   :  { %v14998_v52 = vpop.f32.mrb[146].mxu1 }
 0x584   :  { %v15000_v40 = vpop.f32.mrb[147].mxu1 }
 0x585   :  { %8144 = vmatmul.mubr.bf16.gmra.mrb[188].mxu0 %v16547_v35 }
 0x586   :  { %8186 = vmatprep.mubr.bf16.mxu0 %v16548_v60  ;;  %v13266_v60 = vld [vmem:[#allocation5 + $0xf70] ss:$40 sps:$4 sm:$0xff]  }
 0x589   :  { %v15004_v58 = vpop.f32.mrb[148].mxu1 }
 0x58a   :  { %v15006_v51 = vpop.f32.mrb[149].mxu1 }
 0x58b   :  { %v15008_v22 = vpop.f32.mrb[150].mxu1 }
 0x58c   :  { %v15010_v9 = vpop.f32.mrb[151].mxu1 }
 0x58d   :  { %8187 = vmatmul.mubr.bf16.vlgmr.msra.gmra.mrb[128].mxu0 %v16549_v20  ;;  %v16552_v20 = vld [vmem:[#allocation57_spill] sm:$0xff] }
 0x58e   :  { %8348 = vmatpush1.bf16.msra.mxu0 %v13264_v63  ;;  %8196 = vmatprep.mubr.bf16.mxu0 %v16550_v0  ;;  %v13268_v63 = vld [vmem:[#allocation5 + $0xfc0] ss:$40 sps:$4 sm:$0xff]   ;;  %v13269_v0 = vld [vmem:[#allocation5 + $0x1014] ss:$40 sps:$4 sm:$0xff]  }
 0x58f   :  { %8349 = vmatprep.subr.bf16.mxu0 %v13265_v61 }
 0x591   :  { %v15014_v14 = vpop.f32.mrb[152].mxu1 }
 0x592   :  { %v15016_v35 = vpop.f32.mrb[153].mxu1  ;;  %8350 = vmatpush1.bf16.msra.mxu0 %v13266_v60 }
 0x593   :  { %v15018_v39 = vpop.f32.mrb[154].mxu1  ;;  %8351 = vmatprep.subr.bf16.mxu0 %v13267_v47 }
 0x594   :  { %v15020_v53 = vpop.f32.mrb[155].mxu1 }
 0x595   :  { %8197 = vmatmul.mubr.bf16.gmra.mrb[132].mxu0 %v16551_v46  ;;  %v16554_v46 = vld [vmem:[#allocation59_spill] sm:$0xff] }
 0x596   :  { %8206 = vmatprep.mubr.bf16.mxu0 %v16552_v20  ;;  %8352 = vmatpush1.bf16.msra.mxu0 %v13268_v63  ;;  %v13272_v20 = vld [vmem:[#allocation5 + $0x1060] ss:$40 sps:$4 sm:$0xff]   ;;  %v13273_v63 = vld [vmem:[#allocation5 + $0x10b4] ss:$40 sps:$4 sm:$0xff]  }
 0x597   :  { %8353 = vmatprep.subr.bf16.mxu0 %v13269_v0 }
 0x599   :  { %v15024_v61 = vpop.f32.mrb[156].mxu1 }
 0x59a   :  { %v15026_v2 = vpop.f32.mrb[157].mxu1  ;;  %8354 = vmatpush1.bf16.msra.mxu0 %v13270_v27  ;;  %v13274_v27 = vld [vmem:[#allocation5 + $0x10b0] ss:$40 sps:$4 sm:$0xff]  }
 0x59b   :  { %v15028_v60 = vpop.f32.mrb[158].mxu1  ;;  %8355 = vmatprep.subr.bf16.mxu0 %v13271_v49  ;;  %v13275_v49 = vld [vmem:[#allocation5 + $0x1104] ss:$40 sps:$4 sm:$0xff]  }
 0x59c   :  { %v15030_v47 = vpop.f32.mrb[159].mxu1 }
 0x59d   :  { %8207 = vmatmul.mubr.bf16.gmra.mrb[136].mxu0 %v16553_v23  ;;  %v16560_v23 = vld [vmem:[#allocation61_spill] sm:$0xff] }
 0x59e   :  { %8216 = vmatprep.mubr.bf16.mxu0 %v16554_v46  ;;  %8356 = vmatpush1.bf16.msra.mxu0 %v13272_v20  ;;  %v13276_v46 = vld [vmem:[#allocation5 + $0x1100] ss:$40 sps:$4 sm:$0xff]   ;;  %v13277_v20 = vld [vmem:[#allocation5 + $0x1154] ss:$40 sps:$4 sm:$0xff]  }
 0x59f   :  { %8357 = vmatprep.subr.bf16.mxu0 %v13273_v63 }
 0x5a1   :  { %v15034_v0 = vpop.f32.mrb[160].mxu1 }
 0x5a2   :  { %16555 = vst [vmem:[#allocation144_spill] sm:$0xff] %v15034_v0  ;;  %v15036_v33 = vpop.f32.mrb[161].mxu1  ;;  %8358 = vmatpush1.bf16.msra.mxu0 %v13274_v27 }
 0x5a3   :  { %16556 = vst [vmem:[#allocation146_spill] sm:$0xff] %v15036_v33  ;;  %v15038_v6 = vpop.f32.mrb[162].mxu1  ;;  %8359 = vmatprep.subr.bf16.mxu0 %v13275_v49  ;;  %v16565_v49 = vld [vmem:[#allocation62_spill] sm:$0xff] }
 0x5a4   :  { %16557 = vst [vmem:[#allocation145_spill] sm:$0xff] %v15038_v6  ;;  %v15040_v48 = vpop.f32.mrb[163].mxu1 }
 0x5a5   :  { %16558 = vst [vmem:[#allocation148_spill] sm:$0xff] %v15040_v48  ;;  %8217 = vmatmul.mubr.bf16.gmra.mrb[140].mxu0 %v16559_v28  ;;  %v16566_v28 = vld [vmem:[#allocation63_spill] sm:$0xff]  ;;  %v16577_v48 = vld [vmem:[#allocation66_spill] sm:$0xff] }
 0x5a6   :  { %8226 = vmatprep.mubr.bf16.mxu0 %v16560_v23  ;;  %8360 = vmatpush1.bf16.msra.mxu0 %v13276_v46  ;;  %v13280_v23 = vld [vmem:[#allocation5 + $0x11a0] ss:$40 sps:$4 sm:$0xff]   ;;  %v13281_v46 = vld [vmem:[#allocation5 + $0x11f4] ss:$40 sps:$4 sm:$0xff]  }
 0x5a7   :  { %8361 = vmatprep.subr.bf16.mxu0 %v13277_v20 }
 0x5a9   :  { %v15044_v63 = vpop.f32.mrb[164].mxu1 }
 0x5aa   :  { %16561 = vst [vmem:[#allocation149_spill] sm:$0xff] %v15044_v63  ;;  %v15046_v4 = vpop.f32.mrb[165].mxu1  ;;  %8362 = vmatpush1.bf16.msra.mxu0 %v13278_v10 }
 0x5ab   :  { %16562 = vst [vmem:[#allocation150_spill] sm:$0xff] %v15046_v4  ;;  %v15048_v41 = vpop.f32.mrb[166].mxu1  ;;  %8363 = vmatprep.subr.bf16.mxu0 %v13279_v62  ;;  %v16571_v62 = vld [vmem:[#allocation64_spill] sm:$0xff] }
 0x5ac   :  { %16563 = vst [vmem:[#allocation22_spill] sm:$0xff] %v15048_v41  ;;  %v15050_v27 = vpop.f32.mrb[167].mxu1  ;;  %v13282_v41 = vld [vmem:[#allocation5 + $0x11f0] ss:$40 sps:$4 sm:$0xff]  }
 0x5ad   :  { %16564 = vst [vmem:[#allocation23_spill] sm:$0xff] %v15050_v27  ;;  %8227 = vmatmul.mubr.bf16.gmra.mrb[144].mxu0 %v16565_v49  ;;  %v13283_v27 = vld [vmem:[#allocation5 + $0x1244] ss:$40 sps:$4 sm:$0xff]   ;;  %v16572_v49 = vld [vmem:[#allocation65_spill] sm:$0xff] }
 0x5ae   :  { %8236 = vmatprep.mubr.bf16.mxu0 %v16566_v28  ;;  %8364 = vmatpush1.bf16.msra.mxu0 %v13280_v23  ;;  %v13284_v28 = vld [vmem:[#allocation5 + $0x1240] ss:$40 sps:$4 sm:$0xff]   ;;  %v13285_v23 = vld [vmem:[#allocation5 + $0x1294] ss:$40 sps:$4 sm:$0xff]  }
 0x5af   :  { %8365 = vmatprep.subr.bf16.mxu0 %v13281_v46 }
 0x5b1   :  { %v15054_v20 = vpop.f32.mrb[168].mxu1 }
 0x5b2   :  { %16567 = vst [vmem:[#allocation152_spill] sm:$0xff] %v15054_v20  ;;  %v15056_v63 = vpop.f32.mrb[169].mxu1  ;;  %8366 = vmatpush1.bf16.msra.mxu0 %v13282_v41 }
 0x5b3   :  { %16568 = vst [vmem:[#allocation154_spill] sm:$0xff] %v15056_v63  ;;  %v15058_v4 = vpop.f32.mrb[170].mxu1  ;;  %8367 = vmatprep.subr.bf16.mxu0 %v13283_v27  ;;  %v13175_v27 = vld [vmem:[#allocation7 + $0xc0] sm:$0xff]  }
 0x5b4   :  { %16569 = vst [vmem:[#allocation153_spill] sm:$0xff] %v15058_v4  ;;  %v15060_v10 = vpop.f32.mrb[171].mxu1  ;;  %v13286_v4 = vld [vmem:[#allocation5 + $0x1290] ss:$40 sps:$4 sm:$0xff]   ;;  %11010 = vmatprep.subr.bf16.mxu1 %v13175_v27  ;;  %v13292_v27 = vld [vmem:[#allocation5 + $0x1380] ss:$40 sps:$4 sm:$0xff]  }
 0x5b5   :  { %16570 = vst [vmem:[#allocation156_spill] sm:$0xff] %v15060_v10  ;;  %8237 = vmatmul.mubr.bf16.gmra.mrb[148].mxu0 %v16571_v62  ;;  %v13287_v10 = vld [vmem:[#allocation5 + $0x12e4] ss:$40 sps:$4 sm:$0xff]  }
 0x5b6   :  { %8246 = vmatprep.mubr.bf16.mxu0 %v16572_v49  ;;  %8368 = vmatpush1.bf16.msra.mxu0 %v13284_v28  ;;  %v13176_v62 = vld [vmem:[#allocation7 + $0x80] sm:$0xff]   ;;  %v13177_v49 = vld [vmem:[#allocation7 + $0xc8] sm:$0xff]  }
 0x5b7   :  { %8369 = vmatprep.subr.bf16.mxu0 %v13285_v23  ;;  %v16578_v28 = vld [vmem:[#allocation67_spill] sm:$0xff]  ;;  %11011 = vmatpush3.bf16.msra.mxu1 %v13176_v62  ;;  %v13293_v62 = vld [vmem:[#allocation5 + $0x13d4] ss:$40 sps:$4 sm:$0xff]  }
 0x5b8   :  { %v13288_v23 = vld [vmem:[#allocation5 + $0x12e0] ss:$40 sps:$4 sm:$0xff]   ;;  %11012 = vmatprep.subr.bf16.mxu1 %v13177_v49 }
 0x5b9   :  { %v15064_v46 = vpop.f32.mrb[172].mxu1 }
 0x5ba   :  { %16573 = vst [vmem:[#allocation157_spill] sm:$0xff] %v15064_v46  ;;  %v15066_v20 = vpop.f32.mrb[173].mxu1  ;;  %8370 = vmatpush1.bf16.msra.mxu0 %v13286_v4  ;;  %v13289_v46 = vld [vmem:[#allocation5 + $0x1334] ss:$40 sps:$4 sm:$0xff]  }
 0x5bb   :  { %16574 = vst [vmem:[#allocation158_spill] sm:$0xff] %v15066_v20  ;;  %v15068_v63 = vpop.f32.mrb[174].mxu1  ;;  %8371 = vmatprep.subr.bf16.mxu0 %v13287_v10 }
 0x5bc   :  { %16575 = vst [vmem:[#allocation24_spill] sm:$0xff] %v15068_v63  ;;  %v15070_v41 = vpop.f32.mrb[175].mxu1  ;;  %v13178_v63 = vld [vmem:[#allocation7 + $0x88] sm:$0xff]  }
 0x5bd   :  { %16576 = vst [vmem:[#allocation25_spill] sm:$0xff] %v15070_v41  ;;  %8247 = vmatmul.mubr.bf16.gmra.mrb[152].mxu0 %v16577_v48  ;;  %v13291_v48 = vld [vmem:[#allocation5 + $0x1384] ss:$40 sps:$4 sm:$0xff]   ;;  %11013 = vmatpush3.bf16.msra.mxu1 %v13178_v63 }
 0x5be   :  { %8256 = vmatprep.mubr.bf16.mxu0 %v16578_v28  ;;  %8372 = vmatpush1.bf16.msra.mxu0 %v13288_v23  ;;  %v16581_v28 = vld [vmem:[#allocation68_spill] sm:$0xff]  ;;  %v16586_v63 = vld [vmem:[#allocation71_spill] sm:$0xff] }
 0x5bf   :  { %8373 = vmatprep.subr.bf16.mxu0 %v13289_v46  ;;  %v16582_v46 = vld [vmem:[#allocation69_spill] sm:$0xff] }
 0x5c1   :  { %v10914_v20 = vpop.f32.mrb[176].mxu1 }
 0x5c2   :  { %v10915_v4 = vpop.f32.mrb[177].mxu1  ;;  %8374 = vmatpush1.bf16.msra.mxu0 %v13290_v3  ;;  %v13294_v3 = vld [vmem:[#allocation5 + $0x13d0] ss:$40 sps:$4 sm:$0xff]  }
 0x5c3   :  { %v15074_v41 = vadd.f32 %v10915_v4, %v10914_v20  ;;  %v10917_v10 = vpop.f32.mrb[178].mxu1  ;;  %8375 = vmatprep.subr.bf16.mxu0 %v13291_v48 }
 0x5c4   :  { %v10918_v6 = vpop.f32.mrb[179].mxu1 }
 0x5c5   :  { %16579 = vst [vmem:[#allocation160_spill] sm:$0xff] %v15074_v41  ;;  %v15076_v33 = vadd.f32 %v10918_v6, %v10917_v10  ;;  %8257 = vmatmul.mubr.bf16.gmra.mrb[156].mxu0 %v16581_v28  ;;  %v16585_v6 = vld [vmem:[#allocation70_spill] sm:$0xff] }
 0x5c6   :  { %8266 = vmatprep.mubr.bf16.mxu0 %v16582_v46  ;;  %8376 = vmatpush1.bf16.msra.mxu0 %v13292_v27 }
 0x5c7   :  { %16580 = vst [vmem:[#allocation162_spill] sm:$0xff] %v15076_v33  ;;  %8377 = vmatprep.subr.bf16.mxu0 %v13293_v62 }
 0x5c9   :  { %v10920_v49 = vpop.f32.mrb[180].mxu1 }
 0x5ca   :  { %v10921_v20 = vpop.f32.mrb[181].mxu1  ;;  %8378 = vmatpush1.bf16.msra.mxu0 %v13294_v3 }
 0x5cb   :  { %v15080_v23 = vadd.f32 %v10921_v20, %v10920_v49  ;;  %v10923_v4 = vpop.f32.mrb[182].mxu1  ;;  %v16589_v49 = vld [vmem:[#allocation72_spill] sm:$0xff]  ;;  %v16590_v20 = vld [vmem:[#allocation73_spill] sm:$0xff] }
 0x5cc   :  { %v10924_v41 = vpop.f32.mrb[183].mxu1 }
 0x5cd   :  { %16583 = vst [vmem:[#allocation161_spill] sm:$0xff] %v15080_v23  ;;  %v15082_v48 = vadd.f32 %v10924_v41, %v10923_v4  ;;  %8267 = vmatmul.mubr.bf16.gmra.mrb[160].mxu0 %v16585_v6 }
 0x5ce   :  { %8276 = vmatprep.mubr.bf16.mxu0 %v16586_v63  ;;  %v16593_v63 = vld [vmem:[#allocation74_spill] sm:$0xff] }
 0x5cf   :  { %16584 = vst [vmem:[#allocation164_spill] sm:$0xff] %v15082_v48 }
 0x5d1   :  { %v10926_v10 = vpop.f32.mrb[184].mxu1 }
 0x5d2   :  { %v10927_v28 = vpop.f32.mrb[185].mxu1 }
 0x5d3   :  { %v15086_v46 = vadd.f32 %v10927_v28, %v10926_v10  ;;  %v10929_v27 = vpop.f32.mrb[186].mxu1  ;;  %v16594_v10 = vld [vmem:[#allocation75_spill] sm:$0xff] }
 0x5d4   :  { %v10930_v62 = vpop.f32.mrb[187].mxu1 }
 0x5d5   :  { %16587 = vst [vmem:[#allocation165_spill] sm:$0xff] %v15086_v46  ;;  %v15088_v33 = vadd.f32 %v10930_v62, %v10929_v27  ;;  %8277 = vmatmul.mubr.bf16.gmra.mrb[164].mxu0 %v16589_v49 }
 0x5d6   :  { %8286 = vmatprep.mubr.bf16.mxu0 %v16590_v20  ;;  %v16597_v20 = vld [vmem:[#allocation76_spill] sm:$0xff] }
 0x5d7   :  { %16588 = vst [vmem:[#allocation166_spill] sm:$0xff] %v15088_v33 }
 0x5d9   :  { %v10932_v3 = vpop.f32.mrb[188].mxu1 }
 0x5da   :  { %v10933_v23 = vpop.f32.mrb[189].mxu1 }
 0x5db   :  { %v15092_v41 = vadd.f32 %v10933_v23, %v10932_v3  ;;  %v10935_v4 = vpop.f32.mrb[190].mxu1  ;;  %v16598_v23 = vld [vmem:[#allocation77_spill] sm:$0xff] }
 0x5dc   :  { %v10936_v6 = vpop.f32.mrb[191].mxu1 }
 0x5dd   :  { %16591 = vst [vmem:[#allocation26_spill] sm:$0xff] %v15092_v41  ;;  %v15094_v48 = vadd.f32 %v10936_v6, %v10935_v4  ;;  %8287 = vmatmul.mubr.bf16.gmra.mrb[168].mxu0 %v16593_v63 }
 0x5de   :  { %8296 = vmatprep.mubr.bf16.mxu0 %v16594_v10  ;;  %v16601_v10 = vld [vmem:[#allocation78_spill] sm:$0xff] }
 0x5df   :  { %16592 = vst [vmem:[#allocation27_spill] sm:$0xff] %v15094_v48 }
 0x5e1   :  { %v10938_v28 = vpop.f32.mrb[192].mxu1 }
 0x5e2   :  { %v10939_v46 = vpop.f32.mrb[193].mxu1 }
 0x5e3   :  { %v15098_v27 = vadd.f32 %v10939_v46, %v10938_v28  ;;  %v10941_v62 = vpop.f32.mrb[194].mxu1  ;;  %v16602_v46 = vld [vmem:[#allocation79_spill] sm:$0xff] }
 0x5e4   :  { %v10942_v49 = vpop.f32.mrb[195].mxu1 }
 0x5e5   :  { %16595 = vst [vmem:[#allocation168_spill] sm:$0xff] %v15098_v27  ;;  %v15100_v33 = vadd.f32 %v10942_v49, %v10941_v62  ;;  %8297 = vmatmul.mubr.bf16.gmra.mrb[172].mxu0 %v16597_v20 }
 0x5e6   :  { %8306 = vmatprep.mubr.bf16.mxu0 %v16598_v23  ;;  %v16605_v23 = vld [vmem:[#allocation80_spill] sm:$0xff] }
 0x5e7   :  { %16596 = vst [vmem:[#allocation170_spill] sm:$0xff] %v15100_v33 }
 0x5e9   :  { %v10944_v3 = vpop.f32.mrb[196].mxu1 }
 0x5ea   :  { %v10945_v41 = vpop.f32.mrb[197].mxu1 }
 0x5eb   :  { %v15104_v4 = vadd.f32 %v10945_v41, %v10944_v3  ;;  %v10947_v6 = vpop.f32.mrb[198].mxu1  ;;  %v16606_v41 = vld [vmem:[#allocation81_spill] sm:$0xff] }
 0x5ec   :  { %v10948_v63 = vpop.f32.mrb[199].mxu1 }
 0x5ed   :  { %16599 = vst [vmem:[#allocation169_spill] sm:$0xff] %v15104_v4  ;;  %v15106_v48 = vadd.f32 %v10948_v63, %v10947_v6  ;;  %8307 = vmatmul.mubr.bf16.gmra.mrb[176].mxu0 %v16601_v10 }
 0x5ee   :  { %8316 = vmatprep.mubr.bf16.mxu0 %v16602_v46  ;;  %v16609_v46 = vld [vmem:[#allocation82_spill] sm:$0xff] }
 0x5ef   :  { %16600 = vst [vmem:[#allocation172_spill] sm:$0xff] %v15106_v48 }
 0x5f1   :  { %v10950_v28 = vpop.f32.mrb[200].mxu1 }
 0x5f2   :  { %v10951_v27 = vpop.f32.mrb[201].mxu1 }
 0x5f3   :  { %v15110_v62 = vadd.f32 %v10951_v27, %v10950_v28  ;;  %v10953_v49 = vpop.f32.mrb[202].mxu1  ;;  %v16610_v27 = vld [vmem:[#allocation83_spill] sm:$0xff] }
 0x5f4   :  { %v10954_v20 = vpop.f32.mrb[203].mxu1 }
 0x5f5   :  { %16603 = vst [vmem:[#allocation173_spill] sm:$0xff] %v15110_v62  ;;  %v15112_v33 = vadd.f32 %v10954_v20, %v10953_v49  ;;  %8317 = vmatmul.mubr.bf16.gmra.mrb[180].mxu0 %v16605_v23 }
 0x5f6   :  { %8326 = vmatprep.mubr.bf16.mxu0 %v16606_v41  ;;  %v16613_v41 = vld [vmem:[#allocation84_spill] sm:$0xff] }
 0x5f7   :  { %16604 = vst [vmem:[#allocation174_spill] sm:$0xff] %v15112_v33 }
 0x5f9   :  { %v10956_v3 = vpop.f32.mrb[204].mxu1 }
 0x5fa   :  { %v10957_v4 = vpop.f32.mrb[205].mxu1 }
 0x5fb   :  { %v15116_v6 = vadd.f32 %v10957_v4, %v10956_v3  ;;  %v10959_v63 = vpop.f32.mrb[206].mxu1  ;;  %v16614_v4 = vld [vmem:[#allocation85_spill] sm:$0xff] }
 0x5fc   :  { %v10960_v10 = vpop.f32.mrb[207].mxu1 }
 0x5fd   :  { %16607 = vst [vmem:[#allocation28_spill] sm:$0xff] %v15116_v6  ;;  %v15118_v48 = vadd.f32 %v10960_v10, %v10959_v63  ;;  %8327 = vmatmul.mubr.bf16.gmra.mrb[184].mxu0 %v16609_v46 }
 0x5fe   :  { %8336 = vmatprep.mubr.bf16.mxu0 %v16610_v27  ;;  %v16617_v27 = vld [vmem:[#allocation86_spill] sm:$0xff] }
 0x5ff   :  { %16608 = vst [vmem:[#allocation29_spill] sm:$0xff] %v15118_v48 }
 0x601   :  { %v10962_v28 = vpop.f32.mrb[208].mxu1 }
 0x602   :  { %v10963_v62 = vpop.f32.mrb[209].mxu1 }
 0x603   :  { %v15122_v49 = vadd.f32 %v10963_v62, %v10962_v28  ;;  %v10965_v20 = vpop.f32.mrb[210].mxu1  ;;  %v16618_v62 = vld [vmem:[#allocation87_spill] sm:$0xff]  ;;  %v13179_v28 = vld [vmem:[#allocation7 + $0xd0] sm:$0xff]  }
 0x604   :  { %v10966_v23 = vpop.f32.mrb[211].mxu1  ;;  %11014 = vmatprep.subr.bf16.mxu1 %v13179_v28  ;;  %v16626_v28 = vld [vmem:[#allocation91_spill] sm:$0xff] }
 0x605   :  { %16611 = vst [vmem:[#allocation176_spill] sm:$0xff] %v15122_v49  ;;  %v15124_v33 = vadd.f32 %v10966_v23, %v10965_v20  ;;  %8337 = vmatmul.mubr.bf16.gmra.mrb[188].mxu0 %v16613_v41 }
 0x606   :  { %8379 = vmatprep.mubr.bf16.mxu0 %v16614_v4  ;;  %v13180_v4 = vld [vmem:[#allocation7 + $0x90] sm:$0xff]  }
 0x607   :  { %16612 = vst [vmem:[#allocation178_spill] sm:$0xff] %v15124_v33  ;;  %11015 = vmatpush3.bf16.msra.mxu1 %v13180_v4 }
 0x609   :  { %v10968_v3 = vpop.f32.mrb[212].mxu1 }
 0x60a   :  { %v10969_v6 = vpop.f32.mrb[213].mxu1 }
 0x60b   :  { %v15128_v63 = vadd.f32 %v10969_v6, %v10968_v3  ;;  %v10971_v10 = vpop.f32.mrb[214].mxu1  ;;  %v16621_v6 = vld [vmem:[#allocation88_spill] sm:$0xff]  ;;  %v16622_v3 = vld [vmem:[#allocation89_spill] sm:$0xff] }
 0x60c   :  { %v10972_v46 = vpop.f32.mrb[215].mxu1 }
 0x60d   :  { %16615 = vst [vmem:[#allocation177_spill] sm:$0xff] %v15128_v63  ;;  %v15130_v48 = vadd.f32 %v10972_v46, %v10971_v10  ;;  %8380 = vmatmul.mubr.bf16.vlgmr.msra.gmra.mrb[128].mxu0 %v16617_v27 }
 0x60e   :  { %8389 = vmatprep.mubr.bf16.mxu0 %v16618_v62 }
 0x60f   :  { %16616 = vst [vmem:[#allocation180_spill] sm:$0xff] %v15130_v48 }
 0x611   :  { %v10974_v49 = vpop.f32.mrb[216].mxu1 }
 0x612   :  { %v10975_v20 = vpop.f32.mrb[217].mxu1 }
 0x613   :  { %v15134_v23 = vadd.f32 %v10975_v20, %v10974_v49  ;;  %v10977_v41 = vpop.f32.mrb[218].mxu1  ;;  %v16625_v49 = vld [vmem:[#allocation90_spill] sm:$0xff] }
 0x614   :  { %v10978_v33 = vpop.f32.mrb[219].mxu1  ;;  %v13181_v20 = vld [vmem:[#allocation7 + $0xd8] sm:$0xff]  }
 0x615   :  { %16619 = vst [vmem:[#allocation181_spill] sm:$0xff] %v15134_v23  ;;  %v15136_v0 = vadd.f32 %v10978_v33, %v10977_v41  ;;  %8390 = vmatmul.mubr.bf16.gmra.mrb[132].mxu0 %v16621_v6  ;;  %11016 = vmatprep.subr.bf16.mxu1 %v13181_v20 }
 0x616   :  { %8399 = vmatprep.mubr.bf16.mxu0 %v16622_v3  ;;  %v13182_v3 = vld [vmem:[#allocation7 + $0x98] sm:$0xff]  }
 0x617   :  { %16620 = vst [vmem:[#allocation182_spill] sm:$0xff] %v15136_v0  ;;  %11017 = vmatpush3.bf16.msra.mxu1 %v13182_v3 }
 0x619   :  { %v10980_v10 = vpop.f32.mrb[220].mxu1 }
 0x61a   :  { %v10981_v46 = vpop.f32.mrb[221].mxu1 }
 0x61b   :  { %v15140_v27 = vadd.f32 %v10981_v46, %v10980_v10  ;;  %v10983_v62 = vpop.f32.mrb[222].mxu1  ;;  %v16629_v10 = vld [vmem:[#allocation92_spill] sm:$0xff] }
 0x61c   :  { %v10984_v48 = vpop.f32.mrb[223].mxu1 }
 0x61d   :  { %16623 = vst [vmem:[#allocation30_spill] sm:$0xff] %v15140_v27  ;;  %v15142_v63 = vadd.f32 %v10984_v48, %v10983_v62  ;;  %8400 = vmatmul.mubr.bf16.gmra.mrb[136].mxu0 %v16625_v49  ;;  %v13183_v27 = vld [vmem:[#allocation7 + $0xe0] sm:$0xff]  }
 0x61e   :  { %8409 = vmatprep.mubr.bf16.mxu0 %v16626_v28  ;;  %11018 = vmatprep.subr.bf16.mxu1 %v13183_v27  ;;  %v13187_v27 = vld [vmem:[#allocation7 + $0xf0] sm:$0xff]  }
 0x61f   :  { %16624 = vst [vmem:[#allocation31_spill] sm:$0xff] %v15142_v63 }
 0x621   :  { %v10986_v33 = vpop.f32.mrb[224].mxu1 }
 0x622   :  { %v10987_v41 = vpop.f32.mrb[225].mxu1 }
 0x623   :  { %v15146_v4 = vadd.f32 %v10987_v41, %v10986_v33  ;;  %v10989_v6 = vpop.f32.mrb[226].mxu1 }
 0x624   :  { %v10990_v0 = vpop.f32.mrb[227].mxu1 }
 0x625   :  { %16627 = vst [vmem:[#allocation184_spill] sm:$0xff] %v15146_v4  ;;  %v15148_v23 = vadd.f32 %v10990_v0, %v10989_v6  ;;  %8410 = vmatmul.mubr.bf16.gmra.mrb[140].mxu0 %v16629_v10  ;;  %v13184_v0 = vld [vmem:[#allocation7 + $0xa0] sm:$0xff]  }
 0x626   :  { %11019 = vmatpush3.bf16.msra.mxu1 %v13184_v0  ;;  %v15163_v0 = vld [vmem:[#allocation7 + $0x100] sm:$0xff]  }
 0x627   :  { %16628 = vst [vmem:[#allocation186_spill] sm:$0xff] %v15148_v23 }
 0x629   :  { %v10992_v48 = vpop.f32.mrb[228].mxu1 }
 0x62a   :  { %v10993_v46 = vpop.f32.mrb[229].mxu1 }
 0x62b   :  { %v15151_v62 = vadd.f32 %v10993_v46, %v10992_v48  ;;  %v10995_v49 = vpop.f32.mrb[230].mxu1 }
 0x62c   :  { %v10996_v28 = vpop.f32.mrb[231].mxu1 }
 0x62d   :  { %16630 = vst [vmem:[#allocation185_spill] sm:$0xff] %v15151_v62  ;;  %v15153_v63 = vadd.f32 %v10996_v28, %v10995_v49  ;;  %v13185_v28 = vld [vmem:[#allocation7 + $0xe8] sm:$0xff]  }
 0x62e   :  { %11020 = vmatprep.subr.bf16.mxu1 %v13185_v28 }
 0x62f   :  { %16631 = vst [vmem:[#allocation188_spill] sm:$0xff] %v15153_v63  ;;  %v13186_v63 = vld [vmem:[#allocation7 + $0xa8] sm:$0xff]  }
 0x630   :  { %11021 = vmatpush3.bf16.msra.mxu1 %v13186_v63  ;;  %v16636_v63 = vld [vmem:[#allocation139_spill] sm:$0xff] }
 0x631   :  { %v10998_v20 = vpop.f32.mrb[232].mxu1  ;;  %11022 = vmatprep.subr.bf16.mxu1 %v13187_v27  ;;  %v8583_v28 = vmul.f32 %v16636_v63, %v16636_v63 }
 0x632   :  { %v10999_v33 = vpop.f32.mrb[233].mxu1 }
 0x633   :  { %v15155_v41 = vadd.f32 %v10999_v33, %v10998_v20  ;;  %v11001_v4 = vpop.f32.mrb[234].mxu1  ;;  %v13188_v20 = vld [vmem:[#allocation7 + $0xb0] sm:$0xff]   ;;  %v13189_v33 = vld [vmem:[#allocation7 + $0xf8] sm:$0xff]  }
 0x634   :  { %v11002_v6 = vpop.f32.mrb[235].mxu1  ;;  %11023 = vmatpush3.bf16.msra.mxu1 %v13188_v20 }
 0x635   :  { %16632 = vst [vmem:[#allocation189_spill] sm:$0xff] %v15155_v41  ;;  %v15157_v3 = vadd.f32 %v11002_v6, %v11001_v4  ;;  %11024 = vmatprep.subr.bf16.mxu1 %v13189_v33  ;;  %v13190_v4 = vld [vmem:[#allocation7 + $0xb8] sm:$0xff]  }
 0x637   :  { %16633 = vst [vmem:[#allocation190_spill] sm:$0xff] %v15157_v3  ;;  %v16637_v3 = vld [vmem:[#allocation143_spill] sm:$0xff] }
 0x638   :  { %11025 = vmatpush3.bf16.msra.mxu1 %v13190_v4  ;;  %v8584_v4 = vmul.f32 %v14664_v32, %v14664_v32 }
 0x639   :  { %v11004_v10 = vpop.f32.mrb[236].mxu1  ;;  %11146 = vmatprep.subr.bf16.mxu1 %v15163_v0 }
 0x63a   :  { %v11005_v23 = vpop.f32.mrb[237].mxu1 }
 0x63b   :  { %v15159_v48 = vadd.f32 %v11005_v23, %v11004_v10  ;;  %v11007_v46 = vpop.f32.mrb[238].mxu1 }
 0x63c   :  { %v11008_v62 = vpop.f32.mrb[239].mxu1 }
 0x63d   :  { %16634 = vst [vmem:[#allocation32_spill] sm:$0xff] %v15159_v48  ;;  %v15161_v49 = vadd.f32 %v11008_v62, %v11007_v46 }
 0x63f   :  { %16635 = vst [vmem:[#allocation33_spill] sm:$0xff] %v15161_v49 }
 0x680   :  { %v8228_v23 = vpop.f32.mrb[144].mxu0 }
 0x681   :  { %v11226_v62 = vadd.f32 %v14954_v26, %v8228_v23  ;;  %v8230_v6 = vpop.f32.mrb[145].mxu0  ;;  %v8588_v26 = vmul.f32 %v16637_v3, %v16637_v3 }
 0x682   :  { %v11227_v10 = vadd.f32 %v14956_v44, %v8230_v6  ;;  %v8232_v46 = vpop.f32.mrb[146].mxu0  ;;  %v8589_v6 = vmul.f32 %v14676_v21, %v14676_v21 }
 0x683   :  { %v8743_v27 = vmul.f32 %v11226_v62, %v11226_v62  ;;  %v11228_v20 = vadd.f32 %v14958_v55, %v8232_v46  ;;  %v8234_v33 = vpop.f32.mrb[147].mxu0 }
 0x684   :  { %v8744_v49 = vmul.f32 %v11227_v10, %v11227_v10  ;;  %v11229_v48 = vadd.f32 %v14960_v54, %v8234_v33 }
 0x685   :  { %v15176_v23 = vadd.f32 %v8743_v27, %v8583_v28  ;;  %v8748_v44 = vmul.f32 %v11228_v20, %v11228_v20 }
 0x686   :  { %v15180_v63 = vadd.f32 %v8744_v49, %v8584_v4  ;;  %v8749_v62 = vmul.f32 %v11229_v48, %v11229_v48  ;;  %v16638_v49 = vld [vmem:[#allocation147_spill] sm:$0xff] }
 0x687   :  { %v15182_v55 = vadd.f32 %v8748_v44, %v8588_v26  ;;  %v8593_v48 = vmul.f32 %v16638_v49, %v16638_v49 }
 0x688   :  { %v15184_v46 = vadd.f32 %v8749_v62, %v8589_v6  ;;  %v8238_v32 = vpop.f32.mrb[148].mxu0  ;;  %v16639_v6 = vld [vmem:[#allocation151_spill] sm:$0xff] }
 0x689   :  { %v11230_v10 = vadd.f32 %v14964_v25, %v8238_v32  ;;  %v8240_v54 = vpop.f32.mrb[149].mxu0  ;;  %v8594_v25 = vmul.f32 %v14690_v57, %v14690_v57 }
 0x68a   :  { %v11231_v28 = vadd.f32 %v14966_v37, %v8240_v54  ;;  %v8242_v27 = vpop.f32.mrb[150].mxu0  ;;  %v8598_v37 = vmul.f32 %v16639_v6, %v16639_v6  ;;  %v8599_v54 = vmul.f32 %v14700_v31, %v14700_v31 }
 0x68b   :  { %v8753_v20 = vmul.f32 %v11230_v10, %v11230_v10  ;;  %v11232_v33 = vadd.f32 %v14968_v59, %v8242_v27  ;;  %v8244_v4 = vpop.f32.mrb[151].mxu0 }
 0x68c   :  { %v8754_v26 = vmul.f32 %v11231_v28, %v11231_v28  ;;  %v11233_v44 = vadd.f32 %v14970_v36, %v8244_v4 }
 0x68d   :  { %v15200_v62 = vadd.f32 %v8753_v20, %v8593_v48  ;;  %v8758_v32 = vmul.f32 %v11232_v33, %v11232_v33  ;;  %v16640_v33 = vld [vmem:[#allocation155_spill] sm:$0xff] }
 0x68e   :  { %v15204_v49 = vadd.f32 %v8754_v26, %v8594_v25  ;;  %v8759_v10 = vmul.f32 %v11233_v44, %v11233_v44  ;;  %v8603_v25 = vmul.f32 %v16640_v33, %v16640_v33 }
 0x68f   :  { %v15206_v59 = vadd.f32 %v8758_v32, %v8598_v37 }
 0x690   :  { %v15208_v27 = vadd.f32 %v8759_v10, %v8599_v54  ;;  %v8248_v57 = vpop.f32.mrb[152].mxu0  ;;  %v16641_v54 = vld [vmem:[#allocation159_spill] sm:$0xff] }
 0x691   :  { %v11234_v28 = vadd.f32 %v14974_v34, %v8248_v57  ;;  %v8250_v36 = vpop.f32.mrb[153].mxu0  ;;  %v8604_v34 = vmul.f32 %v14714_v50, %v14714_v50  ;;  %v8608_v10 = vmul.f32 %v16641_v54, %v16641_v54 }
 0x692   :  { %v11235_v20 = vadd.f32 %v14976_v38, %v8250_v36  ;;  %v8252_v31 = vpop.f32.mrb[154].mxu0  ;;  %v8609_v36 = vmul.f32 %v14724_v43, %v14724_v43 }
 0x693   :  { %v8763_v26 = vmul.f32 %v11234_v28, %v11234_v28  ;;  %v11236_v44 = vadd.f32 %v14978_v11, %v8252_v31  ;;  %v8254_v6 = vpop.f32.mrb[155].mxu0 }
 0x694   :  { %v8764_v37 = vmul.f32 %v11235_v20, %v11235_v20  ;;  %v11237_v32 = vadd.f32 %v14980_v24, %v8254_v6 }
 0x695   :  { %v15224_v57 = vadd.f32 %v8763_v26, %v8603_v25  ;;  %v8768_v38 = vmul.f32 %v11236_v44, %v11236_v44  ;;  %v16642_v44 = vld [vmem:[#allocation163_spill] sm:$0xff] }
 0x696   :  { %v15228_v33 = vadd.f32 %v8764_v37, %v8604_v34  ;;  %v8769_v28 = vmul.f32 %v11237_v32, %v11237_v32  ;;  %v8613_v34 = vmul.f32 %v16642_v44, %v16642_v44 }
 0x697   :  { %v15230_v11 = vadd.f32 %v8768_v38, %v8608_v10 }
 0x698   :  { %v15232_v31 = vadd.f32 %v8769_v28, %v8609_v36  ;;  %v8258_v50 = vpop.f32.mrb[156].mxu0  ;;  %v16643_v36 = vld [vmem:[#allocation167_spill] sm:$0xff] }
 0x699   :  { %v11238_v20 = vadd.f32 %v14984_v1, %v8258_v50  ;;  %v8260_v24 = vpop.f32.mrb[157].mxu0  ;;  %v8614_v1 = vmul.f32 %v14738_v7, %v14738_v7 }
 0x69a   :  { %v11239_v25 = vadd.f32 %v14986_v17, %v8260_v24  ;;  %v8262_v26 = vpop.f32.mrb[158].mxu0  ;;  %v8618_v17 = vmul.f32 %v16643_v36, %v16643_v36  ;;  %v8619_v24 = vmul.f32 %v14748_v13, %v14748_v13 }
 0x69b   :  { %v8773_v37 = vmul.f32 %v11238_v20, %v11238_v20  ;;  %v11240_v32 = vadd.f32 %v14988_v42, %v8262_v26  ;;  %v8264_v54 = vpop.f32.mrb[159].mxu0 }
 0x69c   :  { %v8774_v10 = vmul.f32 %v11239_v25, %v11239_v25  ;;  %v11241_v38 = vadd.f32 %v14990_v18, %v8264_v54 }
 0x69d   :  { %v15248_v28 = vadd.f32 %v8773_v37, %v8613_v34  ;;  %v8778_v50 = vmul.f32 %v11240_v32, %v11240_v32  ;;  %v16644_v32 = vld [vmem:[#allocation171_spill] sm:$0xff] }
 0x69e   :  { %v15252_v44 = vadd.f32 %v8774_v10, %v8614_v1  ;;  %v8779_v20 = vmul.f32 %v11241_v38, %v11241_v38  ;;  %v8623_v1 = vmul.f32 %v16644_v32, %v16644_v32 }
 0x69f   :  { %v15254_v42 = vadd.f32 %v8778_v50, %v8618_v17 }
 0x6a0   :  { %v15256_v26 = vadd.f32 %v8779_v20, %v8619_v24  ;;  %v8268_v7 = vpop.f32.mrb[160].mxu0  ;;  %v16645_v24 = vld [vmem:[#allocation175_spill] sm:$0xff] }
 0x6a1   :  { %v11242_v25 = vadd.f32 %v14994_v15, %v8268_v7  ;;  %v8270_v18 = vpop.f32.mrb[161].mxu0  ;;  %v8624_v15 = vmul.f32 %v14762_v56, %v14762_v56  ;;  %v8628_v20 = vmul.f32 %v16645_v24, %v16645_v24 }
 0x6a2   :  { %v11243_v37 = vadd.f32 %v14996_v8, %v8270_v18  ;;  %v8272_v13 = vpop.f32.mrb[162].mxu0  ;;  %v8629_v18 = vmul.f32 %v14772_v45, %v14772_v45  ;;  %v16662_v45 = vld [vmem:[#allocation207_spill] sm:$0xff] }
 0x6a3   :  { %v8783_v10 = vmul.f32 %v11242_v25, %v11242_v25  ;;  %v11244_v38 = vadd.f32 %v14998_v52, %v8272_v13  ;;  %v8274_v36 = vpop.f32.mrb[163].mxu0  ;;  %v8668_v34 = vmul.f32 %v16662_v45, %v16662_v45  ;;  %v16672_v45 = vld [vmem:[#allocation215_spill] sm:$0xff] }
 0x6a4   :  { %v8784_v17 = vmul.f32 %v11243_v37, %v11243_v37  ;;  %v11245_v50 = vadd.f32 %v15000_v40, %v8274_v36 }
 0x6a5   :  { %v15272_v7 = vadd.f32 %v8783_v10, %v8623_v1  ;;  %v8788_v8 = vmul.f32 %v11244_v38, %v11244_v38  ;;  %v16646_v38 = vld [vmem:[#allocation179_spill] sm:$0xff] }
 0x6a6   :  { %v15276_v32 = vadd.f32 %v8784_v17, %v8624_v15  ;;  %v8789_v25 = vmul.f32 %v11245_v50, %v11245_v50  ;;  %v8633_v15 = vmul.f32 %v16646_v38, %v16646_v38 }
 0x6a7   :  { %v15278_v52 = vadd.f32 %v8788_v8, %v8628_v20 }
 0x6a8   :  { %v15280_v13 = vadd.f32 %v8789_v25, %v8629_v18  ;;  %v8278_v56 = vpop.f32.mrb[164].mxu0  ;;  %v16647_v18 = vld [vmem:[#allocation183_spill] sm:$0xff] }
 0x6a9   :  { %v11246_v37 = vadd.f32 %v15004_v58, %v8278_v56  ;;  %v8280_v40 = vpop.f32.mrb[165].mxu0  ;;  %v8634_v58 = vmul.f32 %v14786_v5, %v14786_v5 }
 0x6aa   :  { %v11247_v1 = vadd.f32 %v15006_v51, %v8280_v40  ;;  %v8282_v10 = vpop.f32.mrb[166].mxu0  ;;  %v8638_v51 = vmul.f32 %v16647_v18, %v16647_v18  ;;  %v8639_v40 = vmul.f32 %v14796_v29, %v14796_v29 }
 0x6ab   :  { %v8793_v17 = vmul.f32 %v11246_v37, %v11246_v37  ;;  %v11248_v50 = vadd.f32 %v15008_v22, %v8282_v10  ;;  %v8284_v24 = vpop.f32.mrb[167].mxu0 }
 0x6ac   :  { %v8794_v20 = vmul.f32 %v11247_v1, %v11247_v1  ;;  %v11249_v8 = vadd.f32 %v15010_v9, %v8284_v24 }
 0x6ad   :  { %v15296_v25 = vadd.f32 %v8793_v17, %v8633_v15  ;;  %v8798_v56 = vmul.f32 %v11248_v50, %v11248_v50  ;;  %v16648_v50 = vld [vmem:[#allocation187_spill] sm:$0xff] }
 0x6ae   :  { %v15300_v38 = vadd.f32 %v8794_v20, %v8634_v58  ;;  %v8799_v37 = vmul.f32 %v11249_v8, %v11249_v8  ;;  %v8643_v58 = vmul.f32 %v16648_v50, %v16648_v50 }
 0x6af   :  { %v15302_v22 = vadd.f32 %v8798_v56, %v8638_v51 }
 0x6b0   :  { %v15304_v10 = vadd.f32 %v8799_v37, %v8639_v40  ;;  %v8288_v5 = vpop.f32.mrb[168].mxu0  ;;  %v16649_v40 = vld [vmem:[#allocation191_spill] sm:$0xff] }
 0x6b1   :  { %v11250_v1 = vadd.f32 %v15014_v14, %v8288_v5  ;;  %v8290_v9 = vpop.f32.mrb[169].mxu0  ;;  %v8644_v14 = vmul.f32 %v14810_v19, %v14810_v19  ;;  %v8648_v37 = vmul.f32 %v16649_v40, %v16649_v40 }
 0x6b2   :  { %v11251_v17 = vadd.f32 %v15016_v35, %v8290_v9  ;;  %v8292_v29 = vpop.f32.mrb[170].mxu0  ;;  %v8649_v9 = vmul.f32 %v14820_v16, %v14820_v16 }
 0x6b3   :  { %v8803_v20 = vmul.f32 %v11250_v1, %v11250_v1  ;;  %v11252_v8 = vadd.f32 %v15018_v39, %v8292_v29  ;;  %v8294_v18 = vpop.f32.mrb[171].mxu0 }
 0x6b4   :  { %v8804_v51 = vmul.f32 %v11251_v17, %v11251_v17  ;;  %v11253_v56 = vadd.f32 %v15020_v53, %v8294_v18 }
 0x6b5   :  { %v15320_v5 = vadd.f32 %v8803_v20, %v8643_v58  ;;  %v8808_v35 = vmul.f32 %v11252_v8, %v11252_v8  ;;  %v16652_v8 = vld [vmem:[#allocation195_spill] sm:$0xff] }
 0x6b6   :  { %v15324_v50 = vadd.f32 %v8804_v51, %v8644_v14  ;;  %v8809_v1 = vmul.f32 %v11253_v56, %v11253_v56  ;;  %v8653_v14 = vmul.f32 %v16652_v8, %v16652_v8 }
 0x6b7   :  { %v15326_v39 = vadd.f32 %v8808_v35, %v8648_v37 }
 0x6b8   :  { %16650 = vst [vmem:[#allocation192_spill] sm:$0xff] %v15324_v50  ;;  %v15328_v29 = vadd.f32 %v8809_v1, %v8649_v9  ;;  %v8298_v19 = vpop.f32.mrb[172].mxu0  ;;  %v16653_v9 = vld [vmem:[#allocation199_spill] sm:$0xff] }
 0x6b9   :  { %v11254_v17 = vadd.f32 %v15024_v61, %v8298_v19  ;;  %v8300_v53 = vpop.f32.mrb[173].mxu0  ;;  %v8654_v61 = vmul.f32 %v14834_v30, %v14834_v30 }
 0x6ba   :  { %16651 = vst [vmem:[#allocation194_spill] sm:$0xff] %v15328_v29  ;;  %v11255_v58 = vadd.f32 %v15026_v2, %v8300_v53  ;;  %v8302_v20 = vpop.f32.mrb[174].mxu0  ;;  %v8658_v2 = vmul.f32 %v16653_v9, %v16653_v9  ;;  %v8659_v53 = vmul.f32 %v14844_v12, %v14844_v12  ;;  %v16659_v9 = vld [vmem:[#allocation145_spill] sm:$0xff] }
 0x6bb   :  { %v8813_v51 = vmul.f32 %v11254_v17, %v11254_v17  ;;  %v11256_v56 = vadd.f32 %v15028_v60, %v8302_v20  ;;  %v8304_v40 = vpop.f32.mrb[175].mxu0 }
 0x6bc   :  { %v8814_v37 = vmul.f32 %v11255_v58, %v11255_v58  ;;  %v11257_v35 = vadd.f32 %v15030_v47, %v8304_v40  ;;  %v16656_v58 = vld [vmem:[#allocation144_spill] sm:$0xff] }
 0x6bd   :  { %v15344_v1 = vadd.f32 %v8813_v51, %v8653_v14  ;;  %v8818_v19 = vmul.f32 %v11256_v56, %v11256_v56  ;;  %v16657_v51 = vld [vmem:[#allocation146_spill] sm:$0xff] }
 0x6be   :  { %v15348_v8 = vadd.f32 %v8814_v37, %v8654_v61  ;;  %v8819_v17 = vmul.f32 %v11257_v35, %v11257_v35  ;;  %v16658_v61 = vld [vmem:[#allocation203_spill] sm:$0xff] }
 0x6bf   :  { %v15350_v60 = vadd.f32 %v8818_v19, %v8658_v2  ;;  %v8663_v37 = vmul.f32 %v16658_v61, %v16658_v61 }
 0x6c0   :  { %16654 = vst [vmem:[#allocation193_spill] sm:$0xff] %v15348_v8  ;;  %v15352_v20 = vadd.f32 %v8819_v17, %v8659_v53  ;;  %v8308_v30 = vpop.f32.mrb[176].mxu0  ;;  %v16660_v53 = vld [vmem:[#allocation128_spill] sm:$0xff] }
 0x6c1   :  { %v11258_v16 = vadd.f32 %v16656_v58, %v8308_v30  ;;  %v8310_v47 = vpop.f32.mrb[177].mxu0  ;;  %v8664_v17 = vmul.f32 %v16660_v53, %v16660_v53  ;;  %v16661_v58 = vld [vmem:[#allocation148_spill] sm:$0xff] }
 0x6c2   :  { %16655 = vst [vmem:[#allocation196_spill] sm:$0xff] %v15352_v20  ;;  %v11259_v56 = vadd.f32 %v16657_v51, %v8310_v47  ;;  %v8312_v12 = vpop.f32.mrb[178].mxu0  ;;  %v16663_v51 = vld [vmem:[#allocation130_spill] sm:$0xff] }
 0x6c3   :  { %v8823_v35 = vmul.f32 %v11258_v16, %v11258_v16  ;;  %v11260_v2 = vadd.f32 %v16659_v9, %v8312_v12  ;;  %v8314_v19 = vpop.f32.mrb[179].mxu0  ;;  %v8669_v43 = vmul.f32 %v16663_v51, %v16663_v51  ;;  %v16670_v51 = vld [vmem:[#allocation133_spill] sm:$0xff] }
 0x6c4   :  { %v8824_v30 = vmul.f32 %v11259_v56, %v11259_v56  ;;  %v11261_v15 = vadd.f32 %v16661_v58, %v8314_v19  ;;  %v16666_v56 = vld [vmem:[#allocation149_spill] sm:$0xff]  ;;  %v16673_v58 = vld [vmem:[#allocation134_spill] sm:$0xff] }
 0x6c5   :  { %v15368_v14 = vadd.f32 %v8823_v35, %v8663_v37  ;;  %v8828_v47 = vmul.f32 %v11260_v2, %v11260_v2  ;;  %v16667_v37 = vld [vmem:[#allocation150_spill] sm:$0xff]  ;;  %v8679_v18 = vmul.f32 %v16673_v58, %v16673_v58 }
 0x6c6   :  { %v15372_v61 = vadd.f32 %v8824_v30, %v8664_v17  ;;  %v8829_v16 = vmul.f32 %v11261_v15, %v11261_v15  ;;  %v16668_v17 = vld [vmem:[#allocation211_spill] sm:$0xff]  ;;  %v16669_v30 = vld [vmem:[#allocation22_spill] sm:$0xff] }
 0x6c7   :  { %v15374_v12 = vadd.f32 %v8828_v47, %v8668_v34  ;;  %v8673_v15 = vmul.f32 %v16668_v17, %v16668_v17 }
 0x6c8   :  { %16664 = vst [vmem:[#allocation197_spill] sm:$0xff] %v15372_v61  ;;  %v15376_v9 = vadd.f32 %v8829_v16, %v8669_v43  ;;  %v8318_v53 = vpop.f32.mrb[180].mxu0  ;;  %v8674_v16 = vmul.f32 %v16670_v51, %v16670_v51 }
 0x6c9   :  { %v11262_v48 = vadd.f32 %v16666_v56, %v8318_v53  ;;  %v8320_v19 = vpop.f32.mrb[181].mxu0  ;;  %v16671_v56 = vld [vmem:[#allocation23_spill] sm:$0xff] }
 0x6ca   :  { %16665 = vst [vmem:[#allocation198_spill] sm:$0xff] %v15376_v9  ;;  %v11263_v35 = vadd.f32 %v16667_v37, %v8320_v19  ;;  %v8322_v2 = vpop.f32.mrb[182].mxu0  ;;  %v8678_v19 = vmul.f32 %v16672_v45, %v16672_v45  ;;  %v16682_v45 = vld [vmem:[#allocation223_spill] sm:$0xff] }
 0x6cb   :  { %v8833_v34 = vmul.f32 %v11262_v48, %v11262_v48  ;;  %v11264_v43 = vadd.f32 %v16669_v30, %v8322_v2  ;;  %v8324_v47 = vpop.f32.mrb[183].mxu0  ;;  %v8688_v54 = vmul.f32 %v16682_v45, %v16682_v45  ;;  %v16692_v45 = vld [vmem:[#allocation231_spill] sm:$0xff] }
 0x6cc   :  { %v8834_v53 = vmul.f32 %v11263_v35, %v11263_v35  ;;  %v11265_v21 = vadd.f32 %v16671_v56, %v8324_v47  ;;  %v16676_v35 = vld [vmem:[#allocation152_spill] sm:$0xff] }
 0x6cd   :  { %v15392_v37 = vadd.f32 %v8833_v34, %v8673_v15  ;;  %v8838_v40 = vmul.f32 %v11264_v43, %v11264_v43  ;;  %v16677_v34 = vld [vmem:[#allocation154_spill] sm:$0xff] }
 0x6ce   :  { %v15396_v17 = vadd.f32 %v8834_v53, %v8674_v16  ;;  %v8839_v48 = vmul.f32 %v11265_v21, %v11265_v21  ;;  %v16678_v16 = vld [vmem:[#allocation219_spill] sm:$0xff]  ;;  %v16679_v53 = vld [vmem:[#allocation153_spill] sm:$0xff] }
 0x6cf   :  { %v15398_v2 = vadd.f32 %v8838_v40, %v8678_v19  ;;  %v8683_v21 = vmul.f32 %v16678_v16, %v16678_v16  ;;  %v16680_v19 = vld [vmem:[#allocation136_spill] sm:$0xff] }
 0x6d0   :  { %16674 = vst [vmem:[#allocation34_spill] sm:$0xff] %v15396_v17  ;;  %v15400_v30 = vadd.f32 %v8839_v48, %v8679_v18  ;;  %v8328_v51 = vpop.f32.mrb[184].mxu0  ;;  %v8684_v48 = vmul.f32 %v16680_v19, %v16680_v19 }
 0x6d1   :  { %v11266_v24 = vadd.f32 %v16676_v35, %v8328_v51  ;;  %v8330_v47 = vpop.f32.mrb[185].mxu0  ;;  %v16681_v35 = vld [vmem:[#allocation156_spill] sm:$0xff] }
 0x6d2   :  { %16675 = vst [vmem:[#allocation35_spill] sm:$0xff] %v15400_v30  ;;  %v11267_v43 = vadd.f32 %v16677_v34, %v8330_v47  ;;  %v8332_v58 = vpop.f32.mrb[186].mxu0  ;;  %v16683_v34 = vld [vmem:[#allocation138_spill] sm:$0xff] }
 0x6d3   :  { %v8843_v40 = vmul.f32 %v11266_v24, %v11266_v24  ;;  %v11268_v18 = vadd.f32 %v16679_v53, %v8332_v58  ;;  %v8334_v56 = vpop.f32.mrb[187].mxu0  ;;  %v8689_v6 = vmul.f32 %v16683_v34, %v16683_v34  ;;  %v16690_v34 = vld [vmem:[#allocation141_spill] sm:$0xff] }
 0x6d4   :  { %v8844_v51 = vmul.f32 %v11267_v43, %v11267_v43  ;;  %v11269_v36 = vadd.f32 %v16681_v35, %v8334_v56  ;;  %v16686_v43 = vld [vmem:[#allocation157_spill] sm:$0xff]  ;;  %v16693_v35 = vld [vmem:[#allocation142_spill] sm:$0xff] }
 0x6d5   :  { %v15416_v15 = vadd.f32 %v8843_v40, %v8683_v21  ;;  %v8848_v47 = vmul.f32 %v11268_v18, %v11268_v18  ;;  %v16687_v21 = vld [vmem:[#allocation158_spill] sm:$0xff] }
 0x6d6   :  { %v15420_v16 = vadd.f32 %v8844_v51, %v8684_v48  ;;  %v8849_v24 = vmul.f32 %v11269_v36, %v11269_v36  ;;  %v16688_v48 = vld [vmem:[#allocation227_spill] sm:$0xff]  ;;  %v16689_v51 = vld [vmem:[#allocation24_spill] sm:$0xff] }
 0x6d7   :  { %v15422_v58 = vadd.f32 %v8848_v47, %v8688_v54  ;;  %v8693_v36 = vmul.f32 %v16688_v48, %v16688_v48 }
 0x6d8   :  { %16684 = vst [vmem:[#allocation200_spill] sm:$0xff] %v15420_v16  ;;  %v15424_v53 = vadd.f32 %v8849_v24, %v8689_v6  ;;  %v8338_v19 = vpop.f32.mrb[188].mxu0  ;;  %v8694_v24 = vmul.f32 %v16690_v34, %v16690_v34  ;;  %v8699_v16 = vmul.f32 %v16693_v35, %v16693_v35  ;;  %v13192_v35 = vld [vmem:[#allocation7 + $0x108] sm:$0xff]  }
 0x6d9   :  { %v11270_v4 = vadd.f32 %v16686_v43, %v8338_v19  ;;  %v8340_v56 = vpop.f32.mrb[189].mxu0  ;;  %v16691_v43 = vld [vmem:[#allocation25_spill] sm:$0xff] }
 0x6da   :  { %16685 = vst [vmem:[#allocation202_spill] sm:$0xff] %v15424_v53  ;;  %v11271_v40 = vadd.f32 %v16687_v21, %v8340_v56  ;;  %v8342_v18 = vpop.f32.mrb[190].mxu0  ;;  %v8698_v56 = vmul.f32 %v16692_v45, %v16692_v45 }
 0x6db   :  { %v8853_v54 = vmul.f32 %v11270_v4, %v11270_v4  ;;  %v11272_v6 = vadd.f32 %v16689_v51, %v8342_v18  ;;  %v8344_v47 = vpop.f32.mrb[191].mxu0 }
 0x6dc   :  { %v8854_v19 = vmul.f32 %v11271_v40, %v11271_v40  ;;  %v11273_v3 = vadd.f32 %v16691_v43, %v8344_v47  ;;  %v16696_v40 = vld [vmem:[#allocation109_spill] sm:$0xff] }
 0x6dd   :  { %v15440_v21 = vadd.f32 %v8853_v54, %v8693_v36  ;;  %v8858_v41 = vmul.f32 %v11272_v6, %v11272_v6  ;;  %v8543_v47 = vmul.f32 %v16696_v40, %v16696_v40  ;;  %v16697_v36 = vld [vmem:[#allocation93_spill] sm:$0xff]  ;;  %v16698_v6 = vld [vmem:[#allocation111_spill] sm:$0xff] }
 0x6de   :  { %v15444_v48 = vadd.f32 %v8854_v19, %v8694_v24  ;;  %v8859_v4 = vmul.f32 %v11273_v3, %v11273_v3  ;;  %v8544_v54 = vmul.f32 %v16697_v36, %v16697_v36 }
 0x6df   :  { %v15446_v18 = vadd.f32 %v8858_v41, %v8698_v56 }
 0x6e0   :  { %16694 = vst [vmem:[#allocation201_spill] sm:$0xff] %v15444_v48  ;;  %v15448_v51 = vadd.f32 %v8859_v4, %v8699_v16  ;;  %v8381_v34 = vpop.f32.mrb[128].mxu0  ;;  %v8548_v16 = vmul.f32 %v16698_v6, %v16698_v6  ;;  %v16699_v4 = vld [vmem:[#allocation94_spill] sm:$0xff]  ;;  %v16700_v48 = vld [vmem:[#allocation115_spill] sm:$0xff]  ;;  %v16701_v6 = vld [vmem:[#allocation97_spill] sm:$0xff] }
 0x6e1   :  { %v8703_v43 = vmul.f32 %v8381_v34, %v8381_v34  ;;  %v8383_v53 = vpop.f32.mrb[129].mxu0  ;;  %v8549_v34 = vmul.f32 %v16699_v4, %v16699_v4 }
 0x6e2   :  { %16695 = vst [vmem:[#allocation204_spill] sm:$0xff] %v15448_v51  ;;  %v8704_v3 = vmul.f32 %v8383_v53, %v8383_v53  ;;  %v8385_v41 = vpop.f32.mrb[130].mxu0 }
 0x6e3   :  { %v8863_v24 = vadd.f32 %v8703_v43, %v8543_v47  ;;  %v8708_v19 = vmul.f32 %v8385_v41, %v8385_v41  ;;  %v8387_v56 = vpop.f32.mrb[131].mxu0  ;;  %v8553_v47 = vmul.f32 %v16700_v48, %v16700_v48 }
 0x6e4   :  { %v15462_v40 = vadd.f32 %v8704_v3, %v8544_v54  ;;  %v8709_v45 = vmul.f32 %v8387_v56, %v8387_v56  ;;  %v8554_v54 = vmul.f32 %v16701_v6, %v16701_v6 }
 0x6e5   :  { %v8868_v17 = vadd.f32 %v8708_v19, %v8548_v16  ;;  %v16702_v16 = vld [vmem:[#allocation96_spill] sm:$0xff] }
 0x6e6   :  { %v15464_v30 = vadd.f32 %v8709_v45, %v8549_v34  ;;  %v16703_v45 = vld [vmem:[#allocation95_spill] sm:$0xff] }
 0x6e7   :  { %v9023_v36 = vpack.c.bf16 %v8868_v17, %v8863_v24  ;;  %v16704_v19 = vpack.c.bf16 %v16702_v16, %v16703_v45  ;;  %v16705_v17 = vld [vmem:[#allocation119_spill] sm:$0xff] }
 0x6e8   :  { %v8391_v61 = vpop.f32.mrb[132].mxu0  ;;  %v8558_v24 = vmul.f32 %v16705_v17, %v16705_v17 }
 0x6e9   :  { %v8713_v43 = vmul.f32 %v8391_v61, %v8391_v61  ;;  %v8393_v41 = vpop.f32.mrb[133].mxu0  ;;  %9613 = vmatprep.mubr.bf16.mxu1 %v9023_v36  ;;  %v16706_v61 = vld [vmem:[#allocation98_spill] sm:$0xff] }
 0x6ea   :  { %v8714_v3 = vmul.f32 %v8393_v41, %v8393_v41  ;;  %v8395_v56 = vpop.f32.mrb[134].mxu0  ;;  %9614 = vmatmul.mubr.bf16.vlgmr.msra.gmra.mrb[240].mxu1 %v16704_v19  ;;  %v8559_v48 = vmul.f32 %v16706_v61, %v16706_v61  ;;  %v13193_v41 = vld [vmem:[#allocation7 + $0x110] sm:$0xff]  }
 0x6eb   :  { %v8873_v4 = vadd.f32 %v8713_v43, %v8553_v47  ;;  %v8718_v34 = vmul.f32 %v8395_v56, %v8395_v56  ;;  %v8397_v53 = vpop.f32.mrb[135].mxu0  ;;  %11147 = vmatpush3.bf16.msra.mxu1 %v15163_v0  ;;  %v13194_v56 = vld [vmem:[#allocation7 + $0x118] sm:$0xff]   ;;  %v16707_v0 = vld [vmem:[#allocation123_spill] sm:$0xff] }
 0x6ec   :  { %v15480_v36 = vadd.f32 %v8714_v3, %v8554_v54  ;;  %v8719_v6 = vmul.f32 %v8397_v53, %v8397_v53  ;;  %11148 = vmatprep.subr.bf16.mxu1 %v13192_v35  ;;  %v8563_v45 = vmul.f32 %v16707_v0, %v16707_v0  ;;  %v16708_v53 = vld [vmem:[#allocation101_spill] sm:$0xff]  ;;  %v16713_v0 = vld [vmem:[#allocation102_spill] sm:$0xff] }
 0x6ed   :  { %v8878_v51 = vadd.f32 %v8718_v34, %v8558_v24  ;;  %v8564_v3 = vmul.f32 %v16708_v53, %v16708_v53  ;;  %v16709_v34 = vld [vmem:[#allocation100_spill] sm:$0xff] }
 0x6ee   :  { %v15482_v9 = vadd.f32 %v8719_v6, %v8559_v48 }
 0x6ef   :  { %v9028_v16 = vpack.c.bf16 %v8878_v51, %v8873_v4  ;;  %11149 = vmatpush3.bf16.msra.mxu1 %v13192_v35  ;;  %v16710_v51 = vld [vmem:[#allocation99_spill] sm:$0xff] }
 0x6f0   :  { %v8401_v43 = vpop.f32.mrb[136].mxu0  ;;  %11150 = vmatprep.subr.bf16.mxu1 %v13193_v41  ;;  %v16711_v35 = vpack.c.bf16 %v16709_v34, %v16710_v51  ;;  %v16712_v4 = vld [vmem:[#allocation127_spill] sm:$0xff] }
 0x6f1   :  { %v8723_v19 = vmul.f32 %v8401_v43, %v8401_v43  ;;  %v8403_v54 = vpop.f32.mrb[137].mxu0  ;;  %9621 = vmatprep.mubr.bf16.mxu1 %v9028_v16  ;;  %v8568_v61 = vmul.f32 %v16712_v4, %v16712_v4  ;;  %v8569_v43 = vmul.f32 %v16713_v0, %v16713_v0 }
 0x6f2   :  { %v8724_v17 = vmul.f32 %v8403_v54, %v8403_v54  ;;  %v8405_v24 = vpop.f32.mrb[138].mxu0  ;;  %9622 = vmatmul.mubr.bf16.gmra.mrb[244].mxu1 %v16711_v35  ;;  %v13195_v54 = vld [vmem:[#allocation7 + $0x120] sm:$0xff]   ;;  %v13196_v35 = vld [vmem:[#allocation7 + $0x128] sm:$0xff]  }
 0x6f3   :  { %v8883_v48 = vadd.f32 %v8723_v19, %v8563_v45  ;;  %v8728_v6 = vmul.f32 %v8405_v24, %v8405_v24  ;;  %v8407_v47 = vpop.f32.mrb[139].mxu0  ;;  %11151 = vmatpush3.bf16.msra.mxu1 %v13193_v41  ;;  %v16714_v41 = vld [vmem:[#allocation131_spill] sm:$0xff] }
 0x6f4   :  { %v15497_v16 = vadd.f32 %v8724_v17, %v8564_v3  ;;  %v8729_v8 = vmul.f32 %v8407_v47, %v8407_v47  ;;  %11152 = vmatprep.subr.bf16.mxu1 %v13194_v56  ;;  %v8573_v19 = vmul.f32 %v16714_v41, %v16714_v41  ;;  %v16715_v47 = vld [vmem:[#allocation105_spill] sm:$0xff] }
 0x6f5   :  { %v8888_v53 = vadd.f32 %v8728_v6, %v8568_v61  ;;  %v8574_v17 = vmul.f32 %v16715_v47, %v16715_v47  ;;  %v16716_v61 = vld [vmem:[#allocation104_spill] sm:$0xff]  ;;  %v16719_v6 = vld [vmem:[#allocation135_spill] sm:$0xff] }
 0x6f6   :  { %v15499_v20 = vadd.f32 %v8729_v8, %v8569_v43  ;;  %v8578_v0 = vmul.f32 %v16719_v6, %v16719_v6  ;;  %v13197_v47 = vld [vmem:[#allocation7 + $0x130] sm:$0xff]  }
 0x6f7   :  { %v9033_v34 = vpack.c.bf16 %v8888_v53, %v8883_v48  ;;  %11153 = vmatpush3.bf16.msra.mxu1 %v13194_v56  ;;  %v16717_v48 = vld [vmem:[#allocation103_spill] sm:$0xff]  ;;  %v16720_v53 = vld [vmem:[#allocation106_spill] sm:$0xff] }
 0x6f8   :  { %v8411_v51 = vpop.f32.mrb[140].mxu0  ;;  %11154 = vmatprep.subr.bf16.mxu1 %v13195_v54  ;;  %v9034_v45 = vpack.c.bf16 %v15499_v20, %v15497_v16  ;;  %v16718_v56 = vpack.c.bf16 %v16716_v61, %v16717_v48  ;;  %v13198_v48 = vld [vmem:[#allocation7 + $0x138] sm:$0xff]  }
 0x6f9   :  { %v8733_v24 = vmul.f32 %v8411_v51, %v8411_v51  ;;  %v8413_v3 = vpop.f32.mrb[141].mxu0  ;;  %9629 = vmatprep.mubr.bf16.mxu1 %v9033_v34  ;;  %v8579_v51 = vmul.f32 %v16720_v53, %v16720_v53  ;;  %v16738_v53 = vld [vmem:[#allocation113_spill] sm:$0xff] }
 0x6fa   :  { %v8734_v4 = vmul.f32 %v8413_v3, %v8413_v3  ;;  %v8415_v8 = vpop.f32.mrb[142].mxu0  ;;  %9630 = vmatmul.mubr.bf16.gmra.mrb[248].mxu1 %v16718_v56  ;;  %v16721_v56 = vld [vmem:[#allocation108_spill] sm:$0xff] }
 0x6fb   :  { %v8893_v43 = vadd.f32 %v8733_v24, %v8573_v19  ;;  %v8738_v20 = vmul.f32 %v8415_v8, %v8415_v8  ;;  %v8417_v16 = vpop.f32.mrb[143].mxu0  ;;  %11155 = vmatpush3.bf16.msra.mxu1 %v13195_v54  ;;  %v16722_v19 = vld [vmem:[#allocation107_spill] sm:$0xff]  ;;  %v16724_v54 = vpack.c.bf16 %v15182_v55, %v15176_v23  ;;  %v16733_v23 = vld [vmem:[#allocation114_spill] sm:$0xff]  ;;  %v16734_v55 = vld [vmem:[#allocation112_spill] sm:$0xff] }
 0x6fc   :  { %v8894_v34 = vadd.f32 %v8734_v4, %v8574_v17  ;;  %v8739_v41 = vmul.f32 %v8417_v16, %v8417_v16  ;;  %11156 = vmatprep.subr.bf16.mxu1 %v13196_v35  ;;  %v16723_v24 = vpack.c.bf16 %v16721_v56, %v16722_v19  ;;  %v16725_v17 = vld [vmem:[#allocation16_spill] sm:$0xff]  ;;  %v16726_v4 = vld [vmem:[#allocation15_spill] sm:$0xff]  ;;  %v16753_v56 = vld [vmem:[#allocation126_spill] sm:$0xff] }
 0x6fd   :  { %v8898_v3 = vadd.f32 %v8738_v20, %v8578_v0  ;;  %v16727_v8 = vpack.c.bf16 %v16725_v17, %v16726_v4  ;;  %v16732_v0 = vpack.c.bf16 %v15230_v11, %v15224_v57  ;;  %v16736_v20 = vpack.c.bf16 %v15254_v42, %v15248_v28  ;;  %v16737_v16 = vld [vmem:[#allocation116_spill] sm:$0xff]  ;;  %v16754_v19 = vld [vmem:[#allocation125_spill] sm:$0xff]  ;;  %v16761_v17 = vld [vmem:[#allocation19_spill] sm:$0xff] }
 0x6fe   :  { %v8899_v50 = vadd.f32 %v8739_v41, %v8579_v51  ;;  %v16741_v51 = vld [vmem:[#allocation118_spill] sm:$0xff]  ;;  %v16744_v11 = vpack.c.bf16 %v15302_v22, %v15296_v25  ;;  %v16748_v42 = vpack.c.bf16 %v15326_v39, %v15320_v5  ;;  %v16755_v25 = vpack.c.bf16 %v16753_v56, %v16754_v19 }
 0x6ff   :  { %v9038_v29 = vpack.c.bf16 %v8898_v3, %v8893_v43  ;;  %11157 = vmatpush3.bf16.msra.mxu1 %v13196_v35  ;;  %v16730_v35 = vld [vmem:[#allocation17_spill] sm:$0xff]  ;;  %v16735_v43 = vpack.c.bf16 %v16733_v23, %v16734_v55  ;;  %v16745_v41 = vld [vmem:[#allocation122_spill] sm:$0xff]  ;;  %v16749_v3 = vld [vmem:[#allocation124_spill] sm:$0xff]  ;;  %v16756_v22 = vpack.c.bf16 %v15374_v12, %v15368_v14  ;;  %v16760_v39 = vpack.c.bf16 %v15398_v2, %v15392_v37 }
 0x700   :  { %v9039_v61 = vpack.c.bf16 %v8899_v50, %v8894_v34  ;;  %11158 = vmatprep.subr.bf16.mxu1 %v13197_v47  ;;  %v16728_v50 = vpack.c.bf16 %v15206_v59, %v15200_v62  ;;  %v16739_v62 = vpack.c.bf16 %v16737_v16, %v16738_v53  ;;  %v16740_v59 = vpack.c.bf16 %v15278_v52, %v15272_v7  ;;  %v16742_v34 = vld [vmem:[#allocation117_spill] sm:$0xff]  ;;  %v16762_v4 = vld [vmem:[#allocation18_spill] sm:$0xff] }
 0x701   :  { %9637 = vmatprep.mubr.bf16.mxu1 %v9038_v29  ;;  %v16729_v29 = vld [vmem:[#allocation110_spill] sm:$0xff]  ;;  %v16743_v57 = vpack.c.bf16 %v16741_v51, %v16742_v34  ;;  %v16752_v52 = vpack.c.bf16 %v15350_v60, %v15344_v1  ;;  %v16763_v1 = vpack.c.bf16 %v16761_v17, %v16762_v4  ;;  %v16764_v60 = vpack.c.bf16 %v15422_v58, %v15416_v15 }
 0x702   :  { %9638 = vmatmul.mubr.bf16.gmra.mrb[252].mxu1 %v16723_v24  ;;  %v16731_v6 = vpack.c.bf16 %v16729_v29, %v16730_v35  ;;  %v16757_v24 = vld [vmem:[#allocation132_spill] sm:$0xff]  ;;  %v16768_v12 = vpack.c.bf16 %v15446_v18, %v15440_v21  ;;  %v16769_v29 = vld [vmem:[#allocation21_spill] sm:$0xff]  ;;  %v16772_v2 = vpack.c.bf16 %v15464_v30, %v15462_v40  ;;  %v16773_v15 = vpack.c.bf16 %v15482_v9, %v15480_v36  ;;  %v16799_v34 = vld [vmem:[#allocation162_spill] sm:$0xff] }
 0x703   :  { %9645 = vmatprep.mubr.bf16.mxu1 %v16724_v54  ;;  %11159 = vmatpush3.bf16.msra.mxu1 %v13197_v47  ;;  %v16746_v47 = vld [vmem:[#allocation120_spill] sm:$0xff]  ;;  %v16758_v54 = vld [vmem:[#allocation129_spill] sm:$0xff]  ;;  %v16774_v58 = vpack.c.bf16 %v15184_v46, %v15180_v63  ;;  %v16775_v21 = vpack.c.bf16 %v15208_v27, %v15204_v49  ;;  %v16776_v18 = vpack.c.bf16 %v15232_v31, %v15228_v33  ;;  %v16780_v46 = vld [vmem:[#allocation194_spill] sm:$0xff] }
 0x704   :  { %11160 = vmatprep.subr.bf16.mxu1 %v13198_v48  ;;  %v16747_v28 = vpack.c.bf16 %v16745_v41, %v16746_v47  ;;  %v16759_v5 = vpack.c.bf16 %v16757_v24, %v16758_v54  ;;  %v16770_v35 = vld [vmem:[#allocation20_spill] sm:$0xff]  ;;  %v16777_v30 = vpack.c.bf16 %v15256_v26, %v15252_v44  ;;  %v16778_v9 = vpack.c.bf16 %v15280_v13, %v15276_v32  ;;  %v16784_v36 = vld [vmem:[#allocation193_spill] sm:$0xff]  ;;  %v16786_v31 = vld [vmem:[#allocation198_spill] sm:$0xff] }
 0x705   :  { %v16771_v37 = vpack.c.bf16 %v16769_v29, %v16770_v35  ;;  %v16779_v63 = vpack.c.bf16 %v15304_v10, %v15300_v38  ;;  %v16781_v40 = vld [vmem:[#allocation192_spill] sm:$0xff]  ;;  %v16789_v26 = vld [vmem:[#allocation35_spill] sm:$0xff]  ;;  %v16792_v13 = vld [vmem:[#allocation202_spill] sm:$0xff] }
 0x706   :  { %v16782_v49 = vpack.c.bf16 %v16780_v46, %v16781_v40  ;;  %v16783_v27 = vld [vmem:[#allocation196_spill] sm:$0xff]  ;;  %v16803_v4 = vld [vmem:[#allocation166_spill] sm:$0xff] }
 0x707   :  { %11161 = vmatpush3.bf16.msra.mxu1 %v13198_v48  ;;  %v16750_v48 = vld [vmem:[#allocation121_spill] sm:$0xff]  ;;  %v16785_v33 = vpack.c.bf16 %v16783_v27, %v16784_v36  ;;  %v16795_v10 = vld [vmem:[#allocation204_spill] sm:$0xff]  ;;  %v16804_v35 = vld [vmem:[#allocation26_spill] sm:$0xff] }
 0x708   :  { %v16751_v7 = vpack.c.bf16 %v16749_v3, %v16750_v48  ;;  %v16800_v48 = vld [vmem:[#allocation161_spill] sm:$0xff]  ;;  %v16806_v46 = vld [vmem:[#allocation168_spill] sm:$0xff] }
 0x70a   :  { %9646 = vmatmul.mubr.bf16.gmra.mrb[0].mxu1 %v16727_v8  ;;  %v16765_v8 = vld [vmem:[#allocation140_spill] sm:$0xff] }
 0x70b   :  { %9653 = vmatprep.mubr.bf16.mxu1 %v16728_v50  ;;  %v16766_v50 = vld [vmem:[#allocation137_spill] sm:$0xff] }
 0x70c   :  { %v16767_v14 = vpack.c.bf16 %v16765_v8, %v16766_v50 }
 0x712   :  { %9654 = vmatmul.mubr.bf16.gmra.mrb[4].mxu1 %v16731_v6  ;;  %v16793_v6 = vld [vmem:[#allocation200_spill] sm:$0xff] }
 0x713   :  { %9661 = vmatprep.mubr.bf16.mxu1 %v16732_v0  ;;  %v16794_v38 = vpack.c.bf16 %v16792_v13, %v16793_v6  ;;  %v16796_v0 = vld [vmem:[#allocation201_spill] sm:$0xff]  ;;  %v16809_v13 = vld [vmem:[#allocation172_spill] sm:$0xff] }
 0x714   :  { %v16797_v23 = vpack.c.bf16 %v16795_v10, %v16796_v0 }
 0x71a   :  { %9662 = vmatmul.mubr.bf16.gmra.mrb[8].mxu1 %v16735_v43 }
 0x71b   :  { %9669 = vmatprep.mubr.bf16.mxu1 %v16736_v20 }
 0x722   :  { %9670 = vmatmul.mubr.bf16.gmra.mrb[12].mxu1 %v16739_v62 }
 0x723   :  { %9677 = vmatprep.mubr.bf16.mxu1 %v16740_v59  ;;  %v16798_v59 = vld [vmem:[#allocation160_spill] sm:$0xff] }
 0x72a   :  { %9678 = vmatmul.mubr.bf16.gmra.mrb[16].mxu1 %v16743_v57 }
 0x72b   :  { %9685 = vmatprep.mubr.bf16.mxu1 %v16744_v11 }
 0x732   :  { %9686 = vmatmul.mubr.bf16.gmra.mrb[20].mxu1 %v16747_v28 }
 0x733   :  { %9693 = vmatprep.mubr.bf16.mxu1 %v16748_v42 }
 0x73a   :  { %9694 = vmatmul.mubr.bf16.gmra.mrb[24].mxu1 %v16751_v7 }
 0x73b   :  { %9701 = vmatprep.mubr.bf16.mxu1 %v16752_v52  ;;  %v16801_v52 = vld [vmem:[#allocation164_spill] sm:$0xff] }
 0x742   :  { %9702 = vmatmul.mubr.bf16.gmra.mrb[28].mxu1 %v16755_v25 }
 0x743   :  { %9709 = vmatprep.mubr.bf16.mxu1 %v16756_v22 }
 0x74a   :  { %9710 = vmatmul.mubr.bf16.gmra.mrb[32].mxu1 %v16759_v5 }
 0x74b   :  { %9717 = vmatprep.mubr.bf16.mxu1 %v16760_v39  ;;  %v16802_v39 = vld [vmem:[#allocation165_spill] sm:$0xff] }
 0x752   :  { %9718 = vmatmul.mubr.bf16.gmra.mrb[36].mxu1 %v16763_v1 }
 0x753   :  { %9725 = vmatprep.mubr.bf16.mxu1 %v16764_v60 }
 0x75a   :  { %9726 = vmatmul.mubr.bf16.gmra.mrb[40].mxu1 %v16767_v14 }
 0x75b   :  { %9733 = vmatprep.mubr.bf16.mxu1 %v16768_v12 }
 0x762   :  { %9734 = vmatmul.mubr.bf16.gmra.mrb[44].mxu1 %v16771_v37 }
 0x763   :  { %11162 = vmatprep.mubr.bf16.mxu1 %v16772_v2  ;;  %v16805_v2 = vld [vmem:[#allocation27_spill] sm:$0xff] }
 0x76a   :  { %11163 = vmatmul.mubr.bf16.vlgmr.msra.gmra.mrb[48].mxu1 %v16773_v15 }
 0x76b   :  { %11166 = vmatprep.mubr.bf16.mxu1 %v9034_v45  ;;  %v16787_v45 = vld [vmem:[#allocation197_spill] sm:$0xff] }
 0x76c   :  { %v16788_v44 = vpack.c.bf16 %v16786_v31, %v16787_v45 }
 0x772   :  { %11167 = vmatmul.mubr.bf16.gmra.mrb[52].mxu1 %v9039_v61  ;;  %v16790_v61 = vld [vmem:[#allocation34_spill] sm:$0xff] }
 0x773   :  { %11170 = vmatprep.mubr.bf16.mxu1 %v16774_v58  ;;  %v16791_v32 = vpack.c.bf16 %v16789_v26, %v16790_v61  ;;  %v16808_v61 = vld [vmem:[#allocation169_spill] sm:$0xff] }
 0x77a   :  { %11171 = vmatmul.mubr.bf16.gmra.mrb[56].mxu1 %v16775_v21 }
 0x77b   :  { %11174 = vmatprep.mubr.bf16.mxu1 %v16776_v18 }
 0x782   :  { %11175 = vmatmul.mubr.bf16.gmra.mrb[60].mxu1 %v16777_v30 }
 0x783   :  { %11178 = vmatprep.mubr.bf16.mxu1 %v16778_v9 }
 0x78a   :  { %11179 = vmatmul.mubr.bf16.gmra.mrb[64].mxu1 %v16779_v63 }
 0x78b   :  { %11182 = vmatprep.mubr.bf16.mxu1 %v16782_v49  ;;  %v16807_v49 = vld [vmem:[#allocation170_spill] sm:$0xff] }
 0x792   :  { %11183 = vmatmul.mubr.bf16.gmra.mrb[68].mxu1 %v16785_v33 }
 0x793   :  { %11186 = vmatprep.mubr.bf16.mxu1 %v16788_v44 }
 0x79a   :  { %11187 = vmatmul.mubr.bf16.gmra.mrb[72].mxu1 %v16791_v32 }
 0x79b   :  { %11190 = vmatprep.mubr.bf16.mxu1 %v16794_v38 }
 0x7a2   :  { %11191 = vmatmul.mubr.bf16.gmra.mrb[76].mxu1 %v16797_v23 }
 0x7bd   :  { %v11026_v55 = vpop.f32.mrb[240].mxu1 }
 0x7be   :  { %v11027_v43 = vpop.f32.mrb[241].mxu1 }
 0x7bf   :  { %v11028_v20 = vadd.f32 %v11027_v43, %v11026_v55  ;;  %v11029_v16 = vpop.f32.mrb[242].mxu1 }
 0x7c0   :  { %v11030_v53 = vpop.f32.mrb[243].mxu1 }
 0x7c1   :  { %v11031_v62 = vadd.f32 %v11030_v53, %v11029_v16  ;;  %v15632_v51 = vadd.f32 %v11028_v20, %v16798_v59  ;;  %v16810_v20 = vld [vmem:[#allocation173_spill] sm:$0xff]  ;;  %v16811_v53 = vld [vmem:[#allocation174_spill] sm:$0xff] }
 0x7c3   :  { %v15635_v57 = vadd.f32 %v11031_v62, %v16799_v34 }
 0x7c5   :  { %v11032_v11 = vpop.f32.mrb[244].mxu1 }
 0x7c6   :  { %v11033_v41 = vpop.f32.mrb[245].mxu1 }
 0x7c7   :  { %v11034_v47 = vadd.f32 %v11033_v41, %v11032_v11  ;;  %v11035_v28 = vpop.f32.mrb[246].mxu1 }
 0x7c8   :  { %v11036_v42 = vpop.f32.mrb[247].mxu1 }
 0x7c9   :  { %v11037_v3 = vadd.f32 %v11036_v42, %v11035_v28  ;;  %v15638_v7 = vadd.f32 %v11034_v47, %v16800_v48  ;;  %v16812_v42 = vld [vmem:[#allocation28_spill] sm:$0xff]  ;;  %v16813_v48 = vld [vmem:[#allocation29_spill] sm:$0xff] }
 0x7cb   :  { %v15641_v56 = vadd.f32 %v11037_v3, %v16801_v52 }
 0x7cd   :  { %v11038_v19 = vpop.f32.mrb[248].mxu1 }
 0x7ce   :  { %v11039_v25 = vpop.f32.mrb[249].mxu1 }
 0x7cf   :  { %v11040_v22 = vadd.f32 %v11039_v25, %v11038_v19  ;;  %v11041_v24 = vpop.f32.mrb[250].mxu1 }
 0x7d0   :  { %v11042_v54 = vpop.f32.mrb[251].mxu1 }
 0x7d1   :  { %v11043_v5 = vadd.f32 %v11042_v54, %v11041_v24  ;;  %v15644_v17 = vadd.f32 %v11040_v22, %v16802_v39  ;;  %v16814_v39 = vld [vmem:[#allocation176_spill] sm:$0xff] }
 0x7d3   :  { %v15647_v1 = vadd.f32 %v11043_v5, %v16803_v4 }
 0x7d5   :  { %v11044_v60 = vpop.f32.mrb[252].mxu1 }
 0x7d6   :  { %v11045_v8 = vpop.f32.mrb[253].mxu1 }
 0x7d7   :  { %v11046_v50 = vadd.f32 %v11045_v8, %v11044_v60  ;;  %v11047_v14 = vpop.f32.mrb[254].mxu1  ;;  %v16815_v60 = vld [vmem:[#allocation178_spill] sm:$0xff] }
 0x7d8   :  { %v11048_v12 = vpop.f32.mrb[255].mxu1 }
 0x7d9   :  { %v11049_v29 = vadd.f32 %v11048_v12, %v11047_v14  ;;  %v15650_v37 = vadd.f32 %v11046_v50, %v16804_v35 }
 0x7db   :  { %v15653_v15 = vadd.f32 %v11049_v29, %v16805_v2 }
 0x7dd   :  { %v11050_v58 = vpop.f32.mrb[0].mxu1 }
 0x7de   :  { %v11051_v21 = vpop.f32.mrb[1].mxu1 }
 0x7df   :  { %v11052_v18 = vadd.f32 %v11051_v21, %v11050_v58  ;;  %v11053_v30 = vpop.f32.mrb[2].mxu1  ;;  %v16816_v58 = vld [vmem:[#allocation177_spill] sm:$0xff] }
 0x7e0   :  { %v11054_v9 = vpop.f32.mrb[3].mxu1 }
 0x7e1   :  { %v11055_v63 = vadd.f32 %v11054_v9, %v11053_v30  ;;  %v15656_v40 = vadd.f32 %v11052_v18, %v16806_v46  ;;  %v16817_v18 = vld [vmem:[#allocation180_spill] sm:$0xff] }
 0x7e3   :  { %v15659_v27 = vadd.f32 %v11055_v63, %v16807_v49 }
 0x7e5   :  { %v11056_v36 = vpop.f32.mrb[4].mxu1 }
 0x7e6   :  { %v11057_v33 = vpop.f32.mrb[5].mxu1 }
 0x7e7   :  { %v11058_v31 = vadd.f32 %v11057_v33, %v11056_v36  ;;  %v11059_v45 = vpop.f32.mrb[6].mxu1 }
 0x7e8   :  { %v11060_v44 = vpop.f32.mrb[7].mxu1 }
 0x7e9   :  { %v11061_v26 = vadd.f32 %v11060_v44, %v11059_v45  ;;  %v15662_v32 = vadd.f32 %v11058_v31, %v16808_v61  ;;  %v16818_v31 = vld [vmem:[#allocation181_spill] sm:$0xff]  ;;  %v16819_v44 = vld [vmem:[#allocation182_spill] sm:$0xff] }
 0x7eb   :  { %v15665_v6 = vadd.f32 %v11061_v26, %v16809_v13 }
 0x7ed   :  { %v11062_v38 = vpop.f32.mrb[8].mxu1 }
 0x7ee   :  { %v11063_v10 = vpop.f32.mrb[9].mxu1 }
 0x7ef   :  { %v11064_v0 = vadd.f32 %v11063_v10, %v11062_v38  ;;  %v11065_v23 = vpop.f32.mrb[10].mxu1 }
 0x7f0   :  { %v11066_v55 = vpop.f32.mrb[11].mxu1 }
 0x7f1   :  { %v11067_v43 = vadd.f32 %v11066_v55, %v11065_v23  ;;  %v15668_v16 = vadd.f32 %v11064_v0, %v16810_v20  ;;  %v16820_v55 = vld [vmem:[#allocation30_spill] sm:$0xff]  ;;  %v16821_v20 = vld [vmem:[#allocation31_spill] sm:$0xff] }
 0x7f3   :  { %v15671_v62 = vadd.f32 %v11067_v43, %v16811_v53 }
 0x7f5   :  { %v11068_v59 = vpop.f32.mrb[12].mxu1 }
 0x7f6   :  { %v11069_v34 = vpop.f32.mrb[13].mxu1 }
 0x7f7   :  { %v11070_v11 = vadd.f32 %v11069_v34, %v11068_v59  ;;  %v11071_v41 = vpop.f32.mrb[14].mxu1 }
 0x7f8   :  { %v11072_v47 = vpop.f32.mrb[15].mxu1 }
 0x7f9   :  { %v11073_v28 = vadd.f32 %v11072_v47, %v11071_v41  ;;  %v15674_v3 = vadd.f32 %v11070_v11, %v16812_v42  ;;  %v16822_v42 = vld [vmem:[#allocation184_spill] sm:$0xff] }
 0x7fb   :  { %v15677_v52 = vadd.f32 %v11073_v28, %v16813_v48 }
 0x7fd   :  { %v11074_v19 = vpop.f32.mrb[16].mxu1 }
 0x7fe   :  { %v11075_v25 = vpop.f32.mrb[17].mxu1 }
 0x7ff   :  { %v11076_v22 = vadd.f32 %v11075_v25, %v11074_v19  ;;  %v11077_v24 = vpop.f32.mrb[18].mxu1  ;;  %v16823_v19 = vld [vmem:[#allocation186_spill] sm:$0xff] }
 0x800   :  { %v11078_v54 = vpop.f32.mrb[19].mxu1 }
 0x801   :  { %v11079_v5 = vadd.f32 %v11078_v54, %v11077_v24  ;;  %v15680_v4 = vadd.f32 %v11076_v22, %v16814_v39 }
 0x803   :  { %v15683_v8 = vadd.f32 %v11079_v5, %v16815_v60 }
 0x805   :  { %v11080_v50 = vpop.f32.mrb[20].mxu1 }
 0x806   :  { %v11081_v14 = vpop.f32.mrb[21].mxu1 }
 0x807   :  { %v11082_v12 = vadd.f32 %v11081_v14, %v11080_v50  ;;  %v11083_v29 = vpop.f32.mrb[22].mxu1  ;;  %v16824_v50 = vld [vmem:[#allocation185_spill] sm:$0xff] }
 0x808   :  { %v11084_v35 = vpop.f32.mrb[23].mxu1 }
 0x809   :  { %v11085_v2 = vadd.f32 %v11084_v35, %v11083_v29  ;;  %v15686_v21 = vadd.f32 %v11082_v12, %v16816_v58  ;;  %v16825_v12 = vld [vmem:[#allocation188_spill] sm:$0xff] }
 0x80b   :  { %v15689_v30 = vadd.f32 %v11085_v2, %v16817_v18 }
 0x80d   :  { %v11086_v9 = vpop.f32.mrb[24].mxu1 }
 0x80e   :  { %v11087_v63 = vpop.f32.mrb[25].mxu1 }
 0x80f   :  { %v11088_v46 = vadd.f32 %v11087_v63, %v11086_v9  ;;  %v11089_v49 = vpop.f32.mrb[26].mxu1 }
 0x810   :  { %v11090_v36 = vpop.f32.mrb[27].mxu1 }
 0x811   :  { %v11091_v33 = vadd.f32 %v11090_v36, %v11089_v49  ;;  %v15692_v45 = vadd.f32 %v11088_v46, %v16818_v31  ;;  %v16826_v46 = vld [vmem:[#allocation189_spill] sm:$0xff]  ;;  %v16827_v36 = vld [vmem:[#allocation190_spill] sm:$0xff] }
 0x813   :  { %v15695_v26 = vadd.f32 %v11091_v33, %v16819_v44 }
 0x815   :  { %v11092_v61 = vpop.f32.mrb[28].mxu1 }
 0x816   :  { %v11093_v13 = vpop.f32.mrb[29].mxu1 }
 0x817   :  { %v11094_v38 = vadd.f32 %v11093_v13, %v11092_v61  ;;  %v11095_v10 = vpop.f32.mrb[30].mxu1 }
 0x818   :  { %v11096_v0 = vpop.f32.mrb[31].mxu1 }
 0x819   :  { %v11097_v23 = vadd.f32 %v11096_v0, %v11095_v10  ;;  %v15698_v43 = vadd.f32 %v11094_v38, %v16820_v55  ;;  %v16828_v0 = vld [vmem:[#allocation32_spill] sm:$0xff]  ;;  %v16829_v55 = vld [vmem:[#allocation33_spill] sm:$0xff] }
 0x81b   :  { %v15701_v53 = vadd.f32 %v11097_v23, %v16821_v20 }
 0x81d   :  { %v11098_v59 = vpop.f32.mrb[32].mxu1 }
 0x81e   :  { %v11099_v34 = vpop.f32.mrb[33].mxu1 }
 0x81f   :  { %v11100_v11 = vadd.f32 %v11099_v34, %v11098_v59  ;;  %v11101_v41 = vpop.f32.mrb[34].mxu1 }
 0x820   :  { %v11102_v47 = vpop.f32.mrb[35].mxu1 }
 0x821   :  { %v11103_v28 = vadd.f32 %v11102_v47, %v11101_v41  ;;  %v15704_v48 = vadd.f32 %v11100_v11, %v16822_v42 }
 0x823   :  { %v15707_v25 = vadd.f32 %v11103_v28, %v16823_v19 }
 0x825   :  { %v11104_v22 = vpop.f32.mrb[36].mxu1 }
 0x826   :  { %v11105_v24 = vpop.f32.mrb[37].mxu1 }
 0x827   :  { %v11106_v54 = vadd.f32 %v11105_v24, %v11104_v22  ;;  %v11107_v5 = vpop.f32.mrb[38].mxu1 }
 0x828   :  { %v11108_v39 = vpop.f32.mrb[39].mxu1 }
 0x829   :  { %v11109_v60 = vadd.f32 %v11108_v39, %v11107_v5  ;;  %v15710_v14 = vadd.f32 %v11106_v54, %v16824_v50 }
 0x82b   :  { %v15713_v29 = vadd.f32 %v11109_v60, %v16825_v12 }
 0x82d   :  { %v11110_v35 = vpop.f32.mrb[40].mxu1 }
 0x82e   :  { %v11111_v2 = vpop.f32.mrb[41].mxu1 }
 0x82f   :  { %v11112_v58 = vadd.f32 %v11111_v2, %v11110_v35  ;;  %v11113_v18 = vpop.f32.mrb[42].mxu1 }
 0x830   :  { %v11114_v9 = vpop.f32.mrb[43].mxu1 }
 0x831   :  { %v11115_v63 = vadd.f32 %v11114_v9, %v11113_v18  ;;  %v15716_v49 = vadd.f32 %v11112_v58, %v16826_v46 }
 0x833   :  { %v15719_v33 = vadd.f32 %v11115_v63, %v16827_v36  ;;  %v15735_v63 = vld [vmem:[#allocation8] ss:$0 sm:$0xff] }
 0x835   :  { %v11116_v31 = vpop.f32.mrb[44].mxu1 }
 0x836   :  { %v11117_v44 = vpop.f32.mrb[45].mxu1 }
 0x837   :  { %v11118_v61 = vadd.f32 %v11117_v44, %v11116_v31  ;;  %v11119_v13 = vpop.f32.mrb[46].mxu1 }
 0x838   :  { %v11120_v38 = vpop.f32.mrb[47].mxu1 }
 0x839   :  { %v11121_v10 = vadd.f32 %v11120_v38, %v11119_v13  ;;  %v15722_v23 = vadd.f32 %v11118_v61, %v16828_v0 }
 0x83b   :  { %v15725_v20 = vadd.f32 %v11121_v10, %v16829_v55 }
 0x83d   :  { %v11164_v59 = vpop.f32.mrb[48].mxu1 }
 0x83e   :  { %v9785_v34 = vadd.f32 %v11164_v59, %v15638_v7  ;;  %v9776_v11 = vpop.f32.mrb[49].mxu1 }
 0x83f   :  { %v9777_v41 = vadd.f32 %v9776_v11, %v15632_v51  ;;  %v11165_v47 = vpop.f32.mrb[50].mxu1 }
 0x840   :  { %v9905_v28 = vmax.f32 %v9785_v34, 1e-05  ;;  %v9788_v42 = vadd.f32 %v11165_v47, %v15641_v56  ;;  %v9779_v19 = vpop.f32.mrb[51].mxu1 }
 0x841   :  { %v9903_v22 = vmax.f32 %v9777_v41, 1e-05  ;;  %v9780_v24 = vadd.f32 %v9779_v19, %v15635_v57 }
 0x842   :  { %13199 = vlog2.f32 %v9905_v28  ;;  %v9906_v54 = vmax.f32 %v9788_v42, 1e-05 }
 0x843   :  { %13201 = vlog2.f32 %v9903_v22  ;;  %v9904_v5 = vmax.f32 %v9780_v24, 1e-05 }
 0x844   :  { %13203 = vlog2.f32 %v9906_v54 }
 0x845   :  { %13205 = vlog2.f32 %v9904_v5  ;;  %v11168_v39 = vpop.f32.mrb[52].mxu1 }
 0x846   :  { %v9801_v7 = vadd.f32 %v11168_v39, %v15650_v37  ;;  %v9792_v60 = vpop.f32.mrb[53].mxu1 }
 0x847   :  { %v9793_v51 = vadd.f32 %v9792_v60, %v15644_v17  ;;  %v11169_v50 = vpop.f32.mrb[54].mxu1 }
 0x848   :  { %v9909_v12 = vmax.f32 %v9801_v7, 1e-05  ;;  %v9804_v56 = vadd.f32 %v11169_v50, %v15653_v15  ;;  %v9795_v35 = vpop.f32.mrb[55].mxu1 }
 0x849   :  { %v9907_v2 = vmax.f32 %v9793_v51, 1e-05  ;;  %v9796_v57 = vadd.f32 %v9795_v35, %v15647_v1 }
 0x84a   :  { %13207 = vlog2.f32 %v9909_v12  ;;  %v9910_v58 = vmax.f32 %v9804_v56, 1e-05 }
 0x84b   :  { %13209 = vlog2.f32 %v9907_v2  ;;  %v9908_v18 = vmax.f32 %v9796_v57, 1e-05 }
 0x84c   :  { %v13200_v9 = vpop.eup %13199  ;;  %13211 = vlog2.f32 %v9910_v58 }
 0x84d   :  { %v13202_v37 = vpop.eup %13201  ;;  %v9940_v46 = vmul.f32 0.6931472, %v13200_v9  ;;  %13213 = vlog2.f32 %v9908_v18  ;;  %v11172_v17 = vpop.f32.mrb[56].mxu1 }
 0x84e   :  { %v13204_v36 = vpop.eup %13203  ;;  %v9936_v31 = vmul.f32 0.6931472, %v13202_v37  ;;  %v9817_v15 = vadd.f32 %v11172_v17, %v15662_v32  ;;  %v9808_v44 = vpop.f32.mrb[57].mxu1 }
 0x84f   :  { %v13206_v61 = vpop.eup %13205  ;;  %v10008_v1 = vmul.f32 %v15735_v63, %v9940_v46  ;;  %v9942_v13 = vmul.f32 0.6931472, %v13204_v36  ;;  %v9809_v38 = vadd.f32 %v9808_v44, %v15656_v40  ;;  %v11173_v10 = vpop.f32.mrb[58].mxu1 }
 0x850   :  { %v10006_v0 = vmul.f32 %v15735_v63, %v9936_v31  ;;  %v9938_v55 = vmul.f32 0.6931472, %v13206_v61  ;;  %v9913_v59 = vmax.f32 %v9817_v15, 1e-05  ;;  %v9820_v34 = vadd.f32 %v11173_v10, %v15665_v6  ;;  %v9811_v11 = vpop.f32.mrb[59].mxu1 }
 0x851   :  { %10040 = vst [vmem:[#allocation10 + $0x10] sm:$0xff] %v10008_v1  ;;  %v10009_v41 = vmul.f32 %v15735_v63, %v9942_v13  ;;  %v9911_v47 = vmax.f32 %v9809_v38, 1e-05  ;;  %v9812_v32 = vadd.f32 %v9811_v11, %v15659_v27 }
 0x852   :  { %10038 = vst [vmem:[#allocation10] sm:$0xff] %v10006_v0  ;;  %v10007_v28 = vmul.f32 %v15735_v63, %v9938_v55  ;;  %13215 = vlog2.f32 %v9913_v59  ;;  %v9914_v42 = vmax.f32 %v9820_v34, 1e-05 }
 0x853   :  { %10041 = vst [vmem:[#allocation10 + $0x18] sm:$0xff] %v10009_v41  ;;  %13217 = vlog2.f32 %v9911_v47  ;;  %v9912_v40 = vmax.f32 %v9812_v32, 1e-05 }
 0x854   :  { %v13208_v19 = vpop.eup %13207  ;;  %10039 = vst [vmem:[#allocation10 + $0x8] sm:$0xff] %v10007_v28  ;;  %13219 = vlog2.f32 %v9914_v42 }
 0x855   :  { %v13210_v22 = vpop.eup %13209  ;;  %v9948_v6 = vmul.f32 0.6931472, %v13208_v19  ;;  %13221 = vlog2.f32 %v9912_v40  ;;  %v11176_v24 = vpop.f32.mrb[60].mxu1 }
 0x856   :  { %v13212_v54 = vpop.eup %13211  ;;  %v9944_v5 = vmul.f32 0.6931472, %v13210_v22  ;;  %v9833_v39 = vadd.f32 %v11176_v24, %v15674_v3  ;;  %v9824_v27 = vpop.f32.mrb[61].mxu1 }
 0x857   :  { %v13214_v7 = vpop.eup %13213  ;;  %v10012_v60 = vmul.f32 %v15735_v63, %v9948_v6  ;;  %v9950_v51 = vmul.f32 0.6931472, %v13212_v54  ;;  %v9825_v50 = vadd.f32 %v9824_v27, %v15668_v16  ;;  %v11177_v12 = vpop.f32.mrb[62].mxu1 }
 0x858   :  { %v10010_v56 = vmul.f32 %v15735_v63, %v9944_v5  ;;  %v9946_v35 = vmul.f32 0.6931472, %v13214_v7  ;;  %v9917_v2 = vmax.f32 %v9833_v39, 1e-05  ;;  %v9836_v57 = vadd.f32 %v11177_v12, %v15677_v52  ;;  %v9827_v58 = vpop.f32.mrb[63].mxu1 }
 0x859   :  { %10044 = vst [vmem:[#allocation10 + $0x30] sm:$0xff] %v10012_v60  ;;  %v10013_v18 = vmul.f32 %v15735_v63, %v9950_v51  ;;  %v9915_v9 = vmax.f32 %v9825_v50, 1e-05  ;;  %v9828_v3 = vadd.f32 %v9827_v58, %v15671_v62 }
 0x85a   :  { %10042 = vst [vmem:[#allocation10 + $0x20] sm:$0xff] %v10010_v56  ;;  %v10011_v37 = vmul.f32 %v15735_v63, %v9946_v35  ;;  %13223 = vlog2.f32 %v9917_v2  ;;  %v9918_v46 = vmax.f32 %v9836_v57, 1e-05 }
 0x85b   :  { %10045 = vst [vmem:[#allocation10 + $0x38] sm:$0xff] %v10013_v18  ;;  %13225 = vlog2.f32 %v9915_v9  ;;  %v9916_v16 = vmax.f32 %v9828_v3, 1e-05 }
 0x85c   :  { %v13216_v17 = vpop.eup %13215  ;;  %10043 = vst [vmem:[#allocation10 + $0x28] sm:$0xff] %v10011_v37  ;;  %13227 = vlog2.f32 %v9918_v46 }
 0x85d   :  { %v13218_v36 = vpop.eup %13217  ;;  %v9956_v52 = vmul.f32 0.6931472, %v13216_v17  ;;  %13229 = vlog2.f32 %v9916_v16  ;;  %v11180_v31 = vpop.f32.mrb[64].mxu1 }
 0x85e   :  { %v13220_v15 = vpop.eup %13219  ;;  %v9952_v44 = vmul.f32 0.6931472, %v13218_v36  ;;  %v9849_v61 = vadd.f32 %v11180_v31, %v15686_v21  ;;  %v9840_v62 = vpop.f32.mrb[65].mxu1 }
 0x85f   :  { %v13222_v1 = vpop.eup %13221  ;;  %v10016_v13 = vmul.f32 %v15735_v63, %v9956_v52  ;;  %v9958_v38 = vmul.f32 0.6931472, %v13220_v15  ;;  %v9841_v10 = vadd.f32 %v9840_v62, %v15680_v4  ;;  %v11181_v0 = vpop.f32.mrb[66].mxu1 }
 0x860   :  { %v10014_v55 = vmul.f32 %v15735_v63, %v9952_v44  ;;  %v9954_v59 = vmul.f32 0.6931472, %v13222_v1  ;;  %v9921_v34 = vmax.f32 %v9849_v61, 1e-05  ;;  %v9852_v11 = vadd.f32 %v11181_v0, %v15689_v30  ;;  %v9843_v41 = vpop.f32.mrb[67].mxu1 }
 0x861   :  { %10048 = vst [vmem:[#allocation10 + $0x50] sm:$0xff] %v10016_v13  ;;  %v10017_v47 = vmul.f32 %v15735_v63, %v9958_v38  ;;  %v9919_v32 = vmax.f32 %v9841_v10, 1e-05  ;;  %v9844_v21 = vadd.f32 %v9843_v41, %v15683_v8 }
 0x862   :  { %10046 = vst [vmem:[#allocation10 + $0x40] sm:$0xff] %v10014_v55  ;;  %v10015_v28 = vmul.f32 %v15735_v63, %v9954_v59  ;;  %13231 = vlog2.f32 %v9921_v34  ;;  %v9922_v42 = vmax.f32 %v9852_v11, 1e-05 }
 0x863   :  { %10049 = vst [vmem:[#allocation10 + $0x58] sm:$0xff] %v10017_v47  ;;  %13233 = vlog2.f32 %v9919_v32  ;;  %v9920_v4 = vmax.f32 %v9844_v21, 1e-05 }
 0x864   :  { %v13224_v40 = vpop.eup %13223  ;;  %10047 = vst [vmem:[#allocation10 + $0x48] sm:$0xff] %v10015_v28  ;;  %13235 = vlog2.f32 %v9922_v42 }
 0x865   :  { %v13226_v19 = vpop.eup %13225  ;;  %v9964_v30 = vmul.f32 0.6931472, %v13224_v40  ;;  %13237 = vlog2.f32 %v9920_v4  ;;  %v11184_v22 = vpop.f32.mrb[68].mxu1 }
 0x866   :  { %v13228_v6 = vpop.eup %13227  ;;  %v9960_v24 = vmul.f32 0.6931472, %v13226_v19  ;;  %v9865_v54 = vadd.f32 %v11184_v22, %v15698_v43  ;;  %v9856_v8 = vpop.f32.mrb[69].mxu1 }
 0x867   :  { %v13230_v5 = vpop.eup %13229  ;;  %v10020_v39 = vmul.f32 %v15735_v63, %v9964_v30  ;;  %v9966_v27 = vmul.f32 0.6931472, %v13228_v6  ;;  %v9857_v7 = vadd.f32 %v9856_v8, %v15692_v45  ;;  %v11185_v60 = vpop.f32.mrb[70].mxu1 }
 0x868   :  { %v10018_v51 = vmul.f32 %v15735_v63, %v9960_v24  ;;  %v9962_v50 = vmul.f32 0.6931472, %v13230_v5  ;;  %v9925_v12 = vmax.f32 %v9865_v54, 1e-05  ;;  %v9868_v56 = vadd.f32 %v11185_v60, %v15701_v53  ;;  %v9859_v35 = vpop.f32.mrb[71].mxu1 }
 0x869   :  { %10052 = vst [vmem:[#allocation10 + $0x70] sm:$0xff] %v10020_v39  ;;  %v10021_v2 = vmul.f32 %v15735_v63, %v9966_v27  ;;  %v9923_v57 = vmax.f32 %v9857_v7, 1e-05  ;;  %v9860_v43 = vadd.f32 %v9859_v35, %v15695_v26 }
 0x86a   :  { %10050 = vst [vmem:[#allocation10 + $0x60] sm:$0xff] %v10018_v51  ;;  %v10019_v58 = vmul.f32 %v15735_v63, %v9962_v50  ;;  %13239 = vlog2.f32 %v9925_v12  ;;  %v9926_v18 = vmax.f32 %v9868_v56, 1e-05 }
 0x86b   :  { %10053 = vst [vmem:[#allocation10 + $0x78] sm:$0xff] %v10021_v2  ;;  %13241 = vlog2.f32 %v9923_v57  ;;  %v9924_v45 = vmax.f32 %v9860_v43, 1e-05 }
 0x86c   :  { %v13232_v9 = vpop.eup %13231  ;;  %10051 = vst [vmem:[#allocation10 + $0x68] sm:$0xff] %v10019_v58  ;;  %13243 = vlog2.f32 %v9926_v18 }
 0x86d   :  { %v13234_v3 = vpop.eup %13233  ;;  %v9972_v53 = vmul.f32 0.6931472, %v13232_v9  ;;  %13245 = vlog2.f32 %v9924_v45  ;;  %v11188_v37 = vpop.f32.mrb[72].mxu1 }
 0x86e   :  { %v13236_v46 = vpop.eup %13235  ;;  %v9968_v16 = vmul.f32 0.6931472, %v13234_v3  ;;  %v9881_v17 = vadd.f32 %v11188_v37, %v15710_v14  ;;  %v9872_v26 = vpop.f32.mrb[73].mxu1 }
 0x86f   :  { %v13238_v36 = vpop.eup %13237  ;;  %v10024_v52 = vmul.f32 %v15735_v63, %v9972_v53  ;;  %v9974_v31 = vmul.f32 0.6931472, %v13236_v46  ;;  %v9873_v15 = vadd.f32 %v9872_v26, %v15704_v48  ;;  %v11189_v44 = vpop.f32.mrb[74].mxu1 }
 0x870   :  { %v10022_v61 = vmul.f32 %v15735_v63, %v9968_v16  ;;  %v9970_v62 = vmul.f32 0.6931472, %v13238_v36  ;;  %v9929_v1 = vmax.f32 %v9881_v17, 1e-05  ;;  %v9884_v13 = vadd.f32 %v11189_v44, %v15713_v29  ;;  %v9875_v38 = vpop.f32.mrb[75].mxu1 }
 0x871   :  { %10056 = vst [vmem:[#allocation10 + $0x90] sm:$0xff] %v10024_v52  ;;  %v10025_v10 = vmul.f32 %v15735_v63, %v9974_v31  ;;  %v9927_v0 = vmax.f32 %v9873_v15, 1e-05  ;;  %v9876_v14 = vadd.f32 %v9875_v38, %v15707_v25 }
 0x872   :  { %10054 = vst [vmem:[#allocation10 + $0x80] sm:$0xff] %v10022_v61  ;;  %v10023_v55 = vmul.f32 %v15735_v63, %v9970_v62  ;;  %13247 = vlog2.f32 %v9929_v1  ;;  %v9930_v59 = vmax.f32 %v9884_v13, 1e-05 }
 0x873   :  { %10057 = vst [vmem:[#allocation10 + $0x98] sm:$0xff] %v10025_v10  ;;  %13249 = vlog2.f32 %v9927_v0  ;;  %v9928_v48 = vmax.f32 %v9876_v14, 1e-05 }
 0x874   :  { %v13240_v34 = vpop.eup %13239  ;;  %10055 = vst [vmem:[#allocation10 + $0x88] sm:$0xff] %v10023_v55  ;;  %13251 = vlog2.f32 %v9930_v59 }
 0x875   :  { %v13242_v11 = vpop.eup %13241  ;;  %v9980_v29 = vmul.f32 0.6931472, %v13240_v34  ;;  %13253 = vlog2.f32 %v9928_v48  ;;  %v11192_v41 = vpop.f32.mrb[76].mxu1 }
 0x876   :  { %v13244_v47 = vpop.eup %13243  ;;  %v9976_v32 = vmul.f32 0.6931472, %v13242_v11  ;;  %v9897_v21 = vadd.f32 %v11192_v41, %v15722_v23  ;;  %v9888_v25 = vpop.f32.mrb[77].mxu1 }
 0x877   :  { %v13246_v28 = vpop.eup %13245  ;;  %v10028_v42 = vmul.f32 %v15735_v63, %v9980_v29  ;;  %v9982_v4 = vmul.f32 0.6931472, %v13244_v47  ;;  %v9889_v40 = vadd.f32 %v9888_v25, %v15716_v49  ;;  %v11193_v19 = vpop.f32.mrb[78].mxu1 }
 0x878   :  { %v10026_v30 = vmul.f32 %v15735_v63, %v9976_v32  ;;  %v9978_v22 = vmul.f32 0.6931472, %v13246_v28  ;;  %v9933_v6 = vmax.f32 %v9897_v21, 1e-05  ;;  %v9900_v24 = vadd.f32 %v11193_v19, %v15725_v20  ;;  %v9891_v54 = vpop.f32.mrb[79].mxu1 }
 0x879   :  { %10060 = vst [vmem:[#allocation10 + $0xb0] sm:$0xff] %v10028_v42  ;;  %v10029_v8 = vmul.f32 %v15735_v63, %v9982_v4  ;;  %v9931_v5 = vmax.f32 %v9889_v40, 1e-05  ;;  %v9892_v23 = vadd.f32 %v9891_v54, %v15719_v33 }
 0x87a   :  { %10058 = vst [vmem:[#allocation10 + $0xa0] sm:$0xff] %v10026_v30  ;;  %v10027_v39 = vmul.f32 %v15735_v63, %v9978_v22  ;;  %13255 = vlog2.f32 %v9933_v6  ;;  %v9934_v27 = vmax.f32 %v9900_v24, 1e-05 }
 0x87b   :  { %10061 = vst [vmem:[#allocation10 + $0xb8] sm:$0xff] %v10029_v8  ;;  %13257 = vlog2.f32 %v9931_v5  ;;  %v9932_v49 = vmax.f32 %v9892_v23, 1e-05 }
 0x87c   :  { %v13248_v7 = vpop.eup %13247  ;;  %10059 = vst [vmem:[#allocation10 + $0xa8] sm:$0xff] %v10027_v39  ;;  %13259 = vlog2.f32 %v9934_v27 }
 0x87d   :  { %v13250_v60 = vpop.eup %13249  ;;  %v9988_v20 = vmul.f32 0.6931472, %v13248_v7  ;;  %13261 = vlog2.f32 %v9932_v49 }
 0x87e   :  { %v13252_v51 = vpop.eup %13251  ;;  %v9984_v50 = vmul.f32 0.6931472, %v13250_v60 }
 0x87f   :  { %v13254_v12 = vpop.eup %13253  ;;  %v10032_v56 = vmul.f32 %v15735_v63, %v9988_v20  ;;  %v9990_v33 = vmul.f32 0.6931472, %v13252_v51 }
 0x880   :  { %v10030_v35 = vmul.f32 %v15735_v63, %v9984_v50  ;;  %v9986_v2 = vmul.f32 0.6931472, %v13254_v12 }
 0x881   :  { %10064 = vst [vmem:[#allocation10 + $0xd0] sm:$0xff] %v10032_v56  ;;  %v10033_v57 = vmul.f32 %v15735_v63, %v9990_v33 }
 0x882   :  { %10062 = vst [vmem:[#allocation10 + $0xc0] sm:$0xff] %v10030_v35  ;;  %v10031_v43 = vmul.f32 %v15735_v63, %v9986_v2 }
 0x883   :  { %10065 = vst [vmem:[#allocation10 + $0xd8] sm:$0xff] %v10033_v57 }
 0x884   :  { %v13256_v58 = vpop.eup %13255  ;;  %10063 = vst [vmem:[#allocation10 + $0xc8] sm:$0xff] %v10031_v43 }
 0x885   :  { %v13258_v18 = vpop.eup %13257  ;;  %v9996_v45 = vmul.f32 0.6931472, %v13256_v58 }
 0x886   :  { %v13260_v9 = vpop.eup %13259  ;;  %v9992_v3 = vmul.f32 0.6931472, %v13258_v18 }
 0x887   :  { %v13262_v53 = vpop.eup %13261  ;;  %v10036_v37 = vmul.f32 %v15735_v63, %v9996_v45  ;;  %v9998_v46 = vmul.f32 0.6931472, %v13260_v9 }
 0x888   :  { %v10034_v16 = vmul.f32 %v15735_v63, %v9992_v3  ;;  %v9994_v17 = vmul.f32 0.6931472, %v13262_v53 }
 0x889   :  { %10068 = vst [vmem:[#allocation10 + $0xf0] sm:$0xff] %v10036_v37  ;;  %v10037_v26 = vmul.f32 %v15735_v63, %v9998_v46 }
 0x88a   :  { %10066 = vst [vmem:[#allocation10 + $0xe0] sm:$0xff] %v10034_v16  ;;  %v10035_v36 = vmul.f32 %v15735_v63, %v9994_v17 }
 0x88b   :  { %10069 = vst [vmem:[#allocation10 + $0xf8] sm:$0xff] %v10037_v26 }
 0x88c   :  { %10067 = vst [vmem:[#allocation10 + $0xe8] sm:$0xff] %v10035_v36 }
 0x88d   :  { %13394 = shalt.err (!%p13391_p8)
}
 0x88e   :  { %s13395_s18 = scalar_lea.hbm %s15809_s4, 4096 }
 0x88f   :  { %p13396_p9 = scmp.ne.s32.totalorder %s15809_s4, %s13395_s18  ;;  %p13399_p10 = scmp.lt.u32.totalorder %s13395_s18, %s15809_s4 }
 0x891   :  { %p13401_p11 = pnand %p13399_p10, %p13396_p9 }
 0x893   :  { %13404 = shalt.err (!%p13401_p11)
}
 0x894   :  { %s13424_s23 = smov 128   ;;  %s13425_s24 = smov 8  }
 0x895   :  { %10081 = dma.vmem_to_hbm [thread:$0]  %s10076_s14, 4096, %s15809_s4, [#allocation4], %s13424_s23, %s13424_s23, %s13425_s24  }
 0x896   :  { %13411 = dma.done.wait [#allocation4], 4096  }
 0x897   :  { %13412 = vsyncadd [#allocation4], 4294963200 }
 0x898   :  { %10085 = vsyncpa [#allocation3], 1 }
 0x899   :  { %10086 = vsyncpa [#allocation6], 1 }
 0x89a   :  { %10087 = vsyncpa [#allocation9], 1 }
 0x89b   :  { %10088 = vsyncpa [#allocation4], 1 }

</bundles_post_ra>
